<compile_context>
chip_gen: v7x
topology: tpu7x:2x2x1
jax: 0.10.0
libtpu: 0.0.40
codegen_flags: <defaults>
</compile_context>

<pallas_src>
import functools

import jax
import jax.numpy as jnp
import numpy as np
from jax.experimental import pallas as pl
from jax.experimental.pallas import tpu as pltpu


_TAPS = tuple((dy, dx) for dy in range(3) for dx in range(3))


# ----------------------------------------------------------------------------
# Stage 1: conv1 (im2col -> single MXU matmul), shortcut branch, BN partials.
# ----------------------------------------------------------------------------
def _conv1_kernel(xp_ref, w1_ref, *rest, Cin, Cout, Ho, Wo, stride, has_proj):
    if has_proj:
        wp_ref, h1_ref, sc_ref, st_ref, slab_ref = rest
    else:
        h1_ref, sc_ref, st_ref, slab_ref = rest
    M = Ho * Wo

    xpn = xp_ref[0]                                   # (H+2, W+2, Cin) f32, padded

    def tap(dy, dx):
        if stride == 1:
            return xpn[dy:dy + Ho, dx:dx + Wo, :]
        # stride > 1 only occurs in projection blocks (not exercised below).
        return jax.lax.slice(
            xpn, (dy, dx, 0),
            (dy + (Ho - 1) * stride + 1, dx + (Wo - 1) * stride + 1, Cin),
            (stride, stride, 1))

    # im2col: write the 9 shifted taps into one (M, 9*Cin) slab, then do a
    # single fat MXU matmul (bf16 operands, f32 accumulation).
    for t, (dy, dx) in enumerate(_TAPS):
        slab_ref[:, t * Cin:(t + 1) * Cin] = tap(dy, dx).reshape(M, Cin)
    h1 = jnp.dot(slab_ref[...].astype(jnp.bfloat16), w1_ref[...],
                 preferred_element_type=jnp.float32)  # (M, Cout) f32
    # NOTE: conv1's bias is intentionally omitted -- it is exactly cancelled
    # by the mean subtraction of training-mode BatchNorm.

    # BN1 partial statistics for this image (one-pass sum / sum-of-squares).
    st_ref[0, 0:1, :] = jnp.sum(h1, axis=0, keepdims=True)
    st_ref[0, 1:2, :] = jnp.sum(h1 * h1, axis=0, keepdims=True)

    # Shortcut branch.
    if has_proj:
        xs = tap(1, 1).reshape(M, Cin).astype(jnp.bfloat16)   # unpadded x, strided
        sc = jnp.dot(xs, wp_ref[...], preferred_element_type=jnp.float32)
        st_ref[0, 2:3, :] = jnp.sum(sc, axis=0, keepdims=True)
        st_ref[0, 3:4, :] = jnp.sum(sc * sc, axis=0, keepdims=True)
        sc_ref[0] = sc.reshape(Ho, Wo, Cout)
    else:
        # identity shortcut (stride == 1 and Cin == Cout): exact f32 x.
        sc_ref[0] = xpn[1:1 + Ho, 1:1 + Wo, :]
        z = jnp.zeros((1, Cout), jnp.float32)
        st_ref[0, 2:3, :] = z
        st_ref[0, 3:4, :] = z

    h1_ref[0] = h1.reshape(Ho, Wo, Cout)


# ----------------------------------------------------------------------------
# Stage 2: fused BN1 + ReLU, conv2 (im2col -> single matmul), BN2 partials.
# ----------------------------------------------------------------------------
def _conv2_kernel(h1_ref, a1_ref, c1_ref, w2_ref, h2_ref, st_ref,
                  pad_ref, slab_ref, *, Ho, Wo, Cout):
    M = Ho * Wo

    # BN1 folded into a per-channel affine, fused with ReLU (f32).
    y = jnp.maximum(h1_ref[0] * a1_ref[...] + c1_ref[...], 0.0)   # (Ho, Wo, Cout)

    # Zero only the 1-px halo border of the per-image scratch, write interior.
    pad_ref[0:1, :, :] = jnp.zeros((1, Wo + 2, Cout), jnp.float32)
    pad_ref[Ho + 1:Ho + 2, :, :] = jnp.zeros((1, Wo + 2, Cout), jnp.float32)
    pad_ref[:, 0:1, :] = jnp.zeros((Ho + 2, 1, Cout), jnp.float32)
    pad_ref[:, Wo + 1:Wo + 2, :] = jnp.zeros((Ho + 2, 1, Cout), jnp.float32)
    pad_ref[1:Ho + 1, 1:Wo + 1, :] = y

    # im2col slab for conv2 (stride 1, pad 1), then one bf16 MXU matmul.
    for t, (dy, dx) in enumerate(_TAPS):
        slab_ref[:, t * Cout:(t + 1) * Cout] = (
            pad_ref[dy:dy + Ho, dx:dx + Wo, :].reshape(M, Cout))
    h2 = jnp.dot(slab_ref[...].astype(jnp.bfloat16), w2_ref[...],
                 preferred_element_type=jnp.float32)              # (M, Cout)
    # conv2's bias is likewise cancelled by BN2's mean subtraction.

    st_ref[0, 0:1, :] = jnp.sum(h2, axis=0, keepdims=True)
    st_ref[0, 1:2, :] = jnp.sum(h2 * h2, axis=0, keepdims=True)
    h2_ref[0] = h2.reshape(Ho, Wo, Cout)


# ----------------------------------------------------------------------------
# Stage 3: BN2, shortcut BN (if projection), residual add, final ReLU.
# ----------------------------------------------------------------------------
def _finalize_kernel(h2_ref, sc_ref, a2_ref, c2_ref, *rest, has_proj):
    if has_proj:
        asc_ref, csc_ref, o_ref = rest
    else:
        (o_ref,) = rest
    h2 = h2_ref[0] * a2_ref[...] + c2_ref[...]
    sc = sc_ref[0]
    if has_proj:
        sc = sc * asc_ref[...] + csc_ref[...]
    o_ref[0] = jnp.maximum(h2 + sc, 0.0)


# ----------------------------------------------------------------------------
# Wrapper: NCHW in / NCHW out.
# ----------------------------------------------------------------------------
@functools.partial(jax.jit, static_argnames=("stride", "eps"))
def basic_block_forward(x_nchw, params, stride=1, eps=1e-5):
    x = jnp.transpose(x_nchw, (0, 2, 3, 1)).astype(jnp.float32)   # NCHW -> NHWC
    N, H, W, Cin = x.shape
    Cout = params["w1"].shape[-1]
    has_proj = (stride != 1) or (Cin != Cout)
    Ho = (H - 1) // stride + 1
    Wo = (W - 1) // stride + 1
    M_total = N * Ho * Wo

    xp = jnp.pad(x, ((0, 0), (1, 1), (1, 1), (0, 0)))             # pad=1 for conv1

    # Conv weights flattened for im2col and pre-cast to bf16 (MXU operands);
    # all BatchNorm / elementwise math stays in f32.
    w1f = jnp.asarray(params["w1"], jnp.float32).reshape(9 * Cin, Cout).astype(jnp.bfloat16)
    w2f = jnp.asarray(params["w2"], jnp.float32).reshape(9 * Cout, Cout).astype(jnp.bfloat16)

    cp = pltpu.CompilerParams(dimension_semantics=("parallel",),
                              vmem_limit_bytes=48 * 1024 * 1024)

    def img_spec(*trailing):
        nd0 = len(trailing)
        return pl.BlockSpec((1,) + trailing, lambda n: (n,) + (0,) * nd0)

    def full_spec(shape):
        nd = len(shape)
        return pl.BlockSpec(shape, lambda n: (0,) * nd)

    # ---------------- stage 1: conv1 + shortcut + BN partial stats ----------
    ins1 = [xp, w1f]
    specs1 = [img_spec(H + 2, W + 2, Cin), full_spec((9 * Cin, Cout))]
    if has_proj:
        ins1.append(jnp.asarray(params["wp"], jnp.float32).astype(jnp.bfloat16))
        specs1.append(full_spec((Cin, Cout)))

    k1 = functools.partial(_conv1_kernel, Cin=Cin, Cout=Cout, Ho=Ho, Wo=Wo,
                           stride=stride, has_proj=has_proj)
    h1_raw, sc_raw, st1 = pl.pallas_call(
        k1,
        grid=(N,),
        in_specs=specs1,
        out_specs=[img_spec(Ho, Wo, Cout), img_spec(Ho, Wo, Cout),
                   img_spec(4, Cout)],
        out_shape=[jax.ShapeDtypeStruct((N, Ho, Wo, Cout), jnp.float32),
                   jax.ShapeDtypeStruct((N, Ho, Wo, Cout), jnp.float32),
                   jax.ShapeDtypeStruct((N, 4, Cout), jnp.float32)],
        scratch_shapes=[pltpu.VMEM((Ho * Wo, 9 * Cin), jnp.float32)],
        compiler_params=cp,
    )(*ins1)

    # ---- fold global batch statistics into per-channel affine scale/shift --
    st1s = jnp.sum(st1, axis=0)                                   # (4, Cout)

    def bn_affine(s, sq, gamma, beta):
        mean = s / M_total
        var = jnp.maximum(sq / M_total - mean * mean, 0.0)        # biased (training mode)
        a = jnp.asarray(gamma, jnp.float32) * jax.lax.rsqrt(var + eps)
        return a, jnp.asarray(beta, jnp.float32) - mean * a

    a1, c1 = bn_affine(st1s[0], st1s[1], params["g1"], params["be1"])

    # ---------------- stage 2: BN1 + ReLU + conv2 + BN2 partial stats -------
    k2 = functools.partial(_conv2_kernel, Ho=Ho, Wo=Wo, Cout=Cout)
    h2_raw, st2 = pl.pallas_call(
        k2,
        grid=(N,),
        in_specs=[img_spec(Ho, Wo, Cout), full_spec((1, Cout)),
                  full_spec((1, Cout)), full_spec((9 * Cout, Cout))],
        out_specs=[img_spec(Ho, Wo, Cout), img_spec(2, Cout)],
        out_shape=[jax.ShapeDtypeStruct((N, Ho, Wo, Cout), jnp.float32),
                   jax.ShapeDtypeStruct((N, 2, Cout), jnp.float32)],
        scratch_shapes=[pltpu.VMEM((Ho + 2, Wo + 2, Cout), jnp.float32),
                        pltpu.VMEM((Ho * Wo, 9 * Cout), jnp.float32)],
        compiler_params=cp,
    )(h1_raw, a1.reshape(1, Cout), c1.reshape(1, Cout), w2f)

    st2s = jnp.sum(st2, axis=0)
    a2, c2 = bn_affine(st2s[0], st2s[1], params["g2"], params["be2"])

    # ---------------- stage 3: BN2 + shortcut BN + residual + ReLU ----------
    ins3 = [h2_raw, sc_raw, a2.reshape(1, Cout), c2.reshape(1, Cout)]
    specs3 = [img_spec(Ho, Wo, Cout), img_spec(Ho, Wo, Cout),
              full_spec((1, Cout)), full_spec((1, Cout))]
    if has_proj:
        asc, csc = bn_affine(st1s[2], st1s[3], params["gp"], params["bp"])
        ins3 += [asc.reshape(1, Cout), csc.reshape(1, Cout)]
        specs3 += [full_spec((1, Cout)), full_spec((1, Cout))]

    k3 = functools.partial(_finalize_kernel, has_proj=has_proj)
    out_nhwc = pl.pallas_call(
        k3,
        grid=(N,),
        in_specs=specs3,
        out_specs=img_spec(Ho, Wo, Cout),
        out_shape=jax.ShapeDtypeStruct((N, Ho, Wo, Cout), jnp.float32),
        compiler_params=cp,
    )(*ins3)

    return jnp.transpose(out_nhwc, (0, 3, 1, 2))                  # NHWC -> NCHW


# ----------------------------------------------------------------------------
# Pure-JAX reference (faithful to the PyTorch module, f32 throughout).
# ----------------------------------------------------------------------------
def basic_block_ref(x_nchw, params, stride=1, eps=1e-5):
    x = jnp.transpose(x_nchw, (0, 2, 3, 1)).astype(jnp.float32)

    def conv(v, w, s, pad):
        return jax.lax.conv_general_dilated(
            v, w, (s, s), ((pad, pad), (pad, pad)),
            dimension_numbers=("NHWC", "HWIO", "NHWC"))

    def bn(y, g, b):
        m = jnp.mean(y, axis=(0, 1, 2), keepdims=True)
        v = jnp.mean((y - m) ** 2, axis=(0, 1, 2), keepdims=True)
        return (y - m) * jax.lax.rsqrt(v + eps) * g + b

    h = conv(x, params["w1"], stride, 1) + params["b1"]
    h = jax.nn.relu(bn(h, params["g1"], params["be1"]))
    h = conv(h, params["w2"], 1, 1) + params["b2"]
    h = bn(h, params["g2"], params["be2"])
    if "wp" in params:
        wp = params["wp"].reshape(1, 1, *params["wp"].shape)
        sc = bn(conv(x, wp, stride, 0), params["gp"], params["bp"])
    else:
        sc = x
    out = jax.nn.relu(h + sc)
    return jnp.transpose(out, (0, 3, 1, 2))


def make_params(key, cin, cout, has_proj):
    ks = jax.random.split(key, 11)
    nrm = lambda k, s: 0.1 * jax.random.normal(k, s, jnp.float32)
    p = {
        "w1": nrm(ks[0], (3, 3, cin, cout)),  "b1": nrm(ks[1], (cout,)),
        "g1": 1.0 + nrm(ks[2], (cout,)),      "be1": nrm(ks[3], (cout,)),
        "w2": nrm(ks[4], (3, 3, cout, cout)), "b2": nrm(ks[5], (cout,)),
        "g2": 1.0 + nrm(ks[6], (cout,)),      "be2": nrm(ks[7], (cout,)),
    }
    if has_proj:
        p["wp"] = nrm(ks[8], (cin, cout))          # 1x1 conv, bias=False
        p["gp"] = 1.0 + nrm(ks[9], (cout,))
        p["bp"] = nrm(ks[10], (cout,))
    return p


if __name__ == "__main__":
    key = jax.random.PRNGKey(0)
    kx, kp1, kp2 = jax.random.split(key, 3)

    # Round inputs / conv weights to bf16-representable values so the kernel's
    # bf16 MXU operands add no extra quantization vs. the f32 reference; the
    # only remaining bf16 rounding is on conv2's input activations (tolerance
    # below accounts for that).
    def q(a):
        return jnp.asarray(a, jnp.float32).astype(jnp.bfloat16).astype(jnp.float32)

    def q_params(p):
        return {k: (q(v) if k in ("w1", "w2", "wp") else v) for k, v in p.items()}

    x = q(jax.random.normal(kx, (2, 4, 16, 16), jnp.float32))     # NCHW

    # Config A: in_filters != filters -> projection shortcut (1x1 conv + BN).
    params_a = q_params(make_params(kp1, 4, 8, has_proj=True))
    out_a = basic_block_forward(x, params_a, stride=1)
    ref_a = basic_block_ref(x, params_a, stride=1)
    np.testing.assert_allclose(np.asarray(out_a), np.asarray(ref_a),
                               rtol=3e-2, atol=3e-2)

    # Config B: in_filters == filters, stride=1 -> identity shortcut.
    params_b = q_params(make_params(kp2, 4, 4, has_proj=False))
    out_b = basic_block_forward(x, params_b, stride=1)
    ref_b = basic_block_ref(x, params_b, stride=1)
    np.testing.assert_allclose(np.asarray(out_b), np.asarray(ref_b),
                               rtol=3e-2, atol=3e-2)

    jax.block_until_ready((out_a, out_b))
    print("KERNEL_OK")
</pallas_src>

<mosaic_0001>
module attributes {stable_mosaic.version = 11 : i64} {
  func.func @_conv2_kernel(%arg0: i32, %arg1: memref<1x16x16x8xf32, #tpu.memory_space<vmem>>, %arg2: memref<1x8xf32, #tpu.memory_space<vmem>>, %arg3: memref<1x8xf32, #tpu.memory_space<vmem>>, %arg4: memref<72x8xbf16, #tpu.memory_space<vmem>>, %arg5: memref<1x16x16x8xf32, #tpu.memory_space<vmem>>, %arg6: memref<1x2x8xf32, #tpu.memory_space<vmem>>, %arg7: memref<18x18x8xf32, #tpu.memory_space<vmem>>, %arg8: memref<256x72xf32, #tpu.memory_space<vmem>>) attributes {dimension_semantics = [#tpu.dimension_semantics<parallel>], iteration_bounds = array<i64: 2>, scalar_prefetch = 0 : i64, scratch_operands = 2 : i64, tpu.core_type = #tpu.core_type<tc>, window_params = [{transform_indices = @transform_0, window_bounds = array<i64: 1, 16, 16, 8>}, {pipeline_mode = #tpu.pipeline_mode<synchronous>, transform_indices = @transform_1, window_bounds = array<i64: 1, 8>}, {pipeline_mode = #tpu.pipeline_mode<synchronous>, transform_indices = @transform_2, window_bounds = array<i64: 1, 8>}, {pipeline_mode = #tpu.pipeline_mode<synchronous>, transform_indices = @transform_3, window_bounds = array<i64: 72, 8>}, {transform_indices = @transform_4, window_bounds = array<i64: 1, 16, 16, 8>}, {transform_indices = @transform_5, window_bounds = array<i64: 1, 2, 8>}]} {
    %c0 = arith.constant 0 : index
    %c0_0 = arith.constant 0 : index
    %c0_1 = arith.constant 0 : index
    %c0_2 = arith.constant 0 : index
    %0 = vector.load %arg1[%c0, %c0_0, %c0_1, %c0_2] : memref<1x16x16x8xf32, #tpu.memory_space<vmem>>, vector<1x16x16x8xf32>
    %1 = vector.shape_cast %0 : vector<1x16x16x8xf32> to vector<16x16x8xf32>
    %c0_3 = arith.constant 0 : index
    %c0_4 = arith.constant 0 : index
    %2 = vector.load %arg2[%c0_3, %c0_4] : memref<1x8xf32, #tpu.memory_space<vmem>>, vector<1x8xf32>
    %3 = vector.shape_cast %2 : vector<1x8xf32> to vector<1x1x8xf32>
    %4 = vector.broadcast %3 : vector<1x1x8xf32> to vector<16x16x8xf32>
    %5 = arith.mulf %1, %4 : vector<16x16x8xf32>
    %c0_5 = arith.constant 0 : index
    %c0_6 = arith.constant 0 : index
    %6 = vector.load %arg3[%c0_5, %c0_6] : memref<1x8xf32, #tpu.memory_space<vmem>>, vector<1x8xf32>
    %7 = vector.shape_cast %6 : vector<1x8xf32> to vector<1x1x8xf32>
    %8 = vector.broadcast %7 : vector<1x1x8xf32> to vector<16x16x8xf32>
    %9 = arith.addf %5, %8 : vector<16x16x8xf32>
    %cst = arith.constant 0.000000e+00 : f32
    %10 = vector.broadcast %cst : f32 to vector<16x16x8xf32>
    %11 = arith.maximumf %9, %10 : vector<16x16x8xf32>
    %cst_7 = arith.constant 0.000000e+00 : f32
    %12 = vector.broadcast %cst_7 : f32 to vector<1x18x8xf32>
    %c0_8 = arith.constant 0 : index
    %c0_9 = arith.constant 0 : index
    %c0_10 = arith.constant 0 : index
    %13 = vector.load %arg7[%c0_8, %c0_9, %c0_10] : memref<18x18x8xf32, #tpu.memory_space<vmem>>, vector<1x18x8xf32>
    tpu.vector_store %arg7[%c0_8, %c0_9, %c0_10], %12 {strides = array<i32>} : memref<18x18x8xf32, #tpu.memory_space<vmem>>, vector<1x18x8xf32>,
    %cst_11 = arith.constant 0.000000e+00 : f32
    %14 = vector.broadcast %cst_11 : f32 to vector<1x18x8xf32>
    %c17 = arith.constant 17 : index
    %c0_12 = arith.constant 0 : index
    %c0_13 = arith.constant 0 : index
    %15 = vector.load %arg7[%c17, %c0_12, %c0_13] : memref<18x18x8xf32, #tpu.memory_space<vmem>>, vector<1x18x8xf32>
    tpu.vector_store %arg7[%c17, %c0_12, %c0_13], %14 {strides = array<i32>} : memref<18x18x8xf32, #tpu.memory_space<vmem>>, vector<1x18x8xf32>,
    %cst_14 = arith.constant 0.000000e+00 : f32
    %16 = vector.broadcast %cst_14 : f32 to vector<18x1x8xf32>
    %c0_15 = arith.constant 0 : index
    %c0_16 = arith.constant 0 : index
    %c0_17 = arith.constant 0 : index
    %17 = vector.load %arg7[%c0_15, %c0_16, %c0_17] : memref<18x18x8xf32, #tpu.memory_space<vmem>>, vector<18x1x8xf32>
    tpu.vector_store %arg7[%c0_15, %c0_16, %c0_17], %16 {strides = array<i32>} : memref<18x18x8xf32, #tpu.memory_space<vmem>>, vector<18x1x8xf32>,
    %cst_18 = arith.constant 0.000000e+00 : f32
    %18 = vector.broadcast %cst_18 : f32 to vector<18x1x8xf32>
    %c0_19 = arith.constant 0 : index
    %c17_20 = arith.constant 17 : index
    %c0_21 = arith.constant 0 : index
    %19 = vector.load %arg7[%c0_19, %c17_20, %c0_21] : memref<18x18x8xf32, #tpu.memory_space<vmem>>, vector<18x1x8xf32>
    tpu.vector_store %arg7[%c0_19, %c17_20, %c0_21], %18 {strides = array<i32>} : memref<18x18x8xf32, #tpu.memory_space<vmem>>, vector<18x1x8xf32>,
    %c1 = arith.constant 1 : index
    %c1_22 = arith.constant 1 : index
    %c0_23 = arith.constant 0 : index
    %20 = vector.load %arg7[%c1, %c1_22, %c0_23] : memref<18x18x8xf32, #tpu.memory_space<vmem>>, vector<16x16x8xf32>
    tpu.vector_store %arg7[%c1, %c1_22, %c0_23], %11 {strides = array<i32>} : memref<18x18x8xf32, #tpu.memory_space<vmem>>, vector<16x16x8xf32>,
    %c0_24 = arith.constant 0 : index
    %c0_25 = arith.constant 0 : index
    %c0_26 = arith.constant 0 : index
    %21 = vector.load %arg7[%c0_24, %c0_25, %c0_26] : memref<18x18x8xf32, #tpu.memory_space<vmem>>, vector<16x16x8xf32>
    %22 = vector.shape_cast %21 : vector<16x16x8xf32> to vector<256x8xf32>
    %c0_27 = arith.constant 0 : index
    %c0_28 = arith.constant 0 : index
    %23 = vector.load %arg8[%c0_27, %c0_28] : memref<256x72xf32, #tpu.memory_space<vmem>>, vector<256x8xf32>
    tpu.vector_store %arg8[%c0_27, %c0_28], %22 {strides = array<i32>} : memref<256x72xf32, #tpu.memory_space<vmem>>, vector<256x8xf32>,
    %c0_29 = arith.constant 0 : index
    %c1_30 = arith.constant 1 : index
    %c0_31 = arith.constant 0 : index
    %24 = vector.load %arg7[%c0_29, %c1_30, %c0_31] : memref<18x18x8xf32, #tpu.memory_space<vmem>>, vector<16x16x8xf32>
    %25 = vector.shape_cast %24 : vector<16x16x8xf32> to vector<256x8xf32>
    %c0_32 = arith.constant 0 : index
    %c8 = arith.constant 8 : index
    %26 = vector.load %arg8[%c0_32, %c8] : memref<256x72xf32, #tpu.memory_space<vmem>>, vector<256x8xf32>
    tpu.vector_store %arg8[%c0_32, %c8], %25 {strides = array<i32>} : memref<256x72xf32, #tpu.memory_space<vmem>>, vector<256x8xf32>,
    %c0_33 = arith.constant 0 : index
    %c2 = arith.constant 2 : index
    %c0_34 = arith.constant 0 : index
    %27 = vector.load %arg7[%c0_33, %c2, %c0_34] : memref<18x18x8xf32, #tpu.memory_space<vmem>>, vector<16x16x8xf32>
    %28 = vector.shape_cast %27 : vector<16x16x8xf32> to vector<256x8xf32>
    %c0_35 = arith.constant 0 : index
    %c16 = arith.constant 16 : index
    %29 = vector.load %arg8[%c0_35, %c16] : memref<256x72xf32, #tpu.memory_space<vmem>>, vector<256x8xf32>
    tpu.vector_store %arg8[%c0_35, %c16], %28 {strides = array<i32>} : memref<256x72xf32, #tpu.memory_space<vmem>>, vector<256x8xf32>,
    %c1_36 = arith.constant 1 : index
    %c0_37 = arith.constant 0 : index
    %c0_38 = arith.constant 0 : index
    %30 = vector.load %arg7[%c1_36, %c0_37, %c0_38] : memref<18x18x8xf32, #tpu.memory_space<vmem>>, vector<16x16x8xf32>
    %31 = vector.shape_cast %30 : vector<16x16x8xf32> to vector<256x8xf32>
    %c0_39 = arith.constant 0 : index
    %c24 = arith.constant 24 : index
    %32 = vector.load %arg8[%c0_39, %c24] : memref<256x72xf32, #tpu.memory_space<vmem>>, vector<256x8xf32>
    tpu.vector_store %arg8[%c0_39, %c24], %31 {strides = array<i32>} : memref<256x72xf32, #tpu.memory_space<vmem>>, vector<256x8xf32>,
    %c1_40 = arith.constant 1 : index
    %c1_41 = arith.constant 1 : index
    %c0_42 = arith.constant 0 : index
    %33 = vector.load %arg7[%c1_40, %c1_41, %c0_42] : memref<18x18x8xf32, #tpu.memory_space<vmem>>, vector<16x16x8xf32>
    %34 = vector.shape_cast %33 : vector<16x16x8xf32> to vector<256x8xf32>
    %c0_43 = arith.constant 0 : index
    %c32 = arith.constant 32 : index
    %35 = vector.load %arg8[%c0_43, %c32] : memref<256x72xf32, #tpu.memory_space<vmem>>, vector<256x8xf32>
    tpu.vector_store %arg8[%c0_43, %c32], %34 {strides = array<i32>} : memref<256x72xf32, #tpu.memory_space<vmem>>, vector<256x8xf32>,
    %c1_44 = arith.constant 1 : index
    %c2_45 = arith.constant 2 : index
    %c0_46 = arith.constant 0 : index
    %36 = vector.load %arg7[%c1_44, %c2_45, %c0_46] : memref<18x18x8xf32, #tpu.memory_space<vmem>>, vector<16x16x8xf32>
    %37 = vector.shape_cast %36 : vector<16x16x8xf32> to vector<256x8xf32>
    %c0_47 = arith.constant 0 : index
    %c40 = arith.constant 40 : index
    %38 = vector.load %arg8[%c0_47, %c40] : memref<256x72xf32, #tpu.memory_space<vmem>>, vector<256x8xf32>
    tpu.vector_store %arg8[%c0_47, %c40], %37 {strides = array<i32>} : memref<256x72xf32, #tpu.memory_space<vmem>>, vector<256x8xf32>,
    %c2_48 = arith.constant 2 : index
    %c0_49 = arith.constant 0 : index
    %c0_50 = arith.constant 0 : index
    %39 = vector.load %arg7[%c2_48, %c0_49, %c0_50] : memref<18x18x8xf32, #tpu.memory_space<vmem>>, vector<16x16x8xf32>
    %40 = vector.shape_cast %39 : vector<16x16x8xf32> to vector<256x8xf32>
    %c0_51 = arith.constant 0 : index
    %c48 = arith.constant 48 : index
    %41 = vector.load %arg8[%c0_51, %c48] : memref<256x72xf32, #tpu.memory_space<vmem>>, vector<256x8xf32>
    tpu.vector_store %arg8[%c0_51, %c48], %40 {strides = array<i32>} : memref<256x72xf32, #tpu.memory_space<vmem>>, vector<256x8xf32>,
    %c2_52 = arith.constant 2 : index
    %c1_53 = arith.constant 1 : index
    %c0_54 = arith.constant 0 : index
    %42 = vector.load %arg7[%c2_52, %c1_53, %c0_54] : memref<18x18x8xf32, #tpu.memory_space<vmem>>, vector<16x16x8xf32>
    %43 = vector.shape_cast %42 : vector<16x16x8xf32> to vector<256x8xf32>
    %c0_55 = arith.constant 0 : index
    %c56 = arith.constant 56 : index
    %44 = vector.load %arg8[%c0_55, %c56] : memref<256x72xf32, #tpu.memory_space<vmem>>, vector<256x8xf32>
    tpu.vector_store %arg8[%c0_55, %c56], %43 {strides = array<i32>} : memref<256x72xf32, #tpu.memory_space<vmem>>, vector<256x8xf32>,
    %c2_56 = arith.constant 2 : index
    %c2_57 = arith.constant 2 : index
    %c0_58 = arith.constant 0 : index
    %45 = vector.load %arg7[%c2_56, %c2_57, %c0_58] : memref<18x18x8xf32, #tpu.memory_space<vmem>>, vector<16x16x8xf32>
    %46 = vector.shape_cast %45 : vector<16x16x8xf32> to vector<256x8xf32>
    %c0_59 = arith.constant 0 : index
    %c64 = arith.constant 64 : index
    %47 = vector.load %arg8[%c0_59, %c64] : memref<256x72xf32, #tpu.memory_space<vmem>>, vector<256x8xf32>
    tpu.vector_store %arg8[%c0_59, %c64], %46 {strides = array<i32>} : memref<256x72xf32, #tpu.memory_space<vmem>>, vector<256x8xf32>,
    %c0_60 = arith.constant 0 : index
    %c0_61 = arith.constant 0 : index
    %48 = vector.load %arg8[%c0_60, %c0_61] : memref<256x72xf32, #tpu.memory_space<vmem>>, vector<256x72xf32>
    %49 = arith.truncf %48 : vector<256x72xf32> to vector<256x72xbf16>
    %c0_62 = arith.constant 0 : index
    %c0_63 = arith.constant 0 : index
    %50 = vector.load %arg4[%c0_62, %c0_63] : memref<72x8xbf16, #tpu.memory_space<vmem>>, vector<72x8xbf16>
    %cst_64 = arith.constant dense<0.000000e+00> : vector<256x8xf32>
    %51 = tpu.matmul %49, %50, %cst_64 {dimension_numbers = #tpu.dot_dimension_numbers<[1], [0], [0], [1], [0, 0, 1, 1], [], []>} : vector<256x72xbf16>, vector<72x8xbf16>, vector<256x8xf32> -> vector<256x8xf32>
    %cst_65 = arith.constant dense<0.000000e+00> : vector<8xf32>
    %52 = vector.multi_reduction <add>, %51, %cst_65 [0] : vector<256x8xf32> to vector<8xf32>
    %53 = vector.shape_cast %52 : vector<8xf32> to vector<1x8xf32>
    %c0_66 = arith.constant 0 : index
    %c0_67 = arith.constant 0 : index
    %c0_68 = arith.constant 0 : index
    %54 = vector.load %arg6[%c0_66, %c0_67, %c0_68] : memref<1x2x8xf32, #tpu.memory_space<vmem>>, vector<1x1x8xf32>
    %55 = vector.shape_cast %54 : vector<1x1x8xf32> to vector<1x8xf32>
    %56 = vector.shape_cast %53 : vector<1x8xf32> to vector<1x1x8xf32>
    tpu.vector_store %arg6[%c0_66, %c0_67, %c0_68], %56 {strides = array<i32>} : memref<1x2x8xf32, #tpu.memory_space<vmem>>, vector<1x1x8xf32>,
    %57 = arith.mulf %51, %51 : vector<256x8xf32>
    %cst_69 = arith.constant dense<0.000000e+00> : vector<8xf32>
    %58 = vector.multi_reduction <add>, %57, %cst_69 [0] : vector<256x8xf32> to vector<8xf32>
    %59 = vector.shape_cast %58 : vector<8xf32> to vector<1x8xf32>
    %c0_70 = arith.constant 0 : index
    %c1_71 = arith.constant 1 : index
    %c0_72 = arith.constant 0 : index
    %60 = vector.load %arg6[%c0_70, %c1_71, %c0_72] : memref<1x2x8xf32, #tpu.memory_space<vmem>>, vector<1x1x8xf32>
    %61 = vector.shape_cast %60 : vector<1x1x8xf32> to vector<1x8xf32>
    %62 = vector.shape_cast %59 : vector<1x8xf32> to vector<1x1x8xf32>
    tpu.vector_store %arg6[%c0_70, %c1_71, %c0_72], %62 {strides = array<i32>} : memref<1x2x8xf32, #tpu.memory_space<vmem>>, vector<1x1x8xf32>,
    %63 = vector.shape_cast %51 : vector<256x8xf32> to vector<16x16x8xf32>
    %c0_73 = arith.constant 0 : index
    %c0_74 = arith.constant 0 : index
    %c0_75 = arith.constant 0 : index
    %c0_76 = arith.constant 0 : index
    %64 = vector.load %arg5[%c0_73, %c0_74, %c0_75, %c0_76] : memref<1x16x16x8xf32, #tpu.memory_space<vmem>>, vector<1x16x16x8xf32>
    %65 = vector.shape_cast %64 : vector<1x16x16x8xf32> to vector<16x16x8xf32>
    %66 = vector.shape_cast %63 : vector<16x16x8xf32> to vector<1x16x16x8xf32>
    tpu.vector_store %arg5[%c0_73, %c0_74, %c0_75, %c0_76], %66 {strides = array<i32>} : memref<1x16x16x8xf32, #tpu.memory_space<vmem>>, vector<1x16x16x8xf32>,
    return
  }
  func.func @transform_0(%arg0: i32) -> (i32, i32, i32, i32) {
    %c0_i32 = arith.constant 0 : i32
    %c0_i32_0 = arith.constant 0 : i32
    %c0_i32_1 = arith.constant 0 : i32
    %c0_i32_2 = arith.constant 0 : i32
    return %arg0, %c0_i32, %c0_i32_0, %c0_i32_1 : i32, i32, i32, i32
  }
  func.func @transform_1(%arg0: i32) -> (i32, i32) {
    %c0_i32 = arith.constant 0 : i32
    %c0_i32_0 = arith.constant 0 : i32
    %c0_i32_1 = arith.constant 0 : i32
    return %c0_i32, %c0_i32_0 : i32, i32
  }
  func.func @transform_2(%arg0: i32) -> (i32, i32) {
    %c0_i32 = arith.constant 0 : i32
    %c0_i32_0 = arith.constant 0 : i32
    %c0_i32_1 = arith.constant 0 : i32
    return %c0_i32, %c0_i32_0 : i32, i32
  }
  func.func @transform_3(%arg0: i32) -> (i32, i32) {
    %c0_i32 = arith.constant 0 : i32
    %c0_i32_0 = arith.constant 0 : i32
    %c0_i32_1 = arith.constant 0 : i32
    return %c0_i32, %c0_i32_0 : i32, i32
  }
  func.func @transform_4(%arg0: i32) -> (i32, i32, i32, i32) {
    %c0_i32 = arith.constant 0 : i32
    %c0_i32_0 = arith.constant 0 : i32
    %c0_i32_1 = arith.constant 0 : i32
    %c0_i32_2 = arith.constant 0 : i32
    return %arg0, %c0_i32, %c0_i32_0, %c0_i32_1 : i32, i32, i32, i32
  }
  func.func @transform_5(%arg0: i32) -> (i32, i32, i32) {
    %c0_i32 = arith.constant 0 : i32
    %c0_i32_0 = arith.constant 0 : i32
    %c0_i32_1 = arith.constant 0 : i32
    return %arg0, %c0_i32, %c0_i32_0 : i32, i32, i32
  }
}

module attributes {stable_mosaic.version = 11 : i64} {
  func.func @_finalize_kernel(%arg0: i32, %arg1: memref<1x16x16x8xf32, #tpu.memory_space<vmem>>, %arg2: memref<1x16x16x8xf32, #tpu.memory_space<vmem>>, %arg3: memref<1x8xf32, #tpu.memory_space<vmem>>, %arg4: memref<1x8xf32, #tpu.memory_space<vmem>>, %arg5: memref<1x8xf32, #tpu.memory_space<vmem>>, %arg6: memref<1x8xf32, #tpu.memory_space<vmem>>, %arg7: memref<1x16x16x8xf32, #tpu.memory_space<vmem>>) attributes {dimension_semantics = [#tpu.dimension_semantics<parallel>], iteration_bounds = array<i64: 2>, scalar_prefetch = 0 : i64, scratch_operands = 0 : i64, tpu.core_type = #tpu.core_type<tc>, window_params = [{transform_indices = @transform_0, window_bounds = array<i64: 1, 16, 16, 8>}, {transform_indices = @transform_1, window_bounds = array<i64: 1, 16, 16, 8>}, {pipeline_mode = #tpu.pipeline_mode<synchronous>, transform_indices = @transform_2, window_bounds = array<i64: 1, 8>}, {pipeline_mode = #tpu.pipeline_mode<synchronous>, transform_indices = @transform_3, window_bounds = array<i64: 1, 8>}, {pipeline_mode = #tpu.pipeline_mode<synchronous>, transform_indices = @transform_4, window_bounds = array<i64: 1, 8>}, {pipeline_mode = #tpu.pipeline_mode<synchronous>, transform_indices = @transform_5, window_bounds = array<i64: 1, 8>}, {transform_indices = @transform_6, window_bounds = array<i64: 1, 16, 16, 8>}]} {
    %c0 = arith.constant 0 : index
    %c0_0 = arith.constant 0 : index
    %c0_1 = arith.constant 0 : index
    %c0_2 = arith.constant 0 : index
    %0 = vector.load %arg1[%c0, %c0_0, %c0_1, %c0_2] : memref<1x16x16x8xf32, #tpu.memory_space<vmem>>, vector<1x16x16x8xf32>
    %1 = vector.shape_cast %0 : vector<1x16x16x8xf32> to vector<16x16x8xf32>
    %c0_3 = arith.constant 0 : index
    %c0_4 = arith.constant 0 : index
    %2 = vector.load %arg3[%c0_3, %c0_4] : memref<1x8xf32, #tpu.memory_space<vmem>>, vector<1x8xf32>
    %3 = vector.shape_cast %2 : vector<1x8xf32> to vector<1x1x8xf32>
    %4 = vector.broadcast %3 : vector<1x1x8xf32> to vector<16x16x8xf32>
    %5 = arith.mulf %1, %4 : vector<16x16x8xf32>
    %c0_5 = arith.constant 0 : index
    %c0_6 = arith.constant 0 : index
    %6 = vector.load %arg4[%c0_5, %c0_6] : memref<1x8xf32, #tpu.memory_space<vmem>>, vector<1x8xf32>
    %7 = vector.shape_cast %6 : vector<1x8xf32> to vector<1x1x8xf32>
    %8 = vector.broadcast %7 : vector<1x1x8xf32> to vector<16x16x8xf32>
    %9 = arith.addf %5, %8 : vector<16x16x8xf32>
    %c0_7 = arith.constant 0 : index
    %c0_8 = arith.constant 0 : index
    %c0_9 = arith.constant 0 : index
    %c0_10 = arith.constant 0 : index
    %10 = vector.load %arg2[%c0_7, %c0_8, %c0_9, %c0_10] : memref<1x16x16x8xf32, #tpu.memory_space<vmem>>, vector<1x16x16x8xf32>
    %11 = vector.shape_cast %10 : vector<1x16x16x8xf32> to vector<16x16x8xf32>
    %c0_11 = arith.constant 0 : index
    %c0_12 = arith.constant 0 : index
    %12 = vector.load %arg5[%c0_11, %c0_12] : memref<1x8xf32, #tpu.memory_space<vmem>>, vector<1x8xf32>
    %13 = vector.shape_cast %12 : vector<1x8xf32> to vector<1x1x8xf32>
    %14 = vector.broadcast %13 : vector<1x1x8xf32> to vector<16x16x8xf32>
    %15 = arith.mulf %11, %14 : vector<16x16x8xf32>
    %c0_13 = arith.constant 0 : index
    %c0_14 = arith.constant 0 : index
    %16 = vector.load %arg6[%c0_13, %c0_14] : memref<1x8xf32, #tpu.memory_space<vmem>>, vector<1x8xf32>
    %17 = vector.shape_cast %16 : vector<1x8xf32> to vector<1x1x8xf32>
    %18 = vector.broadcast %17 : vector<1x1x8xf32> to vector<16x16x8xf32>
    %19 = arith.addf %15, %18 : vector<16x16x8xf32>
    %20 = arith.addf %9, %19 : vector<16x16x8xf32>
    %cst = arith.constant 0.000000e+00 : f32
    %21 = vector.broadcast %cst : f32 to vector<16x16x8xf32>
    %22 = arith.maximumf %20, %21 : vector<16x16x8xf32>
    %c0_15 = arith.constant 0 : index
    %c0_16 = arith.constant 0 : index
    %c0_17 = arith.constant 0 : index
    %c0_18 = arith.constant 0 : index
    %23 = vector.load %arg7[%c0_15, %c0_16, %c0_17, %c0_18] : memref<1x16x16x8xf32, #tpu.memory_space<vmem>>, vector<1x16x16x8xf32>
    %24 = vector.shape_cast %23 : vector<1x16x16x8xf32> to vector<16x16x8xf32>
    %25 = vector.shape_cast %22 : vector<16x16x8xf32> to vector<1x16x16x8xf32>
    tpu.vector_store %arg7[%c0_15, %c0_16, %c0_17, %c0_18], %25 {strides = array<i32>} : memref<1x16x16x8xf32, #tpu.memory_space<vmem>>, vector<1x16x16x8xf32>,
    return
  }
  func.func @transform_0(%arg0: i32) -> (i32, i32, i32, i32) {
    %c0_i32 = arith.constant 0 : i32
    %c0_i32_0 = arith.constant 0 : i32
    %c0_i32_1 = arith.constant 0 : i32
    %c0_i32_2 = arith.constant 0 : i32
    return %arg0, %c0_i32, %c0_i32_0, %c0_i32_1 : i32, i32, i32, i32
  }
  func.func @transform_1(%arg0: i32) -> (i32, i32, i32, i32) {
    %c0_i32 = arith.constant 0 : i32
    %c0_i32_0 = arith.constant 0 : i32
    %c0_i32_1 = arith.constant 0 : i32
    %c0_i32_2 = arith.constant 0 : i32
    return %arg0, %c0_i32, %c0_i32_0, %c0_i32_1 : i32, i32, i32, i32
  }
  func.func @transform_2(%arg0: i32) -> (i32, i32) {
    %c0_i32 = arith.constant 0 : i32
    %c0_i32_0 = arith.constant 0 : i32
    %c0_i32_1 = arith.constant 0 : i32
    return %c0_i32, %c0_i32_0 : i32, i32
  }
  func.func @transform_3(%arg0: i32) -> (i32, i32) {
    %c0_i32 = arith.constant 0 : i32
    %c0_i32_0 = arith.constant 0 : i32
    %c0_i32_1 = arith.constant 0 : i32
    return %c0_i32, %c0_i32_0 : i32, i32
  }
  func.func @transform_4(%arg0: i32) -> (i32, i32) {
    %c0_i32 = arith.constant 0 : i32
    %c0_i32_0 = arith.constant 0 : i32
    %c0_i32_1 = arith.constant 0 : i32
    return %c0_i32, %c0_i32_0 : i32, i32
  }
  func.func @transform_5(%arg0: i32) -> (i32, i32) {
    %c0_i32 = arith.constant 0 : i32
    %c0_i32_0 = arith.constant 0 : i32
    %c0_i32_1 = arith.constant 0 : i32
    return %c0_i32, %c0_i32_0 : i32, i32
  }
  func.func @transform_6(%arg0: i32) -> (i32, i32, i32, i32) {
    %c0_i32 = arith.constant 0 : i32
    %c0_i32_0 = arith.constant 0 : i32
    %c0_i32_1 = arith.constant 0 : i32
    %c0_i32_2 = arith.constant 0 : i32
    return %arg0, %c0_i32, %c0_i32_0, %c0_i32_1 : i32, i32, i32, i32
  }
}

module attributes {stable_mosaic.version = 11 : i64} {
  func.func @_conv1_kernel(%arg0: i32, %arg1: memref<1x18x18x4xf32, #tpu.memory_space<vmem>>, %arg2: memref<36x8xbf16, #tpu.memory_space<vmem>>, %arg3: memref<4x8xbf16, #tpu.memory_space<vmem>>, %arg4: memref<1x16x16x8xf32, #tpu.memory_space<vmem>>, %arg5: memref<1x16x16x8xf32, #tpu.memory_space<vmem>>, %arg6: memref<1x4x8xf32, #tpu.memory_space<vmem>>, %arg7: memref<256x36xf32, #tpu.memory_space<vmem>>) attributes {dimension_semantics = [#tpu.dimension_semantics<parallel>], iteration_bounds = array<i64: 2>, scalar_prefetch = 0 : i64, scratch_operands = 1 : i64, tpu.core_type = #tpu.core_type<tc>, window_params = [{transform_indices = @transform_0, window_bounds = array<i64: 1, 18, 18, 4>}, {pipeline_mode = #tpu.pipeline_mode<synchronous>, transform_indices = @transform_1, window_bounds = array<i64: 36, 8>}, {pipeline_mode = #tpu.pipeline_mode<synchronous>, transform_indices = @transform_2, window_bounds = array<i64: 4, 8>}, {transform_indices = @transform_3, window_bounds = array<i64: 1, 16, 16, 8>}, {transform_indices = @transform_4, window_bounds = array<i64: 1, 16, 16, 8>}, {transform_indices = @transform_5, window_bounds = array<i64: 1, 4, 8>}]} {
    %c0 = arith.constant 0 : index
    %c0_0 = arith.constant 0 : index
    %c0_1 = arith.constant 0 : index
    %c0_2 = arith.constant 0 : index
    %0 = vector.load %arg1[%c0, %c0_0, %c0_1, %c0_2] : memref<1x18x18x4xf32, #tpu.memory_space<vmem>>, vector<1x18x18x4xf32>
    %1 = vector.shape_cast %0 : vector<1x18x18x4xf32> to vector<18x18x4xf32>
    %2 = vector.extract_strided_slice %1 {offsets = [0, 0, 0], sizes = [16, 16, 4], strides = [1, 1, 1]} : vector<18x18x4xf32> to vector<16x16x4xf32>
    %3 = vector.shape_cast %2 : vector<16x16x4xf32> to vector<256x4xf32>
    %c0_3 = arith.constant 0 : index
    %c0_4 = arith.constant 0 : index
    %4 = vector.load %arg7[%c0_3, %c0_4] : memref<256x36xf32, #tpu.memory_space<vmem>>, vector<256x4xf32>
    tpu.vector_store %arg7[%c0_3, %c0_4], %3 {strides = array<i32>} : memref<256x36xf32, #tpu.memory_space<vmem>>, vector<256x4xf32>,
    %5 = vector.extract_strided_slice %1 {offsets = [0, 1, 0], sizes = [16, 16, 4], strides = [1, 1, 1]} : vector<18x18x4xf32> to vector<16x16x4xf32>
    %6 = vector.shape_cast %5 : vector<16x16x4xf32> to vector<256x4xf32>
    %c0_5 = arith.constant 0 : index
    %c4 = arith.constant 4 : index
    %7 = vector.load %arg7[%c0_5, %c4] : memref<256x36xf32, #tpu.memory_space<vmem>>, vector<256x4xf32>
    tpu.vector_store %arg7[%c0_5, %c4], %6 {strides = array<i32>} : memref<256x36xf32, #tpu.memory_space<vmem>>, vector<256x4xf32>,
    %8 = vector.extract_strided_slice %1 {offsets = [0, 2, 0], sizes = [16, 16, 4], strides = [1, 1, 1]} : vector<18x18x4xf32> to vector<16x16x4xf32>
    %9 = vector.shape_cast %8 : vector<16x16x4xf32> to vector<256x4xf32>
    %c0_6 = arith.constant 0 : index
    %c8 = arith.constant 8 : index
    %10 = vector.load %arg7[%c0_6, %c8] : memref<256x36xf32, #tpu.memory_space<vmem>>, vector<256x4xf32>
    tpu.vector_store %arg7[%c0_6, %c8], %9 {strides = array<i32>} : memref<256x36xf32, #tpu.memory_space<vmem>>, vector<256x4xf32>,
    %11 = vector.extract_strided_slice %1 {offsets = [1, 0, 0], sizes = [16, 16, 4], strides = [1, 1, 1]} : vector<18x18x4xf32> to vector<16x16x4xf32>
    %12 = vector.shape_cast %11 : vector<16x16x4xf32> to vector<256x4xf32>
    %c0_7 = arith.constant 0 : index
    %c12 = arith.constant 12 : index
    %13 = vector.load %arg7[%c0_7, %c12] : memref<256x36xf32, #tpu.memory_space<vmem>>, vector<256x4xf32>
    tpu.vector_store %arg7[%c0_7, %c12], %12 {strides = array<i32>} : memref<256x36xf32, #tpu.memory_space<vmem>>, vector<256x4xf32>,
    %14 = vector.extract_strided_slice %1 {offsets = [1, 1, 0], sizes = [16, 16, 4], strides = [1, 1, 1]} : vector<18x18x4xf32> to vector<16x16x4xf32>
    %15 = vector.shape_cast %14 : vector<16x16x4xf32> to vector<256x4xf32>
    %c0_8 = arith.constant 0 : index
    %c16 = arith.constant 16 : index
    %16 = vector.load %arg7[%c0_8, %c16] : memref<256x36xf32, #tpu.memory_space<vmem>>, vector<256x4xf32>
    tpu.vector_store %arg7[%c0_8, %c16], %15 {strides = array<i32>} : memref<256x36xf32, #tpu.memory_space<vmem>>, vector<256x4xf32>,
    %17 = vector.extract_strided_slice %1 {offsets = [1, 2, 0], sizes = [16, 16, 4], strides = [1, 1, 1]} : vector<18x18x4xf32> to vector<16x16x4xf32>
    %18 = vector.shape_cast %17 : vector<16x16x4xf32> to vector<256x4xf32>
    %c0_9 = arith.constant 0 : index
    %c20 = arith.constant 20 : index
    %19 = vector.load %arg7[%c0_9, %c20] : memref<256x36xf32, #tpu.memory_space<vmem>>, vector<256x4xf32>
    tpu.vector_store %arg7[%c0_9, %c20], %18 {strides = array<i32>} : memref<256x36xf32, #tpu.memory_space<vmem>>, vector<256x4xf32>,
    %20 = vector.extract_strided_slice %1 {offsets = [2, 0, 0], sizes = [16, 16, 4], strides = [1, 1, 1]} : vector<18x18x4xf32> to vector<16x16x4xf32>
    %21 = vector.shape_cast %20 : vector<16x16x4xf32> to vector<256x4xf32>
    %c0_10 = arith.constant 0 : index
    %c24 = arith.constant 24 : index
    %22 = vector.load %arg7[%c0_10, %c24] : memref<256x36xf32, #tpu.memory_space<vmem>>, vector<256x4xf32>
    tpu.vector_store %arg7[%c0_10, %c24], %21 {strides = array<i32>} : memref<256x36xf32, #tpu.memory_space<vmem>>, vector<256x4xf32>,
    %23 = vector.extract_strided_slice %1 {offsets = [2, 1, 0], sizes = [16, 16, 4], strides = [1, 1, 1]} : vector<18x18x4xf32> to vector<16x16x4xf32>
    %24 = vector.shape_cast %23 : vector<16x16x4xf32> to vector<256x4xf32>
    %c0_11 = arith.constant 0 : index
    %c28 = arith.constant 28 : index
    %25 = vector.load %arg7[%c0_11, %c28] : memref<256x36xf32, #tpu.memory_space<vmem>>, vector<256x4xf32>
    tpu.vector_store %arg7[%c0_11, %c28], %24 {strides = array<i32>} : memref<256x36xf32, #tpu.memory_space<vmem>>, vector<256x4xf32>,
    %26 = vector.extract_strided_slice %1 {offsets = [2, 2, 0], sizes = [16, 16, 4], strides = [1, 1, 1]} : vector<18x18x4xf32> to vector<16x16x4xf32>
    %27 = vector.shape_cast %26 : vector<16x16x4xf32> to vector<256x4xf32>
    %c0_12 = arith.constant 0 : index
    %c32 = arith.constant 32 : index
    %28 = vector.load %arg7[%c0_12, %c32] : memref<256x36xf32, #tpu.memory_space<vmem>>, vector<256x4xf32>
    tpu.vector_store %arg7[%c0_12, %c32], %27 {strides = array<i32>} : memref<256x36xf32, #tpu.memory_space<vmem>>, vector<256x4xf32>,
    %c0_13 = arith.constant 0 : index
    %c0_14 = arith.constant 0 : index
    %29 = vector.load %arg7[%c0_13, %c0_14] : memref<256x36xf32, #tpu.memory_space<vmem>>, vector<256x36xf32>
    %30 = arith.truncf %29 : vector<256x36xf32> to vector<256x36xbf16>
    %c0_15 = arith.constant 0 : index
    %c0_16 = arith.constant 0 : index
    %31 = vector.load %arg2[%c0_15, %c0_16] : memref<36x8xbf16, #tpu.memory_space<vmem>>, vector<36x8xbf16>
    %cst = arith.constant dense<0.000000e+00> : vector<256x8xf32>
    %32 = tpu.matmul %30, %31, %cst {dimension_numbers = #tpu.dot_dimension_numbers<[1], [0], [0], [1], [0, 0, 1, 1], [], []>} : vector<256x36xbf16>, vector<36x8xbf16>, vector<256x8xf32> -> vector<256x8xf32>
    %cst_17 = arith.constant dense<0.000000e+00> : vector<8xf32>
    %33 = vector.multi_reduction <add>, %32, %cst_17 [0] : vector<256x8xf32> to vector<8xf32>
    %34 = vector.shape_cast %33 : vector<8xf32> to vector<1x8xf32>
    %c0_18 = arith.constant 0 : index
    %c0_19 = arith.constant 0 : index
    %c0_20 = arith.constant 0 : index
    %35 = vector.load %arg6[%c0_18, %c0_19, %c0_20] : memref<1x4x8xf32, #tpu.memory_space<vmem>>, vector<1x1x8xf32>
    %36 = vector.shape_cast %35 : vector<1x1x8xf32> to vector<1x8xf32>
    %37 = vector.shape_cast %34 : vector<1x8xf32> to vector<1x1x8xf32>
    tpu.vector_store %arg6[%c0_18, %c0_19, %c0_20], %37 {strides = array<i32>} : memref<1x4x8xf32, #tpu.memory_space<vmem>>, vector<1x1x8xf32>,
    %38 = arith.mulf %32, %32 : vector<256x8xf32>
    %cst_21 = arith.constant dense<0.000000e+00> : vector<8xf32>
    %39 = vector.multi_reduction <add>, %38, %cst_21 [0] : vector<256x8xf32> to vector<8xf32>
    %40 = vector.shape_cast %39 : vector<8xf32> to vector<1x8xf32>
    %c0_22 = arith.constant 0 : index
    %c1 = arith.constant 1 : index
    %c0_23 = arith.constant 0 : index
    %41 = vector.load %arg6[%c0_22, %c1, %c0_23] : memref<1x4x8xf32, #tpu.memory_space<vmem>>, vector<1x1x8xf32>
    %42 = vector.shape_cast %41 : vector<1x1x8xf32> to vector<1x8xf32>
    %43 = vector.shape_cast %40 : vector<1x8xf32> to vector<1x1x8xf32>
    tpu.vector_store %arg6[%c0_22, %c1, %c0_23], %43 {strides = array<i32>} : memref<1x4x8xf32, #tpu.memory_space<vmem>>, vector<1x1x8xf32>,
    %44 = vector.extract_strided_slice %1 {offsets = [1, 1, 0], sizes = [16, 16, 4], strides = [1, 1, 1]} : vector<18x18x4xf32> to vector<16x16x4xf32>
    %45 = vector.shape_cast %44 : vector<16x16x4xf32> to vector<256x4xf32>
    %46 = arith.truncf %45 : vector<256x4xf32> to vector<256x4xbf16>
    %c0_24 = arith.constant 0 : index
    %c0_25 = arith.constant 0 : index
    %47 = vector.load %arg3[%c0_24, %c0_25] : memref<4x8xbf16, #tpu.memory_space<vmem>>, vector<4x8xbf16>
    %cst_26 = arith.constant dense<0.000000e+00> : vector<256x8xf32>
    %48 = tpu.matmul %46, %47, %cst_26 {dimension_numbers = #tpu.dot_dimension_numbers<[1], [0], [0], [1], [0, 0, 1, 1], [], []>} : vector<256x4xbf16>, vector<4x8xbf16>, vector<256x8xf32> -> vector<256x8xf32>
    %cst_27 = arith.constant dense<0.000000e+00> : vector<8xf32>
    %49 = vector.multi_reduction <add>, %48, %cst_27 [0] : vector<256x8xf32> to vector<8xf32>
    %50 = vector.shape_cast %49 : vector<8xf32> to vector<1x8xf32>
    %c0_28 = arith.constant 0 : index
    %c2 = arith.constant 2 : index
    %c0_29 = arith.constant 0 : index
    %51 = vector.load %arg6[%c0_28, %c2, %c0_29] : memref<1x4x8xf32, #tpu.memory_space<vmem>>, vector<1x1x8xf32>
    %52 = vector.shape_cast %51 : vector<1x1x8xf32> to vector<1x8xf32>
    %53 = vector.shape_cast %50 : vector<1x8xf32> to vector<1x1x8xf32>
    tpu.vector_store %arg6[%c0_28, %c2, %c0_29], %53 {strides = array<i32>} : memref<1x4x8xf32, #tpu.memory_space<vmem>>, vector<1x1x8xf32>,
    %54 = arith.mulf %48, %48 : vector<256x8xf32>
    %cst_30 = arith.constant dense<0.000000e+00> : vector<8xf32>
    %55 = vector.multi_reduction <add>, %54, %cst_30 [0] : vector<256x8xf32> to vector<8xf32>
    %56 = vector.shape_cast %55 : vector<8xf32> to vector<1x8xf32>
    %c0_31 = arith.constant 0 : index
    %c3 = arith.constant 3 : index
    %c0_32 = arith.constant 0 : index
    %57 = vector.load %arg6[%c0_31, %c3, %c0_32] : memref<1x4x8xf32, #tpu.memory_space<vmem>>, vector<1x1x8xf32>
    %58 = vector.shape_cast %57 : vector<1x1x8xf32> to vector<1x8xf32>
    %59 = vector.shape_cast %56 : vector<1x8xf32> to vector<1x1x8xf32>
    tpu.vector_store %arg6[%c0_31, %c3, %c0_32], %59 {strides = array<i32>} : memref<1x4x8xf32, #tpu.memory_space<vmem>>, vector<1x1x8xf32>,
    %60 = vector.shape_cast %48 : vector<256x8xf32> to vector<16x16x8xf32>
    %c0_33 = arith.constant 0 : index
    %c0_34 = arith.constant 0 : index
    %c0_35 = arith.constant 0 : index
    %c0_36 = arith.constant 0 : index
    %61 = vector.load %arg5[%c0_33, %c0_34, %c0_35, %c0_36] : memref<1x16x16x8xf32, #tpu.memory_space<vmem>>, vector<1x16x16x8xf32>
    %62 = vector.shape_cast %61 : vector<1x16x16x8xf32> to vector<16x16x8xf32>
    %63 = vector.shape_cast %60 : vector<16x16x8xf32> to vector<1x16x16x8xf32>
    tpu.vector_store %arg5[%c0_33, %c0_34, %c0_35, %c0_36], %63 {strides = array<i32>} : memref<1x16x16x8xf32, #tpu.memory_space<vmem>>, vector<1x16x16x8xf32>,
    %64 = vector.shape_cast %32 : vector<256x8xf32> to vector<16x16x8xf32>
    %c0_37 = arith.constant 0 : index
    %c0_38 = arith.constant 0 : index
    %c0_39 = arith.constant 0 : index
    %c0_40 = arith.constant 0 : index
    %65 = vector.load %arg4[%c0_37, %c0_38, %c0_39, %c0_40] : memref<1x16x16x8xf32, #tpu.memory_space<vmem>>, vector<1x16x16x8xf32>
    %66 = vector.shape_cast %65 : vector<1x16x16x8xf32> to vector<16x16x8xf32>
    %67 = vector.shape_cast %64 : vector<16x16x8xf32> to vector<1x16x16x8xf32>
    tpu.vector_store %arg4[%c0_37, %c0_38, %c0_39, %c0_40], %67 {strides = array<i32>} : memref<1x16x16x8xf32, #tpu.memory_space<vmem>>, vector<1x16x16x8xf32>,
    return
  }
  func.func @transform_0(%arg0: i32) -> (i32, i32, i32, i32) {
    %c0_i32 = arith.constant 0 : i32
    %c0_i32_0 = arith.constant 0 : i32
    %c0_i32_1 = arith.constant 0 : i32
    %c0_i32_2 = arith.constant 0 : i32
    return %arg0, %c0_i32, %c0_i32_0, %c0_i32_1 : i32, i32, i32, i32
  }
  func.func @transform_1(%arg0: i32) -> (i32, i32) {
    %c0_i32 = arith.constant 0 : i32
    %c0_i32_0 = arith.constant 0 : i32
    %c0_i32_1 = arith.constant 0 : i32
    return %c0_i32, %c0_i32_0 : i32, i32
  }
  func.func @transform_2(%arg0: i32) -> (i32, i32) {
    %c0_i32 = arith.constant 0 : i32
    %c0_i32_0 = arith.constant 0 : i32
    %c0_i32_1 = arith.constant 0 : i32
    return %c0_i32, %c0_i32_0 : i32, i32
  }
  func.func @transform_3(%arg0: i32) -> (i32, i32, i32, i32) {
    %c0_i32 = arith.constant 0 : i32
    %c0_i32_0 = arith.constant 0 : i32
    %c0_i32_1 = arith.constant 0 : i32
    %c0_i32_2 = arith.constant 0 : i32
    return %arg0, %c0_i32, %c0_i32_0, %c0_i32_1 : i32, i32, i32, i32
  }
  func.func @transform_4(%arg0: i32) -> (i32, i32, i32, i32) {
    %c0_i32 = arith.constant 0 : i32
    %c0_i32_0 = arith.constant 0 : i32
    %c0_i32_1 = arith.constant 0 : i32
    %c0_i32_2 = arith.constant 0 : i32
    return %arg0, %c0_i32, %c0_i32_0, %c0_i32_1 : i32, i32, i32, i32
  }
  func.func @transform_5(%arg0: i32) -> (i32, i32, i32) {
    %c0_i32 = arith.constant 0 : i32
    %c0_i32_0 = arith.constant 0 : i32
    %c0_i32_1 = arith.constant 0 : i32
    return %arg0, %c0_i32, %c0_i32_0 : i32, i32, i32
  }
}

</mosaic_0001>

<bundles_post_ra>
// kernel: basic_block_forward.5
= control target key start
LH: loop header
LB: loop body
LE: loop exit
PB: predicated region body
PF: predicated region fallthrough
CT: control target
= control target key end

     0   :  { %s727_s21 = smov 0   ;;  %s1034_s0 = inlined_call_operand.vmem [shape: f32[2,16,16,8], index: 0, kind: input, shape index: {}]   ;;  %s1035_s1 = inlined_call_operand.vmem [shape: f32[2,16,16,8], index: 1, kind: input, shape index: {}]   ;;  %s1036_s2 = inlined_call_operand.vmem [shape: f32[1,8], index: 2, kind: input, shape index: {}]   ;;  %s1037_s3 = inlined_call_operand.vmem [shape: f32[1,8], index: 3, kind: input, shape index: {}]   ;;  %s1038_s4 = inlined_call_operand.vmem [shape: f32[1,8], index: 4, kind: input, shape index: {}]   ;;  %s1039_s5 = inlined_call_operand.vmem [shape: f32[1,8], index: 5, kind: input, shape index: {}]   ;;  %s1040_s6 = inlined_call_operand.vmem [shape: f32[2,16,16,8], index: 6, kind: output, shape index: {}]  }
   0x1 LB: > { %s656_s22 = sadd.s32 4294967295, %s690_s21   ;;  %p660_p0 = scmp.ge.s32.totalorder %s690_s21, 1  ;;  %s690_s21 = sphi %s727_s21, %s16_s21  }
   0x2   : > { %p222_p1 = scmp.lt.s32.totalorder %s690_s21, 3 }
   0x4   : > { %p223_p2 = pnand %p660_p0, %p222_p1 }
   0x5   : > { %p257_p3 = scmp.lt.s32.totalorder (!%p223_p2), %s656_s22, 1  ;;  %v740_v0 = vld [vmem:[%s1036_s2] ss:$0 sm:$0xff] (!%p223_p2)  ;;  %vm556_vm0 = vcmask (!%p223_p2), 64512  }
   0x6   : > { %226 = sbr.rel (%p223_p2) target bundleno = 71 (0x47), region = 44  ;;  %v745_v1 = vld [vmem:[%s1038_s4] ss:$0 sm:$0xff] (!%p223_p2) }
   0x7   : > { %v762_v2 = vld [vmem:[%s1037_s3] ss:$0 sm:$0xff] (!%p223_p2) }
   0x8   : > { %v767_v3 = vld [vmem:[%s1039_s5] ss:$0 sm:$0xff] (!%p223_p2) }
   0xd   : > { %s1042_s22 = smov (!%p257_p3, %s656_s22), 1 }
   0xe   : > { %s735_s23 = sshll.u32 %s1042_s22, 8 }
   0xf   : > { %s751_s30 = scalar_lea.vmem %s1034_s0, %s735_s23  ;;  %s757_s9 = scalar_lea.vmem %s1035_s1, %s735_s23 }
  0x10   : > { %v272_v4 = vld [vmem:[%s751_s30] sm:$0xff]  ;;  %v273_v6 = vld [vmem:[%s751_s30 + $0x8] sm:$0xff]  ;;  %v274_v11 = vld [vmem:[%s751_s30 + $0x10] sm:$0xff]  ;;  %s802_s16 = scalar_lea.vmem %s1040_s6, %s735_s23 }
  0x11   : > { %v382_v5 = vld [vmem:[%s757_s9] sm:$0xff]  ;;  %v311_v7 = vmul.f32 %v740_v0, %v272_v4  ;;  %v312_v9 = vmul.f32 %v740_v0, %v273_v6  ;;  %v383_v10 = vld [vmem:[%s757_s9 + $0x8] sm:$0xff]  ;;  %v384_v12 = vld [vmem:[%s757_s9 + $0x10] sm:$0xff]  ;;  %v313_v14 = vmul.f32 %v740_v0, %v274_v11 }
  0x12   : > { %v421_v8 = vmul.f32 %v745_v1, %v382_v5  ;;  %v422_v13 = vmul.f32 %v745_v1, %v383_v10  ;;  %v423_v15 = vmul.f32 %v745_v1, %v384_v12  ;;  %v275_v16 = vld [vmem:[%s751_s30 + $0x18] sm:$0xff]  ;;  %v276_v18 = vld [vmem:[%s751_s30 + $0x20] sm:$0xff]  ;;  %v277_v24 = vld [vmem:[%s751_s30 + $0x28] sm:$0xff] }
  0x13   : > { %v385_v17 = vld [vmem:[%s757_s9 + $0x18] sm:$0xff]  ;;  %v350_v19 = vadd.f32 %v762_v2, %v311_v7  ;;  %v351_v21 = vadd.f32 %v762_v2, %v312_v9  ;;  %v314_v22 = vmul.f32 %v740_v0, %v275_v16  ;;  %v386_v23 = vld [vmem:[%s757_s9 + $0x20] sm:$0xff]  ;;  %v352_v26 = vadd.f32 %v762_v2, %v313_v14  ;;  %v387_v29 = vld [vmem:[%s757_s9 + $0x28] sm:$0xff] }
  0x14   : > { %v460_v20 = vadd.f32 %v767_v3, %v421_v8  ;;  %v461_v25 = vadd.f32 %v767_v3, %v422_v13  ;;  %v462_v27 = vadd.f32 %v767_v3, %v423_v15  ;;  %v424_v28 = vmul.f32 %v745_v1, %v385_v17  ;;  %v278_v38 = vld [vmem:[%s751_s30 + $0x30] sm:$0xff]  ;;  %v279_v44 = vld [vmem:[%s751_s30 + $0x38] sm:$0xff]  ;;  %v280_v46 = vld [vmem:[%s751_s30 + $0x40] sm:$0xff] }
  0x15   : > { %v353_v31 = vadd.f32 %v762_v2, %v314_v22  ;;  %v315_v32 = vmul.f32 %v740_v0, %v276_v18  ;;  %v425_v33 = vmul.f32 %v745_v1, %v386_v23  ;;  %v316_v37 = vmul.f32 %v740_v0, %v277_v24  ;;  %v388_v39 = vld [vmem:[%s757_s9 + $0x30] sm:$0xff]  ;;  %v389_v45 = vld [vmem:[%s757_s9 + $0x38] sm:$0xff]  ;;  %v390_v55 = vld [vmem:[%s757_s9 + $0x40] sm:$0xff] }
  0x16   : > { %v492_v30 = vadd.f32 %v460_v20, %v350_v19  ;;  %v493_v34 = vadd.f32 %v461_v25, %v351_v21  ;;  %v494_v35 = vadd.f32 %v462_v27, %v352_v26  ;;  %v463_v36 = vadd.f32 %v767_v3, %v424_v28  ;;  %v281_v60 = vld [vmem:[%s751_s30 + $0x48] sm:$0xff]  ;;  %v282_v6 = vld [vmem:[%s751_s30 + $0x50] sm:$0xff]  ;;  %v283_v12 = vld [vmem:[%s751_s30 + $0x58] sm:$0xff] }
  0x17   : > { %v354_v41 = vadd.f32 %v762_v2, %v315_v32  ;;  %v464_v42 = vadd.f32 %v767_v3, %v425_v33  ;;  %v426_v43 = vmul.f32 %v745_v1, %v387_v29  ;;  %v355_v50 = vadd.f32 %v762_v2, %v316_v37  ;;  %v391_v61 = vld [vmem:[%s757_s9 + $0x48] sm:$0xff]  ;;  %v392_v7 = vld [vmem:[%s757_s9 + $0x50] sm:$0xff]  ;;  %v393_v21 = vld [vmem:[%s757_s9 + $0x58] sm:$0xff] }
  0x18   : > { %v524_v40 = vmax.f32 %v492_v30, 0.0  ;;  %v525_v47 = vmax.f32 %v493_v34, 0.0  ;;  %v526_v48 = vmax.f32 %v494_v35, 0.0  ;;  %v495_v49 = vadd.f32 %v463_v36, %v353_v31  ;;  %v284_v22 = vld [vmem:[%s751_s30 + $0x60] sm:$0xff]  ;;  %v285_v28 = vld [vmem:[%s751_s30 + $0x68] sm:$0xff] }
  0x19   : > { %v496_v51 = vadd.f32 %v464_v42, %v354_v41  ;;  %v465_v52 = vadd.f32 %v767_v3, %v426_v43  ;;  %v317_v53 = vmul.f32 %v740_v0, %v278_v38  ;;  %v427_v54 = vmul.f32 %v745_v1, %v388_v39  ;;  %v394_v27 = vld [vmem:[%s757_s9 + $0x60] sm:$0xff]  ;;  %v395_v33 = vld [vmem:[%s757_s9 + $0x68] sm:$0xff]  ;;  %v286_v38 = vld [vmem:[%s751_s30 + $0x70] sm:$0xff] }
  0x1a   : > { %557 = vst.msk [vmem:[%s802_s16] sm:$0xff] %vm556_vm0, %v524_v40  ;;  %558 = vst.msk [vmem:[%s802_s16 + $0x8] sm:$0xff] %vm556_vm0, %v525_v47  ;;  %v527_v56 = vmax.f32 %v495_v49, 0.0  ;;  %v318_v57 = vmul.f32 %v740_v0, %v279_v44  ;;  %v428_v58 = vmul.f32 %v745_v1, %v389_v45  ;;  %v319_v59 = vmul.f32 %v740_v0, %v280_v46  ;;  %v396_v43 = vld [vmem:[%s757_s9 + $0x70] sm:$0xff]  ;;  %v287_v44 = vld [vmem:[%s751_s30 + $0x78] sm:$0xff] }
  0x1b   : > { %559 = vst.msk [vmem:[%s802_s16 + $0x10] sm:$0xff] %vm556_vm0, %v526_v48  ;;  %v528_v62 = vmax.f32 %v496_v51, 0.0  ;;  %v497_v63 = vadd.f32 %v465_v52, %v355_v50  ;;  %v356_v4 = vadd.f32 %v762_v2, %v317_v53  ;;  %v466_v5 = vadd.f32 %v767_v3, %v427_v54  ;;  %v397_v49 = vld [vmem:[%s757_s9 + $0x78] sm:$0xff]  ;;  %v288_v50 = vld [vmem:[%s751_s30 + $0x80] sm:$0xff] }
  0x1c   : > { %560 = vst.msk [vmem:[%s802_s16 + $0x18] sm:$0xff] %vm556_vm0, %v527_v56  ;;  %v357_v8 = vadd.f32 %v762_v2, %v318_v57  ;;  %v467_v9 = vadd.f32 %v767_v3, %v428_v58  ;;  %v358_v10 = vadd.f32 %v762_v2, %v319_v59  ;;  %v429_v11 = vmul.f32 %v745_v1, %v390_v55  ;;  %v398_v59 = vld [vmem:[%s757_s9 + $0x80] sm:$0xff] }
  0x1d   : > { %561 = vst.msk [vmem:[%s802_s16 + $0x20] sm:$0xff] %vm556_vm0, %v528_v62  ;;  %v529_v13 = vmax.f32 %v497_v63, 0.0  ;;  %v498_v14 = vadd.f32 %v466_v5, %v356_v4  ;;  %v320_v15 = vmul.f32 %v740_v0, %v281_v60  ;;  %v430_v16 = vmul.f32 %v745_v1, %v391_v61  ;;  %v289_v4 = vld [vmem:[%s751_s30 + $0x88] sm:$0xff] }
  0x1e   : > { %v499_v17 = vadd.f32 %v467_v9, %v357_v8  ;;  %v468_v18 = vadd.f32 %v767_v3, %v429_v11  ;;  %v321_v19 = vmul.f32 %v740_v0, %v282_v6  ;;  %v431_v20 = vmul.f32 %v745_v1, %v392_v7  ;;  %v399_v5 = vld [vmem:[%s757_s9 + $0x88] sm:$0xff]  ;;  %v400_v11 = vld [vmem:[%s757_s9 + $0x90] sm:$0xff] }
  0x1f   : > { %562 = vst.msk [vmem:[%s802_s16 + $0x28] sm:$0xff] %vm556_vm0, %v529_v13  ;;  %v530_v23 = vmax.f32 %v498_v14, 0.0  ;;  %v359_v24 = vadd.f32 %v762_v2, %v320_v15  ;;  %v469_v25 = vadd.f32 %v767_v3, %v430_v16  ;;  %v322_v26 = vmul.f32 %v740_v0, %v283_v12  ;;  %v291_v16 = vld [vmem:[%s751_s30 + $0x98] sm:$0xff] }
  0x20   : > { %v531_v29 = vmax.f32 %v499_v17, 0.0  ;;  %v500_v30 = vadd.f32 %v468_v18, %v358_v10  ;;  %v360_v31 = vadd.f32 %v762_v2, %v321_v19  ;;  %v470_v32 = vadd.f32 %v767_v3, %v431_v20  ;;  %v290_v10 = vld [vmem:[%s751_s30 + $0x90] sm:$0xff] }
  0x21   : > { %563 = vst.msk [vmem:[%s802_s16 + $0x30] sm:$0xff] %vm556_vm0, %v530_v23  ;;  %v501_v34 = vadd.f32 %v469_v25, %v359_v24  ;;  %v361_v35 = vadd.f32 %v762_v2, %v322_v26  ;;  %v432_v36 = vmul.f32 %v745_v1, %v393_v21  ;;  %v323_v37 = vmul.f32 %v740_v0, %v284_v22  ;;  %v401_v25 = vld [vmem:[%s757_s9 + $0x98] sm:$0xff]  ;;  %v292_v26 = vld [vmem:[%s751_s30 + $0xa0] sm:$0xff] }
  0x22   : > { %564 = vst.msk [vmem:[%s802_s16 + $0x38] sm:$0xff] %vm556_vm0, %v531_v29  ;;  %v532_v39 = vmax.f32 %v500_v30, 0.0  ;;  %v502_v40 = vadd.f32 %v470_v32, %v360_v31  ;;  %v433_v41 = vmul.f32 %v745_v1, %v394_v27  ;;  %v324_v42 = vmul.f32 %v740_v0, %v285_v28  ;;  %v402_v31 = vld [vmem:[%s757_s9 + $0xa0] sm:$0xff]  ;;  %v293_v32 = vld [vmem:[%s751_s30 + $0xa8] sm:$0xff] }
  0x23   : > { %v533_v45 = vmax.f32 %v501_v34, 0.0  ;;  %v471_v46 = vadd.f32 %v767_v3, %v432_v36  ;;  %v362_v47 = vadd.f32 %v762_v2, %v323_v37  ;;  %v434_v48 = vmul.f32 %v745_v1, %v395_v33  ;;  %v403_v37 = vld [vmem:[%s757_s9 + $0xa8] sm:$0xff] }
  0x24   : > { %565 = vst.msk [vmem:[%s802_s16 + $0x40] sm:$0xff] %vm556_vm0, %v532_v39  ;;  %v534_v51 = vmax.f32 %v502_v40, 0.0  ;;  %v472_v52 = vadd.f32 %v767_v3, %v433_v41  ;;  %v363_v53 = vadd.f32 %v762_v2, %v324_v42  ;;  %v325_v54 = vmul.f32 %v740_v0, %v286_v38  ;;  %v294_v42 = vld [vmem:[%s751_s30 + $0xb0] sm:$0xff] }
  0x25   : > { %566 = vst.msk [vmem:[%s802_s16 + $0x48] sm:$0xff] %vm556_vm0, %v533_v45  ;;  %v503_v55 = vadd.f32 %v471_v46, %v361_v35  ;;  %v473_v56 = vadd.f32 %v767_v3, %v434_v48  ;;  %v435_v57 = vmul.f32 %v745_v1, %v396_v43  ;;  %v326_v58 = vmul.f32 %v740_v0, %v287_v44  ;;  %v295_v48 = vld [vmem:[%s751_s30 + $0xb8] sm:$0xff] }
  0x26   : > { %567 = vst.msk [vmem:[%s802_s16 + $0x50] sm:$0xff] %vm556_vm0, %v534_v51  ;;  %v504_v60 = vadd.f32 %v472_v52, %v362_v47  ;;  %v364_v61 = vadd.f32 %v762_v2, %v325_v54  ;;  %v436_v62 = vmul.f32 %v745_v1, %v397_v49  ;;  %v327_v63 = vmul.f32 %v740_v0, %v288_v50  ;;  %v404_v47 = vld [vmem:[%s757_s9 + $0xb0] sm:$0xff]  ;;  %v296_v54 = vld [vmem:[%s751_s30 + $0xc0] sm:$0xff] }
  0x27   : > { %v535_v6 = vmax.f32 %v503_v55, 0.0  ;;  %v505_v7 = vadd.f32 %v473_v56, %v363_v53  ;;  %v474_v8 = vadd.f32 %v767_v3, %v435_v57  ;;  %v365_v9 = vadd.f32 %v762_v2, %v326_v58  ;;  %v405_v53 = vld [vmem:[%s757_s9 + $0xb8] sm:$0xff] }
  0x28   : > { %v536_v12 = vmax.f32 %v504_v60, 0.0  ;;  %v475_v13 = vadd.f32 %v767_v3, %v436_v62  ;;  %v366_v14 = vadd.f32 %v762_v2, %v327_v63  ;;  %v437_v15 = vmul.f32 %v745_v1, %v398_v59  ;;  %v406_v63 = vld [vmem:[%s757_s9 + $0xc0] sm:$0xff] }
  0x29   : > { %568 = vst.msk [vmem:[%s802_s16 + $0x58] sm:$0xff] %vm556_vm0, %v535_v6  ;;  %v537_v17 = vmax.f32 %v505_v7, 0.0  ;;  %v506_v18 = vadd.f32 %v474_v8, %v364_v61  ;;  %v328_v19 = vmul.f32 %v740_v0, %v289_v4  ;;  %v438_v20 = vmul.f32 %v745_v1, %v399_v5  ;;  %v297_v8 = vld [vmem:[%s751_s30 + $0xc8] sm:$0xff] }
  0x2a   : > { %569 = vst.msk [vmem:[%s802_s16 + $0x60] sm:$0xff] %vm556_vm0, %v536_v12  ;;  %v507_v21 = vadd.f32 %v475_v13, %v365_v9  ;;  %v476_v22 = vadd.f32 %v767_v3, %v437_v15  ;;  %v329_v23 = vmul.f32 %v740_v0, %v290_v10  ;;  %v439_v24 = vmul.f32 %v745_v1, %v400_v11  ;;  %v407_v9 = vld [vmem:[%s757_s9 + $0xc8] sm:$0xff]  ;;  %v408_v15 = vld [vmem:[%s757_s9 + $0xd0] sm:$0xff] }
  0x2b   : > { %570 = vst.msk [vmem:[%s802_s16 + $0x68] sm:$0xff] %vm556_vm0, %v537_v17  ;;  %v538_v27 = vmax.f32 %v506_v18, 0.0  ;;  %v367_v28 = vadd.f32 %v762_v2, %v328_v19  ;;  %v477_v29 = vadd.f32 %v767_v3, %v438_v20  ;;  %v330_v30 = vmul.f32 %v740_v0, %v291_v16  ;;  %v299_v20 = vld [vmem:[%s751_s30 + $0xd8] sm:$0xff] }
  0x2c   : > { %v539_v33 = vmax.f32 %v507_v21, 0.0  ;;  %v508_v34 = vadd.f32 %v476_v22, %v366_v14  ;;  %v368_v35 = vadd.f32 %v762_v2, %v329_v23  ;;  %v478_v36 = vadd.f32 %v767_v3, %v439_v24  ;;  %v298_v14 = vld [vmem:[%s751_s30 + $0xd0] sm:$0xff] }
  0x2d   : > { %571 = vst.msk [vmem:[%s802_s16 + $0x70] sm:$0xff] %vm556_vm0, %v538_v27  ;;  %v509_v38 = vadd.f32 %v477_v29, %v367_v28  ;;  %v369_v39 = vadd.f32 %v762_v2, %v330_v30  ;;  %v440_v40 = vmul.f32 %v745_v1, %v401_v25  ;;  %v331_v41 = vmul.f32 %v740_v0, %v292_v26  ;;  %v409_v29 = vld [vmem:[%s757_s9 + $0xd8] sm:$0xff]  ;;  %v300_v30 = vld [vmem:[%s751_s30 + $0xe0] sm:$0xff] }
  0x2e   : > { %572 = vst.msk [vmem:[%s802_s16 + $0x78] sm:$0xff] %vm556_vm0, %v539_v33  ;;  %v540_v43 = vmax.f32 %v508_v34, 0.0  ;;  %v510_v44 = vadd.f32 %v478_v36, %v368_v35  ;;  %v441_v45 = vmul.f32 %v745_v1, %v402_v31  ;;  %v332_v46 = vmul.f32 %v740_v0, %v293_v32  ;;  %v410_v35 = vld [vmem:[%s757_s9 + $0xe0] sm:$0xff]  ;;  %v301_v36 = vld [vmem:[%s751_s30 + $0xe8] sm:$0xff] }
  0x2f   : > { %v541_v49 = vmax.f32 %v509_v38, 0.0  ;;  %v479_v50 = vadd.f32 %v767_v3, %v440_v40  ;;  %v370_v51 = vadd.f32 %v762_v2, %v331_v41  ;;  %v442_v52 = vmul.f32 %v745_v1, %v403_v37  ;;  %v411_v41 = vld [vmem:[%s757_s9 + $0xe8] sm:$0xff] }
  0x30   : > { %573 = vst.msk [vmem:[%s802_s16 + $0x80] sm:$0xff] %vm556_vm0, %v540_v43  ;;  %v542_v55 = vmax.f32 %v510_v44, 0.0  ;;  %v480_v56 = vadd.f32 %v767_v3, %v441_v45  ;;  %v371_v57 = vadd.f32 %v762_v2, %v332_v46  ;;  %v333_v58 = vmul.f32 %v740_v0, %v294_v42  ;;  %v302_v46 = vld [vmem:[%s751_s30 + $0xf0] sm:$0xff] }
  0x31   : > { %574 = vst.msk [vmem:[%s802_s16 + $0x88] sm:$0xff] %vm556_vm0, %v541_v49  ;;  %v511_v59 = vadd.f32 %v479_v50, %v369_v39  ;;  %v481_v60 = vadd.f32 %v767_v3, %v442_v52  ;;  %v443_v61 = vmul.f32 %v745_v1, %v404_v47  ;;  %v334_v62 = vmul.f32 %v740_v0, %v295_v48  ;;  %v303_v52 = vld [vmem:[%s751_s30 + $0xf8] sm:$0xff] }
  0x32   : > { %575 = vst.msk [vmem:[%s802_s16 + $0x90] sm:$0xff] %vm556_vm0, %v542_v55  ;;  %v512_v4 = vadd.f32 %v480_v56, %v370_v51  ;;  %v372_v5 = vadd.f32 %v762_v2, %v333_v58  ;;  %v444_v6 = vmul.f32 %v745_v1, %v405_v53  ;;  %v335_v7 = vmul.f32 %v740_v0, %v296_v54  ;;  %v412_v51 = vld [vmem:[%s757_s9 + $0xf0] sm:$0xff] }
  0x33   : > { %v543_v10 = vmax.f32 %v511_v59, 0.0  ;;  %v513_v11 = vadd.f32 %v481_v60, %v371_v57  ;;  %v482_v12 = vadd.f32 %v767_v3, %v443_v61  ;;  %v373_v13 = vadd.f32 %v762_v2, %v334_v62  ;;  %v413_v57 = vld [vmem:[%s757_s9 + $0xf8] sm:$0xff] }
  0x34   : > { %v544_v16 = vmax.f32 %v512_v4, 0.0  ;;  %v483_v17 = vadd.f32 %v767_v3, %v444_v6  ;;  %v374_v18 = vadd.f32 %v762_v2, %v335_v7  ;;  %v445_v19 = vmul.f32 %v745_v1, %v406_v63 }
  0x35   : > { %576 = vst.msk [vmem:[%s802_s16 + $0x98] sm:$0xff] %vm556_vm0, %v543_v10  ;;  %v545_v21 = vmax.f32 %v513_v11, 0.0  ;;  %v514_v22 = vadd.f32 %v482_v12, %v372_v5  ;;  %v336_v23 = vmul.f32 %v740_v0, %v297_v8  ;;  %v446_v24 = vmul.f32 %v745_v1, %v407_v9 }
  0x36   : > { %577 = vst.msk [vmem:[%s802_s16 + $0xa0] sm:$0xff] %vm556_vm0, %v544_v16  ;;  %v515_v25 = vadd.f32 %v483_v17, %v373_v13  ;;  %v484_v26 = vadd.f32 %v767_v3, %v445_v19  ;;  %v337_v27 = vmul.f32 %v740_v0, %v298_v14  ;;  %v447_v28 = vmul.f32 %v745_v1, %v408_v15 }
  0x37   : > { %578 = vst.msk [vmem:[%s802_s16 + $0xa8] sm:$0xff] %vm556_vm0, %v545_v21  ;;  %v546_v31 = vmax.f32 %v514_v22, 0.0  ;;  %v375_v32 = vadd.f32 %v762_v2, %v336_v23  ;;  %v485_v33 = vadd.f32 %v767_v3, %v446_v24  ;;  %v338_v34 = vmul.f32 %v740_v0, %v299_v20 }
  0x38   : > { %v547_v37 = vmax.f32 %v515_v25, 0.0  ;;  %v516_v38 = vadd.f32 %v484_v26, %v374_v18  ;;  %v376_v39 = vadd.f32 %v762_v2, %v337_v27  ;;  %v486_v40 = vadd.f32 %v767_v3, %v447_v28 }
  0x39   : > { %579 = vst.msk [vmem:[%s802_s16 + $0xb0] sm:$0xff] %vm556_vm0, %v546_v31  ;;  %v517_v42 = vadd.f32 %v485_v33, %v375_v32  ;;  %v377_v43 = vadd.f32 %v762_v2, %v338_v34  ;;  %v448_v44 = vmul.f32 %v745_v1, %v409_v29  ;;  %v339_v45 = vmul.f32 %v740_v0, %v300_v30 }
  0x3a   : > { %580 = vst.msk [vmem:[%s802_s16 + $0xb8] sm:$0xff] %vm556_vm0, %v547_v37  ;;  %v548_v47 = vmax.f32 %v516_v38, 0.0  ;;  %v518_v48 = vadd.f32 %v486_v40, %v376_v39  ;;  %v449_v49 = vmul.f32 %v745_v1, %v410_v35  ;;  %v340_v50 = vmul.f32 %v740_v0, %v301_v36 }
  0x3b   : > { %v549_v53 = vmax.f32 %v517_v42, 0.0  ;;  %v487_v54 = vadd.f32 %v767_v3, %v448_v44  ;;  %v378_v55 = vadd.f32 %v762_v2, %v339_v45  ;;  %v450_v56 = vmul.f32 %v745_v1, %v411_v41 }
  0x3c   : > { %581 = vst.msk [vmem:[%s802_s16 + $0xc0] sm:$0xff] %vm556_vm0, %v548_v47  ;;  %v550_v58 = vmax.f32 %v518_v48, 0.0  ;;  %v488_v59 = vadd.f32 %v767_v3, %v449_v49  ;;  %v379_v60 = vadd.f32 %v762_v2, %v340_v50  ;;  %v341_v61 = vmul.f32 %v740_v0, %v302_v46 }
  0x3d   : > { %582 = vst.msk [vmem:[%s802_s16 + $0xc8] sm:$0xff] %vm556_vm0, %v549_v53  ;;  %v519_v62 = vadd.f32 %v487_v54, %v377_v43  ;;  %v489_v63 = vadd.f32 %v767_v3, %v450_v56  ;;  %v451_v4 = vmul.f32 %v745_v1, %v412_v51  ;;  %v342_v5 = vmul.f32 %v740_v0, %v303_v52 }
  0x3e   : > { %583 = vst.msk [vmem:[%s802_s16 + $0xd0] sm:$0xff] %vm556_vm0, %v550_v58  ;;  %v520_v6 = vadd.f32 %v488_v59, %v378_v55  ;;  %v380_v7 = vadd.f32 %v762_v2, %v341_v61  ;;  %v452_v8 = vmul.f32 %v745_v1, %v413_v57 }
  0x3f   : > { %v551_v9 = vmax.f32 %v519_v62, 0.0  ;;  %v521_v10 = vadd.f32 %v489_v63, %v379_v60  ;;  %v490_v11 = vadd.f32 %v767_v3, %v451_v4  ;;  %v381_v12 = vadd.f32 %v762_v2, %v342_v5 }
  0x40   : > { %v552_v13 = vmax.f32 %v520_v6, 0.0  ;;  %v491_v14 = vadd.f32 %v767_v3, %v452_v8 }
  0x41   : > { %584 = vst.msk [vmem:[%s802_s16 + $0xd8] sm:$0xff] %vm556_vm0, %v551_v9  ;;  %v553_v0 = vmax.f32 %v521_v10, 0.0  ;;  %v522_v15 = vadd.f32 %v490_v11, %v380_v7 }
  0x42   : > { %585 = vst.msk [vmem:[%s802_s16 + $0xe0] sm:$0xff] %vm556_vm0, %v552_v13  ;;  %v523_v16 = vadd.f32 %v491_v14, %v381_v12 }
  0x43   : > { %586 = vst.msk [vmem:[%s802_s16 + $0xe8] sm:$0xff] %vm556_vm0, %v553_v0  ;;  %v554_v1 = vmax.f32 %v522_v15, 0.0 }
  0x44   : > { %v555_v17 = vmax.f32 %v523_v16, 0.0 }
  0x45   : > { %587 = vst.msk [vmem:[%s802_s16 + $0xf0] sm:$0xff] %vm556_vm0, %v554_v1 }
  0x46   : > { %588 = vst.msk [vmem:[%s802_s16 + $0xf8] sm:$0xff] %vm556_vm0, %v555_v17 }
  0x47 PF: > { %s16_s21 = sadd.s32 1, %s690_s21  }
  0x48   : > { %p13_p4 = scmp.ge.s32.totalorder %s16_s21, 4  }
  0x4a   :  { %15 = sbr.rel (!%p13_p4) target bundleno = 1 (0x1), region = 77 }

// kernel: basic_block_forward.3
= control target key start
LH: loop header
LB: loop body
LE: loop exit
PB: predicated region body
PF: predicated region fallthrough
CT: control target
= control target key end

     0   :  { %s2902_s18 = smov 0   ;;  %s4567_s0 = inlined_call_operand.vmem [shape: f32[2,18,18,4], index: 0, kind: input, shape index: {}]   ;;  %s4568_s1 = inlined_call_operand.vmem [shape: bf16[36,8], index: 1, kind: input, shape index: {}]   ;;  %s4569_s2 = inlined_call_operand.vmem [shape: bf16[4,8], index: 2, kind: input, shape index: {}]   ;;  %s4570_s3 = inlined_call_operand.vmem [shape: f32[2,16,16,8], index: 3, kind: output, shape index: {0}]   ;;  %s4571_s4 = inlined_call_operand.vmem [shape: f32[2,16,16,8], index: 4, kind: output, shape index: {1}]   ;;  %s4572_s5 = inlined_call_operand.vmem [shape: f32[2,4,8], index: 5, kind: output, shape index: {2}]  }
   0x1 LB: > { %s2676_s19 = sadd.s32 4294967295, %s2862_s18   ;;  %p2680_p0 = scmp.ge.s32.totalorder %s2862_s18, 1  ;;  %s2862_s18 = sphi %s2902_s18, %s16_s18  }
   0x2   : > { %p192_p1 = scmp.lt.s32.totalorder %s2862_s18, 3 }
   0x4   : > { %p193_p2 = pnand %p2680_p0, %p192_p1 }
   0x6   : > { %196 = sbr.rel (%p193_p2) target bundleno = 894 (0x37e), region = 32 }
   0xd   : > { %p229_p3 = scmp.lt.s32.totalorder %s2676_s19, 1  ;;  %vm303_vm0 = vcmask 31744   ;;  %vm384_vm1 = vcmask 1046528   ;;  %s2864_s24 = smov 4   ;;  %vm594_vm2 = vcmask 1045504   ;;  %vm561_vm3 = vcmask 64544  }
   0xe   : > { %s2865_s25 = smov 8   ;;  %s2866_s26 = smov 12   ;;  %vm771_vm4 = vcmask 97344   ;;  %vm1753_vm5 = vcmask 1041408   ;;  %vm902_vm6 = vcmask 130144   ;;  %vm1069_vm7 = vcmask 162944  }
   0xf   : > { %s4706_s19 = smov (!%p229_p3, %s2676_s19), 1  ;;  %s2867_s27 = smov 16   ;;  %vm1203_vm8 = vcmask 195744   ;;  %vm1334_vm9 = vcmask 228544   ;;  %vm1469_vm10 = vcmask 261344   ;;  %vm1603_vm11 = vcmask 294144  }
  0x10   : > { %s2836_s20 = smul.u32 432, %s4706_s19  ;;  %s2868_s28 = smov 20   ;;  %vm1704_vm12 = vcmask 293888   ;;  %vm1918_vm13 = vcmask 64512   ;;  %vm1988_vm14 = vcmask 57344  }
  0x11   : > { %s2869_s29 = smov 24   ;;  %s2870_s7 = smov 28  }
  0x12   : > { %s2916_s23 = scalar_lea.vmem %s4567_s0, %s2836_s20  ;;  %s2871_s12 = smov 32  }
  0x13   : > { %v2919_v0 = vld [vmem:[%s2916_s23 + $0x18] sm:$0xff]  ;;  %v2922_v1 = vld [vmem:[%s2916_s23 + $0x20] sm:$0xff]  ;;  %v2930_v5 = vld [vmem:[%s2916_s23 + $0x8] sm:$0xff]  ;;  %s2724_s15 = sshll.u32 %s4706_s19, 8 }
  0x14   : > { %v2925_v2 = vld [vmem:[%s2916_s23] sm:$0xff]  ;;  %v390_v3 = vrot.slane %v2919_v0, 1  ;;  %v391_v4 = vrot.slane %v2922_v1, 1  ;;  %v2934_v7 = vld [vmem:[%s2916_s23 + $0x28] sm:$0x3]  ;;  %306 = vst.msk [vmem:[#allocation2 + $0x10] sm:$0xff] %vm303_vm0, %v2919_v0  ;;  %s4217_s20 = scalar_lea.vmem %s4570_s3, %s2724_s15 }
  0x15   : > { %v385_v6 = vrot.slane %v2925_v2, 1  ;;  %304 = vst.msk [vmem:[#allocation2] sm:$0xff] %vm303_vm0, %v2925_v2  ;;  %307 = vst.msk [vmem:[#allocation2 + $0x18] sm:$0xff] %vm303_vm0, %v2922_v1  ;;  %v386_v8 = vrot.slane %v2930_v5, 1  ;;  %v393_v9 = vrot.slane %v2934_v7, 1  ;;  %v2948_v11 = vld [vmem:[%s2916_s23 + $0x38] sm:$0xff] }
  0x16   : > { %v2945_v10 = vld [vmem:[%s2916_s23 + $0x10] sm:$0x3]  ;;  %305 = vst.msk [vmem:[#allocation2 + $0x8] sm:$0xff] %vm303_vm0, %v2930_v5  ;;  %v2956_v13 = vsel %vm384_vm1, %v390_v3, %v391_v4  ;;  %v2960_v15 = vld [vmem:[%s2916_s23 + $0x40] sm:$0x3]  ;;  %309 = vst.msk [vmem:[#allocation2 + $0x28] sm:$0xff] %vm303_vm0, %v2948_v11 }
  0x17   : > { %v2951_v12 = vld [vmem:[%s2916_s23 + $0x30] sm:$0xff]  ;;  %v388_v14 = vrot.slane %v2945_v10, 1  ;;  %469 = vrot.lane.b32.xlu1 %v2956_v13, %s2864_s24  ;;  %v387_v17 = vsel %vm384_vm1, %v385_v6, %v386_v8  ;;  %v2973_v18 = vld [vmem:[%s2916_s23 + $0x48] sm:$0xff]  ;;  %v2982_v20 = vsel %vm384_vm1, %v391_v4, %v393_v9  ;;  %v396_v21 = vrot.slane %v2948_v11, 1  ;;  %v2987_v23 = vld [vmem:[%s2916_s23 + $0x60] sm:$0xff] }
  0x18   : > { %v2963_v16 = vld [vmem:[%s2916_s23 + $0x50] sm:$0xff]  ;;  %308 = vst.msk [vmem:[#allocation2 + $0x20] sm:$0xff] %vm303_vm0, %v2951_v12  ;;  %v2976_v19 = vld [vmem:[%s2916_s23 + $0x68] sm:$0xff]  ;;  %465 = vrot.lane.b32.xlu0 %v387_v17, %s2864_s24  ;;  %v398_v22 = vrot.slane %v2960_v15, 1  ;;  %v2990_v24 = vld [vmem:[%s2916_s23 + $0x80] sm:$0xff]  ;;  %v395_v26 = vrot.slane %v2951_v12, 1 }
  0x19   : > { %311 = vst.msk [vmem:[#allocation2 + $0x38] sm:$0xff] %vm303_vm0, %v2963_v16  ;;  %310 = vst.msk [vmem:[#allocation2 + $0x30] sm:$0xff] %vm303_vm0, %v2973_v18  ;;  %v389_v25 = vsel %vm384_vm1, %v386_v8, %v388_v14  ;;  %v2999_v27 = vld [vmem:[%s2916_s23 + $0x58] sm:$0x3]  ;;  %v3012_v30 = vld [vmem:[%s2916_s23 + $0x90] sm:$0xff]  ;;  %v401_v34 = vrot.slane %v2963_v16, 1 }
  0x1a   : > { %313 = vst.msk [vmem:[#allocation2 + $0x48] sm:$0xff] %vm303_vm0, %v2976_v19  ;;  %v3002_v28 = vld [vmem:[%s2916_s23 + $0x78] sm:$0xff]  ;;  %312 = vst.msk [vmem:[#allocation2 + $0x40] sm:$0xff] %vm303_vm0, %v2987_v23  ;;  %v3019_v31 = vld [vmem:[%s2916_s23 + $0xb0] sm:$0xff]  ;;  %v3030_v33 = vsel %vm384_vm1, %v396_v21, %v398_v22  ;;  %v403_v35 = vrot.slane %v2999_v27, 1  ;;  %v3045_v38 = vsel %vm384_vm1, %v395_v26, %v396_v21  ;;  %v400_v39 = vrot.slane %v2973_v18, 1 }
  0x1b   : > { %315 = vst.msk [vmem:[#allocation2 + $0x58] sm:$0xff] %vm303_vm0, %v2990_v24  ;;  %v3009_v29 = vld [vmem:[%s2916_s23 + $0x98] sm:$0xff]  ;;  %314 = vst.msk [vmem:[#allocation2 + $0x50] sm:$0xff] %vm303_vm0, %v3002_v28  ;;  %471 = vrot.lane.b32.xlu1 %v2982_v20, %s2864_s24  ;;  %v3022_v32 = vld [vmem:[%s2916_s23 + $0xa8] sm:$0xff]  ;;  %v406_v48 = vrot.slane %v2976_v19, 1  ;;  %v405_v53 = vrot.slane %v2987_v23, 1 }
  0x1c   : > { %316 = vst.msk [vmem:[#allocation2 + $0x60] sm:$0xff] %vm303_vm0, %v3012_v30  ;;  %317 = vst.msk [vmem:[#allocation2 + $0x68] sm:$0xff] %vm303_vm0, %v3009_v29  ;;  %467 = vrot.lane.b32.xlu0 %v389_v25, %s2864_s24  ;;  %v3035_v36 = vld [vmem:[%s2916_s23 + $0x70] sm:$0x3]  ;;  %v3038_v37 = vld [vmem:[%s2916_s23 + $0xc8] sm:$0xff]  ;;  %v3086_v47 = vsel %vm384_vm1, %v401_v34, %v403_v35  ;;  %v3101_v52 = vsel %vm384_vm1, %v400_v39, %v401_v34  ;;  %v411_v60 = vrot.slane %v2990_v24, 1 }
  0x1d   : > { %4639 = vst [vmem:[#allocation3_spill] sm:$0xff] %v3038_v37  ;;  %318 = vst.msk [vmem:[#allocation2 + $0x70] sm:$0xff] %vm303_vm0, %v3022_v32  ;;  %v3049_v40 = vld [vmem:[%s2916_s23 + $0xc0] sm:$0xff]  ;;  %v3055_v42 = vld [vmem:[%s2916_s23 + $0xd8] sm:$0xff]  ;;  %v408_v49 = vrot.slane %v3035_v36, 1  ;;  %v3147_v3 = vsel %vm384_vm1, %v405_v53, %v406_v48  ;;  %v410_v4 = vrot.slane %v3002_v28, 1 }
  0x1e   : > { %319 = vst.msk [vmem:[#allocation2 + $0x78] sm:$0xff] %vm303_vm0, %v3019_v31  ;;  %v3052_v41 = vld [vmem:[%s2916_s23 + $0xe0] sm:$0xff]  ;;  %321 = vst.msk [vmem:[#allocation2 + $0x88] sm:$0xff] %vm303_vm0, %v3038_v37  ;;  %v3060_v43 = vld [vmem:[%s2916_s23 + $0xf8] sm:$0xff]  ;;  %v416_v9 = vrot.slane %v3009_v29, 1  ;;  %v415_v21 = vrot.slane %v3012_v30, 1 }
  0x1f   : > { %4640 = vst [vmem:[#allocation4_spill] sm:$0xff] %v3052_v41  ;;  %4641 = vst [vmem:[#allocation5_spill] sm:$0xff] %v3060_v43  ;;  %v3063_v44 = vld [vmem:[%s2916_s23 + $0xf0] sm:$0xff]  ;;  %475 = vrot.lane.b32.xlu1 %v3030_v33, %s2864_s24  ;;  %v3077_v46 = vld [vmem:[%s2916_s23 + $0x108] sm:$0xff]  ;;  %v3132_v59 = vsel %vm384_vm1, %v406_v48, %v408_v49  ;;  %v3167_v17 = vsel %vm384_vm1, %v410_v4, %v411_v60  ;;  %v421_v26 = vrot.slane %v3019_v31, 1  ;;  %v420_v39 = vrot.slane %v3022_v32, 1 }
  0x20   : > { %320 = vst.msk [vmem:[#allocation2 + $0x80] sm:$0xff] %vm303_vm0, %v3049_v40  ;;  %322 = vst.msk [vmem:[#allocation2 + $0x90] sm:$0xff] %vm303_vm0, %v3055_v42  ;;  %v3074_v45 = vld [vmem:[%s2916_s23 + $0x110] sm:$0xff]  ;;  %473 = vrot.lane.b32.xlu0 %v3045_v38, %s2864_s24  ;;  %v3091_v50 = vld [vmem:[%s2916_s23 + $0x128] sm:$0xff]  ;;  %v3183_v35 = vsel %vm384_vm1, %v415_v21, %v416_v9  ;;  %v426_v53 = vrot.slane %v3038_v37, 1  ;;  %v425_v4 = vrot.slane %v3049_v40, 1 }
  0x21   : > { %323 = vst.msk [vmem:[#allocation2 + $0x98] sm:$0xff] %vm303_vm0, %v3052_v41  ;;  %4642 = vst [vmem:[#allocation6_spill] sm:$0xff] %v3074_v45  ;;  %v3094_v51 = vld [vmem:[%s2916_s23 + $0x120] sm:$0xff]  ;;  %v3105_v54 = vld [vmem:[%s2916_s23 + $0x88] sm:$0x3]  ;;  %v431_v21 = vrot.slane %v3052_v41, 1 }
  0x22   : > { %324 = vst.msk [vmem:[#allocation2 + $0xa0] sm:$0xff] %vm303_vm0, %v3063_v44  ;;  %325 = vst.msk [vmem:[#allocation2 + $0xa8] sm:$0xff] %vm303_vm0, %v3060_v43  ;;  %v3108_v55 = vld [vmem:[%s2916_s23 + $0x140] sm:$0xff]  ;;  %v3115_v56 = vld [vmem:[%s2916_s23 + $0x138] sm:$0xff]  ;;  %v413_v61 = vrot.slane %v3105_v54, 1 }
  0x23   : > { %4643 = vst [vmem:[#allocation7_spill] sm:$0xff] %v3091_v50  ;;  %326 = vst.msk [vmem:[#allocation2 + $0xb0] sm:$0xff] %vm303_vm0, %v3077_v46  ;;  %479 = vrot.lane.b32.xlu1 %v3086_v47, %s2864_s24  ;;  %v3122_v57 = vld [vmem:[%s2916_s23 + $0x158] sm:$0xff]  ;;  %v3125_v58 = vld [vmem:[%s2916_s23 + $0x150] sm:$0xff] }
  0x24   : > { %327 = vst.msk [vmem:[#allocation2 + $0xb8] sm:$0xff] %vm303_vm0, %v3074_v45  ;;  %4644 = vst [vmem:[#allocation8_spill] sm:$0xff] %v3101_v52  ;;  %477 = vrot.lane.b32.xlu0 %v3101_v52, %s2864_s24  ;;  %v3137_v62 = vld [vmem:[%s2916_s23 + $0x170] sm:$0xff]  ;;  %v3140_v63 = vld [vmem:[%s2916_s23 + $0x168] sm:$0xff]  ;;  %v3162_v8 = vsel %vm384_vm1, %v411_v60, %v413_v61  ;;  %v3199_v61 = vsel %vm384_vm1, %v420_v39, %v421_v26  ;;  %v430_v39 = vrot.slane %v3055_v42, 1 }
  0x25   : > { %4645 = vst [vmem:[#allocation9_spill] sm:$0xff] %v3108_v55  ;;  %328 = vst.msk [vmem:[#allocation2 + $0xc0] sm:$0xff] %vm303_vm0, %v3094_v51  ;;  %v3151_v6 = vld [vmem:[%s2916_s23 + $0xa0] sm:$0x3]  ;;  %v3171_v22 = vld [vmem:[%s2916_s23 + $0xb8] sm:$0x3] }
  0x26   : > { %329 = vst.msk [vmem:[#allocation2 + $0xc8] sm:$0xff] %vm303_vm0, %v3091_v50  ;;  %4646 = vst [vmem:[#allocation10_spill] sm:$0xff] %v3115_v56  ;;  %v418_v14 = vrot.slane %v3151_v6, 1  ;;  %v423_v34 = vrot.slane %v3171_v22, 1  ;;  %v3187_v48 = vld [vmem:[%s2916_s23 + $0xd0] sm:$0x3] }
  0x27   : > { %331 = vst.msk [vmem:[#allocation2 + $0xd8] sm:$0xff] %vm303_vm0, %v3108_v55  ;;  %4647 = vst [vmem:[#allocation11_spill] sm:$0xff] %v3125_v58  ;;  %483 = vrot.lane.b32.xlu1 %v3132_v59, %s2864_s24  ;;  %v428_v60 = vrot.slane %v3187_v48, 1 }
  0x28   : > { %330 = vst.msk [vmem:[#allocation2 + $0xd0] sm:$0xff] %vm303_vm0, %v3115_v56  ;;  %4648 = vst [vmem:[#allocation12_spill] sm:$0xff] %v3132_v59  ;;  %481 = vrot.lane.b32.xlu0 %v3147_v3, %s2864_s24  ;;  %v3178_v25 = vsel %vm384_vm1, %v416_v9, %v418_v14  ;;  %v3194_v49 = vsel %vm384_vm1, %v421_v26, %v423_v34  ;;  %v3203_v9 = vld [vmem:[%s2916_s23 + $0xe8] sm:$0x3]  ;;  %v3215_v26 = vsel %vm384_vm1, %v425_v4, %v426_v53  ;;  %v3299_v59 = vld [vmem:[%s2916_s23 + $0x178] sm:$0x3] }
  0x29   : > { %332 = vst.msk [vmem:[#allocation2 + $0xe0] sm:$0xff] %vm303_vm0, %v3125_v58  ;;  %333 = vst.msk [vmem:[#allocation2 + $0xe8] sm:$0xff] %vm303_vm0, %v3122_v57  ;;  %v3210_v14 = vsel %vm384_vm1, %v426_v53, %v428_v60  ;;  %v433_v34 = vrot.slane %v3203_v9, 1  ;;  %v3231_v53 = vsel %vm384_vm1, %v430_v39, %v431_v21  ;;  %v435_v4 = vrot.slane %v3063_v44, 1 }
  0x2a   : > { %4649 = vst [vmem:[#allocation13_spill] sm:$0xff] %v3147_v3  ;;  %334 = vst.msk [vmem:[#allocation2 + $0xf0] sm:$0xff] %vm303_vm0, %v3140_v63  ;;  %v440_v39 = vrot.slane %v3077_v46, 1  ;;  %v3283_v3 = vld [vmem:[%s2916_s23 + $0x160] sm:$0x3] }
  0x2b   : > { %335 = vst.msk [vmem:[#allocation2 + $0xf8] sm:$0xff] %vm303_vm0, %v3137_v62  ;;  %4650 = vst [vmem:[#allocation14_spill] sm:$0xff] %v3162_v8  ;;  %487 = vrot.lane.b32.xlu1 %v3162_v8, %s2864_s24  ;;  %v3226_v60 = vsel %vm384_vm1, %v431_v21, %v433_v34  ;;  %v3267_v8 = vld [vmem:[%s2916_s23 + $0x148] sm:$0x3] }
  0x2c   : > { %4651 = vst [vmem:[#allocation15_spill] sm:$0xff] %v3167_v17  ;;  %485 = vrot.lane.b32.xlu0 %v3167_v17, %s2864_s24  ;;  %4652 = vst [vmem:[#allocation16_spill] sm:$0xff] %v3178_v25  ;;  %v3251_v17 = vld [vmem:[%s2916_s23 + $0x130] sm:$0x3] }
  0x2d   : > { %4653 = vst [vmem:[#allocation17_spill] sm:$0xff] %v3183_v35  ;;  %4654 = vst [vmem:[#allocation18_spill] sm:$0xff] %v3194_v49 }
  0x2e   : > { %4655 = vst [vmem:[#allocation19_spill] sm:$0xff] %v3199_v61  ;;  %4656 = vst [vmem:[#allocation20_spill] sm:$0xff] %v3210_v14 }
  0x2f   : > { %491 = vrot.lane.b32.xlu1 %v3178_v25, %s2864_s24  ;;  %4657 = vst [vmem:[#allocation21_spill] sm:$0xff] %v3215_v26  ;;  %4658 = vst [vmem:[#allocation22_spill] sm:$0xff] %v3226_v60  ;;  %v3235_v25 = vld [vmem:[%s2916_s23 + $0x118] sm:$0x3] }
  0x30   : > { %489 = vrot.lane.b32.xlu0 %v3183_v35, %s2864_s24  ;;  %v3219_v35 = vld [vmem:[%s2916_s23 + $0x100] sm:$0x3]  ;;  %4659 = vst [vmem:[#allocation23_spill] sm:$0xff] %v3231_v53 }
  0x33   : > { %495 = vrot.lane.b32.xlu1 %v3194_v49, %s2864_s24  ;;  %v438_v49 = vrot.slane %v3219_v35, 1 }
  0x34   : > { %493 = vrot.lane.b32.xlu0 %v3199_v61, %s2864_s24  ;;  %v436_v61 = vrot.slane %v3060_v43, 1 }
  0x36   : > { %v3242_v34 = vsel %vm384_vm1, %v436_v61, %v438_v49  ;;  %v3247_v21 = vsel %vm384_vm1, %v435_v4, %v436_v61  ;;  %v445_v4 = vrot.slane %v3094_v51, 1 }
  0x37   : > { %499 = vrot.lane.b32.xlu1 %v3210_v14, %s2864_s24  ;;  %4660 = vst [vmem:[#allocation24_spill] sm:$0xff] %v3242_v34  ;;  %v443_v14 = vrot.slane %v3235_v25, 1  ;;  %4661 = vst [vmem:[#allocation25_spill] sm:$0xff] %v3247_v21 }
  0x38   : > { %497 = vrot.lane.b32.xlu0 %v3215_v26, %s2864_s24  ;;  %v441_v26 = vrot.slane %v3074_v45, 1 }
  0x3a   : > { %v3258_v49 = vsel %vm384_vm1, %v441_v26, %v443_v14  ;;  %v3263_v61 = vsel %vm384_vm1, %v440_v39, %v441_v26  ;;  %v450_v39 = vrot.slane %v3115_v56, 1 }
  0x3b   : > { %503 = vrot.lane.b32.xlu1 %v3226_v60, %s2864_s24  ;;  %4662 = vst [vmem:[#allocation26_spill] sm:$0xff] %v3258_v49  ;;  %v448_v60 = vrot.slane %v3251_v17, 1  ;;  %4663 = vst [vmem:[#allocation27_spill] sm:$0xff] %v3263_v61 }
  0x3c   : > { %501 = vrot.lane.b32.xlu0 %v3231_v53, %s2864_s24  ;;  %v446_v53 = vrot.slane %v3091_v50, 1 }
  0x3e   : > { %v3274_v14 = vsel %vm384_vm1, %v446_v53, %v448_v60  ;;  %v3279_v26 = vsel %vm384_vm1, %v445_v4, %v446_v53  ;;  %v455_v4 = vrot.slane %v3125_v58, 1 }
  0x3f   : > { %507 = vrot.lane.b32.xlu1 %v3242_v34, %s2864_s24  ;;  %4664 = vst [vmem:[#allocation28_spill] sm:$0xff] %v3274_v14  ;;  %v453_v34 = vrot.slane %v3267_v8, 1  ;;  %4665 = vst [vmem:[#allocation29_spill] sm:$0xff] %v3279_v26 }
  0x40   : > { %505 = vrot.lane.b32.xlu0 %v3247_v21, %s2864_s24  ;;  %v451_v21 = vrot.slane %v3108_v55, 1 }
  0x42   : > { %v3290_v60 = vsel %vm384_vm1, %v451_v21, %v453_v34  ;;  %v3295_v53 = vsel %vm384_vm1, %v450_v39, %v451_v21  ;;  %v460_v39 = vrot.slane %v3140_v63, 1 }
  0x43   : > { %511 = vrot.lane.b32.xlu1 %v3258_v49, %s2864_s24  ;;  %4666 = vst [vmem:[#allocation30_spill] sm:$0xff] %v3290_v60  ;;  %v458_v49 = vrot.slane %v3283_v3, 1  ;;  %4667 = vst [vmem:[#allocation31_spill] sm:$0xff] %v3295_v53 }
  0x44   : > { %509 = vrot.lane.b32.xlu0 %v3263_v61, %s2864_s24  ;;  %v456_v61 = vrot.slane %v3122_v57, 1 }
  0x46   : > { %v3306_v34 = vsel %vm384_vm1, %v456_v61, %v458_v49  ;;  %v3311_v21 = vsel %vm384_vm1, %v455_v4, %v456_v61  ;;  %v596_v49 = vrot.slane %v2930_v5, 2  ;;  %v595_v61 = vrot.slane %v2925_v2, 2 }
  0x47   : > { %515 = vrot.lane.b32.xlu1 %v3274_v14, %s2864_s24  ;;  %4668 = vst [vmem:[#allocation32_spill] sm:$0xff] %v3306_v34  ;;  %v463_v14 = vrot.slane %v3299_v59, 1  ;;  %4669 = vst [vmem:[#allocation33_spill] sm:$0xff] %v3311_v21  ;;  %v603_v5 = vrot.slane %v2934_v7, 2  ;;  %v605_v7 = vrot.slane %v2951_v12, 2 }
  0x48   : > { %513 = vrot.lane.b32.xlu0 %v3279_v26, %s2864_s24  ;;  %v461_v26 = vrot.slane %v3137_v62, 1 }
  0x4a   : > { %v3324_v52 = vsel %vm384_vm1, %v460_v39, %v461_v26  ;;  %v606_v39 = vrot.slane %v2948_v11, 2 }
  0x4b   : > { %519 = vrot.lane.b32.xlu1 %v3290_v60, %s2864_s24  ;;  %v598_v60 = vrot.slane %v2945_v10, 2  ;;  %4671 = vst [vmem:[#allocation35_spill] sm:$0xff] %v3324_v52  ;;  %v597_v10 = vsel %vm594_vm2, %v595_v61, %v596_v49  ;;  %v611_v61 = vrot.slane %v2963_v16, 2 }
  0x4c   : > { %517 = vrot.lane.b32.xlu0 %v3295_v53, %s2864_s24  ;;  %v3319_v53 = vsel %vm384_vm1, %v461_v26, %v463_v14  ;;  %v601_v14 = vrot.slane %v2922_v1, 2  ;;  %v600_v26 = vrot.slane %v2919_v0, 2 }
  0x4d   : > { %4670 = vst [vmem:[#allocation34_spill] sm:$0xff] %v3319_v53  ;;  %v599_v4 = vsel %vm594_vm2, %v596_v49, %v598_v60  ;;  %v608_v60 = vrot.slane %v2960_v15, 2  ;;  %v3357_v15 = vsel %vm594_vm2, %v605_v7, %v606_v39  ;;  %v621_v7 = vrot.slane %v2990_v24, 2 }
  0x4e   : > { %v3339_v2 = vsel %vm594_vm2, %v601_v14, %v603_v5 }
  0x4f   : > { %523 = vrot.lane.b32.xlu1 %v3306_v34, %s2864_s24  ;;  %v3352_v49 = vsel %vm594_vm2, %v606_v39, %v608_v60  ;;  %v615_v39 = vrot.slane %v2987_v23, 2  ;;  %v638_v34 = vrot.slane %v3187_v48, 2 }
  0x50   : > { %521 = vrot.lane.b32.xlu0 %v3311_v21, %s2864_s24  ;;  %v633_v21 = vrot.slane %v3171_v22, 2 }
  0x53   : > { %527 = vrot.lane.b32.xlu1 %v3319_v53, %s2864_s24  ;;  %v628_v53 = vrot.slane %v3151_v6, 2 }
  0x54   : > { %525 = vrot.lane.b32.xlu0 %v3324_v52, %s2864_s24  ;;  %v3344_v52 = vsel %vm594_vm2, %v600_v26, %v601_v14  ;;  %v610_v14 = vrot.slane %v2973_v18, 2  ;;  %v618_v26 = vrot.slane %v3035_v36, 2  ;;  %s2686_s24 = sshll.u32 %s4706_s19, 2 }
  0x57   : > { %677 = vrot.lane.b32.xlu1 %v599_v4, %s2865_s25  ;;  %v613_v4 = vrot.slane %v2999_v27, 2  ;;  %v3370_v27 = vsel %vm594_vm2, %v610_v14, %v611_v61 }
  0x58   : > { %675 = vrot.lane.b32.xlu0 %v597_v10, %s2865_s25  ;;  %v616_v10 = vrot.slane %v2976_v19, 2 }
  0x59   : > { %v3365_v5 = vsel %vm594_vm2, %v611_v61, %v613_v4  ;;  %v623_v4 = vrot.slane %v3105_v54, 2  ;;  %v620_v61 = vrot.slane %v3002_v28, 2 }
  0x5a   : > { %v3378_v60 = vsel %vm594_vm2, %v616_v10, %v618_v26  ;;  %v3383_v36 = vsel %vm594_vm2, %v615_v39, %v616_v10  ;;  %v626_v26 = vrot.slane %v3009_v29, 2  ;;  %v625_v10 = vrot.slane %v3012_v30, 2 }
  0x5b   : > { %681 = vrot.lane.b32.xlu1 %v3339_v2, %s2865_s25  ;;  %v3391_v14 = vsel %vm594_vm2, %v621_v7, %v623_v4  ;;  %v3396_v54 = vsel %vm594_vm2, %v620_v61, %v621_v7  ;;  %v631_v4 = vrot.slane %v3019_v31, 2  ;;  %v630_v7 = vrot.slane %v3022_v32, 2 }
  0x5c   : > { %679 = vrot.lane.b32.xlu0 %v3344_v52, %s2865_s25  ;;  %v3404_v39 = vsel %vm594_vm2, %v626_v26, %v628_v53  ;;  %v3409_v6 = vsel %vm594_vm2, %v625_v10, %v626_v26  ;;  %v636_v53 = vrot.slane %v3038_v37, 2  ;;  %v635_v26 = vrot.slane %v3049_v40, 2 }
  0x5d   : > { %v3417_v61 = vsel %vm594_vm2, %v631_v4, %v633_v21  ;;  %v3422_v22 = vsel %vm594_vm2, %v630_v7, %v631_v4  ;;  %v641_v21 = vrot.slane %v3052_v41, 2  ;;  %v643_v37 = vrot.slane %v3203_v9, 2 }
  0x5e   : > { %v3430_v10 = vsel %vm594_vm2, %v636_v53, %v638_v34  ;;  %v3435_v48 = vsel %vm594_vm2, %v635_v26, %v636_v53  ;;  %v640_v4 = vrot.slane %v3055_v42, 2  ;;  %v646_v34 = vrot.slane %v3060_v43, 2 }
  0x5f   : > { %685 = vrot.lane.b32.xlu1 %v3352_v49, %s2865_s25  ;;  %v3443_v7 = vsel %vm594_vm2, %v641_v21, %v643_v37  ;;  %v648_v41 = vrot.slane %v3219_v35, 2  ;;  %v645_v53 = vrot.slane %v3063_v44, 2  ;;  %v651_v37 = vrot.slane %v3074_v45, 2 }
  0x60   : > { %683 = vrot.lane.b32.xlu0 %v3357_v15, %s2865_s25  ;;  %v3448_v9 = vsel %vm594_vm2, %v640_v4, %v641_v21  ;;  %v653_v43 = vrot.slane %v3235_v25, 2  ;;  %v650_v21 = vrot.slane %v3077_v46, 2  ;;  %v658_v45 = vrot.slane %v3251_v17, 2 }
  0x61   : > { %v3456_v26 = vsel %vm594_vm2, %v646_v34, %v648_v41  ;;  %v3461_v35 = vsel %vm594_vm2, %v645_v53, %v646_v34  ;;  %v656_v41 = vrot.slane %v3091_v50, 2  ;;  %v655_v34 = vrot.slane %v3094_v51, 2 }
  0x62   : > { %v3469_v4 = vsel %vm594_vm2, %v651_v37, %v653_v43  ;;  %v3474_v25 = vsel %vm594_vm2, %v650_v21, %v651_v37  ;;  %v661_v43 = vrot.slane %v3108_v55, 2  ;;  %v663_v50 = vrot.slane %v3267_v8, 2 }
  0x63   : > { %689 = vrot.lane.b32.xlu1 %v3365_v5, %s2865_s25  ;;  %v3482_v53 = vsel %vm594_vm2, %v656_v41, %v658_v45  ;;  %v3487_v17 = vsel %vm594_vm2, %v655_v34, %v656_v41  ;;  %v660_v37 = vrot.slane %v3115_v56, 2  ;;  %v666_v45 = vrot.slane %v3122_v57, 2 }
  0x64   : > { %687 = vrot.lane.b32.xlu0 %v3370_v27, %s2865_s25  ;;  %v3495_v21 = vsel %vm594_vm2, %v661_v43, %v663_v50  ;;  %v668_v55 = vrot.slane %v3283_v3, 2  ;;  %v665_v34 = vrot.slane %v3125_v58, 2  ;;  %v671_v3 = vrot.slane %v3137_v62, 2 }
  0x65   : > { %v3500_v41 = vsel %vm594_vm2, %v660_v37, %v661_v43  ;;  %v673_v43 = vrot.slane %v3299_v59, 2 }
  0x66   : > { %v3510_v50 = vsel %vm594_vm2, %v666_v45, %v668_v55  ;;  %v3515_v58 = vsel %vm594_vm2, %v665_v34, %v666_v45 }
  0x67   : > { %693 = vrot.lane.b32.xlu1 %v3378_v60, %s2865_s25  ;;  %v3525_v55 = vsel %vm594_vm2, %v671_v3, %v673_v43 }
  0x68   : > { %691 = vrot.lane.b32.xlu0 %v3383_v36, %s2865_s25 }
  0x6b   : > { %697 = vrot.lane.b32.xlu1 %v3391_v14, %s2865_s25 }
  0x6c   : > { %695 = vrot.lane.b32.xlu0 %v3396_v54, %s2865_s25 }
  0x6f   : > { %701 = vrot.lane.b32.xlu1 %v3404_v39, %s2865_s25 }
  0x70   : > { %699 = vrot.lane.b32.xlu0 %v3409_v6, %s2865_s25 }
  0x73   : > { %705 = vrot.lane.b32.xlu1 %v3417_v61, %s2865_s25 }
  0x74   : > { %703 = vrot.lane.b32.xlu0 %v3422_v22, %s2865_s25 }
  0x77   : > { %709 = vrot.lane.b32.xlu1 %v3430_v10, %s2865_s25 }
  0x78   : > { %707 = vrot.lane.b32.xlu0 %v3435_v48, %s2865_s25 }
  0x7b   : > { %713 = vrot.lane.b32.xlu1 %v3443_v7, %s2865_s25 }
  0x7c   : > { %711 = vrot.lane.b32.xlu0 %v3448_v9, %s2865_s25 }
  0x7f   : > { %717 = vrot.lane.b32.xlu1 %v3456_v26, %s2865_s25 }
  0x80   : > { %715 = vrot.lane.b32.xlu0 %v3461_v35, %s2865_s25 }
  0x83   : > { %721 = vrot.lane.b32.xlu1 %v3469_v4, %s2865_s25 }
  0x84   : > { %719 = vrot.lane.b32.xlu0 %v3474_v25, %s2865_s25 }
  0x87   : > { %725 = vrot.lane.b32.xlu1 %v3482_v53, %s2865_s25 }
  0x88   : > { %723 = vrot.lane.b32.xlu0 %v3487_v17, %s2865_s25 }
  0x89   : > { %v470_v8 = vpop.permute.xlu1 %469 }
  0x8a   : > { %564 = vst.msk [vmem:[#allocation2 + $0x10] sm:$0xff] %vm561_vm3, %v470_v8  ;;  %v466_v56 = vpop.permute.xlu0 %465  ;;  %v670_v8 = vrot.slane %v3140_v63, 2 }
  0x8b   : > { %562 = vst.msk [vmem:[#allocation2] sm:$0xff] %vm561_vm3, %v466_v56  ;;  %729 = vrot.lane.b32.xlu1 %v3495_v21, %s2865_s25 }
  0x8c   : > { %727 = vrot.lane.b32.xlu0 %v3500_v41, %s2865_s25  ;;  %v3528_v45 = vsel %vm594_vm2, %v670_v8, %v671_v3 }
  0x8d   : > { %v472_v37 = vpop.permute.xlu1 %471 }
  0x8e   : > { %565 = vst.msk [vmem:[#allocation2 + $0x18] sm:$0xff] %vm561_vm3, %v472_v37  ;;  %v468_v56 = vpop.permute.xlu0 %467 }
  0x8f   : > { %563 = vst.msk [vmem:[#allocation2 + $0x8] sm:$0xff] %vm561_vm3, %v468_v56  ;;  %733 = vrot.lane.b32.xlu1 %v3510_v50, %s2865_s25 }
  0x90   : > { %731 = vrot.lane.b32.xlu0 %v3515_v58, %s2865_s25 }
  0x91   : > { %v476_v59 = vpop.permute.xlu1 %475 }
  0x92   : > { %567 = vst.msk [vmem:[#allocation2 + $0x28] sm:$0xff] %vm561_vm3, %v476_v59  ;;  %v474_v34 = vpop.permute.xlu0 %473 }
  0x93   : > { %566 = vst.msk [vmem:[#allocation2 + $0x20] sm:$0xff] %vm561_vm3, %v474_v34  ;;  %737 = vrot.lane.b32.xlu1 %v3525_v55, %s2865_s25 }
  0x94   : > { %735 = vrot.lane.b32.xlu0 %v3528_v45, %s2865_s25 }
  0x95   : > { %v480_v37 = vpop.permute.xlu1 %479 }
  0x96   : > { %569 = vst.msk [vmem:[#allocation2 + $0x38] sm:$0xff] %vm561_vm3, %v480_v37  ;;  %v478_v43 = vpop.permute.xlu0 %477 }
  0x97   : > { %568 = vst.msk [vmem:[#allocation2 + $0x30] sm:$0xff] %vm561_vm3, %v478_v43  ;;  %808 = vrot.lane.b32.xlu1 %v2922_v1, %s2866_s26 }
  0x98   : > { %806 = vrot.lane.b32.xlu0 %v2919_v0, %s2866_s26 }
  0x99   : > { %v484_v3 = vpop.permute.xlu1 %483 }
  0x9a   : > { %571 = vst.msk [vmem:[#allocation2 + $0x48] sm:$0xff] %vm561_vm3, %v484_v3  ;;  %v482_v8 = vpop.permute.xlu0 %481 }
  0x9b   : > { %570 = vst.msk [vmem:[#allocation2 + $0x40] sm:$0xff] %vm561_vm3, %v482_v8  ;;  %812 = vrot.lane.b32.xlu1 %v2948_v11, %s2866_s26 }
  0x9c   : > { %810 = vrot.lane.b32.xlu0 %v2951_v12, %s2866_s26 }
  0x9d   : > { %v488_v56 = vpop.permute.xlu1 %487 }
  0x9e   : > { %573 = vst.msk [vmem:[#allocation2 + $0x58] sm:$0xff] %vm561_vm3, %v488_v56  ;;  %v486_v59 = vpop.permute.xlu0 %485 }
  0x9f   : > { %572 = vst.msk [vmem:[#allocation2 + $0x50] sm:$0xff] %vm561_vm3, %v486_v59  ;;  %816 = vrot.lane.b32.xlu1 %v2963_v16, %s2866_s26 }
  0xa0   : > { %814 = vrot.lane.b32.xlu0 %v2973_v18, %s2866_s26 }
  0xa1   : > { %v492_v0 = vpop.permute.xlu1 %491 }
  0xa2   : > { %575 = vst.msk [vmem:[#allocation2 + $0x68] sm:$0xff] %vm561_vm3, %v492_v0  ;;  %v490_v1 = vpop.permute.xlu0 %489 }
  0xa3   : > { %574 = vst.msk [vmem:[#allocation2 + $0x60] sm:$0xff] %vm561_vm3, %v490_v1  ;;  %820 = vrot.lane.b32.xlu1 %v2976_v19, %s2866_s26 }
  0xa4   : > { %818 = vrot.lane.b32.xlu0 %v2987_v23, %s2866_s26 }
  0xa5   : > { %v496_v34 = vpop.permute.xlu1 %495 }
  0xa6   : > { %577 = vst.msk [vmem:[#allocation2 + $0x78] sm:$0xff] %vm561_vm3, %v496_v34  ;;  %v494_v37 = vpop.permute.xlu0 %493 }
  0xa7   : > { %576 = vst.msk [vmem:[#allocation2 + $0x70] sm:$0xff] %vm561_vm3, %v494_v37  ;;  %824 = vrot.lane.b32.xlu1 %v2990_v24, %s2866_s26 }
  0xa8   : > { %822 = vrot.lane.b32.xlu0 %v3002_v28, %s2866_s26 }
  0xa9   : > { %v500_v43 = vpop.permute.xlu1 %499 }
  0xaa   : > { %579 = vst.msk [vmem:[#allocation2 + $0x88] sm:$0xff] %vm561_vm3, %v500_v43  ;;  %v498_v3 = vpop.permute.xlu0 %497 }
  0xab   : > { %578 = vst.msk [vmem:[#allocation2 + $0x80] sm:$0xff] %vm561_vm3, %v498_v3  ;;  %975 = vrot.lane.b32.xlu1 %v2982_v20, %s2867_s27  ;;  %v2853_v3 = vld [vmem:[%s4568_s1] sm:$0xff]  }
  0xac   : > { %973 = vrot.lane.b32.xlu0 %v2956_v13, %s2867_s27  ;;  %2762 = vmatprep.subr.bf16.mxu0 %v2853_v3 }
  0xad   : > { %v504_v8 = vpop.permute.xlu1 %503  ;;  %2763 = vmatpush3.bf16.msra.mxu0 %v2853_v3  ;;  %v4673_v3 = vld [vmem:[#allocation12_spill] sm:$0xff] }
  0xae   : > { %581 = vst.msk [vmem:[#allocation2 + $0x98] sm:$0xff] %vm561_vm3, %v504_v8  ;;  %v502_v56 = vpop.permute.xlu0 %501 }
  0xaf   : > { %580 = vst.msk [vmem:[#allocation2 + $0x90] sm:$0xff] %vm561_vm3, %v502_v56  ;;  %979 = vrot.lane.b32.xlu1 %v3030_v33, %s2867_s27  ;;  %v2855_v56 = vld [vmem:[%s4568_s1 + $0x10] ss:$0 sps:$4 sm:$0x33]  }
  0xb0   : > { %977 = vrot.lane.b32.xlu0 %v3045_v38, %s2867_s27 }
  0xb1   : > { %v508_v59 = vpop.permute.xlu1 %507 }
  0xb2   : > { %583 = vst.msk [vmem:[#allocation2 + $0xa8] sm:$0xff] %vm561_vm3, %v508_v59  ;;  %v506_v0 = vpop.permute.xlu0 %505  ;;  %v4672_v59 = vld [vmem:[#allocation8_spill] sm:$0xff] }
  0xb3   : > { %582 = vst.msk [vmem:[#allocation2 + $0xa0] sm:$0xff] %vm561_vm3, %v506_v0  ;;  %1109 = vrot.lane.b32.xlu1 %v3339_v2, %s2868_s28 }
  0xb4   : > { %1107 = vrot.lane.b32.xlu0 %v3344_v52, %s2868_s28 }
  0xb5   : > { %v512_v1 = vpop.permute.xlu1 %511 }
  0xb6   : > { %585 = vst.msk [vmem:[#allocation2 + $0xb8] sm:$0xff] %vm561_vm3, %v512_v1  ;;  %v510_v34 = vpop.permute.xlu0 %509  ;;  %v1755_v1 = vsel %vm1753_vm5, %v2855_v56, 0 }
  0xb7   : > { %584 = vst.msk [vmem:[#allocation2 + $0xb0] sm:$0xff] %vm561_vm3, %v510_v34  ;;  %1113 = vrot.lane.b32.xlu1 %v3352_v49, %s2868_s28 }
  0xb8   : > { %1111 = vrot.lane.b32.xlu0 %v3357_v15, %s2868_s28 }
  0xb9   : > { %v516_v37 = vpop.permute.xlu1 %515 }
  0xba   : > { %587 = vst.msk [vmem:[#allocation2 + $0xc8] sm:$0xff] %vm561_vm3, %v516_v37  ;;  %v514_v43 = vpop.permute.xlu0 %513 }
  0xbb   : > { %586 = vst.msk [vmem:[#allocation2 + $0xc0] sm:$0xff] %vm561_vm3, %v514_v43  ;;  %1240 = vrot.lane.b32.xlu1 %v2948_v11, %s2869_s29 }
  0xbc   : > { %1238 = vrot.lane.b32.xlu0 %v2951_v12, %s2869_s29 }
  0xbd   : > { %v520_v52 = vpop.permute.xlu1 %519 }
  0xbe   : > { %589 = vst.msk [vmem:[#allocation2 + $0xd8] sm:$0xff] %vm561_vm3, %v520_v52  ;;  %v518_v2 = vpop.permute.xlu0 %517 }
  0xbf   : > { %588 = vst.msk [vmem:[#allocation2 + $0xd0] sm:$0xff] %vm561_vm3, %v518_v2  ;;  %1244 = vrot.lane.b32.xlu1 %v2963_v16, %s2869_s29  ;;  %v2854_v16 = vld [vmem:[%s4568_s1 + $0x8] sm:$0xff]  }
  0xc0   : > { %1242 = vrot.lane.b32.xlu0 %v2973_v18, %s2869_s29  ;;  %2764 = vmatprep.subr.bf16.mxu0 %v2854_v16 }
  0xc1   : > { %v524_v11 = vpop.permute.xlu1 %523  ;;  %2765 = vmatpush3.bf16.msra.mxu0 %v2854_v16 }
  0xc2   : > { %591 = vst.msk [vmem:[#allocation2 + $0xe8] sm:$0xff] %vm561_vm3, %v524_v11  ;;  %v522_v12 = vpop.permute.xlu0 %521  ;;  %2834 = vmatprep.subr.msk.bf16.mxu0 %vm1753_vm5, %v2855_v56  ;;  %v4674_v11 = vld [vmem:[#allocation13_spill] sm:$0xff] }
  0xc3   : > { %590 = vst.msk [vmem:[#allocation2 + $0xe0] sm:$0xff] %vm561_vm3, %v522_v12  ;;  %1375 = vrot.lane.b32.xlu1 %v3030_v33, %s2870_s7 }
  0xc4   : > { %1373 = vrot.lane.b32.xlu0 %v3045_v38, %s2870_s7 }
  0xc5   : > { %v528_v18 = vpop.permute.xlu1 %527  ;;  %2767 = vmatpush3.bf16.msra.mxu0 %v1755_v1 }
  0xc6   : > { %593 = vst.msk [vmem:[#allocation2 + $0xf8] sm:$0xff] %vm561_vm3, %v528_v18  ;;  %v526_v8 = vpop.permute.xlu0 %525 }
  0xc7   : > { %592 = vst.msk [vmem:[#allocation2 + $0xf0] sm:$0xff] %vm561_vm3, %v526_v8  ;;  %1379 = vrot.lane.b32.xlu1 %v3086_v47, %s2870_s7 }
  0xc8   : > { %1377 = vrot.lane.b32.xlu0 %v4672_v59, %s2870_s7 }
  0xc9   : > { %v678_v0 = vpop.permute.xlu1 %677 }
  0xca   : > { %773 = vst.msk [vmem:[#allocation2 + $0x8] sm:$0xff] %vm771_vm4, %v678_v0  ;;  %v676_v34 = vpop.permute.xlu0 %675 }
  0xcb   : > { %772 = vst.msk [vmem:[#allocation2] sm:$0xff] %vm771_vm4, %v676_v34  ;;  %1509 = vrot.lane.b32.xlu1 %v3352_v49, %s2871_s12 }
  0xcc   : > { %1507 = vrot.lane.b32.xlu0 %v3357_v15, %s2871_s12 }
  0xcd   : > { %v682_v37 = vpop.permute.xlu1 %681 }
  0xce   : > { %775 = vst.msk [vmem:[#allocation2 + $0x18] sm:$0xff] %vm771_vm4, %v682_v37  ;;  %v680_v43 = vpop.permute.xlu0 %679 }
  0xcf   : > { %774 = vst.msk [vmem:[#allocation2 + $0x10] sm:$0xff] %vm771_vm4, %v680_v43  ;;  %1513 = vrot.lane.b32.xlu1 %v3365_v5, %s2871_s12 }
  0xd0   : > { %1511 = vrot.lane.b32.xlu0 %v3370_v27, %s2871_s12 }
  0xd1   : > { %v686_v52 = vpop.permute.xlu1 %685 }
  0xd2   : > { %777 = vst.msk [vmem:[#allocation2 + $0x28] sm:$0xff] %vm771_vm4, %v686_v52  ;;  %v684_v2 = vpop.permute.xlu0 %683 }
  0xd3   : > { %776 = vst.msk [vmem:[#allocation2 + $0x20] sm:$0xff] %vm771_vm4, %v684_v2  ;;  %983 = vrot.lane.b32.xlu1 %v3086_v47, %s2867_s27 }
  0xd4   : > { %981 = vrot.lane.b32.xlu0 %v4672_v59, %s2867_s27 }
  0xd5   : > { %v690_v49 = vpop.permute.xlu1 %689 }
  0xd6   : > { %779 = vst.msk [vmem:[#allocation2 + $0x38] sm:$0xff] %vm771_vm4, %v690_v49  ;;  %v688_v15 = vpop.permute.xlu0 %687 }
  0xd7   : > { %778 = vst.msk [vmem:[#allocation2 + $0x30] sm:$0xff] %vm771_vm4, %v688_v15  ;;  %987 = vrot.lane.b32.xlu1 %v4673_v3, %s2867_s27 }
  0xd8   : > { %985 = vrot.lane.b32.xlu0 %v4674_v11, %s2867_s27 }
  0xd9   : > { %v694_v12 = vpop.permute.xlu1 %693 }
  0xda   : > { %781 = vst.msk [vmem:[#allocation2 + $0x48] sm:$0xff] %vm771_vm4, %v694_v12  ;;  %v692_v16 = vpop.permute.xlu0 %691 }
  0xdb   : > { %780 = vst.msk [vmem:[#allocation2 + $0x40] sm:$0xff] %vm771_vm4, %v692_v16  ;;  %1117 = vrot.lane.b32.xlu1 %v3365_v5, %s2868_s28 }
  0xdc   : > { %1115 = vrot.lane.b32.xlu0 %v3370_v27, %s2868_s28 }
  0xdd   : > { %v698_v18 = vpop.permute.xlu1 %697 }
  0xde   : > { %783 = vst.msk [vmem:[#allocation2 + $0x58] sm:$0xff] %vm771_vm4, %v698_v18  ;;  %v696_v8 = vpop.permute.xlu0 %695  ;;  %v4677_v18 = vld [vmem:[#allocation16_spill] sm:$0xff] }
  0xdf   : > { %782 = vst.msk [vmem:[#allocation2 + $0x50] sm:$0xff] %vm771_vm4, %v696_v8  ;;  %1121 = vrot.lane.b32.xlu1 %v3378_v60, %s2868_s28  ;;  %v4678_v8 = vld [vmem:[#allocation17_spill] sm:$0xff] }
  0xe0   : > { %1119 = vrot.lane.b32.xlu0 %v3383_v36, %s2868_s28 }
  0xe1   : > { %v702_v56 = vpop.permute.xlu1 %701 }
  0xe2   : > { %785 = vst.msk [vmem:[#allocation2 + $0x68] sm:$0xff] %vm771_vm4, %v702_v56  ;;  %v700_v0 = vpop.permute.xlu0 %699 }
  0xe3   : > { %784 = vst.msk [vmem:[#allocation2 + $0x60] sm:$0xff] %vm771_vm4, %v700_v0  ;;  %1248 = vrot.lane.b32.xlu1 %v2976_v19, %s2869_s29 }
  0xe4   : > { %1246 = vrot.lane.b32.xlu0 %v2987_v23, %s2869_s29 }
  0xe5   : > { %v706_v5 = vpop.permute.xlu1 %705 }
  0xe6   : > { %787 = vst.msk [vmem:[#allocation2 + $0x78] sm:$0xff] %vm771_vm4, %v706_v5  ;;  %v704_v27 = vpop.permute.xlu0 %703 }
  0xe7   : > { %786 = vst.msk [vmem:[#allocation2 + $0x70] sm:$0xff] %vm771_vm4, %v704_v27  ;;  %1252 = vrot.lane.b32.xlu1 %v2990_v24, %s2869_s29  ;;  %v4675_v24 = vld [vmem:[#allocation14_spill] sm:$0xff] }
  0xe8   : > { %1250 = vrot.lane.b32.xlu0 %v3002_v28, %s2869_s29  ;;  %v4676_v28 = vld [vmem:[#allocation15_spill] sm:$0xff] }
  0xe9   : > { %v710_v1 = vpop.permute.xlu1 %709 }
  0xea   : > { %789 = vst.msk [vmem:[#allocation2 + $0x88] sm:$0xff] %vm771_vm4, %v710_v1  ;;  %v708_v34 = vpop.permute.xlu0 %707 }
  0xeb   : > { %788 = vst.msk [vmem:[#allocation2 + $0x80] sm:$0xff] %vm771_vm4, %v708_v34  ;;  %1383 = vrot.lane.b32.xlu1 %v4673_v3, %s2870_s7 }
  0xec   : > { %1381 = vrot.lane.b32.xlu0 %v4674_v11, %s2870_s7 }
  0xed   : > { %v714_v19 = vpop.permute.xlu1 %713 }
  0xee   : > { %791 = vst.msk [vmem:[#allocation2 + $0x98] sm:$0xff] %vm771_vm4, %v714_v19  ;;  %v712_v23 = vpop.permute.xlu0 %711 }
  0xef   : > { %790 = vst.msk [vmem:[#allocation2 + $0x90] sm:$0xff] %vm771_vm4, %v712_v23  ;;  %1387 = vrot.lane.b32.xlu1 %v4675_v24, %s2870_s7 }
  0xf0   : > { %1385 = vrot.lane.b32.xlu0 %v4676_v28, %s2870_s7 }
  0xf1   : > { %v718_v37 = vpop.permute.xlu1 %717 }
  0xf2   : > { %793 = vst.msk [vmem:[#allocation2 + $0xa8] sm:$0xff] %vm771_vm4, %v718_v37  ;;  %v716_v43 = vpop.permute.xlu0 %715  ;;  %v4679_v37 = vld [vmem:[#allocation18_spill] sm:$0xff] }
  0xf3   : > { %792 = vst.msk [vmem:[#allocation2 + $0xa0] sm:$0xff] %vm771_vm4, %v716_v43  ;;  %1517 = vrot.lane.b32.xlu1 %v3378_v60, %s2871_s12  ;;  %v4680_v43 = vld [vmem:[#allocation19_spill] sm:$0xff] }
  0xf4   : > { %1515 = vrot.lane.b32.xlu0 %v3383_v36, %s2871_s12 }
  0xf5   : > { %v722_v52 = vpop.permute.xlu1 %721 }
  0xf6   : > { %795 = vst.msk [vmem:[#allocation2 + $0xb8] sm:$0xff] %vm771_vm4, %v722_v52  ;;  %v720_v2 = vpop.permute.xlu0 %719 }
  0xf7   : > { %794 = vst.msk [vmem:[#allocation2 + $0xb0] sm:$0xff] %vm771_vm4, %v720_v2  ;;  %1521 = vrot.lane.b32.xlu1 %v3391_v14, %s2871_s12 }
  0xf8   : > { %1519 = vrot.lane.b32.xlu0 %v3396_v54, %s2871_s12 }
  0xf9   : > { %v726_v49 = vpop.permute.xlu1 %725 }
  0xfa   : > { %797 = vst.msk [vmem:[#allocation2 + $0xc8] sm:$0xff] %vm771_vm4, %v726_v49  ;;  %v724_v15 = vpop.permute.xlu0 %723 }
  0xfb   : > { %796 = vst.msk [vmem:[#allocation2 + $0xc0] sm:$0xff] %vm771_vm4, %v724_v15  ;;  %828 = vrot.lane.b32.xlu1 %v3009_v29, %s2866_s26 }
  0xfc   : > { %826 = vrot.lane.b32.xlu0 %v3012_v30, %s2866_s26 }
  0xfd   : > { %v730_v60 = vpop.permute.xlu1 %729 }
  0xfe   : > { %799 = vst.msk [vmem:[#allocation2 + $0xd8] sm:$0xff] %vm771_vm4, %v730_v60  ;;  %v728_v36 = vpop.permute.xlu0 %727 }
  0xff   : > { %798 = vst.msk [vmem:[#allocation2 + $0xd0] sm:$0xff] %vm771_vm4, %v728_v36  ;;  %991 = vrot.lane.b32.xlu1 %v4675_v24, %s2867_s27 }
 0x100   : > { %989 = vrot.lane.b32.xlu0 %v4676_v28, %s2867_s27 }
 0x101   : > { %v734_v12 = vpop.permute.xlu1 %733 }
 0x102   : > { %801 = vst.msk [vmem:[#allocation2 + $0xe8] sm:$0xff] %vm771_vm4, %v734_v12  ;;  %v732_v16 = vpop.permute.xlu0 %731  ;;  %v4681_v12 = vld [vmem:[#allocation3_spill] sm:$0xff] }
 0x103   : > { %800 = vst.msk [vmem:[#allocation2 + $0xe0] sm:$0xff] %vm771_vm4, %v732_v16  ;;  %995 = vrot.lane.b32.xlu1 %v4677_v18, %s2867_s27 }
 0x104   : > { %993 = vrot.lane.b32.xlu0 %v4678_v8, %s2867_s27 }
 0x105   : > { %v738_v56 = vpop.permute.xlu1 %737 }
 0x106   : > { %803 = vst.msk [vmem:[#allocation2 + $0xf8] sm:$0xff] %vm771_vm4, %v738_v56  ;;  %v736_v0 = vpop.permute.xlu0 %735 }
 0x107   : > { %802 = vst.msk [vmem:[#allocation2 + $0xf0] sm:$0xff] %vm771_vm4, %v736_v0  ;;  %1125 = vrot.lane.b32.xlu1 %v3391_v14, %s2868_s28  ;;  %v4682_v0 = vld [vmem:[#allocation20_spill] sm:$0xff] }
 0x108   : > { %1123 = vrot.lane.b32.xlu0 %v3396_v54, %s2868_s28 }
 0x109   : > { %v809_v5 = vpop.permute.xlu1 %808 }
 0x10a   : > { %904 = vst.msk [vmem:[#allocation2 + $0x8] sm:$0xff] %vm902_vm6, %v809_v5  ;;  %v807_v27 = vpop.permute.xlu0 %806  ;;  %v4683_v5 = vld [vmem:[#allocation21_spill] sm:$0xff] }
 0x10b   : > { %903 = vst.msk [vmem:[#allocation2] sm:$0xff] %vm902_vm6, %v807_v27  ;;  %1129 = vrot.lane.b32.xlu1 %v3404_v39, %s2868_s28 }
 0x10c   : > { %1127 = vrot.lane.b32.xlu0 %v3409_v6, %s2868_s28 }
 0x10d   : > { %v813_v1 = vpop.permute.xlu1 %812 }
 0x10e   : > { %906 = vst.msk [vmem:[#allocation2 + $0x18] sm:$0xff] %vm902_vm6, %v813_v1  ;;  %v811_v14 = vpop.permute.xlu0 %810 }
 0x10f   : > { %905 = vst.msk [vmem:[#allocation2 + $0x10] sm:$0xff] %vm902_vm6, %v811_v14  ;;  %1256 = vrot.lane.b32.xlu1 %v3009_v29, %s2869_s29 }
 0x110   : > { %1254 = vrot.lane.b32.xlu0 %v3012_v30, %s2869_s29 }
 0x111   : > { %v817_v54 = vpop.permute.xlu1 %816 }
 0x112   : > { %908 = vst.msk [vmem:[#allocation2 + $0x28] sm:$0xff] %vm902_vm6, %v817_v54  ;;  %v815_v34 = vpop.permute.xlu0 %814 }
 0x113   : > { %907 = vst.msk [vmem:[#allocation2 + $0x20] sm:$0xff] %vm902_vm6, %v815_v34  ;;  %1260 = vrot.lane.b32.xlu1 %v3019_v31, %s2869_s29 }
 0x114   : > { %1258 = vrot.lane.b32.xlu0 %v3022_v32, %s2869_s29 }
 0x115   : > { %v821_v19 = vpop.permute.xlu1 %820 }
 0x116   : > { %910 = vst.msk [vmem:[#allocation2 + $0x38] sm:$0xff] %vm902_vm6, %v821_v19  ;;  %v819_v23 = vpop.permute.xlu0 %818 }
 0x117   : > { %909 = vst.msk [vmem:[#allocation2 + $0x30] sm:$0xff] %vm902_vm6, %v819_v23  ;;  %1391 = vrot.lane.b32.xlu1 %v4677_v18, %s2870_s7  ;;  %v4684_v23 = vld [vmem:[#allocation4_spill] sm:$0xff] }
 0x118   : > { %1389 = vrot.lane.b32.xlu0 %v4678_v8, %s2870_s7 }
 0x119   : > { %v825_v29 = vpop.permute.xlu1 %824 }
 0x11a   : > { %912 = vst.msk [vmem:[#allocation2 + $0x48] sm:$0xff] %vm902_vm6, %v825_v29  ;;  %v823_v30 = vpop.permute.xlu0 %822 }
 0x11b   : > { %911 = vst.msk [vmem:[#allocation2 + $0x40] sm:$0xff] %vm902_vm6, %v823_v30  ;;  %1395 = vrot.lane.b32.xlu1 %v4679_v37, %s2870_s7 }
 0x11c   : > { %1393 = vrot.lane.b32.xlu0 %v4680_v43, %s2870_s7 }
 0x11d   : > { %v976_v52 = vpop.permute.xlu1 %975 }
 0x11e   : > { %1071 = vst.msk [vmem:[#allocation2 + $0x8] sm:$0xff] %vm1069_vm7, %v976_v52  ;;  %v974_v2 = vpop.permute.xlu0 %973 }
 0x11f   : > { %1070 = vst.msk [vmem:[#allocation2] sm:$0xff] %vm1069_vm7, %v974_v2  ;;  %1525 = vrot.lane.b32.xlu1 %v3404_v39, %s2871_s12 }
 0x120   : > { %1523 = vrot.lane.b32.xlu0 %v3409_v6, %s2871_s12 }
 0x121   : > { %v980_v49 = vpop.permute.xlu1 %979 }
 0x122   : > { %1073 = vst.msk [vmem:[#allocation2 + $0x18] sm:$0xff] %vm1069_vm7, %v980_v49  ;;  %v978_v15 = vpop.permute.xlu0 %977 }
 0x123   : > { %1072 = vst.msk [vmem:[#allocation2 + $0x10] sm:$0xff] %vm1069_vm7, %v978_v15  ;;  %1529 = vrot.lane.b32.xlu1 %v3417_v61, %s2871_s12 }
 0x124   : > { %1527 = vrot.lane.b32.xlu0 %v3422_v22, %s2871_s12 }
 0x125   : > { %v1110_v60 = vpop.permute.xlu1 %1109 }
 0x126   : > { %1205 = vst.msk [vmem:[#allocation2 + $0x8] sm:$0xff] %vm1203_vm8, %v1110_v60  ;;  %v1108_v39 = vpop.permute.xlu0 %1107 }
 0x127   : > { %1204 = vst.msk [vmem:[#allocation2] sm:$0xff] %vm1203_vm8, %v1108_v39  ;;  %832 = vrot.lane.b32.xlu1 %v3019_v31, %s2866_s26 }
 0x128   : > { %830 = vrot.lane.b32.xlu0 %v3022_v32, %s2866_s26 }
 0x129   : > { %v1114_v6 = vpop.permute.xlu1 %1113 }
 0x12a   : > { %1207 = vst.msk [vmem:[#allocation2 + $0x18] sm:$0xff] %vm1203_vm8, %v1114_v6  ;;  %v1112_v36 = vpop.permute.xlu0 %1111  ;;  %v4685_v6 = vld [vmem:[#allocation22_spill] sm:$0xff] }
 0x12b   : > { %1206 = vst.msk [vmem:[#allocation2 + $0x10] sm:$0xff] %vm1203_vm8, %v1112_v36  ;;  %836 = vrot.lane.b32.xlu1 %v4681_v12, %s2866_s26 }
 0x12c   : > { %834 = vrot.lane.b32.xlu0 %v3049_v40, %s2866_s26 }
 0x12d   : > { %v1241_v16 = vpop.permute.xlu1 %1240 }
 0x12e   : > { %1336 = vst.msk [vmem:[#allocation2 + $0x8] sm:$0xff] %vm1334_vm9, %v1241_v16  ;;  %v1239_v31 = vpop.permute.xlu0 %1238 }
 0x12f   : > { %1335 = vst.msk [vmem:[#allocation2] sm:$0xff] %vm1334_vm9, %v1239_v31  ;;  %999 = vrot.lane.b32.xlu1 %v4679_v37, %s2867_s27 }
 0x130   : > { %997 = vrot.lane.b32.xlu0 %v4680_v43, %s2867_s27 }
 0x131   : > { %v1245_v32 = vpop.permute.xlu1 %1244 }
 0x132   : > { %1338 = vst.msk [vmem:[#allocation2 + $0x18] sm:$0xff] %vm1334_vm9, %v1245_v32  ;;  %v1243_v56 = vpop.permute.xlu0 %1242 }
 0x133   : > { %1337 = vst.msk [vmem:[#allocation2 + $0x10] sm:$0xff] %vm1334_vm9, %v1243_v56  ;;  %1003 = vrot.lane.b32.xlu1 %v4682_v0, %s2867_s27 }
 0x134   : > { %1001 = vrot.lane.b32.xlu0 %v4683_v5, %s2867_s27 }
 0x135   : > { %v1376_v27 = vpop.permute.xlu1 %1375 }
 0x136   : > { %1471 = vst.msk [vmem:[#allocation2 + $0x8] sm:$0xff] %vm1469_vm10, %v1376_v27  ;;  %v1374_v1 = vpop.permute.xlu0 %1373 }
 0x137   : > { %1470 = vst.msk [vmem:[#allocation2] sm:$0xff] %vm1469_vm10, %v1374_v1  ;;  %1133 = vrot.lane.b32.xlu1 %v3417_v61, %s2868_s28 }
 0x138   : > { %1131 = vrot.lane.b32.xlu0 %v3422_v22, %s2868_s28 }
 0x139   : > { %v1380_v14 = vpop.permute.xlu1 %1379 }
 0x13a   : > { %1473 = vst.msk [vmem:[#allocation2 + $0x18] sm:$0xff] %vm1469_vm10, %v1380_v14  ;;  %v1378_v54 = vpop.permute.xlu0 %1377  ;;  %v4687_v14 = vld [vmem:[#allocation5_spill] sm:$0xff] }
 0x13b   : > { %1472 = vst.msk [vmem:[#allocation2 + $0x10] sm:$0xff] %vm1469_vm10, %v1378_v54  ;;  %1137 = vrot.lane.b32.xlu1 %v3430_v10, %s2868_s28 }
 0x13c   : > { %1135 = vrot.lane.b32.xlu0 %v3435_v48, %s2868_s28 }
 0x13d   : > { %v1510_v34 = vpop.permute.xlu1 %1509 }
 0x13e   : > { %1605 = vst.msk [vmem:[#allocation2 + $0x8] sm:$0xff] %vm1603_vm11, %v1510_v34  ;;  %v1508_v61 = vpop.permute.xlu0 %1507 }
 0x13f   : > { %1604 = vst.msk [vmem:[#allocation2] sm:$0xff] %vm1603_vm11, %v1508_v61  ;;  %1264 = vrot.lane.b32.xlu1 %v4681_v12, %s2869_s29  ;;  %v4686_v12 = vld [vmem:[#allocation23_spill] sm:$0xff] }
 0x140   : > { %1262 = vrot.lane.b32.xlu0 %v3049_v40, %s2869_s29 }
 0x141   : > { %v1514_v22 = vpop.permute.xlu1 %1513 }
 0x142   : > { %1607 = vst.msk [vmem:[#allocation2 + $0x18] sm:$0xff] %vm1603_vm11, %v1514_v22  ;;  %v1512_v19 = vpop.permute.xlu0 %1511  ;;  %v4688_v22 = vld [vmem:[#allocation24_spill] sm:$0xff] }
 0x143   : > { %1606 = vst.msk [vmem:[#allocation2 + $0x10] sm:$0xff] %vm1603_vm11, %v1512_v19  ;;  %1268 = vrot.lane.b32.xlu1 %v4684_v23, %s2869_s29  ;;  %v4689_v19 = vld [vmem:[#allocation25_spill] sm:$0xff] }
 0x144   : > { %1266 = vrot.lane.b32.xlu0 %v3055_v42, %s2869_s29 }
 0x145   : > { %v984_v29 = vpop.permute.xlu1 %983  ;;  %v1637_v30 = vld [vmem:[#allocation2 + $0x8] sm:$0xff] }
 0x146   : > { %1075 = vst.msk [vmem:[#allocation2 + $0x28] sm:$0xff] %vm1069_vm7, %v984_v29  ;;  %v982_v52 = vpop.permute.xlu0 %981  ;;  %v1636_v2 = vld [vmem:[#allocation2] sm:$0xff] }
 0x147   : > { %1074 = vst.msk [vmem:[#allocation2 + $0x20] sm:$0xff] %vm1069_vm7, %v982_v52  ;;  %1399 = vrot.lane.b32.xlu1 %v4682_v0, %s2870_s7  ;;  %v1668_v40 = vpack.c.bf16 %v1637_v30, %v1636_v2 }
 0x148   : > { %1397 = vrot.lane.b32.xlu0 %v4683_v5, %s2870_s7 }
 0x149   : > { %2768 = vmatprep.mubr.msk.bf16.mxu0 %vm1704_vm12, %v1668_v40  ;;  %v988_v49 = vpop.permute.xlu1 %987  ;;  %v1639_v15 = vld [vmem:[#allocation2 + $0x18] sm:$0xff] }
 0x14a   : > { %1077 = vst.msk [vmem:[#allocation2 + $0x38] sm:$0xff] %vm1069_vm7, %v988_v49  ;;  %v986_v60 = vpop.permute.xlu0 %985  ;;  %v1638_v39 = vld [vmem:[#allocation2 + $0x10] sm:$0xff] }
 0x14b   : > { %1076 = vst.msk [vmem:[#allocation2 + $0x30] sm:$0xff] %vm1069_vm7, %v986_v60  ;;  %1403 = vrot.lane.b32.xlu1 %v4685_v6, %s2870_s7  ;;  %v1669_v36 = vpack.c.bf16 %v1639_v15, %v1638_v39 }
 0x14c   : > { %1401 = vrot.lane.b32.xlu0 %v4686_v12, %s2870_s7 }
 0x14d   : > { %2769 = vmatmul.mubr.msk.bf16.vlgmr.msra.gmra.mrb[0].mxu0 %vm1704_vm12, %v1669_v36  ;;  %v1118_v16 = vpop.permute.xlu1 %1117 }
 0x14e   : > { %1209 = vst.msk [vmem:[#allocation2 + $0x28] sm:$0xff] %vm1203_vm8, %v1118_v16  ;;  %v1116_v31 = vpop.permute.xlu0 %1115  ;;  %v4690_v16 = vld [vmem:[#allocation6_spill] sm:$0xff] }
 0x14f   : > { %1208 = vst.msk [vmem:[#allocation2 + $0x20] sm:$0xff] %vm1203_vm8, %v1116_v31  ;;  %1533 = vrot.lane.b32.xlu1 %v3430_v10, %s2871_s12 }
 0x150   : > { %1531 = vrot.lane.b32.xlu0 %v3435_v48, %s2871_s12 }
 0x151   : > { %v1122_v32 = vpop.permute.xlu1 %1121 }
 0x152   : > { %1211 = vst.msk [vmem:[#allocation2 + $0x38] sm:$0xff] %vm1203_vm8, %v1122_v32  ;;  %v1120_v56 = vpop.permute.xlu0 %1119 }
 0x153   : > { %1210 = vst.msk [vmem:[#allocation2 + $0x30] sm:$0xff] %vm1203_vm8, %v1120_v56  ;;  %1537 = vrot.lane.b32.xlu1 %v3443_v7, %s2871_s12 }
 0x154   : > { %1535 = vrot.lane.b32.xlu0 %v3448_v9, %s2871_s12 }
 0x155   : > { %v1249_v27 = vpop.permute.xlu1 %1248 }
 0x156   : > { %1340 = vst.msk [vmem:[#allocation2 + $0x28] sm:$0xff] %vm1334_vm9, %v1249_v27  ;;  %v1247_v1 = vpop.permute.xlu0 %1246 }
 0x157   : > { %1339 = vst.msk [vmem:[#allocation2 + $0x20] sm:$0xff] %vm1334_vm9, %v1247_v1  ;;  %840 = vrot.lane.b32.xlu1 %v4684_v23, %s2866_s26  ;;  %v4691_v1 = vld [vmem:[#allocation26_spill] sm:$0xff] }
 0x158   : > { %838 = vrot.lane.b32.xlu0 %v3055_v42, %s2866_s26 }
 0x159   : > { %v1253_v10 = vpop.permute.xlu1 %1252 }
 0x15a   : > { %1342 = vst.msk [vmem:[#allocation2 + $0x38] sm:$0xff] %vm1334_vm9, %v1253_v10  ;;  %v1251_v48 = vpop.permute.xlu0 %1250  ;;  %v4692_v10 = vld [vmem:[#allocation27_spill] sm:$0xff] }
 0x15b   : > { %1341 = vst.msk [vmem:[#allocation2 + $0x30] sm:$0xff] %vm1334_vm9, %v1251_v48  ;;  %844 = vrot.lane.b32.xlu1 %v4687_v14, %s2866_s26 }
 0x15c   : > { %842 = vrot.lane.b32.xlu0 %v3063_v44, %s2866_s26 }
 0x15d   : > { %v1384_v54 = vpop.permute.xlu1 %1383 }
 0x15e   : > { %1475 = vst.msk [vmem:[#allocation2 + $0x28] sm:$0xff] %vm1469_vm10, %v1384_v54  ;;  %v1382_v34 = vpop.permute.xlu0 %1381 }
 0x15f   : > { %1474 = vst.msk [vmem:[#allocation2 + $0x20] sm:$0xff] %vm1469_vm10, %v1382_v34  ;;  %1007 = vrot.lane.b32.xlu1 %v4685_v6, %s2867_s27 }
 0x160   : > { %1005 = vrot.lane.b32.xlu0 %v4686_v12, %s2867_s27 }
 0x161   : > { %v1388_v42 = vpop.permute.xlu1 %1387 }
 0x162   : > { %1477 = vst.msk [vmem:[#allocation2 + $0x38] sm:$0xff] %vm1469_vm10, %v1388_v42  ;;  %v1386_v61 = vpop.permute.xlu0 %1385 }
 0x163   : > { %1476 = vst.msk [vmem:[#allocation2 + $0x30] sm:$0xff] %vm1469_vm10, %v1386_v61  ;;  %1011 = vrot.lane.b32.xlu1 %v4688_v22, %s2867_s27 }
 0x164   : > { %1009 = vrot.lane.b32.xlu0 %v4689_v19, %s2867_s27 }
 0x165   : > { %v1518_v23 = vpop.permute.xlu1 %1517 }
 0x166   : > { %1609 = vst.msk [vmem:[#allocation2 + $0x28] sm:$0xff] %vm1603_vm11, %v1518_v23  ;;  %v1516_v29 = vpop.permute.xlu0 %1515  ;;  %v4693_v23 = vld [vmem:[#allocation7_spill] sm:$0xff] }
 0x167   : > { %1608 = vst.msk [vmem:[#allocation2 + $0x20] sm:$0xff] %vm1603_vm11, %v1516_v29  ;;  %1141 = vrot.lane.b32.xlu1 %v3443_v7, %s2868_s28 }
 0x168   : > { %1139 = vrot.lane.b32.xlu0 %v3448_v9, %s2868_s28 }
 0x169   : > { %v1522_v30 = vpop.permute.xlu1 %1521 }
 0x16a   : > { %1611 = vst.msk [vmem:[#allocation2 + $0x38] sm:$0xff] %vm1603_vm11, %v1522_v30  ;;  %v1520_v52 = vpop.permute.xlu0 %1519 }
 0x16b   : > { %1610 = vst.msk [vmem:[#allocation2 + $0x30] sm:$0xff] %vm1603_vm11, %v1520_v52  ;;  %1145 = vrot.lane.b32.xlu1 %v3456_v26, %s2868_s28 }
 0x16c   : > { %1143 = vrot.lane.b32.xlu0 %v3461_v35, %s2868_s28 }
 0x16d   : > { %v829_v2 = vpop.permute.xlu1 %828  ;;  %v1641_v40 = vld [vmem:[#allocation2 + $0x28] sm:$0xff] }
 0x16e   : > { %914 = vst.msk [vmem:[#allocation2 + $0x58] sm:$0xff] %vm902_vm6, %v829_v2  ;;  %v827_v7 = vpop.permute.xlu0 %826  ;;  %v1640_v49 = vld [vmem:[#allocation2 + $0x20] sm:$0xff]  ;;  %v4694_v2 = vld [vmem:[#allocation28_spill] sm:$0xff] }
 0x16f   : > { %913 = vst.msk [vmem:[#allocation2 + $0x50] sm:$0xff] %vm902_vm6, %v827_v7  ;;  %1272 = vrot.lane.b32.xlu1 %v4687_v14, %s2869_s29  ;;  %v1670_v9 = vpack.c.bf16 %v1641_v40, %v1640_v49  ;;  %v4695_v40 = vld [vmem:[#allocation29_spill] sm:$0xff] }
 0x170   : > { %1270 = vrot.lane.b32.xlu0 %v3063_v44, %s2869_s29 }
 0x171   : > { %2772 = vmatprep.mubr.msk.bf16.mxu0 %vm1704_vm12, %v1670_v9  ;;  %v992_v15 = vpop.permute.xlu1 %991  ;;  %v1643_v60 = vld [vmem:[#allocation2 + $0x38] sm:$0xff] }
 0x172   : > { %1079 = vst.msk [vmem:[#allocation2 + $0x48] sm:$0xff] %vm1069_vm7, %v992_v15  ;;  %v990_v39 = vpop.permute.xlu0 %989  ;;  %v1642_v36 = vld [vmem:[#allocation2 + $0x30] sm:$0xff] }
 0x173   : > { %1078 = vst.msk [vmem:[#allocation2 + $0x40] sm:$0xff] %vm1069_vm7, %v990_v39  ;;  %1276 = vrot.lane.b32.xlu1 %v4690_v16, %s2869_s29  ;;  %v1671_v31 = vpack.c.bf16 %v1643_v60, %v1642_v36 }
 0x174   : > { %1274 = vrot.lane.b32.xlu0 %v3077_v46, %s2869_s29 }
 0x175   : > { %2773 = vmatmul.mubr.msk.bf16.gmra.mrb[4].mxu0 %vm1704_vm12, %v1671_v31  ;;  %v996_v44 = vpop.permute.xlu1 %995 }
 0x176   : > { %1081 = vst.msk [vmem:[#allocation2 + $0x58] sm:$0xff] %vm1069_vm7, %v996_v44  ;;  %v994_v32 = vpop.permute.xlu0 %993 }
 0x177   : > { %1080 = vst.msk [vmem:[#allocation2 + $0x50] sm:$0xff] %vm1069_vm7, %v994_v32  ;;  %1407 = vrot.lane.b32.xlu1 %v4688_v22, %s2870_s7 }
 0x178   : > { %1405 = vrot.lane.b32.xlu0 %v4689_v19, %s2870_s7 }
 0x179   : > { %v1126_v56 = vpop.permute.xlu1 %1125 }
 0x17a   : > { %1213 = vst.msk [vmem:[#allocation2 + $0x48] sm:$0xff] %vm1203_vm8, %v1126_v56  ;;  %v1124_v27 = vpop.permute.xlu0 %1123 }
 0x17b   : > { %1212 = vst.msk [vmem:[#allocation2 + $0x40] sm:$0xff] %vm1203_vm8, %v1124_v27  ;;  %1411 = vrot.lane.b32.xlu1 %v4691_v1, %s2870_s7  ;;  %v4696_v27 = vld [vmem:[#allocation9_spill] sm:$0xff] }
 0x17c   : > { %1409 = vrot.lane.b32.xlu0 %v4692_v10, %s2870_s7 }
 0x17d   : > { %v1130_v48 = vpop.permute.xlu1 %1129 }
 0x17e   : > { %1215 = vst.msk [vmem:[#allocation2 + $0x58] sm:$0xff] %vm1203_vm8, %v1130_v48  ;;  %v1128_v14 = vpop.permute.xlu0 %1127  ;;  %v4697_v48 = vld [vmem:[#allocation10_spill] sm:$0xff] }
 0x17f   : > { %1214 = vst.msk [vmem:[#allocation2 + $0x50] sm:$0xff] %vm1203_vm8, %v1128_v14  ;;  %1541 = vrot.lane.b32.xlu1 %v3456_v26, %s2871_s12 }
 0x180   : > { %1539 = vrot.lane.b32.xlu0 %v3461_v35, %s2871_s12 }
 0x181   : > { %v1257_v54 = vpop.permute.xlu1 %1256 }
 0x182   : > { %1344 = vst.msk [vmem:[#allocation2 + $0x48] sm:$0xff] %vm1334_vm9, %v1257_v54  ;;  %v1255_v34 = vpop.permute.xlu0 %1254 }
 0x183   : > { %1343 = vst.msk [vmem:[#allocation2 + $0x40] sm:$0xff] %vm1334_vm9, %v1255_v34  ;;  %1545 = vrot.lane.b32.xlu1 %v3469_v4, %s2871_s12 }
 0x184   : > { %1543 = vrot.lane.b32.xlu0 %v3474_v25, %s2871_s12 }
 0x185   : > { %v1261_v42 = vpop.permute.xlu1 %1260 }
 0x186   : > { %1346 = vst.msk [vmem:[#allocation2 + $0x58] sm:$0xff] %vm1334_vm9, %v1261_v42  ;;  %v1259_v61 = vpop.permute.xlu0 %1258  ;;  %v4698_v42 = vld [vmem:[#allocation30_spill] sm:$0xff] }
 0x187   : > { %1345 = vst.msk [vmem:[#allocation2 + $0x50] sm:$0xff] %vm1334_vm9, %v1259_v61  ;;  %848 = vrot.lane.b32.xlu1 %v4690_v16, %s2866_s26  ;;  %v4699_v61 = vld [vmem:[#allocation31_spill] sm:$0xff] }
 0x188   : > { %846 = vrot.lane.b32.xlu0 %v3077_v46, %s2866_s26 }
 0x189   : > { %v1392_v26 = vpop.permute.xlu1 %1391 }
 0x18a   : > { %1479 = vst.msk [vmem:[#allocation2 + $0x48] sm:$0xff] %vm1469_vm10, %v1392_v26  ;;  %v1390_v35 = vpop.permute.xlu0 %1389 }
 0x18b   : > { %1478 = vst.msk [vmem:[#allocation2 + $0x40] sm:$0xff] %vm1469_vm10, %v1390_v35  ;;  %852 = vrot.lane.b32.xlu1 %v4693_v23, %s2866_s26 }
 0x18c   : > { %850 = vrot.lane.b32.xlu0 %v3094_v51, %s2866_s26 }
 0x18d   : > { %v1396_v29 = vpop.permute.xlu1 %1395 }
 0x18e   : > { %1481 = vst.msk [vmem:[#allocation2 + $0x58] sm:$0xff] %vm1469_vm10, %v1396_v29  ;;  %v1394_v30 = vpop.permute.xlu0 %1393 }
 0x18f   : > { %1480 = vst.msk [vmem:[#allocation2 + $0x50] sm:$0xff] %vm1469_vm10, %v1394_v30  ;;  %1015 = vrot.lane.b32.xlu1 %v4691_v1, %s2867_s27 }
 0x190   : > { %1013 = vrot.lane.b32.xlu0 %v4692_v10, %s2867_s27 }
 0x191   : > { %v1526_v46 = vpop.permute.xlu1 %1525 }
 0x192   : > { %1613 = vst.msk [vmem:[#allocation2 + $0x48] sm:$0xff] %vm1603_vm11, %v1526_v46  ;;  %v1524_v52 = vpop.permute.xlu0 %1523 }
 0x193   : > { %1612 = vst.msk [vmem:[#allocation2 + $0x40] sm:$0xff] %vm1603_vm11, %v1524_v52  ;;  %1019 = vrot.lane.b32.xlu1 %v4694_v2, %s2867_s27  ;;  %v4700_v52 = vld [vmem:[#allocation11_spill] sm:$0xff] }
 0x194   : > { %1017 = vrot.lane.b32.xlu0 %v4695_v40, %s2867_s27 }
 0x195   : > { %v1530_v7 = vpop.permute.xlu1 %1529 }
 0x196   : > { %1615 = vst.msk [vmem:[#allocation2 + $0x58] sm:$0xff] %vm1603_vm11, %v1530_v7  ;;  %v1528_v49 = vpop.permute.xlu0 %1527 }
 0x197   : > { %1614 = vst.msk [vmem:[#allocation2 + $0x50] sm:$0xff] %vm1603_vm11, %v1528_v49  ;;  %1149 = vrot.lane.b32.xlu1 %v3469_v4, %s2868_s28 }
 0x198   : > { %1147 = vrot.lane.b32.xlu0 %v3474_v25, %s2868_s28 }
 0x199   : > { %v833_v9 = vpop.permute.xlu1 %832  ;;  %v1645_v15 = vld [vmem:[#allocation2 + $0x48] sm:$0xff] }
 0x19a   : > { %916 = vst.msk [vmem:[#allocation2 + $0x68] sm:$0xff] %vm902_vm6, %v833_v9  ;;  %v831_v60 = vpop.permute.xlu0 %830  ;;  %v1644_v39 = vld [vmem:[#allocation2 + $0x40] sm:$0xff] }
 0x19b   : > { %915 = vst.msk [vmem:[#allocation2 + $0x60] sm:$0xff] %vm902_vm6, %v831_v60  ;;  %1153 = vrot.lane.b32.xlu1 %v3482_v53, %s2868_s28  ;;  %v1672_v36 = vpack.c.bf16 %v1645_v15, %v1644_v39  ;;  %v4701_v60 = vld [vmem:[#allocation32_spill] sm:$0xff]  ;;  %v4702_v39 = vld [vmem:[#allocation33_spill] sm:$0xff] }
 0x19c   : > { %1151 = vrot.lane.b32.xlu0 %v3487_v17, %s2868_s28 }
 0x19d   : > { %2776 = vmatprep.mubr.msk.bf16.mxu0 %vm1704_vm12, %v1672_v36  ;;  %v837_v4 = vpop.permute.xlu1 %836  ;;  %v1647_v16 = vld [vmem:[#allocation2 + $0x58] sm:$0xff] }
 0x19e   : > { %918 = vst.msk [vmem:[#allocation2 + $0x78] sm:$0xff] %vm902_vm6, %v837_v4  ;;  %v835_v25 = vpop.permute.xlu0 %834  ;;  %v1646_v31 = vld [vmem:[#allocation2 + $0x50] sm:$0xff] }
 0x19f   : > { %917 = vst.msk [vmem:[#allocation2 + $0x70] sm:$0xff] %vm902_vm6, %v835_v25  ;;  %1280 = vrot.lane.b32.xlu1 %v4693_v23, %s2869_s29  ;;  %v1673_v44 = vpack.c.bf16 %v1647_v16, %v1646_v31  ;;  %v2108_v16 = vld [vmem:[%s4569_s2] sm:$0x3] }
 0x1a0   : > { %1278 = vrot.lane.b32.xlu0 %v3094_v51, %s2869_s29  ;;  %2835 = vmatprep.subr.msk.bf16.mxu1 %vm1753_vm5, %v2108_v16  ;;  %v2158_v25 = vsel %vm1753_vm5, %v2108_v16, 0 }
 0x1a1   : > { %2777 = vmatmul.mubr.msk.bf16.gmra.mrb[8].mxu0 %vm1704_vm12, %v1673_v44  ;;  %v1000_v32 = vpop.permute.xlu1 %999  ;;  %2801 = vmatpush3.bf16.msra.mxu1 %v2158_v25 }
 0x1a2   : > { %1083 = vst.msk [vmem:[#allocation2 + $0x68] sm:$0xff] %vm1069_vm7, %v1000_v32  ;;  %v998_v56 = vpop.permute.xlu0 %997  ;;  %v2092_v32 = vpack.c.bf16 %v2982_v20, %v2956_v13 }
 0x1a3   : > { %1082 = vst.msk [vmem:[#allocation2 + $0x60] sm:$0xff] %vm1069_vm7, %v998_v56  ;;  %1284 = vrot.lane.b32.xlu1 %v4696_v27, %s2869_s29 }
 0x1a4   : > { %1282 = vrot.lane.b32.xlu0 %v4697_v48, %s2869_s29  ;;  %2802 = vmatprep.mubr.msk.bf16.mxu1 %vm303_vm0, %v2092_v32 }
 0x1a5   : > { %v1004_v14 = vpop.permute.xlu1 %1003 }
 0x1a6   : > { %1085 = vst.msk [vmem:[#allocation2 + $0x78] sm:$0xff] %vm1069_vm7, %v1004_v14  ;;  %v1002_v54 = vpop.permute.xlu0 %1001 }
 0x1a7   : > { %1084 = vst.msk [vmem:[#allocation2 + $0x70] sm:$0xff] %vm1069_vm7, %v1002_v54  ;;  %1415 = vrot.lane.b32.xlu1 %v4694_v2, %s2870_s7  ;;  %v2094_v54 = vpack.c.bf16 %v3086_v47, %v4672_v59 }
 0x1a8   : > { %1413 = vrot.lane.b32.xlu0 %v4695_v40, %s2870_s7 }
 0x1a9   : > { %v1134_v51 = vpop.permute.xlu1 %1133 }
 0x1aa   : > { %1217 = vst.msk [vmem:[#allocation2 + $0x68] sm:$0xff] %vm1203_vm8, %v1134_v51  ;;  %v1132_v34 = vpop.permute.xlu0 %1131 }
 0x1ab   : > { %1216 = vst.msk [vmem:[#allocation2 + $0x60] sm:$0xff] %vm1203_vm8, %v1132_v34  ;;  %1419 = vrot.lane.b32.xlu1 %v4698_v42, %s2870_s7  ;;  %v2095_v34 = vpack.c.bf16 %v4673_v3, %v4674_v11  ;;  %v2096_v3 = vpack.c.bf16 %v4675_v24, %v4676_v28 }
 0x1ac   : > { %1417 = vrot.lane.b32.xlu0 %v4699_v61, %s2870_s7 }
 0x1ad   : > { %v1138_v26 = vpop.permute.xlu1 %1137 }
 0x1ae   : > { %1219 = vst.msk [vmem:[#allocation2 + $0x78] sm:$0xff] %vm1203_vm8, %v1138_v26  ;;  %v1136_v35 = vpop.permute.xlu0 %1135  ;;  %v2097_v26 = vpack.c.bf16 %v4677_v18, %v4678_v8  ;;  %v2098_v18 = vpack.c.bf16 %v4679_v37, %v4680_v43  ;;  %v4095_v37 = vld [vmem:[%s2916_s23 + $0x188] sm:$0xff] }
 0x1af   : > { %1218 = vst.msk [vmem:[#allocation2 + $0x70] sm:$0xff] %vm1203_vm8, %v1136_v35  ;;  %1549 = vrot.lane.b32.xlu1 %v3482_v53, %s2871_s12  ;;  %v4703_v35 = vld [vmem:[#allocation34_spill] sm:$0xff] }
 0x1b0   : > { %1547 = vrot.lane.b32.xlu0 %v3487_v17, %s2871_s12 }
 0x1b1   : > { %v1265_v23 = vpop.permute.xlu1 %1264 }
 0x1b2   : > { %1348 = vst.msk [vmem:[#allocation2 + $0x68] sm:$0xff] %vm1334_vm9, %v1265_v23  ;;  %v1263_v29 = vpop.permute.xlu0 %1262  ;;  %v4704_v23 = vld [vmem:[#allocation35_spill] sm:$0xff] }
 0x1b3   : > { %1347 = vst.msk [vmem:[#allocation2 + $0x60] sm:$0xff] %vm1334_vm9, %v1263_v29  ;;  %1553 = vrot.lane.b32.xlu1 %v3495_v21, %s2871_s12 }
 0x1b4   : > { %1551 = vrot.lane.b32.xlu0 %v3500_v41, %s2871_s12 }
 0x1b5   : > { %v1269_v30 = vpop.permute.xlu1 %1268 }
 0x1b6   : > { %1350 = vst.msk [vmem:[#allocation2 + $0x78] sm:$0xff] %vm1334_vm9, %v1269_v30  ;;  %v1267_v46 = vpop.permute.xlu0 %1266  ;;  %v2099_v30 = vpack.c.bf16 %v4682_v0, %v4683_v5  ;;  %v4098_v0 = vld [vmem:[%s2916_s23 + $0x180] sm:$0xff]  ;;  %v299_v5 = vld [vmem:[%s2916_s23 + $0x190] sm:$0x3] }
 0x1b7   : > { %1349 = vst.msk [vmem:[#allocation2 + $0x70] sm:$0xff] %vm1334_vm9, %v1267_v46  ;;  %856 = vrot.lane.b32.xlu1 %v4696_v27, %s2866_s26  ;;  %v2093_v27 = vpack.c.bf16 %v3030_v33, %v3045_v38  ;;  %v2100_v46 = vpack.c.bf16 %v4685_v6, %v4686_v12  ;;  %v936_v6 = vrot.slane %v4098_v0, 1 }
 0x1b8   : > { %854 = vrot.lane.b32.xlu0 %v4697_v48, %s2866_s26 }
 0x1b9   : > { %v1400_v53 = vpop.permute.xlu1 %1399  ;;  %2803 = vmatmul.mubr.msk.bf16.vlgmr.msra.gmra.mrb[0].mxu1 %vm303_vm0, %v2093_v27 }
 0x1ba   : > { %1483 = vst.msk [vmem:[#allocation2 + $0x68] sm:$0xff] %vm1469_vm10, %v1400_v53  ;;  %v1398_v17 = vpop.permute.xlu0 %1397  ;;  %2806 = vmatprep.mubr.msk.bf16.mxu1 %vm303_vm0, %v2094_v54 }
 0x1bb   : > { %1482 = vst.msk [vmem:[#allocation2 + $0x60] sm:$0xff] %vm1469_vm10, %v1398_v17  ;;  %860 = vrot.lane.b32.xlu1 %v3122_v57, %s2866_s26  ;;  %v2101_v17 = vpack.c.bf16 %v4688_v22, %v4689_v19 }
 0x1bc   : > { %858 = vrot.lane.b32.xlu0 %v4700_v52, %s2866_s26 }
 0x1bd   : > { %v1404_v7 = vpop.permute.xlu1 %1403 }
 0x1be   : > { %1485 = vst.msk [vmem:[#allocation2 + $0x78] sm:$0xff] %vm1469_vm10, %v1404_v7  ;;  %v1402_v49 = vpop.permute.xlu0 %1401 }
 0x1bf   : > { %1484 = vst.msk [vmem:[#allocation2 + $0x70] sm:$0xff] %vm1469_vm10, %v1402_v49  ;;  %1023 = vrot.lane.b32.xlu1 %v4698_v42, %s2867_s27  ;;  %v2102_v49 = vpack.c.bf16 %v4691_v1, %v4692_v10  ;;  %v1102_v1 = vrot.slane %v4098_v0, 2 }
 0x1c0   : > { %1021 = vrot.lane.b32.xlu0 %v4699_v61, %s2867_s27 }
 0x1c1   : > { %v1534_v9 = vpop.permute.xlu1 %1533  ;;  %2807 = vmatmul.mubr.msk.bf16.gmra.mrb[4].mxu1 %vm303_vm0, %v2095_v34 }
 0x1c2   : > { %1617 = vst.msk [vmem:[#allocation2 + $0x68] sm:$0xff] %vm1603_vm11, %v1534_v9  ;;  %v1532_v15 = vpop.permute.xlu0 %1531  ;;  %2810 = vmatprep.mubr.msk.bf16.mxu1 %vm303_vm0, %v2096_v3 }
 0x1c3   : > { %1616 = vst.msk [vmem:[#allocation2 + $0x60] sm:$0xff] %vm1603_vm11, %v1532_v15  ;;  %1027 = vrot.lane.b32.xlu1 %v4701_v60, %s2867_s27  ;;  %v2103_v15 = vpack.c.bf16 %v4694_v2, %v4695_v40 }
 0x1c4   : > { %1025 = vrot.lane.b32.xlu0 %v4702_v39, %s2867_s27 }
 0x1c5   : > { %v1538_v36 = vpop.permute.xlu1 %1537 }
 0x1c6   : > { %1619 = vst.msk [vmem:[#allocation2 + $0x78] sm:$0xff] %vm1603_vm11, %v1538_v36  ;;  %v1536_v4 = vpop.permute.xlu0 %1535  ;;  %v1103_v36 = vrot.slane %v4095_v37, 2 }
 0x1c7   : > { %1618 = vst.msk [vmem:[#allocation2 + $0x70] sm:$0xff] %vm1603_vm11, %v1536_v4  ;;  %1157 = vrot.lane.b32.xlu1 %v3495_v21, %s2868_s28  ;;  %v1105_v4 = vrot.slane %v299_v5, 2 }
 0x1c8   : > { %1155 = vrot.lane.b32.xlu0 %v3500_v41, %s2868_s28  ;;  %v1104_v25 = vsel %vm594_vm2, %v1102_v1, %v1103_v36 }
 0x1c9   : > { %v841_v31 = vpop.permute.xlu1 %840  ;;  %v1649_v44 = vld [vmem:[#allocation2 + $0x68] sm:$0xff]  ;;  %2811 = vmatmul.mubr.msk.bf16.gmra.mrb[8].mxu1 %vm303_vm0, %v2097_v26  ;;  %v4148_v40 = vsel %vm594_vm2, %v1103_v36, %v1105_v4 }
 0x1ca   : > { %920 = vst.msk [vmem:[#allocation2 + $0x88] sm:$0xff] %vm902_vm6, %v841_v31  ;;  %v839_v21 = vpop.permute.xlu0 %838  ;;  %v1648_v56 = vld [vmem:[#allocation2 + $0x60] sm:$0xff]  ;;  %2814 = vmatprep.mubr.msk.bf16.mxu1 %vm303_vm0, %v2098_v18 }
 0x1cb   : > { %919 = vst.msk [vmem:[#allocation2 + $0x80] sm:$0xff] %vm902_vm6, %v839_v21  ;;  %1161 = vrot.lane.b32.xlu1 %v3510_v50, %s2868_s28  ;;  %v1674_v41 = vpack.c.bf16 %v1649_v44, %v1648_v56  ;;  %v2104_v44 = vpack.c.bf16 %v4698_v42, %v4699_v61 }
 0x1cc   : > { %1159 = vrot.lane.b32.xlu0 %v3515_v58, %s2868_s28 }
 0x1cd   : > { %2780 = vmatprep.mubr.msk.bf16.mxu0 %vm1704_vm12, %v1674_v41  ;;  %v845_v13 = vpop.permute.xlu1 %844  ;;  %v1651_v20 = vld [vmem:[#allocation2 + $0x78] sm:$0xff]  ;;  %v301_v41 = vld [vmem:[%s2916_s23 + $0x1a0] sm:$0xff] }
 0x1ce   : > { %922 = vst.msk [vmem:[#allocation2 + $0x98] sm:$0xff] %vm902_vm6, %v845_v13  ;;  %v843_v33 = vpop.permute.xlu0 %842  ;;  %v1650_v38 = vld [vmem:[#allocation2 + $0x70] sm:$0xff]  ;;  %v1503_v26 = vrot.slane %v301_v41, 2 }
 0x1cf   : > { %921 = vst.msk [vmem:[#allocation2 + $0x90] sm:$0xff] %vm902_vm6, %v843_v33  ;;  %1288 = vrot.lane.b32.xlu1 %v3122_v57, %s2869_s29  ;;  %v1675_v48 = vpack.c.bf16 %v1651_v20, %v1650_v38  ;;  %v300_v20 = vld [vmem:[%s2916_s23 + $0x198] sm:$0xff]  ;;  %v302_v33 = vld [vmem:[%s2916_s23 + $0x1a8] sm:$0x3]  ;;  %v2106_v38 = vpack.c.bf16 %v4703_v35, %v4704_v23  ;;  %s4333_s23 = scalar_lea.vmem %s4571_s4, %s2724_s15 }
 0x1d0   : > { %1286 = vrot.lane.b32.xlu0 %v4700_v52, %s2869_s29  ;;  %v1371_v54 = vrot.slane %v302_v33, 1 }
 0x1d1   : > { %2781 = vmatmul.mubr.msk.bf16.gmra.mrb[12].mxu0 %vm1704_vm12, %v1675_v48  ;;  %v1008_v14 = vpop.permute.xlu1 %1007  ;;  %2815 = vmatmul.mubr.msk.bf16.gmra.mrb[12].mxu1 %vm303_vm0, %v2099_v30 }
 0x1d2   : > { %1087 = vst.msk [vmem:[#allocation2 + $0x88] sm:$0xff] %vm1069_vm7, %v1008_v14  ;;  %v1006_v51 = vpop.permute.xlu0 %1005  ;;  %2818 = vmatprep.mubr.msk.bf16.mxu1 %vm303_vm0, %v2100_v46  ;;  %v1369_v14 = vrot.slane %v301_v41, 1 }
 0x1d3   : > { %1086 = vst.msk [vmem:[#allocation2 + $0x80] sm:$0xff] %vm1069_vm7, %v1006_v51  ;;  %1292 = vrot.lane.b32.xlu1 %v3137_v62, %s2869_s29  ;;  %v1368_v51 = vrot.slane %v300_v20, 1 }
 0x1d4   : > { %1290 = vrot.lane.b32.xlu0 %v3140_v63, %s2869_s29 }
 0x1d5   : > { %v1012_v57 = vpop.permute.xlu1 %1011  ;;  %v1370_v3 = vsel %vm384_vm1, %v1368_v51, %v1369_v14 }
 0x1d6   : > { %1089 = vst.msk [vmem:[#allocation2 + $0x98] sm:$0xff] %vm1069_vm7, %v1012_v57  ;;  %v1010_v47 = vpop.permute.xlu0 %1009 }
 0x1d7   : > { %1088 = vst.msk [vmem:[#allocation2 + $0x90] sm:$0xff] %vm1069_vm7, %v1010_v47  ;;  %1423 = vrot.lane.b32.xlu1 %v4701_v60, %s2870_s7  ;;  %v1372_v47 = vsel %vm384_vm1, %v1369_v14, %v1371_v54 }
 0x1d8   : > { %1421 = vrot.lane.b32.xlu0 %v4702_v39, %s2870_s7 }
 0x1d9   : > { %v1142_v59 = vpop.permute.xlu1 %1141  ;;  %2819 = vmatmul.mubr.msk.bf16.gmra.mrb[16].mxu1 %vm303_vm0, %v2101_v17 }
 0x1da   : > { %1221 = vst.msk [vmem:[#allocation2 + $0x88] sm:$0xff] %vm1203_vm8, %v1142_v59  ;;  %v1140_v11 = vpop.permute.xlu0 %1139  ;;  %2822 = vmatprep.mubr.msk.bf16.mxu1 %vm303_vm0, %v2102_v49 }
 0x1db   : > { %1220 = vst.msk [vmem:[#allocation2 + $0x80] sm:$0xff] %vm1203_vm8, %v1140_v11  ;;  %1427 = vrot.lane.b32.xlu1 %v4703_v35, %s2870_s7 }
 0x1dc   : > { %1425 = vrot.lane.b32.xlu0 %v4704_v23, %s2870_s7 }
 0x1dd   : > { %v1146_v29 = vpop.permute.xlu1 %1145 }
 0x1de   : > { %1223 = vst.msk [vmem:[#allocation2 + $0x98] sm:$0xff] %vm1203_vm8, %v1146_v29  ;;  %v1144_v24 = vpop.permute.xlu0 %1143 }
 0x1df   : > { %1222 = vst.msk [vmem:[#allocation2 + $0x90] sm:$0xff] %vm1203_vm8, %v1144_v24  ;;  %1557 = vrot.lane.b32.xlu1 %v3510_v50, %s2871_s12 }
 0x1e0   : > { %1555 = vrot.lane.b32.xlu0 %v3515_v58, %s2871_s12 }
 0x1e1   : > { %v1273_v28 = vpop.permute.xlu1 %1272  ;;  %2823 = vmatmul.mubr.msk.bf16.gmra.mrb[20].mxu1 %vm303_vm0, %v2103_v15 }
 0x1e2   : > { %1352 = vst.msk [vmem:[#allocation2 + $0x88] sm:$0xff] %vm1334_vm9, %v1273_v28  ;;  %v1271_v8 = vpop.permute.xlu0 %1270  ;;  %2826 = vmatprep.mubr.msk.bf16.mxu1 %vm303_vm0, %v2104_v44 }
 0x1e3   : > { %1351 = vst.msk [vmem:[#allocation2 + $0x80] sm:$0xff] %vm1334_vm9, %v1271_v8  ;;  %1561 = vrot.lane.b32.xlu1 %v3525_v55, %s2871_s12 }
 0x1e4   : > { %1559 = vrot.lane.b32.xlu0 %v3528_v45, %s2871_s12 }
 0x1e5   : > { %v1277_v58 = vpop.permute.xlu1 %1276 }
 0x1e6   : > { %1354 = vst.msk [vmem:[#allocation2 + $0x98] sm:$0xff] %vm1334_vm9, %v1277_v58  ;;  %v1275_v50 = vpop.permute.xlu0 %1274 }
 0x1e7   : > { %1353 = vst.msk [vmem:[#allocation2 + $0x90] sm:$0xff] %vm1334_vm9, %v1275_v50  ;;  %864 = vrot.lane.b32.xlu1 %v3137_v62, %s2866_s26  ;;  %v937_v62 = vrot.slane %v4095_v37, 1 }
 0x1e8   : > { %862 = vrot.lane.b32.xlu0 %v3140_v63, %s2866_s26  ;;  %v939_v63 = vrot.slane %v299_v5, 1 }
 0x1e9   : > { %v1408_v43 = vpop.permute.xlu1 %1407  ;;  %v4125_v7 = vsel %vm384_vm1, %v936_v6, %v937_v62 }
 0x1ea   : > { %1487 = vst.msk [vmem:[#allocation2 + $0x88] sm:$0xff] %vm1469_vm10, %v1408_v43  ;;  %v1406_v53 = vpop.permute.xlu0 %1405  ;;  %v4122_v19 = vsel %vm384_vm1, %v937_v62, %v939_v63 }
 0x1eb   : > { %1486 = vst.msk [vmem:[#allocation2 + $0x80] sm:$0xff] %vm1469_vm10, %v1406_v53  ;;  %868 = vrot.lane.b32.xlu1 %v4095_v37, %s2866_s26  ;;  %v2107_v27 = vpack.c.bf16 %v4122_v19, %v4125_v7 }
 0x1ec   : > { %866 = vrot.lane.b32.xlu0 %v4098_v0, %s2866_s26 }
 0x1ed   : > { %v1412_v12 = vpop.permute.xlu1 %1411 }
 0x1ee   : > { %1489 = vst.msk [vmem:[#allocation2 + $0x98] sm:$0xff] %vm1469_vm10, %v1412_v12  ;;  %v1410_v22 = vpop.permute.xlu0 %1409 }
 0x1ef   : > { %1488 = vst.msk [vmem:[#allocation2 + $0x90] sm:$0xff] %vm1469_vm10, %v1410_v22  ;;  %1031 = vrot.lane.b32.xlu1 %v4703_v35, %s2867_s27  ;;  %v1505_v35 = vrot.slane %v302_v33, 2 }
 0x1f0   : > { %1029 = vrot.lane.b32.xlu0 %v4704_v23, %s2867_s27  ;;  %v1502_v23 = vrot.slane %v300_v20, 2 }
 0x1f1   : > { %v1542_v52 = vpop.permute.xlu1 %1541  ;;  %v1506_v28 = vsel %vm594_vm2, %v1503_v26, %v1505_v35 }
 0x1f2   : > { %1621 = vst.msk [vmem:[#allocation2 + $0x88] sm:$0xff] %vm1603_vm11, %v1542_v52  ;;  %v1540_v9 = vpop.permute.xlu0 %1539  ;;  %v1504_v8 = vsel %vm594_vm2, %v1502_v23, %v1503_v26 }
 0x1f3   : > { %1620 = vst.msk [vmem:[#allocation2 + $0x80] sm:$0xff] %vm1603_vm11, %v1540_v9  ;;  %1035 = vrot.lane.b32.xlu1 %v4122_v19, %s2867_s27 }
 0x1f4   : > { %1033 = vrot.lane.b32.xlu0 %v4125_v7, %s2867_s27  ;;  %s4506_s27 = scalar_lea.vmem %s4572_s5, %s2686_s24 }
 0x1f5   : > { %v1546_v10 = vpop.permute.xlu1 %1545 }
 0x1f6   : > { %1623 = vst.msk [vmem:[#allocation2 + $0x98] sm:$0xff] %vm1603_vm11, %v1546_v10  ;;  %v1544_v2 = vpop.permute.xlu0 %1543 }
 0x1f7   : > { %1622 = vst.msk [vmem:[#allocation2 + $0x90] sm:$0xff] %vm1603_vm11, %v1544_v2  ;;  %1165 = vrot.lane.b32.xlu1 %v3525_v55, %s2868_s28  ;;  %v2105_v55 = vpack.c.bf16 %v4701_v60, %v4702_v39 }
 0x1f8   : > { %1163 = vrot.lane.b32.xlu0 %v3528_v45, %s2868_s28 }
 0x1f9   : > { %v849_v16 = vpop.permute.xlu1 %848  ;;  %v1653_v31 = vld [vmem:[#allocation2 + $0x88] sm:$0xff]  ;;  %2827 = vmatmul.mubr.msk.bf16.gmra.mrb[24].mxu1 %vm303_vm0, %v2105_v55 }
 0x1fa   : > { %924 = vst.msk [vmem:[#allocation2 + $0xa8] sm:$0xff] %vm902_vm6, %v849_v16  ;;  %v847_v32 = vpop.permute.xlu0 %846  ;;  %v1652_v21 = vld [vmem:[#allocation2 + $0x80] sm:$0xff]  ;;  %2830 = vmatprep.mubr.msk.bf16.mxu1 %vm303_vm0, %v2106_v38 }
 0x1fb   : > { %923 = vst.msk [vmem:[#allocation2 + $0xa0] sm:$0xff] %vm902_vm6, %v847_v32  ;;  %1169 = vrot.lane.b32.xlu1 %v4148_v40, %s2868_s28  ;;  %v1676_v45 = vpack.c.bf16 %v1653_v31, %v1652_v21 }
 0x1fc   : > { %1167 = vrot.lane.b32.xlu0 %v1104_v25, %s2868_s28 }
 0x1fd   : > { %2784 = vmatprep.mubr.msk.bf16.mxu0 %vm1704_vm12, %v1676_v45  ;;  %v853_v42 = vpop.permute.xlu1 %852  ;;  %v1655_v61 = vld [vmem:[#allocation2 + $0x98] sm:$0xff] }
 0x1fe   : > { %926 = vst.msk [vmem:[#allocation2 + $0xb8] sm:$0xff] %vm902_vm6, %v853_v42  ;;  %v851_v60 = vpop.permute.xlu0 %850  ;;  %v1654_v39 = vld [vmem:[#allocation2 + $0x90] sm:$0xff] }
 0x1ff   : > { %925 = vst.msk [vmem:[#allocation2 + $0xb0] sm:$0xff] %vm902_vm6, %v851_v60  ;;  %1296 = vrot.lane.b32.xlu1 %v4095_v37, %s2869_s29  ;;  %v1677_v56 = vpack.c.bf16 %v1655_v61, %v1654_v39 }
 0x200   : > { %1294 = vrot.lane.b32.xlu0 %v4098_v0, %s2869_s29 }
 0x201   : > { %2785 = vmatmul.mubr.msk.bf16.gmra.mrb[16].mxu0 %vm1704_vm12, %v1677_v56  ;;  %v1016_v13 = vpop.permute.xlu1 %1015  ;;  %2831 = vmatmul.mubr.msk.bf16.gmra.mrb[28].mxu1 %vm303_vm0, %v2107_v27 }
 0x202   : > { %1091 = vst.msk [vmem:[#allocation2 + $0xa8] sm:$0xff] %vm1069_vm7, %v1016_v13  ;;  %v1014_v48 = vpop.permute.xlu0 %1013 }
 0x203   : > { %1090 = vst.msk [vmem:[#allocation2 + $0xa0] sm:$0xff] %vm1069_vm7, %v1014_v48  ;;  %1300 = vrot.lane.b32.xlu1 %v301_v41, %s2869_s29 }
 0x204   : > { %1298 = vrot.lane.b32.xlu0 %v300_v20, %s2869_s29 }
 0x205   : > { %v1020_v34 = vpop.permute.xlu1 %1019 }
 0x206   : > { %1093 = vst.msk [vmem:[#allocation2 + $0xb8] sm:$0xff] %vm1069_vm7, %v1020_v34  ;;  %v1018_v57 = vpop.permute.xlu0 %1017 }
 0x207   : > { %1092 = vst.msk [vmem:[#allocation2 + $0xb0] sm:$0xff] %vm1069_vm7, %v1018_v57  ;;  %1431 = vrot.lane.b32.xlu1 %v4122_v19, %s2870_s7 }
 0x208   : > { %1429 = vrot.lane.b32.xlu0 %v4125_v7, %s2870_s7 }
 0x209   : > { %v1150_v59 = vpop.permute.xlu1 %1149 }
 0x20a   : > { %1225 = vst.msk [vmem:[#allocation2 + $0xa8] sm:$0xff] %vm1203_vm8, %v1150_v59  ;;  %v1148_v11 = vpop.permute.xlu0 %1147 }
 0x20b   : > { %1224 = vst.msk [vmem:[#allocation2 + $0xa0] sm:$0xff] %vm1203_vm8, %v1148_v11  ;;  %1435 = vrot.lane.b32.xlu1 %v1372_v47, %s2870_s7 }
 0x20c   : > { %1433 = vrot.lane.b32.xlu0 %v1370_v3, %s2870_s7 }
 0x20d   : > { %v1154_v29 = vpop.permute.xlu1 %1153 }
 0x20e   : > { %1227 = vst.msk [vmem:[#allocation2 + $0xb8] sm:$0xff] %vm1203_vm8, %v1154_v29  ;;  %v1152_v24 = vpop.permute.xlu0 %1151 }
 0x20f   : > { %1226 = vst.msk [vmem:[#allocation2 + $0xb0] sm:$0xff] %vm1203_vm8, %v1152_v24  ;;  %1565 = vrot.lane.b32.xlu1 %v4148_v40, %s2871_s12 }
 0x210   : > { %1563 = vrot.lane.b32.xlu0 %v1104_v25, %s2871_s12 }
 0x211   : > { %v1281_v18 = vpop.permute.xlu1 %1280 }
 0x212   : > { %1356 = vst.msk [vmem:[#allocation2 + $0xa8] sm:$0xff] %vm1334_vm9, %v1281_v18  ;;  %v1279_v30 = vpop.permute.xlu0 %1278 }
 0x213   : > { %1355 = vst.msk [vmem:[#allocation2 + $0xa0] sm:$0xff] %vm1334_vm9, %v1279_v30  ;;  %1569 = vrot.lane.b32.xlu1 %v1506_v28, %s2871_s12 }
 0x214   : > { %1567 = vrot.lane.b32.xlu0 %v1504_v8, %s2871_s12 }
 0x215   : > { %v1285_v58 = vpop.permute.xlu1 %1284 }
 0x216   : > { %1358 = vst.msk [vmem:[#allocation2 + $0xb8] sm:$0xff] %vm1334_vm9, %v1285_v58  ;;  %v1283_v50 = vpop.permute.xlu0 %1282 }
 0x217   : > { %1357 = vst.msk [vmem:[#allocation2 + $0xb0] sm:$0xff] %vm1334_vm9, %v1283_v50 }
 0x219   : > { %v1416_v37 = vpop.permute.xlu1 %1415 }
 0x21a   : > { %1491 = vst.msk [vmem:[#allocation2 + $0xa8] sm:$0xff] %vm1469_vm10, %v1416_v37  ;;  %v1414_v43 = vpop.permute.xlu0 %1413 }
 0x21b   : > { %1490 = vst.msk [vmem:[#allocation2 + $0xa0] sm:$0xff] %vm1469_vm10, %v1414_v43 }
 0x21d   : > { %v1420_v0 = vpop.permute.xlu1 %1419 }
 0x21e   : > { %1493 = vst.msk [vmem:[#allocation2 + $0xb8] sm:$0xff] %vm1469_vm10, %v1420_v0  ;;  %v1418_v5 = vpop.permute.xlu0 %1417 }
 0x21f   : > { %1492 = vst.msk [vmem:[#allocation2 + $0xb0] sm:$0xff] %vm1469_vm10, %v1418_v5 }
 0x220   : > { %v2770_v46 = vpop.f32.mrb[0].mxu0 }
 0x221   : > { %2527 = vst.msk [vmem:[%s4217_s20 + $0x10] sm:$0xff] %vm1918_vm13, %v2770_v46  ;;  %v1791_v53 = vpop.f32.mrb[1].mxu0  ;;  %v1550_v17 = vpop.permute.xlu1 %1549  ;;  %v1992_v22 = vmul.f32 %v2770_v46, %v2770_v46  ;;  %v1922_v15 = vsel %vm1918_vm13, %v2770_v46, 0.0 }
 0x222   : > { %v1990_v62 = vmul.f32 %v1791_v53, %v1791_v53  ;;  %2525 = vst.msk [vmem:[%s4217_s20] sm:$0xff] %vm1918_vm13, %v1791_v53  ;;  %v1548_v63 = vpop.permute.xlu0 %1547  ;;  %v2771_v6 = vpop.f32.mrb[2].mxu0  ;;  %v1919_v19 = vsel %vm1918_vm13, %v1791_v53, 0.0 }
 0x223   : > { %1625 = vst.msk [vmem:[#allocation2 + $0xa8] sm:$0xff] %vm1603_vm11, %v1550_v17  ;;  %1624 = vst.msk [vmem:[#allocation2 + $0xa0] sm:$0xff] %vm1603_vm11, %v1548_v63  ;;  %v1794_v12 = vpop.f32.mrb[3].mxu0  ;;  %v1993_v4 = vmul.f32 %v2771_v6, %v2771_v6  ;;  %v2025_v16 = vsel %vm1918_vm13, %v1992_v22, 0.0  ;;  %v1924_v25 = vsel %vm1918_vm13, %v2771_v6, 0.0 }
 0x224   : > { %2528 = vst.msk [vmem:[%s4217_s20 + $0x18] sm:$0xff] %vm1918_vm13, %v2771_v6  ;;  %v1920_v52 = vsel %vm1918_vm13, %v1794_v12, 0.0  ;;  %v1991_v7 = vmul.f32 %v1794_v12, %v1794_v12  ;;  %2526 = vst.msk [vmem:[%s4217_s20 + $0x8] sm:$0xff] %vm1918_vm13, %v1794_v12  ;;  %v2022_v36 = vsel %vm1918_vm13, %v1990_v62, 0.0 }
 0x225   : > { %v1921_v49 = vadd.f32 %v1920_v52, %v1919_v19  ;;  %v1554_v9 = vpop.permute.xlu1 %1553  ;;  %v2027_v55 = vsel %vm1918_vm13, %v1993_v4, 0.0 }
 0x226   : > { %v2023_v1 = vsel %vm1918_vm13, %v1991_v7, 0.0  ;;  %1627 = vst.msk [vmem:[#allocation2 + $0xb8] sm:$0xff] %vm1603_vm11, %v1554_v9  ;;  %v1552_v10 = vpop.permute.xlu0 %1551 }
 0x227   : > { %v1923_v2 = vadd.f32 %v1922_v15, %v1921_v49  ;;  %v2024_v40 = vadd.f32 %v2023_v1, %v2022_v36  ;;  %1626 = vst.msk [vmem:[#allocation2 + $0xb0] sm:$0xff] %vm1603_vm11, %v1552_v10 }
 0x229   : > { %v2026_v31 = vadd.f32 %v2025_v16, %v2024_v40  ;;  %v857_v44 = vpop.permute.xlu1 %856  ;;  %v1925_v21 = vadd.f32 %v1924_v25, %v1923_v2 }
 0x22a   : > { %v1657_v32 = vld [vmem:[#allocation2 + $0xa8] sm:$0xff]  ;;  %928 = vst.msk [vmem:[#allocation2 + $0xc8] sm:$0xff] %vm902_vm6, %v857_v44  ;;  %v855_v45 = vpop.permute.xlu0 %854  ;;  %v1656_v42 = vld [vmem:[#allocation2 + $0xa0] sm:$0xff] }
 0x22b   : > { %927 = vst.msk [vmem:[#allocation2 + $0xc0] sm:$0xff] %vm902_vm6, %v855_v45  ;;  %v1678_v61 = vpack.c.bf16 %v1657_v32, %v1656_v42  ;;  %v2028_v60 = vadd.f32 %v2027_v55, %v2026_v31 }
 0x22d   : > { %2788 = vmatprep.mubr.msk.bf16.mxu0 %vm1704_vm12, %v1678_v61  ;;  %v861_v39 = vpop.permute.xlu1 %860  ;;  %v1659_v56 = vld [vmem:[#allocation2 + $0xb8] sm:$0xff] }
 0x22e   : > { %930 = vst.msk [vmem:[#allocation2 + $0xd8] sm:$0xff] %vm902_vm6, %v861_v39  ;;  %v859_v27 = vpop.permute.xlu0 %858  ;;  %v1658_v41 = vld [vmem:[#allocation2 + $0xb0] sm:$0xff] }
 0x22f   : > { %929 = vst.msk [vmem:[#allocation2 + $0xd0] sm:$0xff] %vm902_vm6, %v859_v27  ;;  %v1679_v13 = vpack.c.bf16 %v1659_v56, %v1658_v41 }
 0x231   : > { %2789 = vmatmul.mubr.msk.bf16.gmra.mrb[20].mxu0 %vm1704_vm12, %v1679_v13  ;;  %v1024_v20 = vpop.permute.xlu1 %1023 }
 0x232   : > { %1095 = vst.msk [vmem:[#allocation2 + $0xc8] sm:$0xff] %vm1069_vm7, %v1024_v20  ;;  %v1022_v33 = vpop.permute.xlu0 %1021 }
 0x233   : > { %1094 = vst.msk [vmem:[#allocation2 + $0xc0] sm:$0xff] %vm1069_vm7, %v1022_v33 }
 0x235   : > { %v1028_v38 = vpop.permute.xlu1 %1027 }
 0x236   : > { %1097 = vst.msk [vmem:[#allocation2 + $0xd8] sm:$0xff] %vm1069_vm7, %v1028_v38  ;;  %v1026_v48 = vpop.permute.xlu0 %1025 }
 0x237   : > { %1096 = vst.msk [vmem:[#allocation2 + $0xd0] sm:$0xff] %vm1069_vm7, %v1026_v48 }
 0x239   : > { %v1158_v14 = vpop.permute.xlu1 %1157 }
 0x23a   : > { %1229 = vst.msk [vmem:[#allocation2 + $0xc8] sm:$0xff] %vm1203_vm8, %v1158_v14  ;;  %v1156_v54 = vpop.permute.xlu0 %1155 }
 0x23b   : > { %1228 = vst.msk [vmem:[#allocation2 + $0xc0] sm:$0xff] %vm1203_vm8, %v1156_v54 }
 0x23d   : > { %v1162_v51 = vpop.permute.xlu1 %1161 }
 0x23e   : > { %1231 = vst.msk [vmem:[#allocation2 + $0xd8] sm:$0xff] %vm1203_vm8, %v1162_v51  ;;  %v1160_v34 = vpop.permute.xlu0 %1159 }
 0x23f   : > { %1230 = vst.msk [vmem:[#allocation2 + $0xd0] sm:$0xff] %vm1203_vm8, %v1160_v34 }
 0x241   : > { %v1289_v57 = vpop.permute.xlu1 %1288 }
 0x242   : > { %1360 = vst.msk [vmem:[#allocation2 + $0xc8] sm:$0xff] %vm1334_vm9, %v1289_v57  ;;  %v1287_v47 = vpop.permute.xlu0 %1286 }
 0x243   : > { %1359 = vst.msk [vmem:[#allocation2 + $0xc0] sm:$0xff] %vm1334_vm9, %v1287_v47 }
 0x245   : > { %v1293_v59 = vpop.permute.xlu1 %1292 }
 0x246   : > { %1362 = vst.msk [vmem:[#allocation2 + $0xd8] sm:$0xff] %vm1334_vm9, %v1293_v59  ;;  %v1291_v3 = vpop.permute.xlu0 %1290 }
 0x247   : > { %1361 = vst.msk [vmem:[#allocation2 + $0xd0] sm:$0xff] %vm1334_vm9, %v1291_v3 }
 0x248   : > { %v2774_v11 = vpop.f32.mrb[4].mxu0 }
 0x249   : > { %2531 = vst.msk [vmem:[%s4217_s20 + $0x30] sm:$0xff] %vm1918_vm13, %v2774_v11  ;;  %v1807_v26 = vpop.f32.mrb[5].mxu0  ;;  %v1424_v35 = vpop.permute.xlu1 %1423  ;;  %v1996_v30 = vmul.f32 %v2774_v11, %v2774_v11  ;;  %v1930_v46 = vsel %vm1918_vm13, %v2774_v11, 0.0 }
 0x24a   : > { %v1926_v23 = vsel %vm1918_vm13, %v1807_v26, 0.0  ;;  %v1994_v29 = vmul.f32 %v1807_v26, %v1807_v26  ;;  %2529 = vst.msk [vmem:[%s4217_s20 + $0x20] sm:$0xff] %vm1918_vm13, %v1807_v26  ;;  %v1422_v24 = vpop.permute.xlu0 %1421  ;;  %v2775_v28 = vpop.f32.mrb[6].mxu0 }
 0x24b   : > { %1495 = vst.msk [vmem:[#allocation2 + $0xc8] sm:$0xff] %vm1469_vm10, %v1424_v35  ;;  %v1927_v18 = vadd.f32 %v1926_v23, %v1925_v21  ;;  %1494 = vst.msk [vmem:[#allocation2 + $0xc0] sm:$0xff] %vm1469_vm10, %v1422_v24  ;;  %v1810_v8 = vpop.f32.mrb[7].mxu0  ;;  %v1997_v53 = vmul.f32 %v2775_v28, %v2775_v28  ;;  %v2033_v12 = vsel %vm1918_vm13, %v1996_v30, 0.0  ;;  %v1932_v22 = vsel %vm1918_vm13, %v2775_v28, 0.0 }
 0x24c   : > { %2532 = vst.msk [vmem:[%s4217_s20 + $0x38] sm:$0xff] %vm1918_vm13, %v2775_v28  ;;  %v2029_v58 = vsel %vm1918_vm13, %v1994_v29, 0.0  ;;  %v1928_v50 = vsel %vm1918_vm13, %v1810_v8, 0.0  ;;  %v1995_v37 = vmul.f32 %v1810_v8, %v1810_v8  ;;  %2530 = vst.msk [vmem:[%s4217_s20 + $0x28] sm:$0xff] %vm1918_vm13, %v1810_v8 }
 0x24d   : > { %v2030_v43 = vadd.f32 %v2029_v58, %v2028_v60  ;;  %v1929_v0 = vadd.f32 %v1928_v50, %v1927_v18  ;;  %v1428_v5 = vpop.permute.xlu1 %1427  ;;  %v2035_v49 = vsel %vm1918_vm13, %v1997_v53, 0.0 }
 0x24e   : > { %v2031_v17 = vsel %vm1918_vm13, %v1995_v37, 0.0  ;;  %1497 = vst.msk [vmem:[#allocation2 + $0xd8] sm:$0xff] %vm1469_vm10, %v1428_v5  ;;  %v1426_v62 = vpop.permute.xlu0 %1425 }
 0x24f   : > { %v1931_v63 = vadd.f32 %v1930_v46, %v1929_v0  ;;  %v2032_v6 = vadd.f32 %v2031_v17, %v2030_v43  ;;  %1496 = vst.msk [vmem:[#allocation2 + $0xd0] sm:$0xff] %vm1469_vm10, %v1426_v62 }
 0x251   : > { %v2034_v19 = vadd.f32 %v2033_v12, %v2032_v6  ;;  %v1558_v52 = vpop.permute.xlu1 %1557  ;;  %v1933_v7 = vadd.f32 %v1932_v22, %v1931_v63 }
 0x252   : > { %1629 = vst.msk [vmem:[#allocation2 + $0xc8] sm:$0xff] %vm1603_vm11, %v1558_v52  ;;  %v1556_v9 = vpop.permute.xlu0 %1555 }
 0x253   : > { %1628 = vst.msk [vmem:[#allocation2 + $0xc0] sm:$0xff] %vm1603_vm11, %v1556_v9  ;;  %v2036_v15 = vadd.f32 %v2035_v49, %v2034_v19 }
 0x255   : > { %v1562_v36 = vpop.permute.xlu1 %1561 }
 0x256   : > { %1631 = vst.msk [vmem:[#allocation2 + $0xd8] sm:$0xff] %vm1603_vm11, %v1562_v36  ;;  %v1560_v4 = vpop.permute.xlu0 %1559 }
 0x257   : > { %1630 = vst.msk [vmem:[#allocation2 + $0xd0] sm:$0xff] %vm1603_vm11, %v1560_v4 }
 0x259   : > { %v865_v1 = vpop.permute.xlu1 %864  ;;  %v1661_v10 = vld [vmem:[#allocation2 + $0xc8] sm:$0xff] }
 0x25a   : > { %932 = vst.msk [vmem:[#allocation2 + $0xe8] sm:$0xff] %vm902_vm6, %v865_v1  ;;  %v863_v2 = vpop.permute.xlu0 %862  ;;  %v1660_v40 = vld [vmem:[#allocation2 + $0xc0] sm:$0xff] }
 0x25b   : > { %931 = vst.msk [vmem:[#allocation2 + $0xe0] sm:$0xff] %vm902_vm6, %v863_v2  ;;  %v1680_v16 = vpack.c.bf16 %v1661_v10, %v1660_v40 }
 0x25d   : > { %2792 = vmatprep.mubr.msk.bf16.mxu0 %vm1704_vm12, %v1680_v16  ;;  %v869_v25 = vpop.permute.xlu1 %868  ;;  %v1663_v31 = vld [vmem:[#allocation2 + $0xd8] sm:$0xff] }
 0x25e   : > { %934 = vst.msk [vmem:[#allocation2 + $0xf8] sm:$0xff] %vm902_vm6, %v869_v25  ;;  %v867_v44 = vpop.permute.xlu0 %866  ;;  %v1662_v32 = vld [vmem:[#allocation2 + $0xd0] sm:$0xff] }
 0x25f   : > { %933 = vst.msk [vmem:[#allocation2 + $0xf0] sm:$0xff] %vm902_vm6, %v867_v44  ;;  %v1681_v21 = vpack.c.bf16 %v1663_v31, %v1662_v32 }
 0x261   : > { %2793 = vmatmul.mubr.msk.bf16.gmra.mrb[24].mxu0 %vm1704_vm12, %v1681_v21  ;;  %v1032_v55 = vpop.permute.xlu1 %1031 }
 0x262   : > { %1099 = vst.msk [vmem:[#allocation2 + $0xe8] sm:$0xff] %vm1069_vm7, %v1032_v55  ;;  %v1030_v45 = vpop.permute.xlu0 %1029 }
 0x263   : > { %1098 = vst.msk [vmem:[#allocation2 + $0xe0] sm:$0xff] %vm1069_vm7, %v1030_v45 }
 0x265   : > { %v1036_v42 = vpop.permute.xlu1 %1035 }
 0x266   : > { %1101 = vst.msk [vmem:[#allocation2 + $0xf8] sm:$0xff] %vm1069_vm7, %v1036_v42  ;;  %v1034_v61 = vpop.permute.xlu0 %1033 }
 0x267   : > { %1100 = vst.msk [vmem:[#allocation2 + $0xf0] sm:$0xff] %vm1069_vm7, %v1034_v61 }
 0x269   : > { %v1166_v60 = vpop.permute.xlu1 %1165 }
 0x26a   : > { %1233 = vst.msk [vmem:[#allocation2 + $0xe8] sm:$0xff] %vm1203_vm8, %v1166_v60  ;;  %v1164_v39 = vpop.permute.xlu0 %1163 }
 0x26b   : > { %1232 = vst.msk [vmem:[#allocation2 + $0xe0] sm:$0xff] %vm1203_vm8, %v1164_v39 }
 0x26d   : > { %v1170_v56 = vpop.permute.xlu1 %1169 }
 0x26e   : > { %1235 = vst.msk [vmem:[#allocation2 + $0xf8] sm:$0xff] %vm1203_vm8, %v1170_v56  ;;  %v1168_v27 = vpop.permute.xlu0 %1167 }
 0x26f   : > { %1234 = vst.msk [vmem:[#allocation2 + $0xf0] sm:$0xff] %vm1203_vm8, %v1168_v27 }
 0x271   : > { %v1297_v41 = vpop.permute.xlu1 %1296 }
 0x272   : > { %1364 = vst.msk [vmem:[#allocation2 + $0xe8] sm:$0xff] %vm1334_vm9, %v1297_v41  ;;  %v1295_v13 = vpop.permute.xlu0 %1294 }
 0x273   : > { %1363 = vst.msk [vmem:[#allocation2 + $0xe0] sm:$0xff] %vm1334_vm9, %v1295_v13 }
 0x274   : > { %v2778_v20 = vpop.f32.mrb[8].mxu0 }
 0x275   : > { %2535 = vst.msk [vmem:[%s4217_s20 + $0x50] sm:$0xff] %vm1918_vm13, %v2778_v20  ;;  %v1823_v33 = vpop.f32.mrb[9].mxu0  ;;  %v1301_v38 = vpop.permute.xlu1 %1300  ;;  %v2000_v47 = vmul.f32 %v2778_v20, %v2778_v20  ;;  %v1938_v29 = vsel %vm1918_vm13, %v2778_v20, 0.0 }
 0x276   : > { %v1934_v48 = vsel %vm1918_vm13, %v1823_v33, 0.0  ;;  %v1998_v14 = vmul.f32 %v1823_v33, %v1823_v33  ;;  %2533 = vst.msk [vmem:[%s4217_s20 + $0x40] sm:$0xff] %vm1918_vm13, %v1823_v33  ;;  %v1299_v54 = vpop.permute.xlu0 %1298  ;;  %v2779_v51 = vpop.f32.mrb[10].mxu0 }
 0x277   : > { %1366 = vst.msk [vmem:[#allocation2 + $0xf8] sm:$0xff] %vm1334_vm9, %v1301_v38  ;;  %v1935_v34 = vadd.f32 %v1934_v48, %v1933_v7  ;;  %1365 = vst.msk [vmem:[#allocation2 + $0xf0] sm:$0xff] %vm1334_vm9, %v1299_v54  ;;  %v1826_v57 = vpop.f32.mrb[11].mxu0  ;;  %v2001_v24 = vmul.f32 %v2779_v51, %v2779_v51  ;;  %v2041_v58 = vsel %vm1918_vm13, %v2000_v47, 0.0  ;;  %v1940_v50 = vsel %vm1918_vm13, %v2779_v51, 0.0 }
 0x278   : > { %2536 = vst.msk [vmem:[%s4217_s20 + $0x58] sm:$0xff] %vm1918_vm13, %v2779_v51  ;;  %v2037_v59 = vsel %vm1918_vm13, %v1998_v14, 0.0  ;;  %v1936_v3 = vsel %vm1918_vm13, %v1826_v57, 0.0  ;;  %v1999_v11 = vmul.f32 %v1826_v57, %v1826_v57  ;;  %2534 = vst.msk [vmem:[%s4217_s20 + $0x48] sm:$0xff] %vm1918_vm13, %v1826_v57 }
 0x279   : > { %v2038_v26 = vadd.f32 %v2037_v59, %v2036_v15  ;;  %v1937_v35 = vadd.f32 %v1936_v3, %v1935_v34  ;;  %v1432_v23 = vpop.permute.xlu1 %1431  ;;  %v2043_v5 = vsel %vm1918_vm13, %v2001_v24, 0.0 }
 0x27a   : > { %v2039_v28 = vsel %vm1918_vm13, %v1999_v11, 0.0  ;;  %1499 = vst.msk [vmem:[#allocation2 + $0xe8] sm:$0xff] %vm1469_vm10, %v1432_v23  ;;  %v1430_v18 = vpop.permute.xlu0 %1429 }
 0x27b   : > { %v1939_v8 = vadd.f32 %v1938_v29, %v1937_v35  ;;  %v2040_v30 = vadd.f32 %v2039_v28, %v2038_v26  ;;  %1498 = vst.msk [vmem:[#allocation2 + $0xe0] sm:$0xff] %vm1469_vm10, %v1430_v18 }
 0x27d   : > { %v2042_v37 = vadd.f32 %v2041_v58, %v2040_v30  ;;  %v1436_v43 = vpop.permute.xlu1 %1435  ;;  %v1941_v0 = vadd.f32 %v1940_v50, %v1939_v8 }
 0x27e   : > { %1501 = vst.msk [vmem:[#allocation2 + $0xf8] sm:$0xff] %vm1469_vm10, %v1436_v43  ;;  %v1434_v46 = vpop.permute.xlu0 %1433 }
 0x27f   : > { %1500 = vst.msk [vmem:[#allocation2 + $0xf0] sm:$0xff] %vm1469_vm10, %v1434_v46  ;;  %v4320_v53 = vadd.f32 %v2043_v5, %v2042_v37 }
 0x281   : > { %v1566_v17 = vpop.permute.xlu1 %1565 }
 0x282   : > { %1633 = vst.msk [vmem:[#allocation2 + $0xe8] sm:$0xff] %vm1603_vm11, %v1566_v17  ;;  %v1564_v62 = vpop.permute.xlu0 %1563 }
 0x283   : > { %1632 = vst.msk [vmem:[#allocation2 + $0xe0] sm:$0xff] %vm1603_vm11, %v1564_v62 }
 0x285   : > { %v1570_v63 = vpop.permute.xlu1 %1569 }
 0x286   : > { %1635 = vst.msk [vmem:[#allocation2 + $0xf8] sm:$0xff] %vm1603_vm11, %v1570_v63  ;;  %v1568_v6 = vpop.permute.xlu0 %1567 }
 0x287   : > { %1634 = vst.msk [vmem:[#allocation2 + $0xf0] sm:$0xff] %vm1603_vm11, %v1568_v6 }
 0x289   : > { %v1665_v12 = vld [vmem:[#allocation2 + $0xe8] sm:$0xff] }
 0x28a   : > { %v1664_v22 = vld [vmem:[#allocation2 + $0xe0] sm:$0xff] }
 0x28b   : > { %v1682_v19 = vpack.c.bf16 %v1665_v12, %v1664_v22 }
 0x28c   : > { %v2804_v9 = vpop.f32.mrb[0].mxu1 }
 0x28d   : > { %2796 = vmatprep.mubr.msk.bf16.mxu0 %vm1704_vm12, %v1682_v19  ;;  %v1667_v52 = vld [vmem:[#allocation2 + $0xf8] sm:$0xff]  ;;  %2495 = vst.msk [vmem:[%s4333_s23 + $0x10] sm:$0xff] %vm1918_vm13, %v2804_v9  ;;  %v2194_v15 = vpop.f32.mrb[1].mxu1  ;;  %v2393_v36 = vmul.f32 %v2804_v9, %v2804_v9  ;;  %v2324_v2 = vsel %vm1918_vm13, %v2804_v9, 0.0 }
 0x28e   : > { %v1666_v7 = vld [vmem:[#allocation2 + $0xf0] sm:$0xff]  ;;  %v2321_v4 = vsel %vm1918_vm13, %v2194_v15, 0.0  ;;  %v2391_v1 = vmul.f32 %v2194_v15, %v2194_v15  ;;  %2493 = vst.msk [vmem:[%s4333_s23] sm:$0xff] %vm1918_vm13, %v2194_v15  ;;  %v2805_v10 = vpop.f32.mrb[2].mxu1 }
 0x28f   : > { %v1683_v49 = vpack.c.bf16 %v1667_v52, %v1666_v7  ;;  %2496 = vst.msk [vmem:[%s4333_s23 + $0x18] sm:$0xff] %vm1918_vm13, %v2805_v10  ;;  %v2197_v40 = vpop.f32.mrb[3].mxu1  ;;  %v2394_v25 = vmul.f32 %v2805_v10, %v2805_v10  ;;  %v2426_v42 = vsel %vm1918_vm13, %v2393_v36, 0.0  ;;  %v2326_v38 = vsel %vm1918_vm13, %v2805_v10, 0.0 }
 0x290   : > { %v2423_v16 = vsel %vm1918_vm13, %v2391_v1, 0.0  ;;  %v2322_v31 = vsel %vm1918_vm13, %v2197_v40, 0.0  ;;  %v2392_v44 = vmul.f32 %v2197_v40, %v2197_v40  ;;  %2494 = vst.msk [vmem:[%s4333_s23 + $0x8] sm:$0xff] %vm1918_vm13, %v2197_v40 }
 0x291   : > { %2797 = vmatmul.mubr.msk.bf16.gmra.mrb[28].mxu0 %vm1704_vm12, %v1683_v49  ;;  %v2323_v21 = vadd.f32 %v2322_v31, %v2321_v4  ;;  %v2428_v48 = vsel %vm1918_vm13, %v2394_v25, 0.0 }
 0x292   : > { %v2424_v61 = vsel %vm1918_vm13, %v2392_v44, 0.0 }
 0x293   : > { %v2325_v27 = vadd.f32 %v2324_v2, %v2323_v21  ;;  %v2425_v41 = vadd.f32 %v2424_v61, %v2423_v16 }
 0x294   : > { %v2808_v14 = vpop.f32.mrb[4].mxu1 }
 0x295   : > { %v2427_v57 = vadd.f32 %v2426_v42, %v2425_v41  ;;  %2499 = vst.msk [vmem:[%s4333_s23 + $0x30] sm:$0xff] %vm1918_vm13, %v2808_v14  ;;  %v2210_v47 = vpop.f32.mrb[5].mxu1  ;;  %v2327_v24 = vadd.f32 %v2326_v38, %v2325_v27  ;;  %v2332_v43 = vsel %vm1918_vm13, %v2808_v14, 0.0 }
 0x296   : > { %2497 = vst.msk [vmem:[%s4333_s23 + $0x20] sm:$0xff] %vm1918_vm13, %v2210_v47  ;;  %v2809_v35 = vpop.f32.mrb[6].mxu1  ;;  %v2328_v28 = vsel %vm1918_vm13, %v2210_v47, 0.0  ;;  %v2395_v58 = vmul.f32 %v2210_v47, %v2210_v47 }
 0x297   : > { %2500 = vst.msk [vmem:[%s4333_s23 + $0x38] sm:$0xff] %vm1918_vm13, %v2809_v35  ;;  %v2213_v18 = vpop.f32.mrb[7].mxu1  ;;  %v2429_v50 = vadd.f32 %v2428_v48, %v2427_v57  ;;  %v2329_v5 = vadd.f32 %v2328_v28, %v2327_v24  ;;  %v2398_v6 = vmul.f32 %v2809_v35, %v2809_v35  ;;  %v2334_v52 = vsel %vm1918_vm13, %v2809_v35, 0.0 }
 0x298   : > { %2498 = vst.msk [vmem:[%s4333_s23 + $0x28] sm:$0xff] %vm1918_vm13, %v2213_v18  ;;  %v2430_v17 = vsel %vm1918_vm13, %v2395_v58, 0.0  ;;  %v2330_v62 = vsel %vm1918_vm13, %v2213_v18, 0.0  ;;  %v2396_v22 = vmul.f32 %v2213_v18, %v2213_v18 }
 0x299   : > { %v2431_v63 = vadd.f32 %v2430_v17, %v2429_v50  ;;  %v2331_v12 = vadd.f32 %v2330_v62, %v2329_v5  ;;  %v2436_v40 = vsel %vm1918_vm13, %v2398_v6, 0.0 }
 0x29a   : > { %v2432_v15 = vsel %vm1918_vm13, %v2396_v22, 0.0 }
 0x29b   : > { %v2333_v9 = vadd.f32 %v2332_v43, %v2331_v12  ;;  %v2433_v4 = vadd.f32 %v2432_v15, %v2431_v63 }
 0x29c   : > { %v2812_v7 = vpop.f32.mrb[8].mxu1 }
 0x29d   : > { %2503 = vst.msk [vmem:[%s4333_s23 + $0x50] sm:$0xff] %vm1918_vm13, %v2812_v7  ;;  %v2226_v36 = vpop.f32.mrb[9].mxu1  ;;  %v2335_v16 = vadd.f32 %v2334_v52, %v2333_v9  ;;  %v2401_v21 = vmul.f32 %v2812_v7, %v2812_v7  ;;  %v2340_v42 = vsel %vm1918_vm13, %v2812_v7, 0.0 }
 0x29e   : > { %v2336_v1 = vsel %vm1918_vm13, %v2226_v36, 0.0  ;;  %v2399_v10 = vmul.f32 %v2226_v36, %v2226_v36  ;;  %2501 = vst.msk [vmem:[%s4333_s23 + $0x40] sm:$0xff] %vm1918_vm13, %v2226_v36  ;;  %v2813_v2 = vpop.f32.mrb[10].mxu1 }
 0x29f   : > { %2504 = vst.msk [vmem:[%s4333_s23 + $0x58] sm:$0xff] %vm1918_vm13, %v2813_v2  ;;  %v2229_v25 = vpop.f32.mrb[11].mxu1  ;;  %v2342_v41 = vsel %vm1918_vm13, %v2813_v2, 0.0 }
 0x2a0   : > { %v2338_v44 = vsel %vm1918_vm13, %v2229_v25, 0.0  ;;  %2502 = vst.msk [vmem:[%s4333_s23 + $0x48] sm:$0xff] %vm1918_vm13, %v2229_v25 }
 0x2a4   : > { %v2782_v32 = vpop.f32.mrb[12].mxu0 }
 0x2a5   : > { %v2004_v55 = vmul.f32 %v2782_v32, %v2782_v32  ;;  %2539 = vst.msk [vmem:[%s4217_s20 + $0x70] sm:$0xff] %vm1918_vm13, %v2782_v32  ;;  %v1839_v45 = vpop.f32.mrb[13].mxu0  ;;  %v1946_v59 = vsel %vm1918_vm13, %v2782_v32, 0.0  ;;  %v2400_v32 = vmul.f32 %v2229_v25, %v2229_v25 }
 0x2a6   : > { %v1942_v60 = vsel %vm1918_vm13, %v1839_v45, 0.0  ;;  %v2002_v39 = vmul.f32 %v1839_v45, %v1839_v45  ;;  %2537 = vst.msk [vmem:[%s4217_s20 + $0x60] sm:$0xff] %vm1918_vm13, %v1839_v45  ;;  %v2783_v56 = vpop.f32.mrb[14].mxu0  ;;  %v2438_v45 = vsel %vm1918_vm13, %v2399_v10, 0.0 }
 0x2a7   : > { %v1943_v13 = vadd.f32 %v1942_v60, %v1941_v0  ;;  %v2005_v20 = vmul.f32 %v2783_v56, %v2783_v56  ;;  %2540 = vst.msk [vmem:[%s4217_s20 + $0x78] sm:$0xff] %vm1918_vm13, %v2783_v56  ;;  %v1842_v33 = vpop.f32.mrb[15].mxu0  ;;  %v2049_v3 = vsel %vm1918_vm13, %v2004_v55, 0.0  ;;  %v1948_v23 = vsel %vm1918_vm13, %v2783_v56, 0.0 }
 0x2a8   : > { %v2045_v54 = vsel %vm1918_vm13, %v2002_v39, 0.0  ;;  %v1944_v51 = vsel %vm1918_vm13, %v1842_v33, 0.0  ;;  %v2003_v34 = vmul.f32 %v1842_v33, %v1842_v33  ;;  %2538 = vst.msk [vmem:[%s4217_s20 + $0x68] sm:$0xff] %vm1918_vm13, %v1842_v33  ;;  %v2397_v0 = vmul.f32 %v2808_v14, %v2808_v14 }
 0x2a9   : > { %v2046_v11 = vadd.f32 %v2045_v54, %v4320_v53  ;;  %v1945_v26 = vadd.f32 %v1944_v51, %v1943_v13  ;;  %v2051_v37 = vsel %vm1918_vm13, %v2005_v20, 0.0  ;;  %v2337_v55 = vadd.f32 %v2336_v1, %v2335_v16  ;;  %v2816_v13 = vpop.f32.mrb[12].mxu1 }
 0x2aa   : > { %v2047_v29 = vsel %vm1918_vm13, %v2003_v34, 0.0  ;;  %v2434_v49 = vsel %vm1918_vm13, %v2397_v0, 0.0  ;;  %v2402_v60 = vmul.f32 %v2813_v2, %v2813_v2  ;;  %v2440_v56 = vsel %vm1918_vm13, %v2400_v32, 0.0  ;;  %2507 = vst.msk [vmem:[%s4333_s23 + $0x70] sm:$0xff] %vm1918_vm13, %v2816_v13  ;;  %v2242_v38 = vpop.f32.mrb[13].mxu1 }
 0x2ab   : > { %v1947_v8 = vadd.f32 %v1946_v59, %v1945_v26  ;;  %v2048_v30 = vadd.f32 %v2047_v29, %v2046_v11  ;;  %v2435_v31 = vadd.f32 %v2434_v49, %v2433_v4  ;;  %v2339_v39 = vadd.f32 %v2338_v44, %v2337_v55  ;;  %2505 = vst.msk [vmem:[%s4333_s23 + $0x60] sm:$0xff] %vm1918_vm13, %v2242_v38  ;;  %v2817_v51 = vpop.f32.mrb[14].mxu1 }
 0x2ac   : > { %v2442_v20 = vsel %vm1918_vm13, %v2401_v21, 0.0  ;;  %v2344_v14 = vsel %vm1918_vm13, %v2242_v38, 0.0  ;;  %v2403_v54 = vmul.f32 %v2242_v38, %v2242_v38  ;;  %v2444_v34 = vsel %vm1918_vm13, %v2402_v60, 0.0  ;;  %2508 = vst.msk [vmem:[%s4333_s23 + $0x78] sm:$0xff] %vm1918_vm13, %v2817_v51  ;;  %v2245_v47 = vpop.f32.mrb[15].mxu1 }
 0x2ad   : > { %v2050_v46 = vadd.f32 %v2049_v3, %v2048_v30  ;;  %v4378_v53 = vadd.f32 %v1948_v23, %v1947_v8  ;;  %v2437_v61 = vadd.f32 %v2436_v40, %v2435_v31  ;;  %v2341_v33 = vadd.f32 %v2340_v42, %v2339_v39  ;;  %2506 = vst.msk [vmem:[%s4333_s23 + $0x68] sm:$0xff] %vm1918_vm13, %v2245_v47  ;;  %v2820_v50 = vpop.f32.mrb[16].mxu1 }
 0x2ae   : > { %v2346_v3 = vsel %vm1918_vm13, %v2245_v47, 0.0  ;;  %v2404_v11 = vmul.f32 %v2245_v47, %v2245_v47  ;;  %v2446_v35 = vsel %vm1918_vm13, %v2403_v54, 0.0  ;;  %v2348_v23 = vsel %vm1918_vm13, %v2816_v13, 0.0  ;;  %2511 = vst.msk [vmem:[%s4333_s23 + $0x90] sm:$0xff] %vm1918_vm13, %v2820_v50  ;;  %v2258_v0 = vpop.f32.mrb[17].mxu1 }
 0x2af   : > { %v4382_v19 = vadd.f32 %v2051_v37, %v2050_v46  ;;  %v2439_v27 = vadd.f32 %v2438_v45, %v2437_v61  ;;  %v2343_v57 = vadd.f32 %v2342_v41, %v2341_v33  ;;  %v2405_v29 = vmul.f32 %v2816_v13, %v2816_v13  ;;  %2509 = vst.msk [vmem:[%s4333_s23 + $0x80] sm:$0xff] %vm1918_vm13, %v2258_v0  ;;  %v2821_v62 = vpop.f32.mrb[18].mxu1 }
 0x2b0   : > { %v2406_v28 = vmul.f32 %v2817_v51, %v2817_v51  ;;  %v2448_v8 = vsel %vm1918_vm13, %v2404_v11, 0.0  ;;  %v2350_v58 = vsel %vm1918_vm13, %v2817_v51, 0.0  ;;  %v2352_v46 = vsel %vm1918_vm13, %v2258_v0, 0.0  ;;  %2512 = vst.msk [vmem:[%s4333_s23 + $0x98] sm:$0xff] %vm1918_vm13, %v2821_v62  ;;  %v2261_v12 = vpop.f32.mrb[19].mxu1 }
 0x2b1   : > { %v2441_v48 = vadd.f32 %v2440_v56, %v2439_v27  ;;  %v2345_v26 = vadd.f32 %v2344_v14, %v2343_v57  ;;  %v2450_v37 = vsel %vm1918_vm13, %v2405_v29, 0.0  ;;  %v2407_v17 = vmul.f32 %v2258_v0, %v2258_v0  ;;  %2510 = vst.msk [vmem:[%s4333_s23 + $0x88] sm:$0xff] %vm1918_vm13, %v2261_v12 }
 0x2b2   : > { %v2452_v63 = vsel %vm1918_vm13, %v2406_v28, 0.0  ;;  %v2354_v52 = vsel %vm1918_vm13, %v2261_v12, 0.0  ;;  %v2408_v7 = vmul.f32 %v2261_v12, %v2261_v12  ;;  %v2409_v49 = vmul.f32 %v2820_v50, %v2820_v50 }
 0x2b3   : > { %v2443_v59 = vadd.f32 %v2442_v20, %v2441_v48  ;;  %v2347_v18 = vadd.f32 %v2346_v3, %v2345_v26  ;;  %v2454_v15 = vsel %vm1918_vm13, %v2407_v17, 0.0  ;;  %v2356_v36 = vsel %vm1918_vm13, %v2820_v50, 0.0 }
 0x2b4   : > { %v2410_v1 = vmul.f32 %v2821_v62, %v2821_v62  ;;  %v2456_v2 = vsel %vm1918_vm13, %v2408_v7, 0.0  ;;  %v2358_v16 = vsel %vm1918_vm13, %v2821_v62, 0.0  ;;  %v2824_v25 = vpop.f32.mrb[20].mxu1  ;;  %v2458_v31 = vsel %vm1918_vm13, %v2409_v49, 0.0 }
 0x2b5   : > { %v2445_v24 = vadd.f32 %v2444_v34, %v2443_v59  ;;  %v2349_v43 = vadd.f32 %v2348_v23, %v2347_v18  ;;  %2515 = vst.msk [vmem:[%s4333_s23 + $0xb0] sm:$0xff] %vm1918_vm13, %v2824_v25  ;;  %v2274_v32 = vpop.f32.mrb[21].mxu1  ;;  %v2413_v13 = vmul.f32 %v2824_v25, %v2824_v25  ;;  %v2364_v38 = vsel %vm1918_vm13, %v2824_v25, 0.0 }
 0x2b6   : > { %v2360_v55 = vsel %vm1918_vm13, %v2274_v32, 0.0  ;;  %v2411_v45 = vmul.f32 %v2274_v32, %v2274_v32  ;;  %2513 = vst.msk [vmem:[%s4333_s23 + $0xa0] sm:$0xff] %vm1918_vm13, %v2274_v32  ;;  %v2825_v42 = vpop.f32.mrb[22].mxu1  ;;  %v2460_v61 = vsel %vm1918_vm13, %v2410_v1, 0.0 }
 0x2b7   : > { %v2447_v30 = vadd.f32 %v2446_v35, %v2445_v24  ;;  %v2351_v6 = vadd.f32 %v2350_v58, %v2349_v43  ;;  %2516 = vst.msk [vmem:[%s4333_s23 + $0xb8] sm:$0xff] %vm1918_vm13, %v2825_v42  ;;  %v2277_v39 = vpop.f32.mrb[23].mxu1  ;;  %v2414_v14 = vmul.f32 %v2825_v42, %v2825_v42  ;;  %v2366_v57 = vsel %vm1918_vm13, %v2825_v42, 0.0 }
 0x2b8   : > { %v2362_v27 = vsel %vm1918_vm13, %v2277_v39, 0.0  ;;  %v2412_v41 = vmul.f32 %v2277_v39, %v2277_v39  ;;  %2514 = vst.msk [vmem:[%s4333_s23 + $0xa8] sm:$0xff] %vm1918_vm13, %v2277_v39  ;;  %v2462_v33 = vsel %vm1918_vm13, %v2411_v45, 0.0  ;;  %v2466_v59 = vsel %vm1918_vm13, %v2413_v13, 0.0 }
 0x2b9   : > { %v2449_v5 = vadd.f32 %v2448_v8, %v2447_v30  ;;  %v2353_v9 = vadd.f32 %v2352_v46, %v2351_v6  ;;  %v2468_v28 = vsel %vm1918_vm13, %v2414_v14, 0.0 }
 0x2ba   : > { %v2464_v51 = vsel %vm1918_vm13, %v2412_v41, 0.0 }
 0x2bb   : > { %v2451_v22 = vadd.f32 %v2450_v37, %v2449_v5  ;;  %v2355_v10 = vadd.f32 %v2354_v52, %v2353_v9 }
 0x2bd   : > { %v2453_v4 = vadd.f32 %v2452_v63, %v2451_v22  ;;  %v2357_v44 = vadd.f32 %v2356_v36, %v2355_v10 }
 0x2bf   : > { %v2455_v40 = vadd.f32 %v2454_v15, %v2453_v4  ;;  %v2359_v60 = vadd.f32 %v2358_v16, %v2357_v44 }
 0x2c1   : > { %v2457_v21 = vadd.f32 %v2456_v2, %v2455_v40  ;;  %v2361_v20 = vadd.f32 %v2360_v55, %v2359_v60 }
 0x2c3   : > { %v2459_v56 = vadd.f32 %v2458_v31, %v2457_v21  ;;  %v2363_v54 = vadd.f32 %v2362_v27, %v2361_v20 }
 0x2c5   : > { %v2461_v48 = vadd.f32 %v2460_v61, %v2459_v56  ;;  %v2365_v3 = vadd.f32 %v2364_v38, %v2363_v54 }
 0x2c7   : > { %v2463_v34 = vadd.f32 %v2462_v33, %v2461_v48  ;;  %v2367_v18 = vadd.f32 %v2366_v57, %v2365_v3 }
 0x2c9   : > { %v2465_v26 = vadd.f32 %v2464_v51, %v2463_v34 }
 0x2cb   : > { %v2467_v30 = vadd.f32 %v2466_v59, %v2465_v26 }
 0x2cc   : > { %v2828_v47 = vpop.f32.mrb[24].mxu1 }
 0x2cd   : > { %2519 = vst.msk [vmem:[%s4333_s23 + $0xd0] sm:$0xff] %vm1918_vm13, %v2828_v47  ;;  %v2290_v11 = vpop.f32.mrb[25].mxu1  ;;  %v2417_v35 = vmul.f32 %v2828_v47, %v2828_v47  ;;  %v2372_v0 = vsel %vm1918_vm13, %v2828_v47, 0.0  ;;  %v2469_v62 = vadd.f32 %v2468_v28, %v2467_v30 }
 0x2ce   : > { %v2368_v23 = vsel %vm1918_vm13, %v2290_v11, 0.0  ;;  %v2415_v29 = vmul.f32 %v2290_v11, %v2290_v11  ;;  %2517 = vst.msk [vmem:[%s4333_s23 + $0xc0] sm:$0xff] %vm1918_vm13, %v2290_v11  ;;  %v2829_v24 = vpop.f32.mrb[26].mxu1 }
 0x2cf   : > { %2520 = vst.msk [vmem:[%s4333_s23 + $0xd8] sm:$0xff] %vm1918_vm13, %v2829_v24  ;;  %v2293_v8 = vpop.f32.mrb[27].mxu1  ;;  %v2418_v58 = vmul.f32 %v2829_v24, %v2829_v24  ;;  %v2369_v5 = vadd.f32 %v2368_v23, %v2367_v18  ;;  %v2474_v17 = vsel %vm1918_vm13, %v2417_v35, 0.0  ;;  %v2374_v6 = vsel %vm1918_vm13, %v2829_v24, 0.0 }
 0x2d0   : > { %v2370_v50 = vsel %vm1918_vm13, %v2293_v8, 0.0  ;;  %v2416_v37 = vmul.f32 %v2293_v8, %v2293_v8  ;;  %2518 = vst.msk [vmem:[%s4333_s23 + $0xc8] sm:$0xff] %vm1918_vm13, %v2293_v8  ;;  %v2470_v63 = vsel %vm1918_vm13, %v2415_v29, 0.0 }
 0x2d1   : > { %v2371_v49 = vadd.f32 %v2370_v50, %v2369_v5  ;;  %v2476_v4 = vsel %vm1918_vm13, %v2418_v58, 0.0  ;;  %v2471_v25 = vadd.f32 %v2470_v63, %v2469_v62 }
 0x2d2   : > { %v2472_v1 = vsel %vm1918_vm13, %v2416_v37, 0.0 }
 0x2d3   : > { %v2373_v21 = vadd.f32 %v2372_v0, %v2371_v49  ;;  %v2473_v60 = vadd.f32 %v2472_v1, %v2471_v25 }
 0x2d4   : > { %v2786_v43 = vpop.f32.mrb[16].mxu0  ;;  %v2832_v10 = vpop.f32.mrb[28].mxu1 }
 0x2d5   : > { %2543 = vst.msk [vmem:[%s4217_s20 + $0x90] sm:$0xff] %vm1918_vm13, %v2786_v43  ;;  %v1855_v46 = vpop.f32.mrb[17].mxu0  ;;  %v2008_v12 = vmul.f32 %v2786_v43, %v2786_v43  ;;  %2523 = vst.msk [vmem:[%s4333_s23 + $0xf0] sm:$0xff] %vm1918_vm13, %v2832_v10  ;;  %v1954_v31 = vsel %vm1918_vm13, %v2786_v43, 0.0  ;;  %v2375_v41 = vadd.f32 %v2374_v6, %v2373_v21  ;;  %v2475_v20 = vadd.f32 %v2474_v17, %v2473_v60 }
 0x2d6   : > { %v1950_v22 = vsel %vm1918_vm13, %v1855_v46, 0.0  ;;  %v2006_v52 = vmul.f32 %v1855_v46, %v1855_v46  ;;  %2541 = vst.msk [vmem:[%s4217_s20 + $0x80] sm:$0xff] %vm1918_vm13, %v1855_v46  ;;  %v2787_v7 = vpop.f32.mrb[18].mxu0  ;;  %v2380_v33 = vsel %vm1918_vm13, %v2832_v10, 0.0  ;;  %v2421_v54 = vmul.f32 %v2832_v10, %v2832_v10 }
 0x2d7   : > { %v1951_v9 = vadd.f32 %v1950_v22, %v4378_v53  ;;  %v2009_v15 = vmul.f32 %v2787_v7, %v2787_v7  ;;  %2544 = vst.msk [vmem:[%s4217_s20 + $0x98] sm:$0xff] %vm1918_vm13, %v2787_v7  ;;  %v1858_v36 = vpop.f32.mrb[19].mxu0  ;;  %v2306_v53 = vpop.f32.mrb[29].mxu1  ;;  %v2057_v45 = vsel %vm1918_vm13, %v2008_v12, 0.0  ;;  %v1956_v42 = vsel %vm1918_vm13, %v2787_v7, 0.0 }
 0x2d8   : > { %v2053_v2 = vsel %vm1918_vm13, %v2006_v52, 0.0  ;;  %v1952_v40 = vsel %vm1918_vm13, %v1858_v36, 0.0  ;;  %v2007_v16 = vmul.f32 %v1858_v36, %v1858_v36  ;;  %2542 = vst.msk [vmem:[%s4217_s20 + $0x88] sm:$0xff] %vm1918_vm13, %v1858_v36  ;;  %2521 = vst.msk [vmem:[%s4333_s23 + $0xe0] sm:$0xff] %vm1918_vm13, %v2306_v53  ;;  %v2833_v55 = vpop.f32.mrb[30].mxu1  ;;  %v2419_v38 = vmul.f32 %v2306_v53, %v2306_v53 }
 0x2d9   : > { %v2054_v44 = vadd.f32 %v2053_v2, %v4382_v19  ;;  %v1953_v32 = vadd.f32 %v1952_v40, %v1951_v9  ;;  %2524 = vst.msk [vmem:[%s4333_s23 + $0xf8] sm:$0xff] %vm1918_vm13, %v2833_v55  ;;  %v2309_v39 = vpop.f32.mrb[31].mxu1  ;;  %v2376_v19 = vsel %vm1918_vm13, %v2306_v53, 0.0  ;;  %v2059_v13 = vsel %vm1918_vm13, %v2009_v15, 0.0 }
 0x2da   : > { %v2055_v61 = vsel %vm1918_vm13, %v2007_v16, 0.0  ;;  %2522 = vst.msk [vmem:[%s4333_s23 + $0xe8] sm:$0xff] %vm1918_vm13, %v2309_v39  ;;  %v2377_v51 = vadd.f32 %v2376_v19, %v2375_v41  ;;  %v2477_v34 = vadd.f32 %v2476_v4, %v2475_v20  ;;  %v2478_v57 = vsel %vm1918_vm13, %v2419_v38, 0.0 }
 0x2db   : > { %v1955_v56 = vadd.f32 %v1954_v31, %v1953_v32  ;;  %v2056_v27 = vadd.f32 %v2055_v61, %v2054_v44  ;;  %v2378_v47 = vsel %vm1918_vm13, %v2309_v39, 0.0  ;;  %v2420_v59 = vmul.f32 %v2309_v39, %v2309_v39 }
 0x2dc   : > { %v2422_v11 = vmul.f32 %v2833_v55, %v2833_v55  ;;  %v2379_v26 = vadd.f32 %v2378_v47, %v2377_v51  ;;  %v2479_v35 = vadd.f32 %v2478_v57, %v2477_v34  ;;  %v2382_v23 = vsel %vm1918_vm13, %v2833_v55, 0.0 }
 0x2dd   : > { %v2058_v48 = vadd.f32 %v2057_v45, %v2056_v27  ;;  %v1957_v14 = vadd.f32 %v1956_v42, %v1955_v56  ;;  %v2480_v29 = vsel %vm1918_vm13, %v2420_v59, 0.0  ;;  %v2482_v24 = vsel %vm1918_vm13, %v2421_v54, 0.0 }
 0x2de   : > { %v2381_v28 = vadd.f32 %v2380_v33, %v2379_v26  ;;  %v2481_v18 = vadd.f32 %v2480_v29, %v2479_v35  ;;  %v2484_v8 = vsel %vm1918_vm13, %v2422_v11, 0.0 }
 0x2df   : > { %v2060_v3 = vadd.f32 %v2059_v13, %v2058_v48 }
 0x2e0   : > { %v2383_v30 = vadd.f32 %v2382_v23, %v2381_v28  ;;  %v2483_v58 = vadd.f32 %v2482_v24, %v2481_v18 }
 0x2e2   : > { %v2384_v50 = vrot.slane %v2383_v30, 4  ;;  %v2485_v37 = vadd.f32 %v2484_v8, %v2483_v58 }
 0x2e4   : > { %v2385_v43 = vadd.f32 %v2384_v50, %v2383_v30  ;;  %v2486_v0 = vrot.slane %v2485_v37, 4 }
 0x2e6   : > { %v2386_v5 = vrot.slane %v2385_v43, 2  ;;  %v2487_v46 = vadd.f32 %v2486_v0, %v2485_v37 }
 0x2e8   : > { %v2387_v17 = vadd.f32 %v2386_v5, %v2385_v43  ;;  %v2488_v62 = vrot.slane %v2487_v46, 2 }
 0x2ea   : > { %v2388_v63 = vrot.slane %v2387_v17, 1  ;;  %v2489_v6 = vadd.f32 %v2488_v62, %v2487_v46 }
 0x2ec   : > { %v2389_v12 = vadd.f32 %v2388_v63, %v2387_v17  ;;  %v2490_v22 = vrot.slane %v2489_v6, 1 }
 0x2ee   : > { %2390 = vst.msk [vmem:[%s4506_s27 + $0x2] sm:$0x1] %vm1988_vm14, %v2389_v12  ;;  %v2491_v52 = vadd.f32 %v2490_v22, %v2489_v6 }
 0x2f0   : > { %2492 = vst.msk [vmem:[%s4506_s27 + $0x3] sm:$0x1] %vm1988_vm14, %v2491_v52 }
 0x304   : > { %v2790_v7 = vpop.f32.mrb[20].mxu0 }
 0x305   : > { %2547 = vst.msk [vmem:[%s4217_s20 + $0xb0] sm:$0xff] %vm1918_vm13, %v2790_v7  ;;  %v1871_v49 = vpop.f32.mrb[21].mxu0  ;;  %v2012_v10 = vmul.f32 %v2790_v7, %v2790_v7  ;;  %v1962_v31 = vsel %vm1918_vm13, %v2790_v7, 0.0 }
 0x306   : > { %v1958_v9 = vsel %vm1918_vm13, %v1871_v49, 0.0  ;;  %v2010_v15 = vmul.f32 %v1871_v49, %v1871_v49  ;;  %2545 = vst.msk [vmem:[%s4217_s20 + $0xa0] sm:$0xff] %vm1918_vm13, %v1871_v49  ;;  %v2791_v36 = vpop.f32.mrb[22].mxu0 }
 0x307   : > { %v1959_v4 = vadd.f32 %v1958_v9, %v1957_v14  ;;  %2548 = vst.msk [vmem:[%s4217_s20 + $0xb8] sm:$0xff] %vm1918_vm13, %v2791_v36  ;;  %v1874_v1 = vpop.f32.mrb[23].mxu0  ;;  %v2013_v44 = vmul.f32 %v2791_v36, %v2791_v36  ;;  %v2065_v45 = vsel %vm1918_vm13, %v2012_v10, 0.0  ;;  %v1964_v42 = vsel %vm1918_vm13, %v2791_v36, 0.0 }
 0x308   : > { %v2061_v2 = vsel %vm1918_vm13, %v2010_v15, 0.0  ;;  %v1960_v40 = vsel %vm1918_vm13, %v1874_v1, 0.0  ;;  %v2011_v16 = vmul.f32 %v1874_v1, %v1874_v1  ;;  %2546 = vst.msk [vmem:[%s4217_s20 + $0xa8] sm:$0xff] %vm1918_vm13, %v1874_v1 }
 0x309   : > { %v2062_v25 = vadd.f32 %v2061_v2, %v2060_v3  ;;  %v1961_v53 = vadd.f32 %v1960_v40, %v1959_v4  ;;  %v2067_v39 = vsel %vm1918_vm13, %v2013_v44, 0.0 }
 0x30a   : > { %v2063_v32 = vsel %vm1918_vm13, %v2011_v16, 0.0 }
 0x30b   : > { %v1963_v21 = vadd.f32 %v1962_v31, %v1961_v53  ;;  %v2064_v55 = vadd.f32 %v2063_v32, %v2062_v25 }
 0x30d   : > { %v2066_v61 = vadd.f32 %v2065_v45, %v2064_v55  ;;  %v1965_v60 = vadd.f32 %v1964_v42, %v1963_v21 }
 0x30f   : > { %v2068_v56 = vadd.f32 %v2067_v39, %v2066_v61 }
 0x334   : > { %v2794_v27 = vpop.f32.mrb[24].mxu0 }
 0x335   : > { %2551 = vst.msk [vmem:[%s4217_s20 + $0xd0] sm:$0xff] %vm1918_vm13, %v2794_v27  ;;  %v1887_v41 = vpop.f32.mrb[25].mxu0  ;;  %v2016_v48 = vmul.f32 %v2794_v27, %v2794_v27  ;;  %v1970_v47 = vsel %vm1918_vm13, %v2794_v27, 0.0 }
 0x336   : > { %v1966_v19 = vsel %vm1918_vm13, %v1887_v41, 0.0  ;;  %v2014_v13 = vmul.f32 %v1887_v41, %v1887_v41  ;;  %2549 = vst.msk [vmem:[%s4217_s20 + $0xc0] sm:$0xff] %vm1918_vm13, %v1887_v41  ;;  %v2795_v20 = vpop.f32.mrb[26].mxu0 }
 0x337   : > { %v1967_v33 = vadd.f32 %v1966_v19, %v1965_v60  ;;  %2552 = vst.msk [vmem:[%s4217_s20 + $0xd8] sm:$0xff] %vm1918_vm13, %v2795_v20  ;;  %v1890_v38 = vpop.f32.mrb[27].mxu0  ;;  %v2017_v59 = vmul.f32 %v2795_v20, %v2795_v20  ;;  %v2073_v35 = vsel %vm1918_vm13, %v2016_v48, 0.0  ;;  %v1972_v23 = vsel %vm1918_vm13, %v2795_v20, 0.0 }
 0x338   : > { %v2069_v14 = vsel %vm1918_vm13, %v2014_v13, 0.0  ;;  %v1968_v54 = vsel %vm1918_vm13, %v1890_v38, 0.0  ;;  %v2015_v51 = vmul.f32 %v1890_v38, %v1890_v38  ;;  %2550 = vst.msk [vmem:[%s4217_s20 + $0xc8] sm:$0xff] %vm1918_vm13, %v1890_v38 }
 0x339   : > { %v2070_v34 = vadd.f32 %v2069_v14, %v2068_v56  ;;  %v1969_v57 = vadd.f32 %v1968_v54, %v1967_v33  ;;  %v2075_v28 = vsel %vm1918_vm13, %v2017_v59, 0.0 }
 0x33a   : > { %v2071_v3 = vsel %vm1918_vm13, %v2015_v51, 0.0 }
 0x33b   : > { %v1971_v11 = vadd.f32 %v1970_v47, %v1969_v57  ;;  %v2072_v26 = vadd.f32 %v2071_v3, %v2070_v34 }
 0x33d   : > { %v2074_v29 = vadd.f32 %v2073_v35, %v2072_v26  ;;  %v1973_v24 = vadd.f32 %v1972_v23, %v1971_v11 }
 0x33f   : > { %v2076_v18 = vadd.f32 %v2075_v28, %v2074_v29 }
 0x364   : > { %v2798_v8 = vpop.f32.mrb[28].mxu0 }
 0x365   : > { %2555 = vst.msk [vmem:[%s4217_s20 + $0xf0] sm:$0xff] %vm1918_vm13, %v2798_v8  ;;  %v1903_v30 = vpop.f32.mrb[29].mxu0  ;;  %v2020_v5 = vmul.f32 %v2798_v8, %v2798_v8  ;;  %v1978_v12 = vsel %vm1918_vm13, %v2798_v8, 0.0 }
 0x366   : > { %v1974_v58 = vsel %vm1918_vm13, %v1903_v30, 0.0  ;;  %v2018_v50 = vmul.f32 %v1903_v30, %v1903_v30  ;;  %2553 = vst.msk [vmem:[%s4217_s20 + $0xe0] sm:$0xff] %vm1918_vm13, %v1903_v30  ;;  %v2799_v37 = vpop.f32.mrb[30].mxu0 }
 0x367   : > { %v1975_v43 = vadd.f32 %v1974_v58, %v1973_v24  ;;  %2556 = vst.msk [vmem:[%s4217_s20 + $0xf8] sm:$0xff] %vm1918_vm13, %v2799_v37  ;;  %v1906_v0 = vpop.f32.mrb[31].mxu0  ;;  %v2021_v22 = vmul.f32 %v2799_v37, %v2799_v37  ;;  %v2081_v9 = vsel %vm1918_vm13, %v2020_v5, 0.0  ;;  %v1980_v15 = vsel %vm1918_vm13, %v2799_v37, 0.0 }
 0x368   : > { %v2077_v46 = vsel %vm1918_vm13, %v2018_v50, 0.0  ;;  %v1976_v17 = vsel %vm1918_vm13, %v1906_v0, 0.0  ;;  %v2019_v62 = vmul.f32 %v1906_v0, %v1906_v0  ;;  %2554 = vst.msk [vmem:[%s4217_s20 + $0xe8] sm:$0xff] %vm1918_vm13, %v1906_v0 }
 0x369   : > { %v2078_v63 = vadd.f32 %v2077_v46, %v2076_v18  ;;  %v1977_v6 = vadd.f32 %v1976_v17, %v1975_v43  ;;  %v2083_v1 = vsel %vm1918_vm13, %v2021_v22, 0.0 }
 0x36a   : > { %v2079_v52 = vsel %vm1918_vm13, %v2019_v62, 0.0 }
 0x36b   : > { %v1979_v7 = vadd.f32 %v1978_v12, %v1977_v6  ;;  %v2080_v49 = vadd.f32 %v2079_v52, %v2078_v63 }
 0x36d   : > { %v1981_v36 = vadd.f32 %v1980_v15, %v1979_v7  ;;  %v2082_v4 = vadd.f32 %v2081_v9, %v2080_v49 }
 0x36f   : > { %v1982_v10 = vrot.slane %v1981_v36, 4  ;;  %v2084_v2 = vadd.f32 %v2083_v1, %v2082_v4 }
 0x371   : > { %v1983_v40 = vadd.f32 %v1982_v10, %v1981_v36  ;;  %v2085_v16 = vrot.slane %v2084_v2, 4 }
 0x373   : > { %v1984_v25 = vrot.slane %v1983_v40, 2  ;;  %v2086_v53 = vadd.f32 %v2085_v16, %v2084_v2 }
 0x375   : > { %v1985_v31 = vadd.f32 %v1984_v25, %v1983_v40  ;;  %v2087_v44 = vrot.slane %v2086_v53, 2 }
 0x377   : > { %v1986_v32 = vrot.slane %v1985_v31, 1  ;;  %v2088_v21 = vadd.f32 %v2087_v44, %v2086_v53 }
 0x379   : > { %v1987_v55 = vadd.f32 %v1986_v32, %v1985_v31  ;;  %v2089_v45 = vrot.slane %v2088_v21, 1 }
 0x37b   : > { %1989 = vst.msk [vmem:[%s4506_s27] sm:$0x1] %vm1988_vm14, %v1987_v55  ;;  %v2090_v42 = vadd.f32 %v2089_v45, %v2088_v21 }
 0x37d   : > { %2091 = vst.msk [vmem:[%s4506_s27 + $0x1] sm:$0x1] %vm1988_vm14, %v2090_v42 }
 0x37e PF: > { %s16_s18 = sadd.s32 1, %s2862_s18  }
 0x37f   : > { %p13_p4 = scmp.ge.s32.totalorder %s16_s18, 4  }
 0x381   :  { %15 = sbr.rel (!%p13_p4) target bundleno = 1 (0x1), region = 86 }

// kernel: basic_block_forward.4
= control target key start
LH: loop header
LB: loop body
LE: loop exit
PB: predicated region body
PF: predicated region fallthrough
CT: control target
= control target key end

     0   :  { %s2838_s18 = smov 0   ;;  %s4015_s0 = inlined_call_operand.vmem [shape: f32[2,16,16,8], index: 0, kind: input, shape index: {}]   ;;  %s4016_s1 = inlined_call_operand.vmem [shape: f32[1,8], index: 1, kind: input, shape index: {}]   ;;  %s4017_s2 = inlined_call_operand.vmem [shape: f32[1,8], index: 2, kind: input, shape index: {}]   ;;  %s4018_s3 = inlined_call_operand.vmem [shape: bf16[72,8], index: 3, kind: input, shape index: {}]   ;;  %s4019_s4 = inlined_call_operand.vmem [shape: f32[2,16,16,8], index: 4, kind: output, shape index: {0}]   ;;  %s4020_s5 = inlined_call_operand.vmem [shape: f32[2,2,8], index: 5, kind: output, shape index: {1}]  }
   0x1 LB: > { %s2655_s19 = sadd.s32 4294967295, %s2797_s18   ;;  %p2659_p0 = scmp.ge.s32.totalorder %s2797_s18, 1  ;;  %s2797_s18 = sphi %s2838_s18, %s16_s18  }
   0x2   : > { %p190_p1 = scmp.lt.s32.totalorder %s2797_s18, 3 }
   0x4   : > { %p191_p2 = pnand %p2659_p0, %p190_p1 }
   0x5   : > { %vm379_vm0 = vcmask (!%p191_p2), 64512   ;;  %vm388_vm1 = vcmask (!%p191_p2), 57344   ;;  %p2848_p3 = scmp.lt.s32.totalorder (!%p191_p2), %s2655_s19, 1  ;;  %vm382_vm2 = vcmask (!%p191_p2), 58368   ;;  %v2799_v0 = vmov (!%p191_p2), 0.0   ;;  %s2800_s29 = smov (!%p191_p2), 8  }
   0x6   : > { %194 = sbr.rel (%p191_p2) target bundleno = 905 (0x389), region = 36  ;;  %380 = vst.msk [vmem:[#allocation2] sm:$0xff] (!%p191_p2), %vm379_vm0, %v2799_v0  ;;  %381 = vst.msk [vmem:[#allocation2 + $0x8] sm:$0xff] (!%p191_p2), %vm379_vm0, %v2799_v0  ;;  %v2900_v1 = vld [vmem:[%s4016_s1] ss:$0 sm:$0xff] (!%p191_p2)  ;;  %s2801_s30 = smov (!%p191_p2), 16  }
   0x7   : > { %385 = vst.msk [vmem:[#allocation2 + $0x198] sm:$0xff] (!%p191_p2), %vm379_vm0, %v2799_v0  ;;  %386 = vst.msk [vmem:[#allocation2 + $0x1a0] sm:$0xff] (!%p191_p2), %vm379_vm0, %v2799_v0  ;;  %v2916_v2 = vld [vmem:[%s4017_s2] ss:$0 sm:$0xff] (!%p191_p2)  ;;  %vm682_vm3 = vcmask (!%p191_p2), 130112   ;;  %s2802_s6 = smov (!%p191_p2), 24  }
   0x8   : > { %390 = vst.msk [vmem:[#allocation2 + $0x18] sm:$0x1] (!%p191_p2), %vm388_vm1, %v2799_v0  ;;  %391 = vst.msk [vmem:[#allocation2 + $0x30] sm:$0x1] (!%p191_p2), %vm388_vm1, %v2799_v0  ;;  %s2803_s7 = smov (!%p191_p2), 32   ;;  %s2804_s8 = smov (!%p191_p2), 40  }
   0x9   : > { %392 = vst.msk [vmem:[#allocation2 + $0x48] sm:$0x1] (!%p191_p2), %vm388_vm1, %v2799_v0  ;;  %393 = vst.msk [vmem:[#allocation2 + $0x60] sm:$0x1] (!%p191_p2), %vm388_vm1, %v2799_v0  ;;  %s2805_s9 = smov (!%p191_p2), 48   ;;  %s2806_s14 = smov (!%p191_p2), 56  }
   0xa   : > { %394 = vst.msk [vmem:[#allocation2 + $0x78] sm:$0x1] (!%p191_p2), %vm388_vm1, %v2799_v0  ;;  %395 = vst.msk [vmem:[#allocation2 + $0x90] sm:$0x1] (!%p191_p2), %vm388_vm1, %v2799_v0  ;;  %vm875_vm4 = vcmask (!%p191_p2), 195712   ;;  %s2807_s21 = smov (!%p191_p2), 64  }
   0xb   : > { %396 = vst.msk [vmem:[#allocation2 + $0xa8] sm:$0x1] (!%p191_p2), %vm388_vm1, %v2799_v0  ;;  %397 = vst.msk [vmem:[#allocation2 + $0xc0] sm:$0x1] (!%p191_p2), %vm388_vm1, %v2799_v0  ;;  %vm2200_vm5 = vcmask (!%p191_p2), 1043456   ;;  %vm1068_vm6 = vcmask (!%p191_p2), 261312  }
   0xc   : > { %398 = vst.msk [vmem:[#allocation2 + $0xd8] sm:$0x1] (!%p191_p2), %vm388_vm1, %v2799_v0  ;;  %399 = vst.msk [vmem:[#allocation2 + $0xf0] sm:$0x1] (!%p191_p2), %vm388_vm1, %v2799_v0  ;;  %vm1261_vm7 = vcmask (!%p191_p2), 326912   ;;  %vm1454_vm8 = vcmask (!%p191_p2), 392512  }
   0xd   : > { %400 = vst.msk [vmem:[#allocation2 + $0x108] sm:$0x1] %vm388_vm1, %v2799_v0  ;;  %401 = vst.msk [vmem:[#allocation2 + $0x120] sm:$0x1] %vm388_vm1, %v2799_v0  ;;  %s4023_s19 = smov (!%p2848_p3, %s2655_s19), 1  ;;  %v522_v12 = vld [vmem:[#allocation2 + $0x1] sm:$0xff] }
   0xe   : > { %402 = vst.msk [vmem:[#allocation2 + $0x138] sm:$0x1] %vm388_vm1, %v2799_v0  ;;  %403 = vst.msk [vmem:[#allocation2 + $0x150] sm:$0x1] %vm388_vm1, %v2799_v0  ;;  %s2690_s23 = sshll.u32 %s4023_s19, 8  ;;  %586 = vrot.lane.b32.xlu0 %v522_v12, %s2800_s29  ;;  %vm1648_vm9 = vcmask 458112  }
   0xf   : > { %404 = vst.msk [vmem:[#allocation2 + $0x168] sm:$0x1] %vm388_vm1, %v2799_v0  ;;  %405 = vst.msk [vmem:[#allocation2 + $0x180] sm:$0x1] %vm388_vm1, %v2799_v0  ;;  %s2911_s26 = scalar_lea.vmem %s4015_s0, %s2690_s23  ;;  %vm1841_vm10 = vcmask 523712   ;;  %vm2034_vm11 = vcmask 589312  }
  0x10   : > { %408 = vst.msk [vmem:[#allocation2 + $0x29] sm:$0x1] %vm388_vm1, %v2799_v0  ;;  %409 = vst.msk [vmem:[#allocation2 + $0x41] sm:$0x1] %vm388_vm1, %v2799_v0  ;;  %v237_v3 = vld [vmem:[%s2911_s26] sm:$0xff]  ;;  %v238_v4 = vld [vmem:[%s2911_s26 + $0x8] sm:$0xff] }
  0x11   : > { %410 = vst.msk [vmem:[#allocation2 + $0x59] sm:$0x1] %vm388_vm1, %v2799_v0  ;;  %411 = vst.msk [vmem:[#allocation2 + $0x71] sm:$0x1] %vm388_vm1, %v2799_v0  ;;  %v239_v5 = vld [vmem:[%s2911_s26 + $0x10] sm:$0xff]  ;;  %v276_v6 = vmul.f32 %v2900_v1, %v237_v3  ;;  %v277_v7 = vmul.f32 %v2900_v1, %v238_v4  ;;  %v240_v9 = vld [vmem:[%s2911_s26 + $0x18] sm:$0xff] }
  0x12   : > { %412 = vst.msk [vmem:[#allocation2 + $0x89] sm:$0x1] %vm388_vm1, %v2799_v0  ;;  %413 = vst.msk [vmem:[#allocation2 + $0xa1] sm:$0x1] %vm388_vm1, %v2799_v0  ;;  %v278_v8 = vmul.f32 %v2900_v1, %v239_v5  ;;  %v241_v10 = vld [vmem:[%s2911_s26 + $0x20] sm:$0xff]  ;;  %v242_v11 = vld [vmem:[%s2911_s26 + $0x28] sm:$0xff]  ;;  %v279_v13 = vmul.f32 %v2900_v1, %v240_v9 }
  0x13   : > { %414 = vst.msk [vmem:[#allocation2 + $0xb9] sm:$0x1] %vm388_vm1, %v2799_v0  ;;  %415 = vst.msk [vmem:[#allocation2 + $0xd1] sm:$0x1] %vm388_vm1, %v2799_v0  ;;  %v280_v14 = vmul.f32 %v2900_v1, %v241_v10  ;;  %v281_v15 = vmul.f32 %v2900_v1, %v242_v11  ;;  %v243_v16 = vld [vmem:[%s2911_s26 + $0x30] sm:$0xff]  ;;  %v315_v17 = vadd.f32 %v2916_v2, %v276_v6  ;;  %v244_v22 = vld [vmem:[%s2911_s26 + $0x38] sm:$0xff] }
  0x14   : > { %416 = vst.msk [vmem:[#allocation2 + $0xe9] sm:$0x1] %vm388_vm1, %v2799_v0  ;;  %417 = vst.msk [vmem:[#allocation2 + $0x101] sm:$0x1] %vm388_vm1, %v2799_v0  ;;  %v316_v19 = vadd.f32 %v2916_v2, %v277_v7  ;;  %v317_v20 = vadd.f32 %v2916_v2, %v278_v8  ;;  %v282_v21 = vmul.f32 %v2900_v1, %v243_v16  ;;  %v245_v27 = vld [vmem:[%s2911_s26 + $0x40] sm:$0xff]  ;;  %v246_v28 = vld [vmem:[%s2911_s26 + $0x48] sm:$0xff] }
  0x15   : > { %418 = vst.msk [vmem:[#allocation2 + $0x119] sm:$0x1] %vm388_vm1, %v2799_v0  ;;  %419 = vst.msk [vmem:[#allocation2 + $0x131] sm:$0x1] %vm388_vm1, %v2799_v0  ;;  %v318_v23 = vadd.f32 %v2916_v2, %v279_v13  ;;  %v319_v24 = vadd.f32 %v2916_v2, %v280_v14  ;;  %v320_v25 = vadd.f32 %v2916_v2, %v281_v15  ;;  %v247_v29 = vld [vmem:[%s2911_s26 + $0x50] sm:$0xff]  ;;  %v347_v30 = vmax.f32 %v315_v17, 0.0 }
  0x16   : > { %420 = vst.msk [vmem:[#allocation2 + $0x149] sm:$0x1] %vm388_vm1, %v2799_v0  ;;  %421 = vst.msk [vmem:[#allocation2 + $0x161] sm:$0x1] %vm388_vm1, %v2799_v0  ;;  %v283_v26 = vmul.f32 %v2900_v1, %v244_v22  ;;  %v348_v31 = vmax.f32 %v316_v19, 0.0  ;;  %v349_v32 = vmax.f32 %v317_v20, 0.0  ;;  %v321_v33 = vadd.f32 %v2916_v2, %v282_v21 }
  0x17   : > { %422 = vst.msk [vmem:[#allocation2 + $0x179] sm:$0x1] %vm388_vm1, %v2799_v0  ;;  %423 = vst.msk [vmem:[#allocation2 + $0x191] sm:$0x1] %vm388_vm1, %v2799_v0  ;;  %v248_v34 = vld [vmem:[%s2911_s26 + $0x58] sm:$0xff]  ;;  %v249_v35 = vld [vmem:[%s2911_s26 + $0x60] sm:$0xff]  ;;  %v284_v43 = vmul.f32 %v2900_v1, %v245_v27  ;;  %v285_v44 = vmul.f32 %v2900_v1, %v246_v28  ;;  %v286_v45 = vmul.f32 %v2900_v1, %v247_v29 }
  0x18   : > { %383 = vst.msk [vmem:[#allocation2 + $0x10] sm:$0x3] %vm382_vm2, %v2799_v0  ;;  %387 = vst.msk [vmem:[#allocation2 + $0x1a8] sm:$0x3] %vm382_vm2, %v2799_v0  ;;  %v250_v36 = vld [vmem:[%s2911_s26 + $0x68] sm:$0xff]  ;;  %v350_v37 = vmax.f32 %v318_v23, 0.0  ;;  %v322_v40 = vadd.f32 %v2916_v2, %v283_v26  ;;  %v287_v48 = vmul.f32 %v2900_v1, %v248_v34  ;;  %v288_v49 = vmul.f32 %v2900_v1, %v249_v35 }
  0x19   : > { %389 = vst.msk [vmem:[#allocation2] sm:$0x1] %vm388_vm1, %v2799_v0  ;;  %406 = vst.msk [vmem:[#allocation2 + $0x198] sm:$0x1] %vm388_vm1, %v2799_v0  ;;  %v351_v38 = vmax.f32 %v319_v24, 0.0  ;;  %v352_v39 = vmax.f32 %v320_v25, 0.0  ;;  %v289_v50 = vmul.f32 %v2900_v1, %v250_v36  ;;  %v323_v51 = vadd.f32 %v2916_v2, %v284_v43 }
  0x1a   : > { %407 = vst.msk [vmem:[#allocation2 + $0x11] sm:$0x1] %vm388_vm1, %v2799_v0  ;;  %424 = vst.msk [vmem:[#allocation2 + $0x1a9] sm:$0x1] %vm388_vm1, %v2799_v0  ;;  %v251_v41 = vld [vmem:[%s2911_s26 + $0x70] sm:$0xff]  ;;  %v353_v42 = vmax.f32 %v321_v33, 0.0  ;;  %v324_v52 = vadd.f32 %v2916_v2, %v285_v44  ;;  %v325_v53 = vadd.f32 %v2916_v2, %v286_v45  ;;  %v326_v57 = vadd.f32 %v2916_v2, %v287_v48 }
  0x1b   : > { %426 = vst.msk [vmem:[#allocation2 + $0x19] sm:$0xff] %vm379_vm0, %v347_v30  ;;  %427 = vst.msk [vmem:[#allocation2 + $0x21] sm:$0xff] %vm379_vm0, %v348_v31  ;;  %v252_v46 = vld [vmem:[%s2911_s26 + $0x78] sm:$0xff]  ;;  %v354_v47 = vmax.f32 %v322_v40, 0.0  ;;  %v290_v54 = vmul.f32 %v2900_v1, %v251_v41  ;;  %v253_v55 = vld [vmem:[%s2911_s26 + $0x80] sm:$0xff]  ;;  %v327_v58 = vadd.f32 %v2916_v2, %v288_v49  ;;  %v328_v59 = vadd.f32 %v2916_v2, %v289_v50 }
  0x1c   : > { %428 = vst.msk [vmem:[#allocation2 + $0x31] sm:$0xff] %vm379_vm0, %v349_v32  ;;  %429 = vst.msk [vmem:[#allocation2 + $0x39] sm:$0xff] %vm379_vm0, %v350_v37  ;;  %v254_v56 = vld [vmem:[%s2911_s26 + $0x88] sm:$0xff]  ;;  %v291_v60 = vmul.f32 %v2900_v1, %v252_v46  ;;  %v255_v61 = vld [vmem:[%s2911_s26 + $0x90] sm:$0xff]  ;;  %v355_v0 = vmax.f32 %v323_v51, 0.0  ;;  %v356_v3 = vmax.f32 %v324_v52, 0.0  ;;  %v292_v14 = vmul.f32 %v2900_v1, %v253_v55 }
  0x1d   : > { %430 = vst.msk [vmem:[#allocation2 + $0x49] sm:$0xff] %vm379_vm0, %v351_v38  ;;  %431 = vst.msk [vmem:[#allocation2 + $0x51] sm:$0xff] %vm379_vm0, %v352_v39  ;;  %v256_v62 = vld [vmem:[%s2911_s26 + $0x98] sm:$0xff]  ;;  %v257_v63 = vld [vmem:[%s2911_s26 + $0xa0] sm:$0xff]  ;;  %v357_v4 = vmax.f32 %v325_v53, 0.0  ;;  %v329_v5 = vadd.f32 %v2916_v2, %v290_v54  ;;  %v358_v9 = vmax.f32 %v326_v57, 0.0  ;;  %v293_v15 = vmul.f32 %v2900_v1, %v254_v56 }
  0x1e   : > { %432 = vst.msk [vmem:[#allocation2 + $0x61] sm:$0xff] %vm379_vm0, %v353_v42  ;;  %433 = vst.msk [vmem:[#allocation2 + $0x69] sm:$0xff] %vm379_vm0, %v354_v47  ;;  %v258_v6 = vld [vmem:[%s2911_s26 + $0xa8] sm:$0xff]  ;;  %v359_v10 = vmax.f32 %v327_v58, 0.0  ;;  %v360_v11 = vmax.f32 %v328_v59, 0.0  ;;  %v330_v12 = vadd.f32 %v2916_v2, %v291_v60  ;;  %v294_v16 = vmul.f32 %v2900_v1, %v255_v61  ;;  %v259_v17 = vld [vmem:[%s2911_s26 + $0xb0] sm:$0xff] }
  0x1f   : > { %v523_v18 = vld [vmem:[#allocation2 + $0x9] sm:$0xff]  ;;  %434 = vst.msk [vmem:[#allocation2 + $0x79] sm:$0xff] %vm379_vm0, %v355_v0  ;;  %435 = vst.msk [vmem:[#allocation2 + $0x81] sm:$0xff] %vm379_vm0, %v356_v3  ;;  %v361_v13 = vmax.f32 %v329_v5, 0.0  ;;  %v295_v21 = vmul.f32 %v2900_v1, %v256_v62  ;;  %v296_v22 = vmul.f32 %v2900_v1, %v257_v63  ;;  %v297_v23 = vmul.f32 %v2900_v1, %v258_v6  ;;  %v260_v24 = vld [vmem:[%s2911_s26 + $0xb8] sm:$0xff] }
  0x20   : > { %588 = vrot.lane.b32.xlu0 %v523_v18, %s2800_s29  ;;  %v458_v7 = vld [vmem:[#allocation2] sm:$0xff]  ;;  %v459_v8 = vld [vmem:[#allocation2 + $0x8] sm:$0xff]  ;;  %436 = vst.msk [vmem:[#allocation2 + $0x91] sm:$0xff] %vm379_vm0, %v357_v4  ;;  %437 = vst.msk [vmem:[#allocation2 + $0x99] sm:$0xff] %vm379_vm0, %v358_v9  ;;  %v362_v20 = vmax.f32 %v330_v12, 0.0  ;;  %v331_v25 = vadd.f32 %v2916_v2, %v292_v14  ;;  %v332_v26 = vadd.f32 %v2916_v2, %v293_v15  ;;  %vm2151_vm12 = vcmask 588800  }
  0x21   : > { %490 = vst.msk [vmem:[#allocation3] sm:$0xff] %vm379_vm0, %v458_v7  ;;  %491 = vst.msk [vmem:[#allocation3 + $0x8] sm:$0xff] %vm379_vm0, %v459_v8  ;;  %v333_v27 = vadd.f32 %v2916_v2, %v294_v16  ;;  %v261_v28 = vld [vmem:[%s2911_s26 + $0xc0] sm:$0xff]  ;;  %v334_v31 = vadd.f32 %v2916_v2, %v295_v21  ;;  %v335_v32 = vadd.f32 %v2916_v2, %v296_v22  ;;  %v262_v35 = vld [vmem:[%s2911_s26 + $0xc8] sm:$0xff] }
  0x22   : > { %v2991_v18 = vld [vmem:[#allocation2 + $0x19] sm:$0xff]  ;;  %438 = vst.msk [vmem:[#allocation2 + $0xa9] sm:$0xff] %vm379_vm0, %v359_v10  ;;  %439 = vst.msk [vmem:[#allocation2 + $0xb1] sm:$0xff] %vm379_vm0, %v360_v11  ;;  %v3011_v29 = vld [vmem:[#allocation2 + $0x21] sm:$0xff]  ;;  %v336_v33 = vadd.f32 %v2916_v2, %v297_v23  ;;  %v298_v34 = vmul.f32 %v2900_v1, %v259_v17  ;;  %v363_v36 = vmax.f32 %v331_v25, 0.0  ;;  %v364_v37 = vmax.f32 %v332_v26, 0.0 }
  0x23   : > { %v2993_v19 = vld [vmem:[#allocation2 + $0x31] sm:$0xff]  ;;  %590 = vrot.lane.b32.xlu1 %v2991_v18, %s2800_s29  ;;  %440 = vst.msk [vmem:[#allocation2 + $0xc1] sm:$0xff] %vm379_vm0, %v361_v13  ;;  %441 = vst.msk [vmem:[#allocation2 + $0xc9] sm:$0xff] %vm379_vm0, %v362_v20  ;;  %v365_v38 = vmax.f32 %v333_v27, 0.0  ;;  %v299_v39 = vmul.f32 %v2900_v1, %v260_v24  ;;  %v265_v42 = vld [vmem:[%s2911_s26 + $0xe0] sm:$0xff]  ;;  %v366_v43 = vmax.f32 %v334_v31, 0.0  ;;  %v300_v49 = vmul.f32 %v2900_v1, %v261_v28 }
  0x24   : > { %594 = vrot.lane.b32.xlu0 %v2993_v19, %s2800_s29  ;;  %v3013_v30 = vld [vmem:[#allocation2 + $0x49] sm:$0xff]  ;;  %v264_v41 = vld [vmem:[%s2911_s26 + $0xd8] sm:$0xff]  ;;  %v367_v44 = vmax.f32 %v335_v32, 0.0  ;;  %v368_v45 = vmax.f32 %v336_v33, 0.0  ;;  %v337_v46 = vadd.f32 %v2916_v2, %v298_v34  ;;  %442 = vst.msk [vmem:[#allocation2 + $0xd9] sm:$0xff] %vm379_vm0, %v363_v36  ;;  %443 = vst.msk [vmem:[#allocation2 + $0xe1] sm:$0xff] %vm379_vm0, %v364_v37  ;;  %v301_v50 = vmul.f32 %v2900_v1, %v262_v35 }
  0x25   : > { %v263_v40 = vld [vmem:[%s2911_s26 + $0xd0] sm:$0xff]  ;;  %v266_v47 = vld [vmem:[%s2911_s26 + $0xe8] sm:$0xff]  ;;  %444 = vst.msk [vmem:[#allocation2 + $0xf1] sm:$0xff] %vm379_vm0, %v365_v38  ;;  %v338_v48 = vadd.f32 %v2916_v2, %v299_v39  ;;  %v3037_v51 = vld [vmem:[#allocation2 + $0x18] sm:$0xff]  ;;  %v303_v57 = vmul.f32 %v2900_v1, %v264_v41  ;;  %v304_v58 = vmul.f32 %v2900_v1, %v265_v42  ;;  %v339_v60 = vadd.f32 %v2916_v2, %v300_v49 }
  0x26   : > { %v3039_v52 = vld [vmem:[#allocation2 + $0x20] sm:$0xff]  ;;  %445 = vst.msk [vmem:[#allocation2 + $0xf9] sm:$0xff] %vm379_vm0, %v366_v43  ;;  %446 = vst.msk [vmem:[#allocation2 + $0x109] sm:$0xff] %vm379_vm0, %v367_v44  ;;  %v369_v55 = vmax.f32 %v337_v46, 0.0  ;;  %v302_v56 = vmul.f32 %v2900_v1, %v263_v40  ;;  %v340_v61 = vadd.f32 %v2916_v2, %v301_v50  ;;  %v305_v62 = vmul.f32 %v2900_v1, %v266_v47  ;;  %v3068_v6 = vld [vmem:[#allocation2 + $0x51] sm:$0xff] }
  0x27   : > { %592 = vrot.lane.b32.xlu1 %v3011_v29, %s2800_s29  ;;  %v3041_v53 = vld [vmem:[#allocation2 + $0x39] sm:$0xff]  ;;  %v3043_v54 = vld [vmem:[#allocation2 + $0x61] sm:$0xff]  ;;  %447 = vst.msk [vmem:[#allocation2 + $0x111] sm:$0xff] %vm379_vm0, %v368_v45  ;;  %492 = vst.msk [vmem:[#allocation3 + $0x10] sm:$0xff] %vm379_vm0, %v3037_v51  ;;  %v370_v59 = vmax.f32 %v338_v48, 0.0  ;;  %v342_v0 = vadd.f32 %v2916_v2, %v303_v57  ;;  %v343_v3 = vadd.f32 %v2916_v2, %v304_v58  ;;  %v371_v4 = vmax.f32 %v339_v60, 0.0 }
  0x28   : > { %598 = vrot.lane.b32.xlu0 %v3013_v30, %s2800_s29  ;;  %493 = vst.msk [vmem:[#allocation3 + $0x18] sm:$0xff] %vm379_vm0, %v3039_v52  ;;  %448 = vst.msk [vmem:[#allocation2 + $0x121] sm:$0xff] %vm379_vm0, %v369_v55  ;;  %v341_v63 = vadd.f32 %v2916_v2, %v302_v56  ;;  %v372_v5 = vmax.f32 %v340_v61, 0.0  ;;  %v344_v1 = vadd.f32 %v2916_v2, %v305_v62  ;;  %v3070_v7 = vld [vmem:[#allocation2 + $0x79] sm:$0xff]  ;;  %v3074_v12 = vld [vmem:[#allocation2 + $0x30] sm:$0xff] }
  0x29   : > { %449 = vst.msk [vmem:[#allocation2 + $0x129] sm:$0xff] %vm379_vm0, %v370_v59  ;;  %v374_v9 = vmax.f32 %v342_v0, 0.0  ;;  %v375_v10 = vmax.f32 %v343_v3, 0.0  ;;  %450 = vst.msk [vmem:[#allocation2 + $0x139] sm:$0xff] %vm379_vm0, %v371_v4  ;;  %v3076_v13 = vld [vmem:[#allocation2 + $0x38] sm:$0xff]  ;;  %v3090_v2 = vld [vmem:[#allocation2 + $0x69] sm:$0xff] }
  0x2a   : > { %v373_v8 = vmax.f32 %v341_v63, 0.0  ;;  %451 = vst.msk [vmem:[#allocation2 + $0x141] sm:$0xff] %vm379_vm0, %v372_v5  ;;  %v376_v11 = vmax.f32 %v344_v1, 0.0  ;;  %494 = vst.msk [vmem:[#allocation3 + $0x20] sm:$0xff] %vm379_vm0, %v3074_v12  ;;  %v3092_v14 = vld [vmem:[#allocation2 + $0x91] sm:$0xff]  ;;  %v3098_v15 = vld [vmem:[#allocation2 + $0x48] sm:$0xff] }
  0x2b   : > { %596 = vrot.lane.b32.xlu1 %v3041_v53, %s2800_s29  ;;  %453 = vst.msk [vmem:[#allocation2 + $0x159] sm:$0xff] %vm379_vm0, %v374_v9  ;;  %454 = vst.msk [vmem:[#allocation2 + $0x169] sm:$0xff] %vm379_vm0, %v375_v10  ;;  %v3100_v16 = vld [vmem:[#allocation2 + $0x50] sm:$0xff]  ;;  %v3102_v17 = vld [vmem:[#allocation2 + $0x81] sm:$0xff] }
  0x2c   : > { %602 = vrot.lane.b32.xlu0 %v3043_v54, %s2800_s29  ;;  %452 = vst.msk [vmem:[#allocation2 + $0x151] sm:$0xff] %vm379_vm0, %v373_v8  ;;  %495 = vst.msk [vmem:[#allocation3 + $0x28] sm:$0xff] %vm379_vm0, %v3076_v13  ;;  %v536_v20 = vld [vmem:[#allocation2 + $0xa9] sm:$0xff]  ;;  %v3110_v21 = vld [vmem:[#allocation2 + $0x99] sm:$0xff] }
  0x2d   : > { %455 = vst.msk [vmem:[#allocation2 + $0x171] sm:$0xff] %vm379_vm0, %v376_v11  ;;  %496 = vst.msk [vmem:[#allocation3 + $0x30] sm:$0xff] %vm379_vm0, %v3098_v15  ;;  %v538_v22 = vld [vmem:[#allocation2 + $0xc1] sm:$0xff]  ;;  %v3117_v25 = vld [vmem:[#allocation2 + $0x78] sm:$0xff] }
  0x2e   : > { %497 = vst.msk [vmem:[#allocation3 + $0x38] sm:$0xff] %vm379_vm0, %v3100_v16  ;;  %v3113_v23 = vld [vmem:[#allocation2 + $0x60] sm:$0xff]  ;;  %v3115_v24 = vld [vmem:[#allocation2 + $0x68] sm:$0xff]  ;;  %500 = vst.msk [vmem:[#allocation3 + $0x50] sm:$0xff] %vm379_vm0, %v3117_v25 }
  0x2f   : > { %600 = vrot.lane.b32.xlu1 %v3068_v6, %s2800_s29  ;;  %498 = vst.msk [vmem:[#allocation3 + $0x40] sm:$0xff] %vm379_vm0, %v3113_v23  ;;  %499 = vst.msk [vmem:[#allocation3 + $0x48] sm:$0xff] %vm379_vm0, %v3115_v24  ;;  %v3125_v26 = vld [vmem:[#allocation2 + $0x80] sm:$0xff]  ;;  %v3127_v27 = vld [vmem:[#allocation2 + $0x90] sm:$0xff] }
  0x30   : > { %606 = vrot.lane.b32.xlu0 %v3070_v7, %s2800_s29  ;;  %v3129_v28 = vld [vmem:[#allocation2 + $0x98] sm:$0xff]  ;;  %501 = vst.msk [vmem:[#allocation3 + $0x58] sm:$0xff] %vm379_vm0, %v3125_v26  ;;  %502 = vst.msk [vmem:[#allocation3 + $0x60] sm:$0xff] %vm379_vm0, %v3127_v27  ;;  %v3137_v32 = vld [vmem:[#allocation2 + $0xa8] sm:$0xff] }
  0x31   : > { %v537_v31 = vld [vmem:[#allocation2 + $0xb1] sm:$0xff]  ;;  %503 = vst.msk [vmem:[#allocation3 + $0x68] sm:$0xff] %vm379_vm0, %v3129_v28  ;;  %v3141_v34 = vld [vmem:[#allocation2 + $0xc0] sm:$0xff]  ;;  %504 = vst.msk [vmem:[#allocation3 + $0x70] sm:$0xff] %vm379_vm0, %v3137_v32 }
  0x32   : > { %v3139_v33 = vld [vmem:[#allocation2 + $0xb0] sm:$0xff]  ;;  %506 = vst.msk [vmem:[#allocation3 + $0x80] sm:$0xff] %vm379_vm0, %v3141_v34  ;;  %v3152_v35 = vld [vmem:[#allocation2 + $0xc8] sm:$0xff]  ;;  %v3154_v36 = vld [vmem:[#allocation2 + $0xd8] sm:$0xff] }
  0x33   : > { %604 = vrot.lane.b32.xlu1 %v3090_v2, %s2800_s29  ;;  %505 = vst.msk [vmem:[#allocation3 + $0x78] sm:$0xff] %vm379_vm0, %v3139_v33  ;;  %v3156_v37 = vld [vmem:[#allocation2 + $0xe0] sm:$0xff]  ;;  %507 = vst.msk [vmem:[#allocation3 + $0x88] sm:$0xff] %vm379_vm0, %v3152_v35  ;;  %v3164_v39 = vld [vmem:[#allocation2 + $0xf0] sm:$0xff] }
  0x34   : > { %610 = vrot.lane.b32.xlu0 %v3092_v14, %s2800_s29  ;;  %v540_v38 = vld [vmem:[#allocation2 + $0xd9] sm:$0xff]  ;;  %508 = vst.msk [vmem:[#allocation3 + $0x90] sm:$0xff] %vm379_vm0, %v3154_v36  ;;  %509 = vst.msk [vmem:[#allocation3 + $0x98] sm:$0xff] %vm379_vm0, %v3156_v37  ;;  %v3174_v41 = vld [vmem:[#allocation2 + $0x108] sm:$0xff] }
  0x35   : > { %v3166_v40 = vld [vmem:[#allocation2 + $0xf8] sm:$0xff]  ;;  %510 = vst.msk [vmem:[#allocation3 + $0xa0] sm:$0xff] %vm379_vm0, %v3164_v39  ;;  %v3176_v42 = vld [vmem:[#allocation2 + $0x110] sm:$0xff]  ;;  %512 = vst.msk [vmem:[#allocation3 + $0xb0] sm:$0xff] %vm379_vm0, %v3174_v41 }
  0x36   : > { %511 = vst.msk [vmem:[#allocation3 + $0xa8] sm:$0xff] %vm379_vm0, %v3166_v40  ;;  %v539_v43 = vld [vmem:[#allocation2 + $0xc9] sm:$0xff]  ;;  %v542_v44 = vld [vmem:[#allocation2 + $0xf1] sm:$0xff]  ;;  %513 = vst.msk [vmem:[#allocation3 + $0xb8] sm:$0xff] %vm379_vm0, %v3176_v42 }
  0x37   : > { %608 = vrot.lane.b32.xlu1 %v3102_v17, %s2800_s29  ;;  %v3184_v45 = vld [vmem:[#allocation2 + $0x120] sm:$0xff]  ;;  %v3186_v46 = vld [vmem:[#allocation2 + $0x128] sm:$0xff]  ;;  %v484_v49 = vld [vmem:[#allocation2 + $0x138] sm:$0xff] }
  0x38   : > { %614 = vrot.lane.b32.xlu0 %v536_v20, %s2800_s29  ;;  %v541_v47 = vld [vmem:[#allocation2 + $0xe1] sm:$0xff]  ;;  %v544_v48 = vld [vmem:[#allocation2 + $0x109] sm:$0xff]  ;;  %514 = vst.msk [vmem:[#allocation3 + $0xc0] sm:$0xff] %vm379_vm0, %v3184_v45  ;;  %515 = vst.msk [vmem:[#allocation3 + $0xc8] sm:$0xff] %vm379_vm0, %v3186_v46 }
  0x39   : > { %v485_v50 = vld [vmem:[#allocation2 + $0x140] sm:$0xff]  ;;  %516 = vst.msk [vmem:[#allocation3 + $0xd0] sm:$0xff] %vm379_vm0, %v484_v49  ;;  %v486_v57 = vld [vmem:[#allocation2 + $0x150] sm:$0xff]  ;;  %v487_v58 = vld [vmem:[#allocation2 + $0x158] sm:$0xff] }
  0x3a   : > { %v543_v55 = vld [vmem:[#allocation2 + $0xf9] sm:$0xff]  ;;  %v546_v56 = vld [vmem:[#allocation2 + $0x121] sm:$0xff]  ;;  %517 = vst.msk [vmem:[#allocation3 + $0xd8] sm:$0xff] %vm379_vm0, %v485_v50  ;;  %v545_v59 = vld [vmem:[#allocation2 + $0x111] sm:$0xff] }
  0x3b   : > { %612 = vrot.lane.b32.xlu1 %v3110_v21, %s2800_s29  ;;  %v548_v60 = vld [vmem:[#allocation2 + $0x139] sm:$0xff]  ;;  %518 = vst.msk [vmem:[#allocation3 + $0xe0] sm:$0xff] %vm379_vm0, %v486_v57  ;;  %519 = vst.msk [vmem:[#allocation3 + $0xe8] sm:$0xff] %vm379_vm0, %v487_v58  ;;  %v488_v61 = vld [vmem:[#allocation2 + $0x168] sm:$0xff] }
  0x3c   : > { %618 = vrot.lane.b32.xlu0 %v538_v22, %s2800_s29  ;;  %v489_v62 = vld [vmem:[#allocation2 + $0x170] sm:$0xff]  ;;  %520 = vst.msk [vmem:[#allocation3 + $0xf0] sm:$0xff] %vm379_vm0, %v488_v61  ;;  %v549_v3 = vld [vmem:[#allocation2 + $0x141] sm:$0xff]  ;;  %v551_v5 = vld [vmem:[#allocation2 + $0x159] sm:$0xff] }
  0x3d   : > { %v547_v63 = vld [vmem:[#allocation2 + $0x129] sm:$0xff]  ;;  %v550_v0 = vld [vmem:[#allocation2 + $0x151] sm:$0xff]  ;;  %521 = vst.msk [vmem:[#allocation3 + $0xf8] sm:$0xff] %vm379_vm0, %v489_v62  ;;  %v3210_v9 = vld [vmem:[#allocation2 + $0x1a] sm:$0xff] }
  0x3e   : > { %v552_v4 = vld [vmem:[#allocation2 + $0x169] sm:$0xff]  ;;  %v553_v8 = vld [vmem:[#allocation2 + $0x171] sm:$0xff]  ;;  %v733_v58 = vld [vmem:[#allocation2 + $0xda] sm:$0xff] }
  0x3f   : > { %616 = vrot.lane.b32.xlu1 %v537_v31, %s2800_s29  ;;  %v715_v1 = vld [vmem:[#allocation2 + $0x2] sm:$0xff]  ;;  %v716_v10 = vld [vmem:[#allocation2 + $0xa] sm:$0xff]  ;;  %v3215_v11 = vld [vmem:[#allocation2 + $0x32] sm:$0xff] }
  0x40   : > { %622 = vrot.lane.b32.xlu0 %v540_v38, %s2800_s29  ;;  %v3220_v20 = vld [vmem:[#allocation2 + $0x22] sm:$0xff]  ;;  %v3222_v22 = vld [vmem:[#allocation2 + $0x4a] sm:$0xff]  ;;  %v3228_v31 = vld [vmem:[#allocation2 + $0x3a] sm:$0xff] }
  0x41   : > { %v3230_v38 = vld [vmem:[#allocation2 + $0x62] sm:$0xff]  ;;  %v3254_v50 = vld [vmem:[#allocation2 + $0xaa] sm:$0xff]  ;;  %v3268_v57 = vld [vmem:[#allocation2 + $0xb2] sm:$0xff] }
  0x42   : > { %v3252_v49 = vld [vmem:[#allocation2 + $0x82] sm:$0xff]  ;;  %v737_v62 = vld [vmem:[#allocation2 + $0x10a] sm:$0xff] }
  0x43   : > { %620 = vrot.lane.b32.xlu1 %v539_v43, %s2800_s29  ;;  %v3236_v43 = vld [vmem:[#allocation2 + $0x52] sm:$0xff]  ;;  %v734_v61 = vld [vmem:[#allocation2 + $0xe2] sm:$0xff] }
  0x44   : > { %626 = vrot.lane.b32.xlu0 %v542_v44, %s2800_s29  ;;  %v3238_v44 = vld [vmem:[#allocation2 + $0x7a] sm:$0xff] }
  0x47   : > { %624 = vrot.lane.b32.xlu1 %v541_v47, %s2800_s29  ;;  %v3244_v47 = vld [vmem:[#allocation2 + $0x6a] sm:$0xff] }
  0x48   : > { %630 = vrot.lane.b32.xlu0 %v544_v48, %s2800_s29  ;;  %v3246_v48 = vld [vmem:[#allocation2 + $0x92] sm:$0xff] }
  0x4b   : > { %628 = vrot.lane.b32.xlu1 %v543_v55, %s2800_s29  ;;  %v3260_v55 = vld [vmem:[#allocation2 + $0x9a] sm:$0xff] }
  0x4c   : > { %634 = vrot.lane.b32.xlu0 %v546_v56, %s2800_s29  ;;  %v3262_v56 = vld [vmem:[#allocation2 + $0xc2] sm:$0xff] }
  0x4f   : > { %632 = vrot.lane.b32.xlu1 %v545_v59, %s2800_s29  ;;  %v3273_v59 = vld [vmem:[#allocation2 + $0xca] sm:$0xff] }
  0x50   : > { %638 = vrot.lane.b32.xlu0 %v548_v60, %s2800_s29  ;;  %v735_v60 = vld [vmem:[#allocation2 + $0xf2] sm:$0xff] }
  0x53   : > { %636 = vrot.lane.b32.xlu1 %v547_v63, %s2800_s29  ;;  %v736_v63 = vld [vmem:[#allocation2 + $0xfa] sm:$0xff] }
  0x54   : > { %642 = vrot.lane.b32.xlu0 %v550_v0, %s2800_s29  ;;  %v739_v0 = vld [vmem:[#allocation2 + $0x122] sm:$0xff] }
  0x57   : > { %640 = vrot.lane.b32.xlu1 %v549_v3, %s2800_s29 }
  0x58   : > { %646 = vrot.lane.b32.xlu0 %v552_v4, %s2800_s29  ;;  %v738_v4 = vld [vmem:[#allocation2 + $0x112] sm:$0xff] }
  0x5b   : > { %644 = vrot.lane.b32.xlu1 %v551_v5, %s2800_s29  ;;  %v741_v5 = vld [vmem:[#allocation2 + $0x13a] sm:$0xff] }
  0x5c   : > { %779 = vrot.lane.b32.xlu0 %v715_v1, %s2801_s30 }
  0x5f   : > { %648 = vrot.lane.b32.xlu1 %v553_v8, %s2800_s29  ;;  %v740_v8 = vld [vmem:[#allocation2 + $0x12a] sm:$0xff] }
  0x60   : > { %783 = vrot.lane.b32.xlu0 %v3210_v9, %s2801_s30 }
  0x63   : > { %781 = vrot.lane.b32.xlu1 %v716_v10, %s2801_s30  ;;  %v743_v10 = vld [vmem:[#allocation2 + $0x152] sm:$0xff] }
  0x64   : > { %787 = vrot.lane.b32.xlu0 %v3215_v11, %s2801_s30 }
  0x67   : > { %785 = vrot.lane.b32.xlu1 %v3220_v20, %s2801_s30 }
  0x68   : > { %791 = vrot.lane.b32.xlu0 %v3222_v22, %s2801_s30 }
  0x6b   : > { %789 = vrot.lane.b32.xlu1 %v3228_v31, %s2801_s30 }
  0x6c   : > { %795 = vrot.lane.b32.xlu0 %v3230_v38, %s2801_s30 }
  0x6f   : > { %793 = vrot.lane.b32.xlu1 %v3236_v43, %s2801_s30 }
  0x70   : > { %799 = vrot.lane.b32.xlu0 %v3238_v44, %s2801_s30 }
  0x73   : > { %797 = vrot.lane.b32.xlu1 %v3244_v47, %s2801_s30 }
  0x74   : > { %803 = vrot.lane.b32.xlu0 %v3246_v48, %s2801_s30 }
  0x77   : > { %801 = vrot.lane.b32.xlu1 %v3252_v49, %s2801_s30 }
  0x78   : > { %807 = vrot.lane.b32.xlu0 %v3254_v50, %s2801_s30 }
  0x7b   : > { %805 = vrot.lane.b32.xlu1 %v3260_v55, %s2801_s30 }
  0x7c   : > { %811 = vrot.lane.b32.xlu0 %v3262_v56, %s2801_s30 }
  0x7f   : > { %809 = vrot.lane.b32.xlu1 %v3268_v57, %s2801_s30 }
  0x80   : > { %815 = vrot.lane.b32.xlu0 %v733_v58, %s2801_s30  ;;  %v587_v3 = vpop.permute.xlu0 %586  ;;  %v742_v58 = vld [vmem:[#allocation2 + $0x142] sm:$0xff] }
  0x81   : > { %683 = vst.msk [vmem:[#allocation3] sm:$0xff] %vm682_vm3, %v587_v3 }
  0x83   : > { %813 = vrot.lane.b32.xlu1 %v3273_v59, %s2801_s30 }
  0x84   : > { %819 = vrot.lane.b32.xlu0 %v735_v60, %s2801_s30  ;;  %v745_v60 = vld [vmem:[#allocation2 + $0x16a] sm:$0xff] }
  0x87   : > { %817 = vrot.lane.b32.xlu1 %v734_v61, %s2801_s30 }
  0x88   : > { %823 = vrot.lane.b32.xlu0 %v737_v62, %s2801_s30 }
  0x8b   : > { %821 = vrot.lane.b32.xlu1 %v736_v63, %s2801_s30  ;;  %v744_v63 = vld [vmem:[#allocation2 + $0x15a] sm:$0xff] }
  0x8c   : > { %827 = vrot.lane.b32.xlu0 %v739_v0, %s2801_s30 }
  0x8f   : > { %825 = vrot.lane.b32.xlu1 %v738_v4, %s2801_s30  ;;  %v746_v4 = vld [vmem:[#allocation2 + $0x172] sm:$0xff] }
  0x90   : > { %831 = vrot.lane.b32.xlu0 %v741_v5, %s2801_s30 }
  0x92   : > { %v589_v1 = vpop.permute.xlu0 %588 }
  0x93   : > { %684 = vst.msk [vmem:[#allocation3 + $0x8] sm:$0xff] %vm682_vm3, %v589_v1  ;;  %829 = vrot.lane.b32.xlu1 %v740_v8, %s2801_s30 }
  0x94   : > { %835 = vrot.lane.b32.xlu0 %v743_v10, %s2801_s30 }
  0x95   : > { %v591_v61 = vpop.permute.xlu1 %590 }
  0x96   : > { %v595_v62 = vpop.permute.xlu0 %594  ;;  %685 = vst.msk [vmem:[#allocation3 + $0x10] sm:$0xff] %vm682_vm3, %v591_v61 }
  0x97   : > { %687 = vst.msk [vmem:[#allocation3 + $0x20] sm:$0xff] %vm682_vm3, %v595_v62  ;;  %833 = vrot.lane.b32.xlu1 %v742_v58, %s2801_s30 }
  0x98   : > { %839 = vrot.lane.b32.xlu0 %v745_v60, %s2801_s30 }
  0x99   : > { %v593_v0 = vpop.permute.xlu1 %592 }
  0x9a   : > { %v599_v3 = vpop.permute.xlu0 %598  ;;  %686 = vst.msk [vmem:[#allocation3 + $0x18] sm:$0xff] %vm682_vm3, %v593_v0 }
  0x9b   : > { %689 = vst.msk [vmem:[#allocation3 + $0x30] sm:$0xff] %vm682_vm3, %v599_v3  ;;  %837 = vrot.lane.b32.xlu1 %v744_v63, %s2801_s30 }
  0x9c   : > { %972 = vrot.lane.b32.xlu0 %v3037_v51, %s2802_s6 }
  0x9d   : > { %v597_v5 = vpop.permute.xlu1 %596 }
  0x9e   : > { %v603_v1 = vpop.permute.xlu0 %602  ;;  %688 = vst.msk [vmem:[#allocation3 + $0x28] sm:$0xff] %vm682_vm3, %v597_v5 }
  0x9f   : > { %691 = vst.msk [vmem:[#allocation3 + $0x40] sm:$0xff] %vm682_vm3, %v603_v1  ;;  %841 = vrot.lane.b32.xlu1 %v746_v4, %s2801_s30 }
  0xa0   : > { %976 = vrot.lane.b32.xlu0 %v3074_v12, %s2802_s6 }
  0xa1   : > { %v601_v8 = vpop.permute.xlu1 %600 }
  0xa2   : > { %v607_v10 = vpop.permute.xlu0 %606  ;;  %690 = vst.msk [vmem:[#allocation3 + $0x38] sm:$0xff] %vm682_vm3, %v601_v8 }
  0xa3   : > { %693 = vst.msk [vmem:[#allocation3 + $0x50] sm:$0xff] %vm682_vm3, %v607_v10  ;;  %974 = vrot.lane.b32.xlu1 %v3039_v52, %s2802_s6  ;;  %v2784_v10 = vld [vmem:[%s4018_s3] sm:$0xff]  }
  0xa4   : > { %980 = vrot.lane.b32.xlu0 %v3098_v15, %s2802_s6  ;;  %2713 = vmatprep.subr.bf16.mxu0 %v2784_v10 }
  0xa5   : > { %v605_v51 = vpop.permute.xlu1 %604  ;;  %2755 = vmatprep.subr.bf16.mxu1 %v2784_v10  ;;  %2714 = vmatpush3.bf16.msra.mxu0 %v2784_v10 }
  0xa6   : > { %v611_v58 = vpop.permute.xlu0 %610  ;;  %692 = vst.msk [vmem:[#allocation3 + $0x48] sm:$0xff] %vm682_vm3, %v605_v51  ;;  %2760 = vmatpush3.bf16.msra.mxu1 %v2784_v10  ;;  %v2785_v51 = vld [vmem:[%s4018_s3 + $0x8] sm:$0xff]  }
  0xa7   : > { %695 = vst.msk [vmem:[#allocation3 + $0x60] sm:$0xff] %vm682_vm3, %v611_v58  ;;  %978 = vrot.lane.b32.xlu1 %v3076_v13, %s2802_s6  ;;  %2715 = vmatprep.subr.bf16.mxu0 %v2785_v51 }
  0xa8   : > { %984 = vrot.lane.b32.xlu0 %v3113_v23, %s2802_s6  ;;  %2756 = vmatprep.subr.bf16.mxu1 %v2785_v51 }
  0xa9   : > { %v609_v60 = vpop.permute.xlu1 %608  ;;  %2716 = vmatpush3.bf16.msra.mxu0 %v2785_v51 }
  0xaa   : > { %v615_v61 = vpop.permute.xlu0 %614  ;;  %694 = vst.msk [vmem:[#allocation3 + $0x58] sm:$0xff] %vm682_vm3, %v609_v60  ;;  %2761 = vmatpush3.bf16.msra.mxu1 %v2785_v51  ;;  %v2786_v60 = vld [vmem:[%s4018_s3 + $0x10] sm:$0xff]  }
  0xab   : > { %697 = vst.msk [vmem:[#allocation3 + $0x70] sm:$0xff] %vm682_vm3, %v615_v61  ;;  %982 = vrot.lane.b32.xlu1 %v3100_v16, %s2802_s6  ;;  %2717 = vmatprep.subr.bf16.mxu0 %v2786_v60  ;;  %v2787_v61 = vld [vmem:[%s4018_s3 + $0x18] sm:$0xff]  }
  0xac   : > { %988 = vrot.lane.b32.xlu0 %v3117_v25, %s2802_s6  ;;  %2757 = vmatprep.subr.bf16.mxu1 %v2786_v60 }
  0xad   : > { %v613_v52 = vpop.permute.xlu1 %612  ;;  %2718 = vmatpush3.bf16.msra.mxu0 %v2786_v60 }
  0xae   : > { %v619_v62 = vpop.permute.xlu0 %618  ;;  %696 = vst.msk [vmem:[#allocation3 + $0x68] sm:$0xff] %vm682_vm3, %v613_v52  ;;  %2762 = vmatpush3.bf16.msra.mxu1 %v2786_v60  ;;  %2719 = vmatprep.subr.bf16.mxu0 %v2787_v61 }
  0xaf   : > { %699 = vst.msk [vmem:[#allocation3 + $0x80] sm:$0xff] %vm682_vm3, %v619_v62  ;;  %986 = vrot.lane.b32.xlu1 %v3115_v24, %s2802_s6  ;;  %2758 = vmatprep.subr.bf16.mxu1 %v2787_v61  ;;  %v2788_v62 = vld [vmem:[%s4018_s3 + $0x20] ss:$0 sps:$4 sm:$0xff]  }
  0xb0   : > { %1165 = vrot.lane.b32.xlu0 %v2991_v18, %s2803_s7 }
  0xb1   : > { %v617_v63 = vpop.permute.xlu1 %616  ;;  %2720 = vmatpush3.bf16.msra.mxu0 %v2787_v61 }
  0xb2   : > { %v623_v0 = vpop.permute.xlu0 %622  ;;  %698 = vst.msk [vmem:[#allocation3 + $0x78] sm:$0xff] %vm682_vm3, %v617_v63  ;;  %2763 = vmatpush3.bf16.msra.mxu1 %v2787_v61  ;;  %2765 = vmatprep.subr.msk.bf16.mxu0 %vm2200_vm5, %v2788_v62  ;;  %v1690_v61 = vld [vmem:[#allocation2 + $0x99] sm:$0xff] }
  0xb3   : > { %701 = vst.msk [vmem:[#allocation3 + $0x90] sm:$0xff] %vm682_vm3, %v623_v0  ;;  %990 = vrot.lane.b32.xlu1 %v3125_v26, %s2802_s6  ;;  %2766 = vmatprep.subr.msk.bf16.mxu1 %vm2200_vm5, %v2788_v62 }
  0xb4   : > { %1169 = vrot.lane.b32.xlu0 %v2993_v19, %s2803_s7 }
  0xb5   : > { %v621_v3 = vpop.permute.xlu1 %620 }
  0xb6   : > { %v627_v4 = vpop.permute.xlu0 %626  ;;  %700 = vst.msk [vmem:[#allocation3 + $0x88] sm:$0xff] %vm682_vm3, %v621_v3 }
  0xb7   : > { %703 = vst.msk [vmem:[#allocation3 + $0xa0] sm:$0xff] %vm682_vm3, %v627_v4  ;;  %1167 = vrot.lane.b32.xlu1 %v3011_v29, %s2803_s7 }
  0xb8   : > { %1358 = vrot.lane.b32.xlu0 %v3210_v9, %s2804_s8 }
  0xb9   : > { %v625_v18 = vpop.permute.xlu1 %624 }
  0xba   : > { %v631_v5 = vpop.permute.xlu0 %630  ;;  %702 = vst.msk [vmem:[#allocation3 + $0x98] sm:$0xff] %vm682_vm3, %v625_v18 }
  0xbb   : > { %705 = vst.msk [vmem:[#allocation3 + $0xb0] sm:$0xff] %vm682_vm3, %v631_v5  ;;  %1171 = vrot.lane.b32.xlu1 %v3041_v53, %s2803_s7 }
  0xbc   : > { %1362 = vrot.lane.b32.xlu0 %v3215_v11, %s2804_s8 }
  0xbd   : > { %v629_v1 = vpop.permute.xlu1 %628 }
  0xbe   : > { %v635_v8 = vpop.permute.xlu0 %634  ;;  %704 = vst.msk [vmem:[#allocation3 + $0xa8] sm:$0xff] %vm682_vm3, %v629_v1 }
  0xbf   : > { %707 = vst.msk [vmem:[#allocation3 + $0xc0] sm:$0xff] %vm682_vm3, %v635_v8  ;;  %1360 = vrot.lane.b32.xlu1 %v3220_v20, %s2804_s8 }
  0xc0   : > { %1552 = vrot.lane.b32.xlu0 %v3074_v12, %s2805_s9 }
  0xc1   : > { %v633_v29 = vpop.permute.xlu1 %632 }
  0xc2   : > { %v639_v9 = vpop.permute.xlu0 %638  ;;  %706 = vst.msk [vmem:[#allocation3 + $0xb8] sm:$0xff] %vm682_vm3, %v633_v29 }
  0xc3   : > { %709 = vst.msk [vmem:[#allocation3 + $0xd0] sm:$0xff] %vm682_vm3, %v639_v9  ;;  %1364 = vrot.lane.b32.xlu1 %v3228_v31, %s2804_s8 }
  0xc4   : > { %1556 = vrot.lane.b32.xlu0 %v3098_v15, %s2805_s9 }
  0xc5   : > { %v637_v20 = vpop.permute.xlu1 %636 }
  0xc6   : > { %v643_v12 = vpop.permute.xlu0 %642  ;;  %708 = vst.msk [vmem:[#allocation3 + $0xc8] sm:$0xff] %vm682_vm3, %v637_v20 }
  0xc7   : > { %711 = vst.msk [vmem:[#allocation3 + $0xe0] sm:$0xff] %vm682_vm3, %v643_v12  ;;  %1554 = vrot.lane.b32.xlu1 %v3076_v13, %s2805_s9 }
  0xc8   : > { %1745 = vrot.lane.b32.xlu0 %v2993_v19, %s2806_s14 }
  0xc9   : > { %v641_v15 = vpop.permute.xlu1 %640 }
  0xca   : > { %v647_v58 = vpop.permute.xlu0 %646  ;;  %710 = vst.msk [vmem:[#allocation3 + $0xd8] sm:$0xff] %vm682_vm3, %v641_v15 }
  0xcb   : > { %713 = vst.msk [vmem:[#allocation3 + $0xf0] sm:$0xff] %vm682_vm3, %v647_v58  ;;  %1558 = vrot.lane.b32.xlu1 %v3100_v16, %s2805_s9 }
  0xcc   : > { %1749 = vrot.lane.b32.xlu0 %v3013_v30, %s2806_s14 }
  0xcd   : > { %v645_v19 = vpop.permute.xlu1 %644 }
  0xce   : > { %v780_v13 = vpop.permute.xlu0 %779  ;;  %712 = vst.msk [vmem:[#allocation3 + $0xe8] sm:$0xff] %vm682_vm3, %v645_v19 }
  0xcf   : > { %876 = vst.msk [vmem:[#allocation3] sm:$0xff] %vm875_vm4, %v780_v13  ;;  %1747 = vrot.lane.b32.xlu1 %v3041_v53, %s2806_s14  ;;  %v2202_v53 = vsel %vm2200_vm5, %v2788_v62, 0 }
  0xd0   : > { %1938 = vrot.lane.b32.xlu0 %v3215_v11, %s2807_s21  ;;  %2722 = vmatpush3.bf16.msra.mxu0 %v2202_v53 }
  0xd1   : > { %v649_v16 = vpop.permute.xlu1 %648  ;;  %2764 = vmatpush3.bf16.msra.mxu1 %v2202_v53 }
  0xd2   : > { %v784_v52 = vpop.permute.xlu0 %783  ;;  %714 = vst.msk [vmem:[#allocation3 + $0xf8] sm:$0xff] %vm682_vm3, %v649_v16 }
  0xd3   : > { %878 = vst.msk [vmem:[#allocation3 + $0x10] sm:$0xff] %vm875_vm4, %v784_v52  ;;  %1751 = vrot.lane.b32.xlu1 %v3068_v6, %s2806_s14 }
  0xd4   : > { %1942 = vrot.lane.b32.xlu0 %v3222_v22, %s2807_s21 }
  0xd5   : > { %v782_v11 = vpop.permute.xlu1 %781 }
  0xd6   : > { %v788_v63 = vpop.permute.xlu0 %787  ;;  %877 = vst.msk [vmem:[#allocation3 + $0x8] sm:$0xff] %vm875_vm4, %v782_v11 }
  0xd7   : > { %880 = vst.msk [vmem:[#allocation3 + $0x20] sm:$0xff] %vm875_vm4, %v788_v63  ;;  %1940 = vrot.lane.b32.xlu1 %v3228_v31, %s2807_s21 }
  0xd8   : > { %1173 = vrot.lane.b32.xlu0 %v3013_v30, %s2803_s7 }
  0xd9   : > { %v786_v0 = vpop.permute.xlu1 %785 }
  0xda   : > { %v792_v3 = vpop.permute.xlu0 %791  ;;  %879 = vst.msk [vmem:[#allocation3 + $0x18] sm:$0xff] %vm875_vm4, %v786_v0 }
  0xdb   : > { %882 = vst.msk [vmem:[#allocation3 + $0x30] sm:$0xff] %vm875_vm4, %v792_v3  ;;  %1944 = vrot.lane.b32.xlu1 %v3236_v43, %s2807_s21 }
  0xdc   : > { %1177 = vrot.lane.b32.xlu0 %v3043_v54, %s2803_s7 }
  0xdd   : > { %v790_v4 = vpop.permute.xlu1 %789 }
  0xde   : > { %v796_v18 = vpop.permute.xlu0 %795  ;;  %881 = vst.msk [vmem:[#allocation3 + $0x28] sm:$0xff] %vm875_vm4, %v790_v4 }
  0xdf   : > { %884 = vst.msk [vmem:[#allocation3 + $0x40] sm:$0xff] %vm875_vm4, %v796_v18  ;;  %1175 = vrot.lane.b32.xlu1 %v3068_v6, %s2803_s7 }
  0xe0   : > { %1366 = vrot.lane.b32.xlu0 %v3222_v22, %s2804_s8 }
  0xe1   : > { %v794_v30 = vpop.permute.xlu1 %793 }
  0xe2   : > { %v800_v31 = vpop.permute.xlu0 %799  ;;  %883 = vst.msk [vmem:[#allocation3 + $0x38] sm:$0xff] %vm875_vm4, %v794_v30 }
  0xe3   : > { %886 = vst.msk [vmem:[#allocation3 + $0x50] sm:$0xff] %vm875_vm4, %v800_v31  ;;  %1179 = vrot.lane.b32.xlu1 %v3090_v2, %s2803_s7 }
  0xe4   : > { %1370 = vrot.lane.b32.xlu0 %v3230_v38, %s2804_s8 }
  0xe5   : > { %v798_v5 = vpop.permute.xlu1 %797 }
  0xe6   : > { %v804_v1 = vpop.permute.xlu0 %803  ;;  %885 = vst.msk [vmem:[#allocation3 + $0x48] sm:$0xff] %vm875_vm4, %v798_v5 }
  0xe7   : > { %888 = vst.msk [vmem:[#allocation3 + $0x60] sm:$0xff] %vm875_vm4, %v804_v1  ;;  %1368 = vrot.lane.b32.xlu1 %v3236_v43, %s2804_s8 }
  0xe8   : > { %1560 = vrot.lane.b32.xlu0 %v3113_v23, %s2805_s9 }
  0xe9   : > { %v802_v6 = vpop.permute.xlu1 %801 }
  0xea   : > { %v808_v22 = vpop.permute.xlu0 %807  ;;  %887 = vst.msk [vmem:[#allocation3 + $0x58] sm:$0xff] %vm875_vm4, %v802_v6 }
  0xeb   : > { %890 = vst.msk [vmem:[#allocation3 + $0x70] sm:$0xff] %vm875_vm4, %v808_v22  ;;  %1372 = vrot.lane.b32.xlu1 %v3244_v47, %s2804_s8 }
  0xec   : > { %1564 = vrot.lane.b32.xlu0 %v3117_v25, %s2805_s9 }
  0xed   : > { %v806_v8 = vpop.permute.xlu1 %805 }
  0xee   : > { %v812_v29 = vpop.permute.xlu0 %811  ;;  %889 = vst.msk [vmem:[#allocation3 + $0x68] sm:$0xff] %vm875_vm4, %v806_v8 }
  0xef   : > { %892 = vst.msk [vmem:[#allocation3 + $0x80] sm:$0xff] %vm875_vm4, %v812_v29  ;;  %1562 = vrot.lane.b32.xlu1 %v3115_v24, %s2805_s9 }
  0xf0   : > { %1753 = vrot.lane.b32.xlu0 %v3043_v54, %s2806_s14 }
  0xf1   : > { %v810_v23 = vpop.permute.xlu1 %809 }
  0xf2   : > { %v816_v43 = vpop.permute.xlu0 %815  ;;  %891 = vst.msk [vmem:[#allocation3 + $0x78] sm:$0xff] %vm875_vm4, %v810_v23 }
  0xf3   : > { %894 = vst.msk [vmem:[#allocation3 + $0x90] sm:$0xff] %vm875_vm4, %v816_v43  ;;  %1566 = vrot.lane.b32.xlu1 %v3125_v26, %s2805_s9  ;;  %v1886_v43 = vld [vmem:[#allocation2 + $0xc2] sm:$0xff] }
  0xf4   : > { %1757 = vrot.lane.b32.xlu0 %v3070_v7, %s2806_s14 }
  0xf5   : > { %v814_v25 = vpop.permute.xlu1 %813 }
  0xf6   : > { %v820_v9 = vpop.permute.xlu0 %819  ;;  %893 = vst.msk [vmem:[#allocation3 + $0x88] sm:$0xff] %vm875_vm4, %v814_v25 }
  0xf7   : > { %896 = vst.msk [vmem:[#allocation3 + $0xa0] sm:$0xff] %vm875_vm4, %v820_v9  ;;  %1755 = vrot.lane.b32.xlu1 %v3090_v2, %s2806_s14 }
  0xf8   : > { %1946 = vrot.lane.b32.xlu0 %v3230_v38, %s2807_s21 }
  0xf9   : > { %v818_v54 = vpop.permute.xlu1 %817 }
  0xfa   : > { %v824_v24 = vpop.permute.xlu0 %823  ;;  %895 = vst.msk [vmem:[#allocation3 + $0x98] sm:$0xff] %vm875_vm4, %v818_v54 }
  0xfb   : > { %898 = vst.msk [vmem:[#allocation3 + $0xb0] sm:$0xff] %vm875_vm4, %v824_v24  ;;  %1759 = vrot.lane.b32.xlu1 %v3102_v17, %s2806_s14 }
  0xfc   : > { %1950 = vrot.lane.b32.xlu0 %v3238_v44, %s2807_s21 }
  0xfd   : > { %v822_v26 = vpop.permute.xlu1 %821 }
  0xfe   : > { %v828_v10 = vpop.permute.xlu0 %827  ;;  %897 = vst.msk [vmem:[#allocation3 + $0xa8] sm:$0xff] %vm875_vm4, %v822_v26  ;;  %v1696_v26 = vld [vmem:[#allocation2 + $0xe1] sm:$0xff] }
  0xff   : > { %900 = vst.msk [vmem:[#allocation3 + $0xc0] sm:$0xff] %vm875_vm4, %v828_v10  ;;  %1948 = vrot.lane.b32.xlu1 %v3244_v47, %s2807_s21  ;;  %v1888_v10 = vld [vmem:[#allocation2 + $0xda] sm:$0xff] }
 0x100   : > { %992 = vrot.lane.b32.xlu0 %v3127_v27, %s2802_s6 }
 0x101   : > { %v826_v2 = vpop.permute.xlu1 %825 }
 0x102   : > { %v832_v38 = vpop.permute.xlu0 %831  ;;  %899 = vst.msk [vmem:[#allocation3 + $0xb8] sm:$0xff] %vm875_vm4, %v826_v2 }
 0x103   : > { %902 = vst.msk [vmem:[#allocation3 + $0xd0] sm:$0xff] %vm875_vm4, %v832_v38  ;;  %1952 = vrot.lane.b32.xlu1 %v3252_v49, %s2807_s21 }
 0x104   : > { %1181 = vrot.lane.b32.xlu0 %v3070_v7, %s2803_s7 }
 0x105   : > { %v830_v20 = vpop.permute.xlu1 %829 }
 0x106   : > { %v836_v12 = vpop.permute.xlu0 %835  ;;  %901 = vst.msk [vmem:[#allocation3 + $0xc8] sm:$0xff] %vm875_vm4, %v830_v20 }
 0x107   : > { %904 = vst.msk [vmem:[#allocation3 + $0xe0] sm:$0xff] %vm875_vm4, %v836_v12  ;;  %994 = vrot.lane.b32.xlu1 %v3129_v28, %s2802_s6 }
 0x108   : > { %1185 = vrot.lane.b32.xlu0 %v3092_v14, %s2803_s7 }
 0x109   : > { %v834_v47 = vpop.permute.xlu1 %833 }
 0x10a   : > { %v840_v51 = vpop.permute.xlu0 %839  ;;  %903 = vst.msk [vmem:[#allocation3 + $0xd8] sm:$0xff] %vm875_vm4, %v834_v47  ;;  %v1887_v47 = vld [vmem:[#allocation2 + $0xca] sm:$0xff] }
 0x10b   : > { %906 = vst.msk [vmem:[#allocation3 + $0xf0] sm:$0xff] %vm875_vm4, %v840_v51  ;;  %1183 = vrot.lane.b32.xlu1 %v3102_v17, %s2803_s7 }
 0x10c   : > { %1374 = vrot.lane.b32.xlu0 %v3238_v44, %s2804_s8 }
 0x10d   : > { %v838_v7 = vpop.permute.xlu1 %837 }
 0x10e   : > { %v973_v15 = vpop.permute.xlu0 %972  ;;  %905 = vst.msk [vmem:[#allocation3 + $0xe8] sm:$0xff] %vm875_vm4, %v838_v7 }
 0x10f   : > { %1069 = vst.msk [vmem:[#allocation3] sm:$0xff] %vm1068_vm6, %v973_v15  ;;  %1187 = vrot.lane.b32.xlu1 %v3110_v21, %s2803_s7  ;;  %v1689_v21 = vld [vmem:[#allocation2 + $0x91] sm:$0xff]  ;;  %v1889_v15 = vld [vmem:[#allocation2 + $0xe2] sm:$0xff] }
 0x110   : > { %1378 = vrot.lane.b32.xlu0 %v3246_v48, %s2804_s8 }
 0x111   : > { %v842_v14 = vpop.permute.xlu1 %841 }
 0x112   : > { %v977_v58 = vpop.permute.xlu0 %976  ;;  %907 = vst.msk [vmem:[#allocation3 + $0xf8] sm:$0xff] %vm875_vm4, %v842_v14 }
 0x113   : > { %1071 = vst.msk [vmem:[#allocation3 + $0x10] sm:$0xff] %vm1068_vm6, %v977_v58  ;;  %1376 = vrot.lane.b32.xlu1 %v3252_v49, %s2804_s8 }
 0x114   : > { %1568 = vrot.lane.b32.xlu0 %v3127_v27, %s2805_s9  ;;  %v1691_v27 = vld [vmem:[#allocation2 + $0xa9] sm:$0xff] }
 0x115   : > { %v975_v17 = vpop.permute.xlu1 %974 }
 0x116   : > { %v981_v44 = vpop.permute.xlu0 %980  ;;  %1070 = vst.msk [vmem:[#allocation3 + $0x8] sm:$0xff] %vm1068_vm6, %v975_v17 }
 0x117   : > { %1073 = vst.msk [vmem:[#allocation3 + $0x20] sm:$0xff] %vm1068_vm6, %v981_v44  ;;  %1380 = vrot.lane.b32.xlu1 %v3260_v55, %s2804_s8 }
 0x118   : > { %1572 = vrot.lane.b32.xlu0 %v3137_v32, %s2805_s9 }
 0x119   : > { %v979_v60 = vpop.permute.xlu1 %978 }
 0x11a   : > { %v985_v19 = vpop.permute.xlu0 %984  ;;  %1072 = vst.msk [vmem:[#allocation3 + $0x18] sm:$0xff] %vm1068_vm6, %v979_v60 }
 0x11b   : > { %1075 = vst.msk [vmem:[#allocation3 + $0x30] sm:$0xff] %vm1068_vm6, %v985_v19  ;;  %1570 = vrot.lane.b32.xlu1 %v3129_v28, %s2805_s9  ;;  %v1692_v28 = vld [vmem:[#allocation2 + $0xb1] sm:$0xff] }
 0x11c   : > { %1761 = vrot.lane.b32.xlu0 %v1689_v21, %s2806_s14  ;;  %v267_v19 = vld [vmem:[%s2911_s26 + $0xf0] sm:$0xff] }
 0x11d   : > { %v983_v49 = vpop.permute.xlu1 %982 }
 0x11e   : > { %v989_v13 = vpop.permute.xlu0 %988  ;;  %1074 = vst.msk [vmem:[#allocation3 + $0x28] sm:$0xff] %vm1068_vm6, %v983_v49 }
 0x11f   : > { %1077 = vst.msk [vmem:[#allocation3 + $0x40] sm:$0xff] %vm1068_vm6, %v989_v13  ;;  %1574 = vrot.lane.b32.xlu1 %v3139_v33, %s2805_s9 }
 0x120   : > { %1765 = vrot.lane.b32.xlu0 %v1691_v27, %s2806_s14 }
 0x121   : > { %v987_v16 = vpop.permute.xlu1 %986 }
 0x122   : > { %v1166_v52 = vpop.permute.xlu0 %1165  ;;  %1076 = vst.msk [vmem:[#allocation3 + $0x38] sm:$0xff] %vm1068_vm6, %v987_v16 }
 0x123   : > { %1262 = vst.msk [vmem:[#allocation3] sm:$0xff] %vm1261_vm7, %v1166_v52  ;;  %1763 = vrot.lane.b32.xlu1 %v1690_v61, %s2806_s14  ;;  %v2790_v52 = vld [vmem:[%s4017_s2] ss:$0 sm:$0xff] }
 0x124   : > { %1954 = vrot.lane.b32.xlu0 %v3246_v48, %s2807_s21 }
 0x125   : > { %v991_v62 = vpop.permute.xlu1 %990 }
 0x126   : > { %v1170_v53 = vpop.permute.xlu0 %1169  ;;  %1078 = vst.msk [vmem:[#allocation3 + $0x48] sm:$0xff] %vm1068_vm6, %v991_v62 }
 0x127   : > { %1264 = vst.msk [vmem:[#allocation3 + $0x10] sm:$0xff] %vm1261_vm7, %v1170_v53  ;;  %1767 = vrot.lane.b32.xlu1 %v1692_v28, %s2806_s14  ;;  %v1120_v53 = vld [vmem:[#allocation2 + $0xf9] sm:$0xff] }
 0x128   : > { %1958 = vrot.lane.b32.xlu0 %v3254_v50, %s2807_s21 }
 0x129   : > { %v1168_v11 = vpop.permute.xlu1 %1167 }
 0x12a   : > { %v1359_v63 = vpop.permute.xlu0 %1358  ;;  %1263 = vst.msk [vmem:[#allocation3 + $0x8] sm:$0xff] %vm1261_vm7, %v1168_v11  ;;  %v1312_v11 = vld [vmem:[#allocation2 + $0xf2] sm:$0xff] }
 0x12b   : > { %1455 = vst.msk [vmem:[#allocation3] sm:$0xff] %vm1454_vm8, %v1359_v63  ;;  %1956 = vrot.lane.b32.xlu1 %v3260_v55, %s2807_s21 }
 0x12c   : > { %996 = vrot.lane.b32.xlu0 %v3137_v32, %s2802_s6  ;;  %v1115_v32 = vld [vmem:[#allocation2 + $0xc1] sm:$0xff] }
 0x12d   : > { %v1172_v48 = vpop.permute.xlu1 %1171 }
 0x12e   : > { %v1363_v0 = vpop.permute.xlu0 %1362  ;;  %1265 = vst.msk [vmem:[#allocation3 + $0x18] sm:$0xff] %vm1261_vm7, %v1172_v48 }
 0x12f   : > { %1457 = vst.msk [vmem:[#allocation3 + $0x10] sm:$0xff] %vm1454_vm8, %v1363_v0  ;;  %1960 = vrot.lane.b32.xlu1 %v3268_v57, %s2807_s21 }
 0x130   : > { %1000 = vrot.lane.b32.xlu0 %v3141_v34, %s2802_s6 }
 0x131   : > { %v1361_v3 = vpop.permute.xlu1 %1360 }
 0x132   : > { %v1553_v4 = vpop.permute.xlu0 %1552  ;;  %1456 = vst.msk [vmem:[#allocation3 + $0x8] sm:$0xff] %vm1454_vm8, %v1361_v3 }
 0x133   : > { %1649 = vst.msk [vmem:[#allocation3] sm:$0xff] %vm1648_vm9, %v1553_v4  ;;  %998 = vrot.lane.b32.xlu1 %v3139_v33, %s2802_s6  ;;  %v1116_v33 = vld [vmem:[#allocation2 + $0xc9] sm:$0xff] }
 0x134   : > { %1189 = vrot.lane.b32.xlu0 %v1691_v27, %s2803_s7  ;;  %v268_v27 = vld [vmem:[%s2911_s26 + $0xf8] sm:$0xff] }
 0x135   : > { %v1365_v55 = vpop.permute.xlu1 %1364 }
 0x136   : > { %v1557_v18 = vpop.permute.xlu0 %1556  ;;  %1458 = vst.msk [vmem:[#allocation3 + $0x18] sm:$0xff] %vm1454_vm8, %v1365_v55  ;;  %v1313_v55 = vld [vmem:[#allocation2 + $0xfa] sm:$0xff] }
 0x137   : > { %1651 = vst.msk [vmem:[#allocation3 + $0x10] sm:$0xff] %vm1648_vm9, %v1557_v18  ;;  %1002 = vrot.lane.b32.xlu1 %v3152_v35, %s2802_s6 }
 0x138   : > { %1193 = vrot.lane.b32.xlu0 %v1115_v32, %s2803_s7 }
 0x139   : > { %v1555_v30 = vpop.permute.xlu1 %1554 }
 0x13a   : > { %v1746_v31 = vpop.permute.xlu0 %1745  ;;  %1650 = vst.msk [vmem:[#allocation3 + $0x8] sm:$0xff] %vm1648_vm9, %v1555_v30 }
 0x13b   : > { %1842 = vst.msk [vmem:[#allocation3] sm:$0xff] %vm1841_vm10, %v1746_v31  ;;  %1191 = vrot.lane.b32.xlu1 %v1692_v28, %s2803_s7 }
 0x13c   : > { %1382 = vrot.lane.b32.xlu0 %v3254_v50, %s2804_s8 }
 0x13d   : > { %v1559_v5 = vpop.permute.xlu1 %1558 }
 0x13e   : > { %v1750_v1 = vpop.permute.xlu0 %1749  ;;  %1652 = vst.msk [vmem:[#allocation3 + $0x18] sm:$0xff] %vm1648_vm9, %v1559_v5 }
 0x13f   : > { %1844 = vst.msk [vmem:[#allocation3 + $0x10] sm:$0xff] %vm1841_vm10, %v1750_v1  ;;  %1195 = vrot.lane.b32.xlu1 %v1116_v33, %s2803_s7 }
 0x140   : > { %1386 = vrot.lane.b32.xlu0 %v3262_v56, %s2804_s8 }
 0x141   : > { %v1748_v6 = vpop.permute.xlu1 %1747 }
 0x142   : > { %v1939_v22 = vpop.permute.xlu0 %1938  ;;  %1843 = vst.msk [vmem:[#allocation3 + $0x8] sm:$0xff] %vm1841_vm10, %v1748_v6 }
 0x143   : > { %2035 = vst.msk [vmem:[#allocation3] sm:$0xff] %vm2034_vm11, %v1939_v22  ;;  %1384 = vrot.lane.b32.xlu1 %v3268_v57, %s2804_s8  ;;  %v1699_v22 = vld [vmem:[#allocation2 + $0x109] sm:$0xff] }
 0x144   : > { %1576 = vrot.lane.b32.xlu0 %v3141_v34, %s2805_s9  ;;  %v1695_v34 = vld [vmem:[#allocation2 + $0xd9] sm:$0xff] }
 0x145   : > { %v1752_v50 = vpop.permute.xlu1 %1751 }
 0x146   : > { %v1943_v8 = vpop.permute.xlu0 %1942  ;;  %1845 = vst.msk [vmem:[#allocation3 + $0x18] sm:$0xff] %vm1841_vm10, %v1752_v50 }
 0x147   : > { %2037 = vst.msk [vmem:[#allocation3 + $0x10] sm:$0xff] %vm2034_vm11, %v1943_v8  ;;  %1388 = vrot.lane.b32.xlu1 %v3273_v59, %s2804_s8 }
 0x148   : > { %1580 = vrot.lane.b32.xlu0 %v3154_v36, %s2805_s9 }
 0x149   : > { %v1941_v56 = vpop.permute.xlu1 %1940 }
 0x14a   : > { %v1174_v29 = vpop.permute.xlu0 %1173  ;;  %2036 = vst.msk [vmem:[#allocation3 + $0x8] sm:$0xff] %vm2034_vm11, %v1941_v56  ;;  %v2067_v59 = vld [vmem:[#allocation3] sm:$0xff] }
 0x14b   : > { %1266 = vst.msk [vmem:[#allocation3 + $0x20] sm:$0xff] %vm1261_vm7, %v1174_v29  ;;  %1578 = vrot.lane.b32.xlu1 %v3152_v35, %s2805_s9 }
 0x14c   : > { %1769 = vrot.lane.b32.xlu0 %v1115_v32, %s2806_s14 }
 0x14d   : > { %v1945_v57 = vpop.permute.xlu1 %1944 }
 0x14e   : > { %v1178_v23 = vpop.permute.xlu0 %1177  ;;  %2038 = vst.msk [vmem:[#allocation3 + $0x18] sm:$0xff] %vm2034_vm11, %v1945_v57  ;;  %v2069_v24 = vld [vmem:[#allocation3 + $0x10] sm:$0xff]  ;;  %v1700_v57 = vld [vmem:[#allocation2 + $0x111] sm:$0xff] }
 0x14f   : > { %1268 = vst.msk [vmem:[#allocation3 + $0x30] sm:$0xff] %vm1261_vm7, %v1178_v23  ;;  %1582 = vrot.lane.b32.xlu1 %v3156_v37, %s2805_s9  ;;  %v1892_v23 = vld [vmem:[#allocation2 + $0x10a] sm:$0xff] }
 0x150   : > { %1773 = vrot.lane.b32.xlu0 %v1695_v34, %s2806_s14 }
 0x151   : > { %v1176_v25 = vpop.permute.xlu1 %1175  ;;  %v2068_v9 = vld [vmem:[#allocation3 + $0x8] sm:$0xff] }
 0x152   : > { %v1367_v35 = vpop.permute.xlu0 %1366  ;;  %1267 = vst.msk [vmem:[#allocation3 + $0x28] sm:$0xff] %vm1261_vm7, %v1176_v25  ;;  %v2099_v54 = vpack.c.bf16 %v2068_v9, %v2067_v59 }
 0x153   : > { %1459 = vst.msk [vmem:[#allocation3 + $0x20] sm:$0xff] %vm1454_vm8, %v1367_v35  ;;  %1771 = vrot.lane.b32.xlu1 %v1116_v33, %s2806_s14  ;;  %v1893_v35 = vld [vmem:[#allocation2 + $0x112] sm:$0xff] }
 0x154   : > { %1962 = vrot.lane.b32.xlu0 %v1886_v43, %s2807_s21  ;;  %2723 = vmatprep.mubr.msk.bf16.mxu0 %vm2151_vm12, %v2099_v54 }
 0x155   : > { %v1180_v2 = vpop.permute.xlu1 %1179  ;;  %v2070_v38 = vld [vmem:[#allocation3 + $0x18] sm:$0xff] }
 0x156   : > { %v1371_v20 = vpop.permute.xlu0 %1370  ;;  %1269 = vst.msk [vmem:[#allocation3 + $0x38] sm:$0xff] %vm1261_vm7, %v1180_v2  ;;  %v2100_v12 = vpack.c.bf16 %v2070_v38, %v2069_v24 }
 0x157   : > { %1461 = vst.msk [vmem:[#allocation3 + $0x30] sm:$0xff] %vm1454_vm8, %v1371_v20  ;;  %1775 = vrot.lane.b32.xlu1 %v1696_v26, %s2806_s14 }
 0x158   : > { %1966 = vrot.lane.b32.xlu0 %v1888_v10, %s2807_s21  ;;  %2724 = vmatmul.mubr.msk.bf16.vlgmr.msra.gmra.mrb[0].mxu0 %vm2151_vm12, %v2100_v12  ;;  %v1316_v12 = vld [vmem:[#allocation2 + $0x122] sm:$0xff] }
 0x159   : > { %v1369_v51 = vpop.permute.xlu1 %1368 }
 0x15a   : > { %v1561_v7 = vpop.permute.xlu0 %1560  ;;  %1460 = vst.msk [vmem:[#allocation3 + $0x28] sm:$0xff] %vm1454_vm8, %v1369_v51 }
 0x15b   : > { %1653 = vst.msk [vmem:[#allocation3 + $0x20] sm:$0xff] %vm1648_vm9, %v1561_v7  ;;  %1964 = vrot.lane.b32.xlu1 %v1887_v47, %s2807_s21 }
 0x15c   : > { %1004 = vrot.lane.b32.xlu0 %v3154_v36, %s2802_s6  ;;  %v1119_v36 = vld [vmem:[#allocation2 + $0xf1] sm:$0xff] }
 0x15d   : > { %v1373_v14 = vpop.permute.xlu1 %1372 }
 0x15e   : > { %v1565_v58 = vpop.permute.xlu0 %1564  ;;  %1462 = vst.msk [vmem:[#allocation3 + $0x38] sm:$0xff] %vm1454_vm8, %v1373_v14 }
 0x15f   : > { %1655 = vst.msk [vmem:[#allocation3 + $0x30] sm:$0xff] %vm1648_vm9, %v1565_v58  ;;  %1968 = vrot.lane.b32.xlu1 %v1889_v15, %s2807_s21  ;;  %v1317_v58 = vld [vmem:[#allocation2 + $0x12a] sm:$0xff] }
 0x160   : > { %1008 = vrot.lane.b32.xlu0 %v3164_v39, %s2802_s6 }
 0x161   : > { %v1563_v17 = vpop.permute.xlu1 %1562 }
 0x162   : > { %v1754_v44 = vpop.permute.xlu0 %1753  ;;  %1654 = vst.msk [vmem:[#allocation3 + $0x28] sm:$0xff] %vm1648_vm9, %v1563_v17  ;;  %v1510_v17 = vld [vmem:[#allocation2 + $0x138] sm:$0xff] }
 0x163   : > { %1846 = vst.msk [vmem:[#allocation3 + $0x20] sm:$0xff] %vm1841_vm10, %v1754_v44  ;;  %1006 = vrot.lane.b32.xlu1 %v3156_v37, %s2802_s6  ;;  %v2789_v37 = vld [vmem:[%s4016_s1] ss:$0 sm:$0xff] }
 0x164   : > { %1197 = vrot.lane.b32.xlu0 %v1695_v34, %s2803_s7  ;;  %v306_v61 = vmul.f32 %v2789_v37, %v267_v19  ;;  %v307_v16 = vmul.f32 %v2789_v37, %v268_v27  ;;  %v1509_v27 = vld [vmem:[#allocation2 + $0x128] sm:$0xff] }
 0x165   : > { %v1567_v21 = vpop.permute.xlu1 %1566 }
 0x166   : > { %v1758_v60 = vpop.permute.xlu0 %1757  ;;  %1656 = vst.msk [vmem:[#allocation3 + $0x38] sm:$0xff] %vm1648_vm9, %v1567_v21  ;;  %v345_v28 = vadd.f32 %v2790_v52, %v306_v61  ;;  %v346_v62 = vadd.f32 %v2790_v52, %v307_v16  ;;  %v1511_v16 = vld [vmem:[#allocation2 + $0x140] sm:$0xff] }
 0x167   : > { %1848 = vst.msk [vmem:[#allocation3 + $0x30] sm:$0xff] %vm1841_vm10, %v1758_v60  ;;  %1010 = vrot.lane.b32.xlu1 %v3166_v40, %s2802_s6  ;;  %v1703_v52 = vld [vmem:[#allocation2 + $0x139] sm:$0xff] }
 0x168   : > { %1201 = vrot.lane.b32.xlu0 %v1119_v36, %s2803_s7  ;;  %v377_v0 = vmax.f32 %v345_v28, 0.0  ;;  %v378_v3 = vmax.f32 %v346_v62, 0.0 }
 0x169   : > { %v1756_v49 = vpop.permute.xlu1 %1755 }
 0x16a   : > { %v1947_v13 = vpop.permute.xlu0 %1946  ;;  %1847 = vst.msk [vmem:[#allocation3 + $0x28] sm:$0xff] %vm1841_vm10, %v1756_v49 }
 0x16b   : > { %2039 = vst.msk [vmem:[#allocation3 + $0x20] sm:$0xff] %vm2034_vm11, %v1947_v13  ;;  %1199 = vrot.lane.b32.xlu1 %v1696_v26, %s2803_s7 }
 0x16c   : > { %1390 = vrot.lane.b32.xlu0 %v1888_v10, %s2804_s8  ;;  %456 = vst.msk [vmem:[#allocation2 + $0x181] sm:$0xff] %vm379_vm0, %v377_v0  ;;  %457 = vst.msk [vmem:[#allocation2 + $0x189] sm:$0xff] %vm379_vm0, %v378_v3 }
 0x16d   : > { %v1760_v63 = vpop.permute.xlu1 %1759 }
 0x16e   : > { %v1951_v48 = vpop.permute.xlu0 %1950  ;;  %1849 = vst.msk [vmem:[#allocation3 + $0x38] sm:$0xff] %vm1841_vm10, %v1760_v63  ;;  %v1704_v63 = vld [vmem:[#allocation2 + $0x141] sm:$0xff] }
 0x16f   : > { %2041 = vst.msk [vmem:[#allocation3 + $0x30] sm:$0xff] %vm2034_vm11, %v1951_v48  ;;  %1203 = vrot.lane.b32.xlu1 %v1120_v53, %s2803_s7  ;;  %v1896_v48 = vld [vmem:[#allocation2 + $0x13a] sm:$0xff] }
 0x170   : > { %1394 = vrot.lane.b32.xlu0 %v1312_v11, %s2804_s8 }
 0x171   : > { %v1949_v4 = vpop.permute.xlu1 %1948 }
 0x172   : > { %v993_v32 = vpop.permute.xlu0 %992  ;;  %2040 = vst.msk [vmem:[#allocation3 + $0x28] sm:$0xff] %vm2034_vm11, %v1949_v4  ;;  %v2071_v31 = vld [vmem:[#allocation3 + $0x20] sm:$0xff] }
 0x173   : > { %1079 = vst.msk [vmem:[#allocation3 + $0x50] sm:$0xff] %vm1068_vm6, %v993_v32  ;;  %1392 = vrot.lane.b32.xlu1 %v1889_v15, %s2804_s8 }
 0x174   : > { %1584 = vrot.lane.b32.xlu0 %v3164_v39, %s2805_s9 }
 0x175   : > { %v1953_v18 = vpop.permute.xlu1 %1952 }
 0x176   : > { %v1182_v30 = vpop.permute.xlu0 %1181  ;;  %2042 = vst.msk [vmem:[#allocation3 + $0x38] sm:$0xff] %vm2034_vm11, %v1953_v18  ;;  %v2073_v39 = vld [vmem:[#allocation3 + $0x30] sm:$0xff]  ;;  %v934_v18 = vld [vmem:[#allocation2 + $0x150] sm:$0xff] }
 0x177   : > { %1270 = vst.msk [vmem:[#allocation3 + $0x40] sm:$0xff] %vm1261_vm7, %v1182_v30  ;;  %1396 = vrot.lane.b32.xlu1 %v1313_v55, %s2804_s8 }
 0x178   : > { %1588 = vrot.lane.b32.xlu0 %v3174_v41, %s2805_s9 }
 0x179   : > { %v995_v33 = vpop.permute.xlu1 %994  ;;  %v2072_v5 = vld [vmem:[#allocation3 + $0x28] sm:$0xff] }
 0x17a   : > { %v1186_v1 = vpop.permute.xlu0 %1185  ;;  %1080 = vst.msk [vmem:[#allocation3 + $0x58] sm:$0xff] %vm1068_vm6, %v995_v33  ;;  %v2101_v6 = vpack.c.bf16 %v2072_v5, %v2071_v31 }
 0x17b   : > { %1272 = vst.msk [vmem:[#allocation3 + $0x50] sm:$0xff] %vm1261_vm7, %v1186_v1  ;;  %1586 = vrot.lane.b32.xlu1 %v3166_v40, %s2805_s9  ;;  %v935_v1 = vld [vmem:[#allocation2 + $0x158] sm:$0xff] }
 0x17c   : > { %1777 = vrot.lane.b32.xlu0 %v1119_v36, %s2806_s14  ;;  %2727 = vmatprep.mubr.msk.bf16.mxu0 %vm2151_vm12, %v2101_v6  ;;  %v1127_v6 = vld [vmem:[#allocation2 + $0x151] sm:$0xff] }
 0x17d   : > { %v1184_v50 = vpop.permute.xlu1 %1183  ;;  %v2074_v8 = vld [vmem:[#allocation3 + $0x38] sm:$0xff] }
 0x17e   : > { %v1375_v56 = vpop.permute.xlu0 %1374  ;;  %1271 = vst.msk [vmem:[#allocation3 + $0x48] sm:$0xff] %vm1261_vm7, %v1184_v50  ;;  %v2102_v29 = vpack.c.bf16 %v2074_v8, %v2073_v39 }
 0x17f   : > { %1463 = vst.msk [vmem:[#allocation3 + $0x40] sm:$0xff] %vm1454_vm8, %v1375_v56  ;;  %1590 = vrot.lane.b32.xlu1 %v3176_v42, %s2805_s9  ;;  %v1128_v56 = vld [vmem:[#allocation2 + $0x159] sm:$0xff] }
 0x180   : > { %1781 = vrot.lane.b32.xlu0 %v1699_v22, %s2806_s14  ;;  %2728 = vmatmul.mubr.msk.bf16.gmra.mrb[4].mxu0 %vm2151_vm12, %v2102_v29  ;;  %v1320_v29 = vld [vmem:[#allocation2 + $0x152] sm:$0xff] }
 0x181   : > { %v1188_v40 = vpop.permute.xlu1 %1187 }
 0x182   : > { %v1379_v34 = vpop.permute.xlu0 %1378  ;;  %1273 = vst.msk [vmem:[#allocation3 + $0x58] sm:$0xff] %vm1261_vm7, %v1188_v40 }
 0x183   : > { %1465 = vst.msk [vmem:[#allocation3 + $0x50] sm:$0xff] %vm1454_vm8, %v1379_v34  ;;  %1779 = vrot.lane.b32.xlu1 %v1120_v53, %s2806_s14 }
 0x184   : > { %1970 = vrot.lane.b32.xlu0 %v1312_v11, %s2807_s21 }
 0x185   : > { %v1377_v59 = vpop.permute.xlu1 %1376 }
 0x186   : > { %v1569_v43 = vpop.permute.xlu0 %1568  ;;  %1464 = vst.msk [vmem:[#allocation3 + $0x48] sm:$0xff] %vm1454_vm8, %v1377_v59 }
 0x187   : > { %1657 = vst.msk [vmem:[#allocation3 + $0x40] sm:$0xff] %vm1648_vm9, %v1569_v43  ;;  %1783 = vrot.lane.b32.xlu1 %v1700_v57, %s2806_s14  ;;  %v1321_v43 = vld [vmem:[#allocation2 + $0x15a] sm:$0xff] }
 0x188   : > { %1974 = vrot.lane.b32.xlu0 %v1892_v23, %s2807_s21 }
 0x189   : > { %v1381_v25 = vpop.permute.xlu1 %1380 }
 0x18a   : > { %v1573_v9 = vpop.permute.xlu0 %1572  ;;  %1466 = vst.msk [vmem:[#allocation3 + $0x58] sm:$0xff] %vm1454_vm8, %v1381_v25  ;;  %v1514_v25 = vld [vmem:[#allocation2 + $0x168] sm:$0xff] }
 0x18b   : > { %1659 = vst.msk [vmem:[#allocation3 + $0x50] sm:$0xff] %vm1648_vm9, %v1573_v9  ;;  %1972 = vrot.lane.b32.xlu1 %v1313_v55, %s2807_s21  ;;  %v1897_v55 = vld [vmem:[#allocation2 + $0x142] sm:$0xff] }
 0x18c   : > { %1012 = vrot.lane.b32.xlu0 %v3174_v41, %s2802_s6  ;;  %v1123_v41 = vld [vmem:[#allocation2 + $0x121] sm:$0xff] }
 0x18d   : > { %v1571_v54 = vpop.permute.xlu1 %1570 }
 0x18e   : > { %v1762_v24 = vpop.permute.xlu0 %1761  ;;  %1658 = vst.msk [vmem:[#allocation3 + $0x48] sm:$0xff] %vm1648_vm9, %v1571_v54 }
 0x18f   : > { %1850 = vst.msk [vmem:[#allocation3 + $0x40] sm:$0xff] %vm1841_vm10, %v1762_v24  ;;  %1976 = vrot.lane.b32.xlu1 %v1893_v35, %s2807_s21 }
 0x190   : > { %1016 = vrot.lane.b32.xlu0 %v3184_v45, %s2802_s6 }
 0x191   : > { %v1575_v26 = vpop.permute.xlu1 %1574 }
 0x192   : > { %v1766_v10 = vpop.permute.xlu0 %1765  ;;  %1660 = vst.msk [vmem:[#allocation3 + $0x58] sm:$0xff] %vm1648_vm9, %v1575_v26 }
 0x193   : > { %1852 = vst.msk [vmem:[#allocation3 + $0x50] sm:$0xff] %vm1841_vm10, %v1766_v10  ;;  %1014 = vrot.lane.b32.xlu1 %v3176_v42, %s2802_s6  ;;  %v1124_v42 = vld [vmem:[#allocation2 + $0x129] sm:$0xff] }
 0x194   : > { %1205 = vrot.lane.b32.xlu0 %v1699_v22, %s2803_s7 }
 0x195   : > { %v1764_v2 = vpop.permute.xlu1 %1763 }
 0x196   : > { %v1955_v38 = vpop.permute.xlu0 %1954  ;;  %1851 = vst.msk [vmem:[#allocation3 + $0x48] sm:$0xff] %vm1841_vm10, %v1764_v2 }
 0x197   : > { %2043 = vst.msk [vmem:[#allocation3 + $0x40] sm:$0xff] %vm2034_vm11, %v1955_v38  ;;  %1018 = vrot.lane.b32.xlu1 %v3186_v46, %s2802_s6  ;;  %v1508_v46 = vld [vmem:[#allocation2 + $0x120] sm:$0xff] }
 0x198   : > { %1209 = vrot.lane.b32.xlu0 %v1123_v41, %s2803_s7 }
 0x199   : > { %v1768_v45 = vpop.permute.xlu1 %1767 }
 0x19a   : > { %v1959_v20 = vpop.permute.xlu0 %1958  ;;  %1853 = vst.msk [vmem:[#allocation3 + $0x58] sm:$0xff] %vm1841_vm10, %v1768_v45  ;;  %v1515_v45 = vld [vmem:[#allocation2 + $0x170] sm:$0xff] }
 0x19b   : > { %2045 = vst.msk [vmem:[#allocation3 + $0x50] sm:$0xff] %vm2034_vm11, %v1959_v20  ;;  %1207 = vrot.lane.b32.xlu1 %v1700_v57, %s2803_s7  ;;  %v1707_v20 = vld [vmem:[#allocation2 + $0x169] sm:$0xff] }
 0x19c   : > { %1398 = vrot.lane.b32.xlu0 %v1892_v23, %s2804_s8 }
 0x19d   : > { %v1957_v47 = vpop.permute.xlu1 %1956 }
 0x19e   : > { %v997_v51 = vpop.permute.xlu0 %996  ;;  %2044 = vst.msk [vmem:[#allocation3 + $0x48] sm:$0xff] %vm2034_vm11, %v1957_v47  ;;  %v2075_v14 = vld [vmem:[#allocation3 + $0x40] sm:$0xff] }
 0x19f   : > { %1081 = vst.msk [vmem:[#allocation3 + $0x60] sm:$0xff] %vm1068_vm6, %v997_v51  ;;  %1211 = vrot.lane.b32.xlu1 %v1124_v42, %s2803_s7 }
 0x1a0   : > { %1402 = vrot.lane.b32.xlu0 %v1316_v12, %s2804_s8 }
 0x1a1   : > { %v1961_v7 = vpop.permute.xlu1 %1960 }
 0x1a2   : > { %v1001_v15 = vpop.permute.xlu0 %1000  ;;  %2046 = vst.msk [vmem:[#allocation3 + $0x58] sm:$0xff] %vm2034_vm11, %v1961_v7  ;;  %v2077_v19 = vld [vmem:[#allocation3 + $0x50] sm:$0xff]  ;;  %v1900_v7 = vld [vmem:[#allocation2 + $0x16a] sm:$0xff] }
 0x1a3   : > { %1083 = vst.msk [vmem:[#allocation3 + $0x70] sm:$0xff] %vm1068_vm6, %v1001_v15  ;;  %1400 = vrot.lane.b32.xlu1 %v1893_v35, %s2804_s8 }
 0x1a4   : > { %1592 = vrot.lane.b32.xlu0 %v1508_v46, %s2805_s9  ;;  %v1708_v46 = vld [vmem:[#allocation2 + $0x171] sm:$0xff] }
 0x1a5   : > { %v999_v44 = vpop.permute.xlu1 %998  ;;  %v2076_v36 = vld [vmem:[#allocation3 + $0x48] sm:$0xff] }
 0x1a6   : > { %v1190_v21 = vpop.permute.xlu0 %1189  ;;  %1082 = vst.msk [vmem:[#allocation3 + $0x68] sm:$0xff] %vm1068_vm6, %v999_v44  ;;  %v2103_v60 = vpack.c.bf16 %v2076_v36, %v2075_v14  ;;  %v1901_v44 = vld [vmem:[#allocation2 + $0x172] sm:$0xff]  ;;  %v938_v36 = vld [vmem:[#allocation2 + $0x180] sm:$0xff] }
 0x1a7   : > { %1274 = vst.msk [vmem:[#allocation3 + $0x60] sm:$0xff] %vm1261_vm7, %v1190_v21  ;;  %1404 = vrot.lane.b32.xlu1 %v1317_v58, %s2804_s8 }
 0x1a8   : > { %1596 = vrot.lane.b32.xlu0 %v1510_v17, %s2805_s9  ;;  %2731 = vmatprep.mubr.msk.bf16.mxu0 %vm2151_vm12, %v2103_v60 }
 0x1a9   : > { %v1003_v49 = vpop.permute.xlu1 %1002  ;;  %v2078_v13 = vld [vmem:[#allocation3 + $0x58] sm:$0xff] }
 0x1aa   : > { %v1194_v37 = vpop.permute.xlu0 %1193  ;;  %1084 = vst.msk [vmem:[#allocation3 + $0x78] sm:$0xff] %vm1068_vm6, %v1003_v49  ;;  %v2104_v61 = vpack.c.bf16 %v2078_v13, %v2077_v19  ;;  %v939_v49 = vld [vmem:[#allocation2 + $0x188] sm:$0xff] }
 0x1ab   : > { %1276 = vst.msk [vmem:[#allocation3 + $0x70] sm:$0xff] %vm1261_vm7, %v1194_v37  ;;  %1594 = vrot.lane.b32.xlu1 %v1509_v27, %s2805_s9  ;;  %v1131_v13 = vld [vmem:[#allocation2 + $0x181] sm:$0xff] }
 0x1ac   : > { %1785 = vrot.lane.b32.xlu0 %v1123_v41, %s2806_s14  ;;  %2732 = vmatmul.mubr.msk.bf16.gmra.mrb[8].mxu0 %vm2151_vm12, %v2104_v61 }
 0x1ad   : > { %v1192_v28 = vpop.permute.xlu1 %1191 }
 0x1ae   : > { %v1383_v62 = vpop.permute.xlu0 %1382  ;;  %1275 = vst.msk [vmem:[#allocation3 + $0x68] sm:$0xff] %vm1261_vm7, %v1192_v28  ;;  %v1132_v28 = vld [vmem:[#allocation2 + $0x189] sm:$0xff] }
 0x1af   : > { %1467 = vst.msk [vmem:[#allocation3 + $0x60] sm:$0xff] %vm1454_vm8, %v1383_v62  ;;  %1598 = vrot.lane.b32.xlu1 %v1511_v16, %s2805_s9  ;;  %v1324_v62 = vld [vmem:[#allocation2 + $0x182] sm:$0xff] }
 0x1b0   : > { %1789 = vrot.lane.b32.xlu0 %v1703_v52, %s2806_s14 }
 0x1b1   : > { %v1196_v53 = vpop.permute.xlu1 %1195 }
 0x1b2   : > { %v1387_v11 = vpop.permute.xlu0 %1386  ;;  %1277 = vst.msk [vmem:[#allocation3 + $0x78] sm:$0xff] %vm1261_vm7, %v1196_v53 }
 0x1b3   : > { %1469 = vst.msk [vmem:[#allocation3 + $0x70] sm:$0xff] %vm1454_vm8, %v1387_v11  ;;  %1787 = vrot.lane.b32.xlu1 %v1124_v42, %s2806_s14 }
 0x1b4   : > { %1978 = vrot.lane.b32.xlu0 %v1316_v12, %s2807_s21 }
 0x1b5   : > { %v1385_v0 = vpop.permute.xlu1 %1384 }
 0x1b6   : > { %v1577_v3 = vpop.permute.xlu0 %1576  ;;  %1468 = vst.msk [vmem:[#allocation3 + $0x68] sm:$0xff] %vm1454_vm8, %v1385_v0 }
 0x1b7   : > { %1661 = vst.msk [vmem:[#allocation3 + $0x60] sm:$0xff] %vm1648_vm9, %v1577_v3  ;;  %1791 = vrot.lane.b32.xlu1 %v1704_v63, %s2806_s14  ;;  %v1325_v3 = vld [vmem:[#allocation2 + $0x18a] sm:$0xff] }
 0x1b8   : > { %1982 = vrot.lane.b32.xlu0 %v1896_v48, %s2807_s21 }
 0x1b9   : > { %v1389_v4 = vpop.permute.xlu1 %1388 }
 0x1ba   : > { %v1581_v32 = vpop.permute.xlu0 %1580  ;;  %1470 = vst.msk [vmem:[#allocation3 + $0x78] sm:$0xff] %vm1454_vm8, %v1389_v4  ;;  %v1518_v4 = vld [vmem:[#allocation2 + $0x198] sm:$0xff] }
 0x1bb   : > { %1663 = vst.msk [vmem:[#allocation3 + $0x70] sm:$0xff] %vm1648_vm9, %v1581_v32  ;;  %1980 = vrot.lane.b32.xlu1 %v1317_v58, %s2807_s21 }
 0x1bc   : > { %1020 = vrot.lane.b32.xlu0 %v1510_v17, %s2802_s6 }
 0x1bd   : > { %v1579_v30 = vpop.permute.xlu1 %1578 }
 0x1be   : > { %v1770_v31 = vpop.permute.xlu0 %1769  ;;  %1662 = vst.msk [vmem:[#allocation3 + $0x68] sm:$0xff] %vm1648_vm9, %v1579_v30 }
 0x1bf   : > { %1854 = vst.msk [vmem:[#allocation3 + $0x60] sm:$0xff] %vm1841_vm10, %v1770_v31  ;;  %1984 = vrot.lane.b32.xlu1 %v1897_v55, %s2807_s21 }
 0x1c0   : > { %1024 = vrot.lane.b32.xlu0 %v934_v18, %s2802_s6 }
 0x1c1   : > { %v1583_v33 = vpop.permute.xlu1 %1582 }
 0x1c2   : > { %v1774_v5 = vpop.permute.xlu0 %1773  ;;  %1664 = vst.msk [vmem:[#allocation3 + $0x78] sm:$0xff] %vm1648_vm9, %v1583_v33 }
 0x1c3   : > { %1856 = vst.msk [vmem:[#allocation3 + $0x70] sm:$0xff] %vm1841_vm10, %v1774_v5  ;;  %1022 = vrot.lane.b32.xlu1 %v1511_v16, %s2802_s6 }
 0x1c4   : > { %1213 = vrot.lane.b32.xlu0 %v1703_v52, %s2803_s7 }
 0x1c5   : > { %v1772_v39 = vpop.permute.xlu1 %1771 }
 0x1c6   : > { %v1963_v22 = vpop.permute.xlu0 %1962  ;;  %1855 = vst.msk [vmem:[#allocation3 + $0x68] sm:$0xff] %vm1841_vm10, %v1772_v39  ;;  %v1519_v39 = vld [vmem:[#allocation2 + $0x1a0] sm:$0xff] }
 0x1c7   : > { %2047 = vst.msk [vmem:[#allocation3 + $0x60] sm:$0xff] %vm2034_vm11, %v1963_v22  ;;  %1026 = vrot.lane.b32.xlu1 %v935_v1, %s2802_s6  ;;  %v1711_v22 = vld [vmem:[#allocation2 + $0x199] sm:$0xff] }
 0x1c8   : > { %1217 = vrot.lane.b32.xlu0 %v1127_v6, %s2803_s7 }
 0x1c9   : > { %v1776_v50 = vpop.permute.xlu1 %1775 }
 0x1ca   : > { %v1967_v8 = vpop.permute.xlu0 %1966  ;;  %1857 = vst.msk [vmem:[#allocation3 + $0x78] sm:$0xff] %vm1841_vm10, %v1776_v50 }
 0x1cb   : > { %2049 = vst.msk [vmem:[#allocation3 + $0x70] sm:$0xff] %vm2034_vm11, %v1967_v8  ;;  %1215 = vrot.lane.b32.xlu1 %v1704_v63, %s2803_s7 }
 0x1cc   : > { %1406 = vrot.lane.b32.xlu0 %v1896_v48, %s2804_s8 }
 0x1cd   : > { %v1965_v40 = vpop.permute.xlu1 %1964 }
 0x1ce   : > { %v1005_v34 = vpop.permute.xlu0 %1004  ;;  %2048 = vst.msk [vmem:[#allocation3 + $0x68] sm:$0xff] %vm2034_vm11, %v1965_v40  ;;  %v2079_v59 = vld [vmem:[#allocation3 + $0x60] sm:$0xff]  ;;  %v1712_v40 = vld [vmem:[#allocation2 + $0x1a1] sm:$0xff] }
 0x1cf   : > { %1085 = vst.msk [vmem:[#allocation3 + $0x80] sm:$0xff] %vm1068_vm6, %v1005_v34  ;;  %1219 = vrot.lane.b32.xlu1 %v1128_v56, %s2803_s7  ;;  %v1904_v34 = vld [vmem:[#allocation2 + $0x19a] sm:$0xff] }
 0x1d0   : > { %1410 = vrot.lane.b32.xlu0 %v1320_v29, %s2804_s8 }
 0x1d1   : > { %v1969_v57 = vpop.permute.xlu1 %1968 }
 0x1d2   : > { %v1009_v23 = vpop.permute.xlu0 %1008  ;;  %2050 = vst.msk [vmem:[#allocation3 + $0x78] sm:$0xff] %vm2034_vm11, %v1969_v57  ;;  %v2081_v26 = vld [vmem:[#allocation3 + $0x70] sm:$0xff] }
 0x1d3   : > { %1087 = vst.msk [vmem:[#allocation3 + $0x90] sm:$0xff] %vm1068_vm6, %v1009_v23  ;;  %1408 = vrot.lane.b32.xlu1 %v1897_v55, %s2804_s8 }
 0x1d4   : > { %1600 = vrot.lane.b32.xlu0 %v934_v18, %s2805_s9 }
 0x1d5   : > { %v1007_v9 = vpop.permute.xlu1 %1006  ;;  %v2080_v35 = vld [vmem:[#allocation3 + $0x68] sm:$0xff] }
 0x1d6   : > { %v1198_v54 = vpop.permute.xlu0 %1197  ;;  %1086 = vst.msk [vmem:[#allocation3 + $0x88] sm:$0xff] %vm1068_vm6, %v1007_v9  ;;  %v2105_v24 = vpack.c.bf16 %v2080_v35, %v2079_v59 }
 0x1d7   : > { %1278 = vst.msk [vmem:[#allocation3 + $0x80] sm:$0xff] %vm1261_vm7, %v1198_v54  ;;  %1412 = vrot.lane.b32.xlu1 %v1321_v43, %s2804_s8 }
 0x1d8   : > { %1604 = vrot.lane.b32.xlu0 %v1514_v25, %s2805_s9  ;;  %2735 = vmatprep.mubr.msk.bf16.mxu0 %vm2151_vm12, %v2105_v24 }
 0x1d9   : > { %v1011_v10 = vpop.permute.xlu1 %1010  ;;  %v2082_v41 = vld [vmem:[#allocation3 + $0x78] sm:$0xff] }
 0x1da   : > { %v1202_v2 = vpop.permute.xlu0 %1201  ;;  %1088 = vst.msk [vmem:[#allocation3 + $0x98] sm:$0xff] %vm1068_vm6, %v1011_v10  ;;  %v2106_v38 = vpack.c.bf16 %v2082_v41, %v2081_v26 }
 0x1db   : > { %1280 = vst.msk [vmem:[#allocation3 + $0x90] sm:$0xff] %vm1261_vm7, %v1202_v2  ;;  %1602 = vrot.lane.b32.xlu1 %v935_v1, %s2805_s9 }
 0x1dc   : > { %1793 = vrot.lane.b32.xlu0 %v1127_v6, %s2806_s14  ;;  %2736 = vmatmul.mubr.msk.bf16.gmra.mrb[12].mxu0 %vm2151_vm12, %v2106_v38 }
 0x1dd   : > { %v1200_v42 = vpop.permute.xlu1 %1199 }
 0x1de   : > { %v1391_v12 = vpop.permute.xlu0 %1390  ;;  %1279 = vst.msk [vmem:[#allocation3 + $0x88] sm:$0xff] %vm1261_vm7, %v1200_v42 }
 0x1df   : > { %1471 = vst.msk [vmem:[#allocation3 + $0x80] sm:$0xff] %vm1454_vm8, %v1391_v12  ;;  %1606 = vrot.lane.b32.xlu1 %v1515_v45, %s2805_s9 }
 0x1e0   : > { %1797 = vrot.lane.b32.xlu0 %v1707_v20, %s2806_s14 }
 0x1e1   : > { %v1204_v47 = vpop.permute.xlu1 %1203 }
 0x1e2   : > { %v1395_v51 = vpop.permute.xlu0 %1394  ;;  %1281 = vst.msk [vmem:[#allocation3 + $0x98] sm:$0xff] %vm1261_vm7, %v1204_v47 }
 0x1e3   : > { %1473 = vst.msk [vmem:[#allocation3 + $0x90] sm:$0xff] %vm1454_vm8, %v1395_v51  ;;  %1795 = vrot.lane.b32.xlu1 %v1128_v56, %s2806_s14 }
 0x1e4   : > { %1986 = vrot.lane.b32.xlu0 %v1320_v29, %s2807_s21 }
 0x1e5   : > { %v1393_v15 = vpop.permute.xlu1 %1392 }
 0x1e6   : > { %v1585_v14 = vpop.permute.xlu0 %1584  ;;  %1472 = vst.msk [vmem:[#allocation3 + $0x88] sm:$0xff] %vm1454_vm8, %v1393_v15 }
 0x1e7   : > { %1665 = vst.msk [vmem:[#allocation3 + $0x80] sm:$0xff] %vm1648_vm9, %v1585_v14  ;;  %1799 = vrot.lane.b32.xlu1 %v1708_v46, %s2806_s14 }
 0x1e8   : > { %1990 = vrot.lane.b32.xlu0 %v1900_v7, %s2807_s21 }
 0x1e9   : > { %v1397_v58 = vpop.permute.xlu1 %1396 }
 0x1ea   : > { %v1589_v17 = vpop.permute.xlu0 %1588  ;;  %1474 = vst.msk [vmem:[#allocation3 + $0x98] sm:$0xff] %vm1454_vm8, %v1397_v58 }
 0x1eb   : > { %1667 = vst.msk [vmem:[#allocation3 + $0x90] sm:$0xff] %vm1648_vm9, %v1589_v17  ;;  %1988 = vrot.lane.b32.xlu1 %v1321_v43, %s2807_s21 }
 0x1ec   : > { %1028 = vrot.lane.b32.xlu0 %v1514_v25, %s2802_s6  ;;  %v1905_v25 = vld [vmem:[#allocation2 + $0x1a2] sm:$0xff] }
 0x1ed   : > { %v1587_v21 = vpop.permute.xlu1 %1586 }
 0x1ee   : > { %v1778_v60 = vpop.permute.xlu0 %1777  ;;  %1666 = vst.msk [vmem:[#allocation3 + $0x88] sm:$0xff] %vm1648_vm9, %v1587_v21 }
 0x1ef   : > { %1858 = vst.msk [vmem:[#allocation3 + $0x80] sm:$0xff] %vm1841_vm10, %v1778_v60  ;;  %1992 = vrot.lane.b32.xlu1 %v1901_v44, %s2807_s21 }
 0x1f0   : > { %1032 = vrot.lane.b32.xlu0 %v938_v36, %s2802_s6 }
 0x1f1   : > { %v1591_v19 = vpop.permute.xlu1 %1590 }
 0x1f2   : > { %v1782_v27 = vpop.permute.xlu0 %1781  ;;  %1668 = vst.msk [vmem:[#allocation3 + $0x98] sm:$0xff] %vm1648_vm9, %v1591_v19 }
 0x1f3   : > { %1860 = vst.msk [vmem:[#allocation3 + $0x90] sm:$0xff] %vm1841_vm10, %v1782_v27  ;;  %1030 = vrot.lane.b32.xlu1 %v1515_v45, %s2802_s6 }
 0x1f4   : > { %1221 = vrot.lane.b32.xlu0 %v1707_v20, %s2803_s7 }
 0x1f5   : > { %v1780_v37 = vpop.permute.xlu1 %1779 }
 0x1f6   : > { %v1971_v61 = vpop.permute.xlu0 %1970  ;;  %1859 = vst.msk [vmem:[#allocation3 + $0x88] sm:$0xff] %vm1841_vm10, %v1780_v37 }
 0x1f7   : > { %2051 = vst.msk [vmem:[#allocation3 + $0x80] sm:$0xff] %vm2034_vm11, %v1971_v61  ;;  %1034 = vrot.lane.b32.xlu1 %v939_v49, %s2802_s6  ;;  %s3818_s6 = scalar_lea.vmem %s4019_s4, %s2690_s23  ;;  %s2664_s23 = sshll.u32 %s4023_s19, 1 }
 0x1f8   : > { %1225 = vrot.lane.b32.xlu0 %v1131_v13, %s2803_s7 }
 0x1f9   : > { %v1784_v16 = vpop.permute.xlu1 %1783 }
 0x1fa   : > { %v1975_v52 = vpop.permute.xlu0 %1974  ;;  %1861 = vst.msk [vmem:[#allocation3 + $0x98] sm:$0xff] %vm1841_vm10, %v1784_v16 }
 0x1fb   : > { %2053 = vst.msk [vmem:[#allocation3 + $0x90] sm:$0xff] %vm2034_vm11, %v1975_v52  ;;  %1223 = vrot.lane.b32.xlu1 %v1708_v46, %s2803_s7 }
 0x1fc   : > { %1414 = vrot.lane.b32.xlu0 %v1900_v7, %s2804_s8 }
 0x1fd   : > { %v1973_v53 = vpop.permute.xlu1 %1972 }
 0x1fe   : > { %v1013_v11 = vpop.permute.xlu0 %1012  ;;  %2052 = vst.msk [vmem:[#allocation3 + $0x88] sm:$0xff] %vm2034_vm11, %v1973_v53  ;;  %v2083_v0 = vld [vmem:[#allocation3 + $0x80] sm:$0xff] }
 0x1ff   : > { %1089 = vst.msk [vmem:[#allocation3 + $0xa0] sm:$0xff] %vm1068_vm6, %v1013_v11  ;;  %1227 = vrot.lane.b32.xlu1 %v1132_v28, %s2803_s7 }
 0x200   : > { %1418 = vrot.lane.b32.xlu0 %v1324_v62, %s2804_s8 }
 0x201   : > { %v1977_v63 = vpop.permute.xlu1 %1976 }
 0x202   : > { %v1017_v48 = vpop.permute.xlu0 %1016  ;;  %2054 = vst.msk [vmem:[#allocation3 + $0x98] sm:$0xff] %vm2034_vm11, %v1977_v63  ;;  %v2085_v31 = vld [vmem:[#allocation3 + $0x90] sm:$0xff] }
 0x203   : > { %1091 = vst.msk [vmem:[#allocation3 + $0xb0] sm:$0xff] %vm1068_vm6, %v1017_v48  ;;  %1416 = vrot.lane.b32.xlu1 %v1901_v44, %s2804_s8 }
 0x204   : > { %1608 = vrot.lane.b32.xlu0 %v938_v36, %s2805_s9 }
 0x205   : > { %v1015_v32 = vpop.permute.xlu1 %1014  ;;  %v2084_v55 = vld [vmem:[#allocation3 + $0x88] sm:$0xff] }
 0x206   : > { %v1206_v18 = vpop.permute.xlu0 %1205  ;;  %1090 = vst.msk [vmem:[#allocation3 + $0xa8] sm:$0xff] %vm1068_vm6, %v1015_v32  ;;  %v2107_v30 = vpack.c.bf16 %v2084_v55, %v2083_v0 }
 0x207   : > { %1282 = vst.msk [vmem:[#allocation3 + $0xa0] sm:$0xff] %vm1261_vm7, %v1206_v18  ;;  %1420 = vrot.lane.b32.xlu1 %v1325_v3, %s2804_s8 }
 0x208   : > { %1612 = vrot.lane.b32.xlu0 %v1518_v4, %s2805_s9  ;;  %2739 = vmatprep.mubr.msk.bf16.mxu1 %vm2151_vm12, %v2107_v30 }
 0x209   : > { %v1019_v33 = vpop.permute.xlu1 %1018  ;;  %v2086_v5 = vld [vmem:[#allocation3 + $0x98] sm:$0xff] }
 0x20a   : > { %v1210_v1 = vpop.permute.xlu0 %1209  ;;  %1092 = vst.msk [vmem:[#allocation3 + $0xb8] sm:$0xff] %vm1068_vm6, %v1019_v33  ;;  %v2108_v6 = vpack.c.bf16 %v2086_v5, %v2085_v31 }
 0x20b   : > { %1284 = vst.msk [vmem:[#allocation3 + $0xb0] sm:$0xff] %vm1261_vm7, %v1210_v1  ;;  %1610 = vrot.lane.b32.xlu1 %v939_v49, %s2805_s9 }
 0x20c   : > { %1801 = vrot.lane.b32.xlu0 %v1131_v13, %s2806_s14  ;;  %2740 = vmatmul.mubr.msk.bf16.vlgmr.msra.gmra.mrb[0].mxu1 %vm2151_vm12, %v2108_v6 }
 0x20d   : > { %v1208_v50 = vpop.permute.xlu1 %1207 }
 0x20e   : > { %v1399_v8 = vpop.permute.xlu0 %1398  ;;  %1283 = vst.msk [vmem:[#allocation3 + $0xa8] sm:$0xff] %vm1261_vm7, %v1208_v50 }
 0x20f   : > { %1475 = vst.msk [vmem:[#allocation3 + $0xa0] sm:$0xff] %vm1454_vm8, %v1399_v8  ;;  %1614 = vrot.lane.b32.xlu1 %v1519_v39, %s2805_s9  ;;  %s235_s9 = scalar_lea.vmem %s4020_s5, %s2664_s23 }
 0x210   : > { %1805 = vrot.lane.b32.xlu0 %v1711_v22, %s2806_s14 }
 0x211   : > { %v1212_v56 = vpop.permute.xlu1 %1211 }
 0x212   : > { %v1403_v29 = vpop.permute.xlu0 %1402  ;;  %1285 = vst.msk [vmem:[#allocation3 + $0xb8] sm:$0xff] %vm1261_vm7, %v1212_v56 }
 0x213   : > { %1477 = vst.msk [vmem:[#allocation3 + $0xb0] sm:$0xff] %vm1454_vm8, %v1403_v29  ;;  %1803 = vrot.lane.b32.xlu1 %v1132_v28, %s2806_s14 }
 0x214   : > { %1994 = vrot.lane.b32.xlu0 %v1324_v62, %s2807_s21 }
 0x215   : > { %v1401_v57 = vpop.permute.xlu1 %1400 }
 0x216   : > { %v1593_v23 = vpop.permute.xlu0 %1592  ;;  %1476 = vst.msk [vmem:[#allocation3 + $0xa8] sm:$0xff] %vm1454_vm8, %v1401_v57 }
 0x217   : > { %1669 = vst.msk [vmem:[#allocation3 + $0xa0] sm:$0xff] %vm1648_vm9, %v1593_v23  ;;  %1807 = vrot.lane.b32.xlu1 %v1712_v40, %s2806_s14 }
 0x218   : > { %1998 = vrot.lane.b32.xlu0 %v1904_v34, %s2807_s21 }
 0x219   : > { %v1405_v59 = vpop.permute.xlu1 %1404 }
 0x21a   : > { %v1597_v43 = vpop.permute.xlu0 %1596  ;;  %1478 = vst.msk [vmem:[#allocation3 + $0xb8] sm:$0xff] %vm1454_vm8, %v1405_v59 }
 0x21b   : > { %1671 = vst.msk [vmem:[#allocation3 + $0xb0] sm:$0xff] %vm1648_vm9, %v1597_v43  ;;  %1996 = vrot.lane.b32.xlu1 %v1325_v3, %s2807_s21 }
 0x21d   : > { %v1595_v9 = vpop.permute.xlu1 %1594 }
 0x21e   : > { %v1786_v35 = vpop.permute.xlu0 %1785  ;;  %1670 = vst.msk [vmem:[#allocation3 + $0xa8] sm:$0xff] %vm1648_vm9, %v1595_v9 }
 0x21f   : > { %1862 = vst.msk [vmem:[#allocation3 + $0xa0] sm:$0xff] %vm1841_vm10, %v1786_v35  ;;  %2000 = vrot.lane.b32.xlu1 %v1905_v25, %s2807_s21 }
 0x221   : > { %v1599_v54 = vpop.permute.xlu1 %1598 }
 0x222   : > { %v1790_v24 = vpop.permute.xlu0 %1789  ;;  %1672 = vst.msk [vmem:[#allocation3 + $0xb8] sm:$0xff] %vm1648_vm9, %v1599_v54 }
 0x223   : > { %1864 = vst.msk [vmem:[#allocation3 + $0xb0] sm:$0xff] %vm1841_vm10, %v1790_v24 }
 0x225   : > { %v1788_v26 = vpop.permute.xlu1 %1787 }
 0x226   : > { %v1979_v10 = vpop.permute.xlu0 %1978  ;;  %1863 = vst.msk [vmem:[#allocation3 + $0xa8] sm:$0xff] %vm1841_vm10, %v1788_v26 }
 0x227   : > { %2055 = vst.msk [vmem:[#allocation3 + $0xa0] sm:$0xff] %vm2034_vm11, %v1979_v10 }
 0x229   : > { %v1792_v41 = vpop.permute.xlu1 %1791 }
 0x22a   : > { %v1983_v2 = vpop.permute.xlu0 %1982  ;;  %1865 = vst.msk [vmem:[#allocation3 + $0xb8] sm:$0xff] %vm1841_vm10, %v1792_v41 }
 0x22b   : > { %2057 = vst.msk [vmem:[#allocation3 + $0xb0] sm:$0xff] %vm2034_vm11, %v1983_v2  ;;  %v2725_v38 = vpop.f32.mrb[0].mxu0 }
 0x22c   : > { %2539 = vst.msk [vmem:[%s3818_s6 + $0x10] sm:$0xff] %vm379_vm0, %v2725_v38  ;;  %v2238_v45 = vpop.f32.mrb[1].mxu0  ;;  %v2437_v46 = vmul.f32 %v2725_v38, %v2725_v38  ;;  %v2368_v17 = vsel %vm379_vm0, %v2725_v38, 0.0 }
 0x22d   : > { %v2435_v20 = vmul.f32 %v2238_v45, %v2238_v45  ;;  %2537 = vst.msk [vmem:[%s3818_s6] sm:$0xff] %vm379_vm0, %v2238_v45  ;;  %v1981_v42 = vpop.permute.xlu1 %1980  ;;  %v2726_v12 = vpop.f32.mrb[2].mxu0  ;;  %v2365_v7 = vsel %vm379_vm0, %v2238_v45, 0.0 }
 0x22e   : > { %2056 = vst.msk [vmem:[#allocation3 + $0xa8] sm:$0xff] %vm2034_vm11, %v1981_v42  ;;  %v2241_v47 = vpop.f32.mrb[3].mxu0  ;;  %v1021_v51 = vpop.permute.xlu0 %1020  ;;  %v2438_v36 = vmul.f32 %v2726_v12, %v2726_v12  ;;  %v2470_v13 = vsel %vm379_vm0, %v2437_v46, 0.0  ;;  %v2370_v37 = vsel %vm379_vm0, %v2726_v12, 0.0  ;;  %v2087_v61 = vld [vmem:[#allocation3 + $0xa0] sm:$0xff] }
 0x22f   : > { %2540 = vst.msk [vmem:[%s3818_s6 + $0x18] sm:$0xff] %vm379_vm0, %v2726_v12  ;;  %v2366_v15 = vsel %vm379_vm0, %v2241_v47, 0.0  ;;  %v2436_v14 = vmul.f32 %v2241_v47, %v2241_v47  ;;  %2538 = vst.msk [vmem:[%s3818_s6 + $0x8] sm:$0xff] %vm379_vm0, %v2241_v47  ;;  %v2467_v44 = vsel %vm379_vm0, %v2435_v20, 0.0 }
 0x230   : > { %1093 = vst.msk [vmem:[#allocation3 + $0xc0] sm:$0xff] %vm1068_vm6, %v1021_v51  ;;  %v2367_v58 = vadd.f32 %v2366_v15, %v2365_v7  ;;  %v2472_v28 = vsel %vm379_vm0, %v2438_v36, 0.0 }
 0x231   : > { %v2468_v21 = vsel %vm379_vm0, %v2436_v14, 0.0  ;;  %v1985_v60 = vpop.permute.xlu1 %1984 }
 0x232   : > { %v2369_v19 = vadd.f32 %v2368_v17, %v2367_v58  ;;  %v2469_v27 = vadd.f32 %v2468_v21, %v2467_v44  ;;  %2058 = vst.msk [vmem:[#allocation3 + $0xb8] sm:$0xff] %vm2034_vm11, %v1985_v60  ;;  %v1025_v49 = vpop.permute.xlu0 %1024  ;;  %v2089_v0 = vld [vmem:[#allocation3 + $0xb0] sm:$0xff] }
 0x233   : > { %1095 = vst.msk [vmem:[#allocation3 + $0xd0] sm:$0xff] %vm1068_vm6, %v1025_v49 }
 0x234   : > { %v2471_v16 = vadd.f32 %v2470_v13, %v2469_v27  ;;  %v2371_v52 = vadd.f32 %v2370_v37, %v2369_v19 }
 0x235   : > { %v1023_v62 = vpop.permute.xlu1 %1022  ;;  %v2088_v53 = vld [vmem:[#allocation3 + $0xa8] sm:$0xff] }
 0x236   : > { %1094 = vst.msk [vmem:[#allocation3 + $0xc8] sm:$0xff] %vm1068_vm6, %v1023_v62  ;;  %v2109_v11 = vpack.c.bf16 %v2088_v53, %v2087_v61  ;;  %v1214_v63 = vpop.permute.xlu0 %1213  ;;  %v2473_v48 = vadd.f32 %v2472_v28, %v2471_v16 }
 0x237   : > { %1286 = vst.msk [vmem:[#allocation3 + $0xc0] sm:$0xff] %vm1261_vm7, %v1214_v63 }
 0x238   : > { %2743 = vmatprep.mubr.msk.bf16.mxu1 %vm2151_vm12, %v2109_v11 }
 0x239   : > { %v1027_v3 = vpop.permute.xlu1 %1026  ;;  %v2090_v4 = vld [vmem:[#allocation3 + $0xb8] sm:$0xff] }
 0x23a   : > { %1096 = vst.msk [vmem:[#allocation3 + $0xd8] sm:$0xff] %vm1068_vm6, %v1027_v3  ;;  %v2110_v32 = vpack.c.bf16 %v2090_v4, %v2089_v0  ;;  %v1218_v55 = vpop.permute.xlu0 %1217 }
 0x23b   : > { %1288 = vst.msk [vmem:[#allocation3 + $0xd0] sm:$0xff] %vm1261_vm7, %v1218_v55 }
 0x23c   : > { %2744 = vmatmul.mubr.msk.bf16.gmra.mrb[4].mxu1 %vm2151_vm12, %v2110_v32 }
 0x23d   : > { %v1216_v18 = vpop.permute.xlu1 %1215 }
 0x23e   : > { %1287 = vst.msk [vmem:[#allocation3 + $0xc8] sm:$0xff] %vm1261_vm7, %v1216_v18  ;;  %v1407_v30 = vpop.permute.xlu0 %1406 }
 0x23f   : > { %1479 = vst.msk [vmem:[#allocation3 + $0xc0] sm:$0xff] %vm1454_vm8, %v1407_v30 }
 0x241   : > { %v1220_v31 = vpop.permute.xlu1 %1219 }
 0x242   : > { %1289 = vst.msk [vmem:[#allocation3 + $0xd8] sm:$0xff] %vm1261_vm7, %v1220_v31  ;;  %v1411_v33 = vpop.permute.xlu0 %1410 }
 0x243   : > { %1481 = vst.msk [vmem:[#allocation3 + $0xd0] sm:$0xff] %vm1454_vm8, %v1411_v33 }
 0x245   : > { %v1409_v5 = vpop.permute.xlu1 %1408 }
 0x246   : > { %1480 = vst.msk [vmem:[#allocation3 + $0xc8] sm:$0xff] %vm1454_vm8, %v1409_v5  ;;  %v1601_v1 = vpop.permute.xlu0 %1600 }
 0x247   : > { %1673 = vst.msk [vmem:[#allocation3 + $0xc0] sm:$0xff] %vm1648_vm9, %v1601_v1 }
 0x249   : > { %v1413_v6 = vpop.permute.xlu1 %1412 }
 0x24a   : > { %1482 = vst.msk [vmem:[#allocation3 + $0xd8] sm:$0xff] %vm1454_vm8, %v1413_v6  ;;  %v1605_v39 = vpop.permute.xlu0 %1604 }
 0x24b   : > { %1675 = vst.msk [vmem:[#allocation3 + $0xd0] sm:$0xff] %vm1648_vm9, %v1605_v39 }
 0x24d   : > { %v1603_v22 = vpop.permute.xlu1 %1602 }
 0x24e   : > { %1674 = vst.msk [vmem:[#allocation3 + $0xc8] sm:$0xff] %vm1648_vm9, %v1603_v22  ;;  %v1794_v50 = vpop.permute.xlu0 %1793 }
 0x24f   : > { %1866 = vst.msk [vmem:[#allocation3 + $0xc0] sm:$0xff] %vm1841_vm10, %v1794_v50 }
 0x251   : > { %v1607_v8 = vpop.permute.xlu1 %1606 }
 0x252   : > { %1676 = vst.msk [vmem:[#allocation3 + $0xd8] sm:$0xff] %vm1648_vm9, %v1607_v8  ;;  %v1798_v56 = vpop.permute.xlu0 %1797 }
 0x253   : > { %v2729_v29 = vpop.f32.mrb[4].mxu0  ;;  %1868 = vst.msk [vmem:[#allocation3 + $0xd0] sm:$0xff] %vm1841_vm10, %v1798_v56 }
 0x254   : > { %2543 = vst.msk [vmem:[%s3818_s6 + $0x30] sm:$0xff] %vm379_vm0, %v2729_v29  ;;  %v2254_v40 = vpop.f32.mrb[5].mxu0  ;;  %v2441_v35 = vmul.f32 %v2729_v29, %v2729_v29  ;;  %v2376_v2 = vsel %vm379_vm0, %v2729_v29, 0.0 }
 0x255   : > { %v2372_v34 = vsel %vm379_vm0, %v2254_v40, 0.0  ;;  %v2439_v57 = vmul.f32 %v2254_v40, %v2254_v40  ;;  %2541 = vst.msk [vmem:[%s3818_s6 + $0x20] sm:$0xff] %vm379_vm0, %v2254_v40  ;;  %v1796_v23 = vpop.permute.xlu1 %1795  ;;  %v2730_v59 = vpop.f32.mrb[6].mxu0 }
 0x256   : > { %v2373_v43 = vadd.f32 %v2372_v34, %v2371_v52  ;;  %1867 = vst.msk [vmem:[#allocation3 + $0xc8] sm:$0xff] %vm1841_vm10, %v1796_v23  ;;  %v2257_v25 = vpop.f32.mrb[7].mxu0  ;;  %v1987_v9 = vpop.permute.xlu0 %1986  ;;  %v2442_v38 = vmul.f32 %v2730_v59, %v2730_v59  ;;  %v2478_v51 = vsel %vm379_vm0, %v2441_v35, 0.0  ;;  %v2378_v46 = vsel %vm379_vm0, %v2730_v59, 0.0 }
 0x257   : > { %2544 = vst.msk [vmem:[%s3818_s6 + $0x38] sm:$0xff] %vm379_vm0, %v2730_v59  ;;  %v2474_v54 = vsel %vm379_vm0, %v2439_v57, 0.0  ;;  %v2374_v24 = vsel %vm379_vm0, %v2257_v25, 0.0  ;;  %v2440_v26 = vmul.f32 %v2257_v25, %v2257_v25  ;;  %2542 = vst.msk [vmem:[%s3818_s6 + $0x28] sm:$0xff] %vm379_vm0, %v2257_v25 }
 0x258   : > { %2059 = vst.msk [vmem:[#allocation3 + $0xc0] sm:$0xff] %vm2034_vm11, %v1987_v9  ;;  %v2475_v10 = vadd.f32 %v2474_v54, %v2473_v48  ;;  %v2375_v41 = vadd.f32 %v2374_v24, %v2373_v43  ;;  %v2480_v14 = vsel %vm379_vm0, %v2442_v38, 0.0 }
 0x259   : > { %v2476_v45 = vsel %vm379_vm0, %v2440_v26, 0.0  ;;  %v1800_v20 = vpop.permute.xlu1 %1799 }
 0x25a   : > { %v2377_v42 = vadd.f32 %v2376_v2, %v2375_v41  ;;  %v2477_v12 = vadd.f32 %v2476_v45, %v2475_v10  ;;  %1869 = vst.msk [vmem:[#allocation3 + $0xd8] sm:$0xff] %vm1841_vm10, %v1800_v20  ;;  %v1991_v47 = vpop.permute.xlu0 %1990 }
 0x25b   : > { %2061 = vst.msk [vmem:[#allocation3 + $0xd0] sm:$0xff] %vm2034_vm11, %v1991_v47 }
 0x25c   : > { %v2479_v7 = vadd.f32 %v2478_v51, %v2477_v12  ;;  %v2379_v15 = vadd.f32 %v2378_v46, %v2377_v42 }
 0x25d   : > { %v1989_v58 = vpop.permute.xlu1 %1988 }
 0x25e   : > { %2060 = vst.msk [vmem:[#allocation3 + $0xc8] sm:$0xff] %vm2034_vm11, %v1989_v58  ;;  %v1029_v17 = vpop.permute.xlu0 %1028  ;;  %v2481_v44 = vadd.f32 %v2480_v14, %v2479_v7 }
 0x25f   : > { %1097 = vst.msk [vmem:[#allocation3 + $0xe0] sm:$0xff] %vm1068_vm6, %v1029_v17  ;;  %v2091_v60 = vld [vmem:[#allocation3 + $0xc0] sm:$0xff] }
 0x261   : > { %v1993_v36 = vpop.permute.xlu1 %1992 }
 0x262   : > { %2062 = vst.msk [vmem:[#allocation3 + $0xd8] sm:$0xff] %vm2034_vm11, %v1993_v36  ;;  %v1033_v21 = vpop.permute.xlu0 %1032  ;;  %v2093_v37 = vld [vmem:[#allocation3 + $0xd0] sm:$0xff] }
 0x263   : > { %1099 = vst.msk [vmem:[#allocation3 + $0xf0] sm:$0xff] %vm1068_vm6, %v1033_v21 }
 0x265   : > { %v1031_v19 = vpop.permute.xlu1 %1030  ;;  %v2092_v27 = vld [vmem:[#allocation3 + $0xc8] sm:$0xff] }
 0x266   : > { %1098 = vst.msk [vmem:[#allocation3 + $0xe8] sm:$0xff] %vm1068_vm6, %v1031_v19  ;;  %v2111_v49 = vpack.c.bf16 %v2092_v27, %v2091_v60  ;;  %v1222_v13 = vpop.permute.xlu0 %1221 }
 0x267   : > { %1290 = vst.msk [vmem:[#allocation3 + $0xe0] sm:$0xff] %vm1261_vm7, %v1222_v13 }
 0x268   : > { %2747 = vmatprep.mubr.msk.bf16.mxu1 %vm2151_vm12, %v2111_v49 }
 0x269   : > { %v1035_v61 = vpop.permute.xlu1 %1034  ;;  %v2094_v16 = vld [vmem:[#allocation3 + $0xd8] sm:$0xff] }
 0x26a   : > { %1100 = vst.msk [vmem:[#allocation3 + $0xf8] sm:$0xff] %vm1068_vm6, %v1035_v61  ;;  %v2112_v52 = vpack.c.bf16 %v2094_v16, %v2093_v37  ;;  %v1226_v28 = vpop.permute.xlu0 %1225 }
 0x26b   : > { %1292 = vst.msk [vmem:[#allocation3 + $0xf0] sm:$0xff] %vm1261_vm7, %v1226_v28 }
 0x26c   : > { %2748 = vmatmul.mubr.msk.bf16.gmra.mrb[8].mxu1 %vm2151_vm12, %v2112_v52 }
 0x26d   : > { %v1224_v62 = vpop.permute.xlu1 %1223 }
 0x26e   : > { %1291 = vst.msk [vmem:[#allocation3 + $0xe8] sm:$0xff] %vm1261_vm7, %v1224_v62  ;;  %v1415_v53 = vpop.permute.xlu0 %1414 }
 0x26f   : > { %1483 = vst.msk [vmem:[#allocation3 + $0xe0] sm:$0xff] %vm1454_vm8, %v1415_v53 }
 0x271   : > { %v1228_v11 = vpop.permute.xlu1 %1227 }
 0x272   : > { %1293 = vst.msk [vmem:[#allocation3 + $0xf8] sm:$0xff] %vm1261_vm7, %v1228_v11  ;;  %v1419_v63 = vpop.permute.xlu0 %1418 }
 0x273   : > { %1485 = vst.msk [vmem:[#allocation3 + $0xf0] sm:$0xff] %vm1454_vm8, %v1419_v63 }
 0x275   : > { %v1417_v48 = vpop.permute.xlu1 %1416 }
 0x276   : > { %1484 = vst.msk [vmem:[#allocation3 + $0xe8] sm:$0xff] %vm1454_vm8, %v1417_v48  ;;  %v1609_v0 = vpop.permute.xlu0 %1608 }
 0x277   : > { %1677 = vst.msk [vmem:[#allocation3 + $0xe0] sm:$0xff] %vm1648_vm9, %v1609_v0 }
 0x279   : > { %v1421_v3 = vpop.permute.xlu1 %1420 }
 0x27a   : > { %1486 = vst.msk [vmem:[#allocation3 + $0xf8] sm:$0xff] %vm1454_vm8, %v1421_v3  ;;  %v1613_v4 = vpop.permute.xlu0 %1612 }
 0x27b   : > { %1679 = vst.msk [vmem:[#allocation3 + $0xf0] sm:$0xff] %vm1648_vm9, %v1613_v4 }
 0x27d   : > { %v1611_v32 = vpop.permute.xlu1 %1610 }
 0x27e   : > { %1678 = vst.msk [vmem:[#allocation3 + $0xe8] sm:$0xff] %vm1648_vm9, %v1611_v32  ;;  %v1802_v55 = vpop.permute.xlu0 %1801 }
 0x27f   : > { %v2733_v18 = vpop.f32.mrb[8].mxu0  ;;  %1870 = vst.msk [vmem:[#allocation3 + $0xe0] sm:$0xff] %vm1841_vm10, %v1802_v55 }
 0x280   : > { %2547 = vst.msk [vmem:[%s3818_s6 + $0x50] sm:$0xff] %vm379_vm0, %v2733_v18  ;;  %v2270_v30 = vpop.f32.mrb[9].mxu0  ;;  %v2445_v50 = vmul.f32 %v2733_v18, %v2733_v18  ;;  %v2384_v57 = vsel %vm379_vm0, %v2733_v18, 0.0 }
 0x281   : > { %v2380_v31 = vsel %vm379_vm0, %v2270_v30, 0.0  ;;  %v2443_v33 = vmul.f32 %v2270_v30, %v2270_v30  ;;  %2545 = vst.msk [vmem:[%s3818_s6 + $0x40] sm:$0xff] %vm379_vm0, %v2270_v30  ;;  %v1615_v5 = vpop.permute.xlu1 %1614  ;;  %v2734_v1 = vpop.f32.mrb[10].mxu0 }
 0x282   : > { %v2381_v6 = vadd.f32 %v2380_v31, %v2379_v15  ;;  %1680 = vst.msk [vmem:[#allocation3 + $0xf8] sm:$0xff] %vm1648_vm9, %v1615_v5  ;;  %v2273_v39 = vpop.f32.mrb[11].mxu0  ;;  %v1806_v22 = vpop.permute.xlu0 %1805  ;;  %v2446_v23 = vmul.f32 %v2734_v1, %v2734_v1  ;;  %v2486_v54 = vsel %vm379_vm0, %v2445_v50, 0.0  ;;  %v2386_v24 = vsel %vm379_vm0, %v2734_v1, 0.0 }
 0x283   : > { %2548 = vst.msk [vmem:[%s3818_s6 + $0x58] sm:$0xff] %vm379_vm0, %v2734_v1  ;;  %v2482_v8 = vsel %vm379_vm0, %v2443_v33, 0.0  ;;  %v2382_v56 = vsel %vm379_vm0, %v2273_v39, 0.0  ;;  %v2444_v29 = vmul.f32 %v2273_v39, %v2273_v39  ;;  %2546 = vst.msk [vmem:[%s3818_s6 + $0x48] sm:$0xff] %vm379_vm0, %v2273_v39 }
 0x284   : > { %1872 = vst.msk [vmem:[#allocation3 + $0xf0] sm:$0xff] %vm1841_vm10, %v1806_v22  ;;  %v2483_v40 = vadd.f32 %v2482_v8, %v2481_v44  ;;  %v2383_v34 = vadd.f32 %v2382_v56, %v2381_v6  ;;  %v2488_v41 = vsel %vm379_vm0, %v2446_v23, 0.0 }
 0x285   : > { %v2484_v59 = vsel %vm379_vm0, %v2444_v29, 0.0  ;;  %v1804_v43 = vpop.permute.xlu1 %1803 }
 0x286   : > { %v2385_v25 = vadd.f32 %v2384_v57, %v2383_v34  ;;  %v2485_v9 = vadd.f32 %v2484_v59, %v2483_v40  ;;  %1871 = vst.msk [vmem:[#allocation3 + $0xe8] sm:$0xff] %vm1841_vm10, %v1804_v43  ;;  %v1995_v35 = vpop.permute.xlu0 %1994 }
 0x287   : > { %2063 = vst.msk [vmem:[#allocation3 + $0xe0] sm:$0xff] %vm2034_vm11, %v1995_v35 }
 0x288   : > { %v2487_v26 = vadd.f32 %v2486_v54, %v2485_v9  ;;  %v2387_v10 = vadd.f32 %v2386_v24, %v2385_v25 }
 0x289   : > { %v1808_v2 = vpop.permute.xlu1 %1807 }
 0x28a   : > { %1873 = vst.msk [vmem:[#allocation3 + $0xf8] sm:$0xff] %vm1841_vm10, %v1808_v2  ;;  %v1999_v38 = vpop.permute.xlu0 %1998  ;;  %v2489_v45 = vadd.f32 %v2488_v41, %v2487_v26 }
 0x28b   : > { %2065 = vst.msk [vmem:[#allocation3 + $0xf0] sm:$0xff] %vm2034_vm11, %v1999_v38 }
 0x28d   : > { %v1997_v20 = vpop.permute.xlu1 %1996 }
 0x28e   : > { %2064 = vst.msk [vmem:[#allocation3 + $0xe8] sm:$0xff] %vm2034_vm11, %v1997_v20  ;;  %v2095_v12 = vld [vmem:[#allocation3 + $0xe0] sm:$0xff] }
 0x291   : > { %v2001_v42 = vpop.permute.xlu1 %2000 }
 0x292   : > { %2066 = vst.msk [vmem:[#allocation3 + $0xf8] sm:$0xff] %vm2034_vm11, %v2001_v42  ;;  %v2097_v46 = vld [vmem:[#allocation3 + $0xf0] sm:$0xff] }
 0x295   : > { %v2096_v47 = vld [vmem:[#allocation3 + $0xe8] sm:$0xff] }
 0x296   : > { %v2113_v51 = vpack.c.bf16 %v2096_v47, %v2095_v12 }
 0x298   : > { %2751 = vmatprep.mubr.msk.bf16.mxu1 %vm2151_vm12, %v2113_v51 }
 0x299   : > { %v2098_v7 = vld [vmem:[#allocation3 + $0xf8] sm:$0xff] }
 0x29a   : > { %v2114_v15 = vpack.c.bf16 %v2098_v7, %v2097_v46 }
 0x29c   : > { %2752 = vmatmul.mubr.msk.bf16.gmra.mrb[12].mxu1 %vm2151_vm12, %v2114_v15 }
 0x2af   : > { %v2737_v14 = vpop.f32.mrb[12].mxu0 }
 0x2b0   : > { %2551 = vst.msk [vmem:[%s3818_s6 + $0x70] sm:$0xff] %vm379_vm0, %v2737_v14  ;;  %v2286_v58 = vpop.f32.mrb[13].mxu0  ;;  %v2449_v19 = vmul.f32 %v2737_v14, %v2737_v14  ;;  %v2392_v16 = vsel %vm379_vm0, %v2737_v14, 0.0 }
 0x2b1   : > { %v2388_v17 = vsel %vm379_vm0, %v2286_v58, 0.0  ;;  %v2447_v44 = vmul.f32 %v2286_v58, %v2286_v58  ;;  %2549 = vst.msk [vmem:[%s3818_s6 + $0x60] sm:$0xff] %vm379_vm0, %v2286_v58  ;;  %v2738_v36 = vpop.f32.mrb[14].mxu0 }
 0x2b2   : > { %v2389_v21 = vadd.f32 %v2388_v17, %v2387_v10  ;;  %2552 = vst.msk [vmem:[%s3818_s6 + $0x78] sm:$0xff] %vm379_vm0, %v2738_v36  ;;  %v2289_v60 = vpop.f32.mrb[15].mxu0  ;;  %v2450_v52 = vmul.f32 %v2738_v36, %v2738_v36  ;;  %v2494_v11 = vsel %vm379_vm0, %v2449_v19, 0.0  ;;  %v2394_v63 = vsel %vm379_vm0, %v2738_v36, 0.0 }
 0x2b3   : > { %v2490_v27 = vsel %vm379_vm0, %v2447_v44, 0.0  ;;  %v2390_v49 = vsel %vm379_vm0, %v2289_v60, 0.0  ;;  %v2448_v13 = vmul.f32 %v2289_v60, %v2289_v60  ;;  %2550 = vst.msk [vmem:[%s3818_s6 + $0x68] sm:$0xff] %vm379_vm0, %v2289_v60 }
 0x2b4   : > { %v2491_v37 = vadd.f32 %v2490_v27, %v2489_v45  ;;  %v2391_v61 = vadd.f32 %v2390_v49, %v2389_v21  ;;  %v2496_v3 = vsel %vm379_vm0, %v2450_v52, 0.0 }
 0x2b5   : > { %v2492_v28 = vsel %vm379_vm0, %v2448_v13, 0.0 }
 0x2b6   : > { %v2393_v62 = vadd.f32 %v2392_v16, %v2391_v61  ;;  %v2493_v53 = vadd.f32 %v2492_v28, %v2491_v37 }
 0x2b8   : > { %v2495_v48 = vadd.f32 %v2494_v11, %v2493_v53  ;;  %v2395_v0 = vadd.f32 %v2394_v63, %v2393_v62 }
 0x2ba   : > { %v2497_v4 = vadd.f32 %v2496_v3, %v2495_v48 }
 0x2df   : > { %v2741_v32 = vpop.f32.mrb[0].mxu1 }
 0x2e0   : > { %2555 = vst.msk [vmem:[%s3818_s6 + $0x90] sm:$0xff] %vm379_vm0, %v2741_v32  ;;  %v2302_v55 = vpop.f32.mrb[1].mxu1  ;;  %v2453_v1 = vmul.f32 %v2741_v32, %v2741_v32  ;;  %v2400_v56 = vsel %vm379_vm0, %v2741_v32, 0.0 }
 0x2e1   : > { %v2396_v18 = vsel %vm379_vm0, %v2302_v55, 0.0  ;;  %v2451_v30 = vmul.f32 %v2302_v55, %v2302_v55  ;;  %2553 = vst.msk [vmem:[%s3818_s6 + $0x80] sm:$0xff] %vm379_vm0, %v2302_v55  ;;  %v2742_v31 = vpop.f32.mrb[2].mxu1 }
 0x2e2   : > { %v2397_v33 = vadd.f32 %v2396_v18, %v2395_v0  ;;  %2556 = vst.msk [vmem:[%s3818_s6 + $0x98] sm:$0xff] %vm379_vm0, %v2742_v31  ;;  %v2305_v5 = vpop.f32.mrb[3].mxu1  ;;  %v2454_v29 = vmul.f32 %v2742_v31, %v2742_v31  ;;  %v2502_v23 = vsel %vm379_vm0, %v2453_v1, 0.0  ;;  %v2402_v59 = vsel %vm379_vm0, %v2742_v31, 0.0 }
 0x2e3   : > { %v2498_v6 = vsel %vm379_vm0, %v2451_v30, 0.0  ;;  %v2398_v39 = vsel %vm379_vm0, %v2305_v5, 0.0  ;;  %v2452_v22 = vmul.f32 %v2305_v5, %v2305_v5  ;;  %2554 = vst.msk [vmem:[%s3818_s6 + $0x88] sm:$0xff] %vm379_vm0, %v2305_v5 }
 0x2e4   : > { %v2499_v50 = vadd.f32 %v2498_v6, %v2497_v4  ;;  %v2399_v8 = vadd.f32 %v2398_v39, %v2397_v33  ;;  %v2504_v9 = vsel %vm379_vm0, %v2454_v29, 0.0 }
 0x2e5   : > { %v2500_v40 = vsel %vm379_vm0, %v2452_v22, 0.0 }
 0x2e6   : > { %v2401_v34 = vadd.f32 %v2400_v56, %v2399_v8  ;;  %v2501_v57 = vadd.f32 %v2500_v40, %v2499_v50 }
 0x2e8   : > { %v2503_v43 = vadd.f32 %v2502_v23, %v2501_v57  ;;  %v2403_v25 = vadd.f32 %v2402_v59, %v2401_v34 }
 0x2ea   : > { %v2505_v35 = vadd.f32 %v2504_v9, %v2503_v43 }
 0x30f   : > { %v2745_v54 = vpop.f32.mrb[4].mxu1 }
 0x310   : > { %2559 = vst.msk [vmem:[%s3818_s6 + $0xb0] sm:$0xff] %vm379_vm0, %v2745_v54  ;;  %v2318_v24 = vpop.f32.mrb[5].mxu1  ;;  %v2457_v45 = vmul.f32 %v2745_v54, %v2745_v54  ;;  %v2408_v46 = vsel %vm379_vm0, %v2745_v54, 0.0 }
 0x311   : > { %v2404_v26 = vsel %vm379_vm0, %v2318_v24, 0.0  ;;  %v2455_v10 = vmul.f32 %v2318_v24, %v2318_v24  ;;  %2557 = vst.msk [vmem:[%s3818_s6 + $0xa0] sm:$0xff] %vm379_vm0, %v2318_v24  ;;  %v2746_v41 = vpop.f32.mrb[6].mxu1 }
 0x312   : > { %v2405_v2 = vadd.f32 %v2404_v26, %v2403_v25  ;;  %2560 = vst.msk [vmem:[%s3818_s6 + $0xb8] sm:$0xff] %vm379_vm0, %v2746_v41  ;;  %v2321_v38 = vpop.f32.mrb[7].mxu1  ;;  %v2458_v7 = vmul.f32 %v2746_v41, %v2746_v41  ;;  %v2510_v17 = vsel %vm379_vm0, %v2457_v45, 0.0  ;;  %v2410_v44 = vsel %vm379_vm0, %v2746_v41, 0.0 }
 0x313   : > { %v2506_v20 = vsel %vm379_vm0, %v2455_v10, 0.0  ;;  %v2406_v42 = vsel %vm379_vm0, %v2321_v38, 0.0  ;;  %v2456_v12 = vmul.f32 %v2321_v38, %v2321_v38  ;;  %2558 = vst.msk [vmem:[%s3818_s6 + $0xa8] sm:$0xff] %vm379_vm0, %v2321_v38 }
 0x314   : > { %v2507_v47 = vadd.f32 %v2506_v20, %v2505_v35  ;;  %v2407_v51 = vadd.f32 %v2406_v42, %v2405_v2  ;;  %v2512_v60 = vsel %vm379_vm0, %v2458_v7, 0.0 }
 0x315   : > { %v2508_v15 = vsel %vm379_vm0, %v2456_v12, 0.0 }
 0x316   : > { %v2409_v14 = vadd.f32 %v2408_v46, %v2407_v51  ;;  %v2509_v58 = vadd.f32 %v2508_v15, %v2507_v47 }
 0x318   : > { %v2511_v36 = vadd.f32 %v2510_v17, %v2509_v58  ;;  %v2411_v21 = vadd.f32 %v2410_v44, %v2409_v14 }
 0x31a   : > { %v2513_v19 = vadd.f32 %v2512_v60, %v2511_v36 }
 0x33f   : > { %v2749_v27 = vpop.f32.mrb[8].mxu1 }
 0x340   : > { %2563 = vst.msk [vmem:[%s3818_s6 + $0xd0] sm:$0xff] %vm379_vm0, %v2749_v27  ;;  %v2334_v49 = vpop.f32.mrb[9].mxu1  ;;  %v2461_v28 = vmul.f32 %v2749_v27, %v2749_v27  ;;  %v2416_v0 = vsel %vm379_vm0, %v2749_v27, 0.0 }
 0x341   : > { %v2412_v13 = vsel %vm379_vm0, %v2334_v49, 0.0  ;;  %v2459_v37 = vmul.f32 %v2334_v49, %v2334_v49  ;;  %2561 = vst.msk [vmem:[%s3818_s6 + $0xc0] sm:$0xff] %vm379_vm0, %v2334_v49  ;;  %v2750_v61 = vpop.f32.mrb[10].mxu1 }
 0x342   : > { %v2413_v16 = vadd.f32 %v2412_v13, %v2411_v21  ;;  %2564 = vst.msk [vmem:[%s3818_s6 + $0xd8] sm:$0xff] %vm379_vm0, %v2750_v61  ;;  %v2337_v52 = vpop.f32.mrb[11].mxu1  ;;  %v2462_v3 = vmul.f32 %v2750_v61, %v2750_v61  ;;  %v2518_v18 = vsel %vm379_vm0, %v2461_v28, 0.0  ;;  %v2418_v30 = vsel %vm379_vm0, %v2750_v61, 0.0 }
 0x343   : > { %v2514_v62 = vsel %vm379_vm0, %v2459_v37, 0.0  ;;  %v2414_v53 = vsel %vm379_vm0, %v2337_v52, 0.0  ;;  %v2460_v11 = vmul.f32 %v2337_v52, %v2337_v52  ;;  %2562 = vst.msk [vmem:[%s3818_s6 + $0xc8] sm:$0xff] %vm379_vm0, %v2337_v52 }
 0x344   : > { %v2515_v63 = vadd.f32 %v2514_v62, %v2513_v19  ;;  %v2415_v48 = vadd.f32 %v2414_v53, %v2413_v16  ;;  %v2520_v5 = vsel %vm379_vm0, %v2462_v3, 0.0 }
 0x345   : > { %v2516_v4 = vsel %vm379_vm0, %v2460_v11, 0.0 }
 0x346   : > { %v2417_v32 = vadd.f32 %v2416_v0, %v2415_v48  ;;  %v2517_v55 = vadd.f32 %v2516_v4, %v2515_v63 }
 0x348   : > { %v2519_v31 = vadd.f32 %v2518_v18, %v2517_v55  ;;  %v2419_v33 = vadd.f32 %v2418_v30, %v2417_v32 }
 0x34a   : > { %v2521_v1 = vadd.f32 %v2520_v5, %v2519_v31 }
 0x36f   : > { %v2753_v6 = vpop.f32.mrb[12].mxu1 }
 0x370   : > { %2567 = vst.msk [vmem:[%s3818_s6 + $0xf0] sm:$0xff] %vm379_vm0, %v2753_v6  ;;  %v2350_v39 = vpop.f32.mrb[13].mxu1  ;;  %v2465_v40 = vmul.f32 %v2753_v6, %v2753_v6  ;;  %v2424_v25 = vsel %vm379_vm0, %v2753_v6, 0.0 }
 0x371   : > { %v2420_v22 = vsel %vm379_vm0, %v2350_v39, 0.0  ;;  %v2463_v50 = vmul.f32 %v2350_v39, %v2350_v39  ;;  %2565 = vst.msk [vmem:[%s3818_s6 + $0xe0] sm:$0xff] %vm379_vm0, %v2350_v39  ;;  %v2754_v8 = vpop.f32.mrb[14].mxu1 }
 0x372   : > { %v2421_v56 = vadd.f32 %v2420_v22, %v2419_v33  ;;  %2568 = vst.msk [vmem:[%s3818_s6 + $0xf8] sm:$0xff] %vm379_vm0, %v2754_v8  ;;  %v2353_v29 = vpop.f32.mrb[15].mxu1  ;;  %v2466_v9 = vmul.f32 %v2754_v8, %v2754_v8  ;;  %v2526_v26 = vsel %vm379_vm0, %v2465_v40, 0.0  ;;  %v2426_v10 = vsel %vm379_vm0, %v2754_v8, 0.0 }
 0x373   : > { %v2522_v34 = vsel %vm379_vm0, %v2463_v50, 0.0  ;;  %v2422_v57 = vsel %vm379_vm0, %v2353_v29, 0.0  ;;  %v2464_v23 = vmul.f32 %v2353_v29, %v2353_v29  ;;  %2566 = vst.msk [vmem:[%s3818_s6 + $0xe8] sm:$0xff] %vm379_vm0, %v2353_v29 }
 0x374   : > { %v2523_v59 = vadd.f32 %v2522_v34, %v2521_v1  ;;  %v2423_v43 = vadd.f32 %v2422_v57, %v2421_v56  ;;  %v2528_v38 = vsel %vm379_vm0, %v2466_v9, 0.0 }
 0x375   : > { %v2524_v35 = vsel %vm379_vm0, %v2464_v23, 0.0 }
 0x376   : > { %v2425_v54 = vadd.f32 %v2424_v25, %v2423_v43  ;;  %v2525_v24 = vadd.f32 %v2524_v35, %v2523_v59 }
 0x378   : > { %v2427_v41 = vadd.f32 %v2426_v10, %v2425_v54  ;;  %v2527_v2 = vadd.f32 %v2526_v26, %v2525_v24 }
 0x37a   : > { %v2428_v45 = vrot.slane %v2427_v41, 4  ;;  %v2529_v20 = vadd.f32 %v2528_v38, %v2527_v2 }
 0x37c   : > { %v2429_v42 = vadd.f32 %v2428_v45, %v2427_v41  ;;  %v2530_v12 = vrot.slane %v2529_v20, 4 }
 0x37e   : > { %v2430_v47 = vrot.slane %v2429_v42, 2  ;;  %v2531_v51 = vadd.f32 %v2530_v12, %v2529_v20 }
 0x380   : > { %v2431_v46 = vadd.f32 %v2430_v47, %v2429_v42  ;;  %v2532_v7 = vrot.slane %v2531_v51, 2 }
 0x382   : > { %v2432_v15 = vrot.slane %v2431_v46, 1  ;;  %v2533_v14 = vadd.f32 %v2532_v7, %v2531_v51 }
 0x384   : > { %v2433_v58 = vadd.f32 %v2432_v15, %v2431_v46  ;;  %v2534_v17 = vrot.slane %v2533_v14, 1 }
 0x386   : > { %2434 = vst.msk [vmem:[%s235_s9] sm:$0x1] %vm388_vm1, %v2433_v58  ;;  %v2535_v44 = vadd.f32 %v2534_v17, %v2533_v14 }
 0x388   : > { %2536 = vst.msk [vmem:[%s235_s9 + $0x1] sm:$0x1] %vm388_vm1, %v2535_v44 }
 0x389 PF: > { %s16_s18 = sadd.s32 1, %s2797_s18  }
 0x38a   : > { %p13_p4 = scmp.ge.s32.totalorder %s16_s18, 4  }
 0x38c   :  { %15 = sbr.rel (!%p13_p4) target bundleno = 1 (0x1), region = 81 }

</bundles_post_ra>
